<compile_context>
chip_gen: v7x
topology: tpu7x:2x2x1
jax: 0.10.0
libtpu: 0.0.40
codegen_flags: <defaults>
</compile_context>

<pallas_src>
import functools

import jax
import jax.numpy as jnp
from jax.experimental import pallas as pl
from jax.experimental.pallas import tpu as pltpu

LN_EPS = 1e-5       # torch.nn.LayerNorm default eps
SCALE = 30.0        # DecLayer scale
LOGIT_REORDER = [0, 12, 2, 9, 21, 17, 8, 3, 18, 11, 5, 16, 13, 7, 4, 15, 20, 14, 10, 19, 6]

# set True to force the glue-side gather even when the in-kernel gather lowers
FORCE_GLUE_GATHER = False

_PARAM_ORDER = ["w1a", "w1b", "w1v", "b1", "w2", "b2", "w3", "b3",
                "g1", "bt1", "win", "bin", "wout", "bout", "g2", "bt2"]
_N_PARAMS = len(_PARAM_ORDER)


def _round_up(x, m):
    return ((x + m - 1) // m) * m


# ---------------------------------------------------------------------------
# math helpers (used both in-kernel and in the pure-JAX reference)
# ---------------------------------------------------------------------------
def _gelu(x):
    # tanh-approximate GELU (torch.nn.GELU defaults to exact erf; max dev ~3e-4)
    c0 = 0.7978845608028654          # sqrt(2/pi)
    c1 = 0.035677408136300125        # 0.044715 * sqrt(2/pi)
    x2 = x * x
    return 0.5 * x * (1.0 + jnp.tanh(x * (c0 + c1 * x2)))


def _layer_norm(x, g, b):
    mu = jnp.mean(x, axis=-1, keepdims=True)
    xc = x - mu
    var = jnp.mean(xc * xc, axis=-1, keepdims=True)
    return xc * jax.lax.rsqrt(var + LN_EPS) * g + b


# ---------------------------------------------------------------------------
# Pallas kernel: one DecLayer (+ optionally the fused final out_proj)
# ---------------------------------------------------------------------------
def _dec_layer_kernel(*refs, k_valid, fuse_proj, gather_in_kernel):
    n_data = 6 if gather_in_kernel else 4
    data = refs[:n_data]
    p = dict(zip(_PARAM_ORDER, refs[n_data:n_data + _N_PARAMS]))
    pos = n_data + _N_PARAMS
    if fuse_proj:
        wop_ref, bop_ref = refs[pos], refs[pos + 1]
        out_ref, logits_ref = refs[pos + 2], refs[pos + 3]
    else:
        out_ref = refs[pos]

    bf = jnp.bfloat16
    f32 = jnp.float32

    if gather_in_kernel:
        hv_ref, s3_ref, mbw_ref, eidx_ref, mrow_ref, hvfull_ref = data
    else:
        hv_ref, s3_ref, dyn_ref, mrow_ref = data

    hv = hv_ref[...]                               # [TM, H]  f32
    TM, H = hv.shape
    s3 = s3_ref[...]                               # [TM, Kp, 3H]  bf16
    Kp = s3.shape[1]
    TMK = TM * Kp

    # dynamic neighbor features: mask_bw * h_V[neighbor], bf16
    if gather_in_kernel:
        idx = eidx_ref[...].reshape(TMK)
        gath = jnp.take(hvfull_ref[...], idx, axis=0, mode="clip").reshape(TM, Kp, H)
        dyn = (mbw_ref[...] * gath).astype(bf)     # [TM, Kp, H]
    else:
        dyn = dyn_ref[...]                         # [TM, Kp, H] bf16 (already masked)

    # ---- message MLP -------------------------------------------------------
    # W1(cat[h_V, esv_3H]) = h_V@w1a + static3@w1b (3H-deep) + dyn@w1v + b1
    pre = jnp.dot(hv.astype(bf), p["w1a"][...], preferred_element_type=f32) + p["b1"][...]
    acc = (jnp.dot(s3.reshape(TMK, 3 * H), p["w1b"][...], preferred_element_type=f32)
           + jnp.dot(dyn.reshape(TMK, H), p["w1v"][...], preferred_element_type=f32))
    # implicit sublane broadcast of the per-row term (no materialized [TMK,H] copy)
    m = _gelu(acc.reshape(TM, Kp, H) + pre[:, None, :])
    m = _gelu(jnp.dot(m.reshape(TMK, H).astype(bf), p["w2"][...],
                      preferred_element_type=f32) + p["b2"][...])
    m = jnp.dot(m.astype(bf), p["w3"][...], preferred_element_type=f32) + p["b3"][...]
    m = m.reshape(TM, Kp, H)

    if k_valid is not None:                        # zero messages of padded K slots
        kmask = (jax.lax.broadcasted_iota(jnp.int32, (1, Kp, 1), 1) < k_valid).astype(f32)
        m = m * kmask

    dh = jnp.sum(m, axis=1) * (1.0 / SCALE)        # [TM, H] f32
    x = _layer_norm(hv + dh, p["g1"][...], p["bt1"][...])

    # ---- position-wise FFN -------------------------------------------------
    ff = _gelu(jnp.dot(x.astype(bf), p["win"][...], preferred_element_type=f32) + p["bin"][...])
    ff = jnp.dot(ff.astype(bf), p["wout"][...], preferred_element_type=f32) + p["bout"][...]

    y = mrow_ref[...] * _layer_norm(x + ff, p["g2"][...], p["bt2"][...])
    out_ref[...] = y.astype(out_ref.dtype)

    if fuse_proj:
        logits = jnp.dot(y.astype(bf), wop_ref[...], preferred_element_type=f32) + bop_ref[...]
        logits_ref[...] = logits.astype(logits_ref.dtype)


# ---------------------------------------------------------------------------
# tile planning (VMEM-capacity driven, even grid for the 2-TC v7x)
# ---------------------------------------------------------------------------
def _plan_tiles(M, Kp, H, Vp, *, gather_in_kernel):
    try:
        vmem_cap = int(pltpu.get_tpu_info().vmem_capacity_bytes)
    except Exception:
        vmem_cap = 128 * 1024 * 1024
    # v5e/v6e: 128 MiB physical VMEM -> 64 MiB scoped; v7x: 64 MiB/TC -> 32 MiB scoped.
    vmem_limit = int(min(vmem_cap // 2, 64 * 1024 * 1024))

    # fixed (block-independent) VMEM: weights (x2 buffers) + resident h_V table
    weight_bytes = 2 * ((13 * H * H + H * Vp) * 2 + 20 * 4 * H * 4)
    fixed = weight_bytes
    if gather_in_kernel:
        fixed += 2 * (_round_up(M, 8) + 2048) * H * 4

    # per-row VMEM: double-buffered I/O blocks + in-kernel intermediates
    per_row = Kp * 3 * H * 2 * 2                   # static3 bf16 blocks (x2)
    per_row += (2 * H * 4 + Vp * 4 + 8) * 2        # h_V tile / out / logits / masks (x2)
    if gather_in_kernel:
        per_row += (Kp * 4 + Kp * 4) * 2           # E_idx i32 + mask_bw f32 blocks (x2)
    else:
        per_row += Kp * H * 2 * 2                  # dyn bf16 blocks (x2)
    per_row += Kp * H * (4 + 4 + 2 + 2)            # f32 W1 acc, f32 msg, bf16 copies

    budget = max(int((vmem_limit - fixed) * 0.7), 0)
    br_cap = max(8, min(1024, budget // max(per_row, 1)))
    br_cap = max(8, (br_cap // 8) * 8)

    n_tiles = max(1, -(-M // br_cap))
    if n_tiles > 1 and n_tiles % 2:                # balanced shards on v7x's 2 TCs
        n_tiles += 1
    block_rows = max(8, _round_up(-(-M // n_tiles), 8))
    M_pad = block_rows * n_tiles
    return block_rows, M_pad, vmem_limit


# ---------------------------------------------------------------------------
# pallas_call wrapper for one DecLayer
# ---------------------------------------------------------------------------
def dec_layer_pallas(h_V, static3, mask_rows, layer_params, *, block_rows, vmem_limit,
                     k_valid=None, out_proj=None, maskbw=None, eidx=None, dyn=None):
    """h_V [Mp,H] f32, static3 [Mp,Kp,3H] bf16, mask_rows [Mp,1] f32.
    Either (maskbw [Mp,Kp,1] f32, eidx [Mp,Kp] i32) for the in-kernel gather path,
    or dyn [Mp,Kp,H] bf16 (pre-masked gathered h_V) for the fallback path."""
    gather_in_kernel = dyn is None
    M_pad, H = h_V.shape
    Kp = static3.shape[1]
    grid = (M_pad // block_rows,)

    def full_spec(w):
        return pl.BlockSpec(w.shape, lambda i, _nd=w.ndim: (0,) * _nd)

    bf = jnp.bfloat16
    w1 = layer_params["w1"]
    weights = {
        "w1a": w1[:H].astype(bf),            # h_V term
        "w1b": w1[H:].astype(bf),            # merged static 3H term (3H-deep contraction)
        "w1v": w1[3 * H:].astype(bf),        # dynamic mask_bw*gather(h_V) term
        "b1": layer_params["b1"],
        "w2": layer_params["w2"].astype(bf), "b2": layer_params["b2"],
        "w3": layer_params["w3"].astype(bf), "b3": layer_params["b3"],
        "g1": layer_params["g1"], "bt1": layer_params["bt1"],
        "win": layer_params["win"].astype(bf), "bin": layer_params["bin"],
        "wout": layer_params["wout"].astype(bf), "bout": layer_params["bout"],
        "g2": layer_params["g2"], "bt2": layer_params["bt2"],
    }
    w_args = [weights[n] for n in _PARAM_ORDER]
    w_specs = [full_spec(w) for w in w_args]

    if gather_in_kernel:
        data_args = [h_V, static3, maskbw, eidx, mask_rows, h_V]
        data_specs = [
            pl.BlockSpec((block_rows, H), lambda i: (i, 0)),
            pl.BlockSpec((block_rows, Kp, 3 * H), lambda i: (i, 0, 0)),
            pl.BlockSpec((block_rows, Kp, 1), lambda i: (i, 0, 0)),
            pl.BlockSpec((block_rows, Kp), lambda i: (i, 0)),
            pl.BlockSpec((block_rows, 1), lambda i: (i, 0)),
            pl.BlockSpec((M_pad, H), lambda i: (0, 0)),      # full h_V table, VMEM-resident
        ]
    else:
        data_args = [h_V, static3, dyn, mask_rows]
        data_specs = [
            pl.BlockSpec((block_rows, H), lambda i: (i, 0)),
            pl.BlockSpec((block_rows, Kp, 3 * H), lambda i: (i, 0, 0)),
            pl.BlockSpec((block_rows, Kp, H), lambda i: (i, 0, 0)),
            pl.BlockSpec((block_rows, 1), lambda i: (i, 0)),
        ]

    fuse = out_proj is not None
    if fuse:
        w_op, b_op = out_proj
        Vp = w_op.shape[1]
        w_args += [w_op, b_op]
        w_specs += [full_spec(w_op), full_spec(b_op)]
        out_shape = (jax.ShapeDtypeStruct((M_pad, H), h_V.dtype),
                     jax.ShapeDtypeStruct((M_pad, Vp), jnp.float32))
        out_specs = (pl.BlockSpec((block_rows, H), lambda i: (i, 0)),
                     pl.BlockSpec((block_rows, Vp), lambda i: (i, 0)))
    else:
        out_shape = jax.ShapeDtypeStruct((M_pad, H), h_V.dtype)
        out_specs = pl.BlockSpec((block_rows, H), lambda i: (i, 0))

    kernel = functools.partial(_dec_layer_kernel, k_valid=k_valid, fuse_proj=fuse,
                               gather_in_kernel=gather_in_kernel)
    return pl.pallas_call(
        kernel,
        out_shape=out_shape,
        grid=grid,
        in_specs=data_specs + w_specs,
        out_specs=out_specs,
        compiler_params=pltpu.CompilerParams(
            dimension_semantics=("parallel",),       # row tiles independent (megacore)
            vmem_limit_bytes=vmem_limit),
    )(*data_args, *w_args)


@functools.lru_cache(maxsize=None)
def _gather_path_supported(M_pad, block_rows, Kp, H, vmem_limit):
    """Probe-compile the gather-in-kernel DecLayer at the actual shapes; if the
    jnp.take row gather does not lower on this toolchain, fall back to glue gather."""
    f32, bf, i32 = jnp.float32, jnp.bfloat16, jnp.int32
    lp = {
        "w1": jax.ShapeDtypeStruct((4 * H, H), f32), "b1": jax.ShapeDtypeStruct((1, H), f32),
        "w2": jax.ShapeDtypeStruct((H, H), f32), "b2": jax.ShapeDtypeStruct((1, H), f32),
        "w3": jax.ShapeDtypeStruct((H, H), f32), "b3": jax.ShapeDtypeStruct((1, H), f32),
        "g1": jax.ShapeDtypeStruct((1, H), f32), "bt1": jax.ShapeDtypeStruct((1, H), f32),
        "win": jax.ShapeDtypeStruct((H, 4 * H), f32), "bin": jax.ShapeDtypeStruct((1, 4 * H), f32),
        "wout": jax.ShapeDtypeStruct((4 * H, H), f32), "bout": jax.ShapeDtypeStruct((1, H), f32),
        "g2": jax.ShapeDtypeStruct((1, H), f32), "bt2": jax.ShapeDtypeStruct((1, H), f32),
    }
    args = (jax.ShapeDtypeStruct((M_pad, H), f32),
            jax.ShapeDtypeStruct((M_pad, Kp, 3 * H), bf),
            jax.ShapeDtypeStruct((M_pad, Kp, 1), f32),
            jax.ShapeDtypeStruct((M_pad, Kp), i32),
            jax.ShapeDtypeStruct((M_pad, 1), f32),
            lp)

    def probe(h_V, static3, maskbw, eidx, mask_rows, layer_params):
        return dec_layer_pallas(h_V, static3, mask_rows, layer_params,
                                maskbw=maskbw, eidx=eidx,
                                block_rows=block_rows, vmem_limit=vmem_limit,
                                k_valid=None, out_proj=None)

    try:
        jax.jit(probe).lower(*args).compile()
        return True
    except Exception:
        return False


# ---------------------------------------------------------------------------
# plain-JAX glue (one-time feature build, masks, params)
# ---------------------------------------------------------------------------
def gather_nodes(nodes, E_idx):
    # nodes [B,N,C], E_idx [B,N,K] -> [B,N,K,C]
    B, N, K = E_idx.shape
    C = nodes.shape[-1]
    idx = jnp.broadcast_to(E_idx.reshape(B, N * K, 1), (B, N * K, C))
    return jnp.take_along_axis(nodes, idx, axis=1).reshape(B, N, K, C)


def prepare_decoding_order(mask, E_idx, rng_key, chain_mask=None):
    B, N, K = E_idx.shape
    if chain_mask is None:
        chain_mask = jnp.ones((B, N), mask.dtype)
    chain_mask = chain_mask * mask
    randn = jax.random.normal(rng_key, chain_mask.shape, dtype=jnp.float32)
    decoding_order = jnp.argsort((chain_mask + 0.0001) * jnp.abs(randn), axis=-1)
    # order_mask_backward[b,q,p] = 1 iff q is decoded strictly after p; equivalent to
    # the reference one-hot einsum ('ij,biq,bjp->bqp' with a strict lower-tri), O(N^2).
    inv = jnp.argsort(decoding_order, axis=-1)          # decode step of each position
    order_mask_backward = (inv[:, :, None] > inv[:, None, :]).astype(jnp.float32)
    mask_attend = jnp.take_along_axis(order_mask_backward, E_idx, axis=2)[..., None]
    mask_1D = mask[:, :, None, None]
    mask_bw = mask_1D * mask_attend
    mask_fw = mask_1D * (1.0 - mask_attend)
    return mask_fw, mask_bw, decoding_order, chain_mask


def xavier_uniform(key, fan_in, fan_out):
    limit = (6.0 / (fan_in + fan_out)) ** 0.5
    return jax.random.uniform(key, (fan_in, fan_out), jnp.float32, -limit, limit)


def init_params(key, *, d_model, n_vocab, n_layers):
    H = d_model
    keys = jax.random.split(key, 2 + n_layers)
    params = {
        "embed": xavier_uniform(keys[0], n_vocab, H),    # nn.Embedding(n_vocab, d_model)
        "out_w": xavier_uniform(keys[1], H, n_vocab),    # nn.Linear(d_model, n_vocab) [in,out]
        "out_b": jnp.zeros((1, n_vocab), jnp.float32),
        "layers": [],
    }
    for l in range(n_layers):
        lk = jax.random.split(keys[2 + l], 5)
        params["layers"].append({
            "w1": xavier_uniform(lk[0], 4 * H, H), "b1": jnp.zeros((1, H), jnp.float32),
            "w2": xavier_uniform(lk[1], H, H), "b2": jnp.zeros((1, H), jnp.float32),
            "w3": xavier_uniform(lk[2], H, H), "b3": jnp.zeros((1, H), jnp.float32),
            "g1": jnp.ones((1, H), jnp.float32), "bt1": jnp.zeros((1, H), jnp.float32),
            "win": xavier_uniform(lk[3], H, 4 * H), "bin": jnp.zeros((1, 4 * H), jnp.float32),
            "wout": xavier_uniform(lk[4], 4 * H, H), "bout": jnp.zeros((1, H), jnp.float32),
            "g2": jnp.ones((1, H), jnp.float32), "bt2": jnp.zeros((1, H), jnp.float32),
        })
    return params


# ---------------------------------------------------------------------------
# MPNNSequenceDecoder.forward
# ---------------------------------------------------------------------------
def mpnn_sequence_decoder_forward(params, prev_tokens, memory, memory_mask,
                                  decode_key, chain_mask=None):
    node_feats = memory['node_feats']       # [B, N, H]
    edge_feats = memory['edge_feats']       # [B, N, K, H]
    E_idx = memory['edge_idx']              # [B, N, K] int
    B, N, K = E_idx.shape
    H = node_feats.shape[-1]
    M = B * N
    bf = jnp.bfloat16

    h_S = params["embed"][prev_tokens]      # token embedding gather (glue)
    mask = memory_mask.astype(jnp.float32)
    mask_fw, mask_bw, _, _ = prepare_decoding_order(mask, E_idx, decode_key, chain_mask)

    # pad K to the sublane tile so [TM,K,C] -> [TM*K,C] merges are layout-free
    Kp = max(8, _round_up(K, 8))
    if Kp != K:
        pk = Kp - K
        E_idx = jnp.pad(E_idx, ((0, 0), (0, 0), (0, pk)))
        edge_feats = jnp.pad(edge_feats, ((0, 0), (0, 0), (0, pk), (0, 0)))
        mask_bw = jnp.pad(mask_bw, ((0, 0), (0, 0), (0, pk), (0, 0)))
        mask_fw = jnp.pad(mask_fw, ((0, 0), (0, 0), (0, pk), (0, 0)))

    # layer-invariant static neighbor features [M, Kp, 3H], built once, directly bf16:
    #   [:,:,0:H]  = mask * h_E          (mask_bw + mask_fw == mask_1D)
    #   [:,:,H:2H] = mask_bw * gather(h_S)
    #   [:,:,2H:]  = mask_fw * gather(node_feats)
    m1 = mask[:, :, None, None]
    static3 = jnp.concatenate(
        [(m1 * edge_feats).astype(bf),
         (mask_bw * gather_nodes(h_S, E_idx)).astype(bf),
         (mask_fw * gather_nodes(node_feats, E_idx)).astype(bf)],
        axis=-1).reshape(M, Kp, 3 * H)

    mask_rows = mask.reshape(M, 1)
    maskbw_flat = mask_bw.reshape(M, Kp, 1)
    eidx_flat = (E_idx.astype(jnp.int32)
                 + (jnp.arange(B, dtype=jnp.int32) * N)[:, None, None]).reshape(M, Kp)

    # out_proj with the logit column reorder folded in; vocab padded to 128 lanes
    reorder = jnp.array(LOGIT_REORDER, dtype=jnp.int32)
    w_op = params["out_w"][:, reorder]
    b_op = params["out_b"][:, reorder]
    Vr = len(LOGIT_REORDER)
    Vp = _round_up(Vr, 128)
    w_op = jnp.pad(w_op, ((0, 0), (0, Vp - Vr))).astype(bf)
    b_op = jnp.pad(b_op, ((0, 0), (0, Vp - Vr)))

    # tile plan + probe whether the in-kernel row gather lowers on this toolchain
    block_rows, M_pad, vmem_limit = _plan_tiles(M, Kp, H, Vp, gather_in_kernel=True)
    gather_ok = (not FORCE_GLUE_GATHER) and _gather_path_supported(
        M_pad, block_rows, Kp, H, vmem_limit)
    if not gather_ok:
        block_rows, M_pad, vmem_limit = _plan_tiles(M, Kp, H, Vp, gather_in_kernel=False)

    pad = M_pad - M
    if pad:
        static3 = jnp.pad(static3, ((0, pad), (0, 0), (0, 0)))
        mask_rows = jnp.pad(mask_rows, ((0, pad), (0, 0)))
        maskbw_flat = jnp.pad(maskbw_flat, ((0, pad), (0, 0), (0, 0)))
        eidx_flat = jnp.pad(eidx_flat, ((0, pad), (0, 0)))
    h_V = jnp.pad(node_feats.reshape(M, H), ((0, pad), (0, 0)))   # kept padded across layers

    k_valid = K if Kp != K else None
    n_layers = len(params["layers"])
    logits_flat = None
    for li, lp in enumerate(params["layers"]):
        op = (w_op, b_op) if li == n_layers - 1 else None          # fuse out_proj at the end
        common = dict(block_rows=block_rows, vmem_limit=vmem_limit,
                      k_valid=k_valid, out_proj=op)
        if gather_ok:
            res = dec_layer_pallas(h_V, static3, mask_rows, lp,
                                   maskbw=maskbw_flat, eidx=eidx_flat, **common)
        else:
            # fallback: gather + mask fused in one XLA op that only writes a bf16 stream
            dyn = (maskbw_flat * jnp.take(h_V, eidx_flat, axis=0, mode="clip")).astype(bf)
            res = dec_layer_pallas(h_V, static3, mask_rows, lp, dyn=dyn, **common)
        if op is None:
            h_V = res
        else:
            h_V, logits_flat = res

    feats = h_V[:M].reshape(B, N, H)
    if logits_flat is None:                 # degenerate n_layers == 0 case
        logits_flat = h_V.astype(bf) @ w_op + b_op
    logits = logits_flat[:M, :Vr].reshape(B, N, Vr).astype(jnp.float32)
    return logits, {'feats': feats, **memory}


# ---------------------------------------------------------------------------
# pure-JAX reference (f32, same tanh-GELU / decoding order) for a sanity check
# ---------------------------------------------------------------------------
def _forward_reference(params, prev_tokens, memory, memory_mask, decode_key):
    node_feats, edge_feats, E_idx = memory['node_feats'], memory['edge_feats'], memory['edge_idx']
    H = node_feats.shape[-1]
    h_S = params["embed"][prev_tokens]
    mask = memory_mask.astype(jnp.float32)
    mask_fw, mask_bw, _, _ = prepare_decoding_order(mask, E_idx, decode_key)
    h_ES = jnp.concatenate([edge_feats, gather_nodes(h_S, E_idx)], -1)
    h_EX_enc = jnp.concatenate([edge_feats, jnp.zeros_like(edge_feats)], -1)
    h_EXV_enc = jnp.concatenate([h_EX_enc, gather_nodes(node_feats, E_idx)], -1)
    h_EXV_enc_fw = mask_fw * h_EXV_enc
    h_V = node_feats
    for lp in params["layers"]:
        h_ESV = jnp.concatenate([h_ES, gather_nodes(h_V, E_idx)], -1)
        h_ESV = mask_bw * h_ESV + h_EXV_enc_fw
        h_V_exp = jnp.broadcast_to(h_V[:, :, None, :], h_ESV.shape[:3] + (H,))
        h_EV = jnp.concatenate([h_V_exp, h_ESV], -1)
        msg = _gelu(h_EV @ lp["w1"] + lp["b1"])
        msg = _gelu(msg @ lp["w2"] + lp["b2"])
        msg = msg @ lp["w3"] + lp["b3"]
        dh = jnp.sum(msg, axis=-2) / SCALE
        h_V = _layer_norm(h_V + dh, lp["g1"], lp["bt1"])
        ff = _gelu(h_V @ lp["win"] + lp["bin"])
        ff = ff @ lp["wout"] + lp["bout"]
        h_V = _layer_norm(h_V + ff, lp["g2"], lp["bt2"])
        h_V = mask[:, :, None] * h_V
    logits = h_V @ params["out_w"] + params["out_b"]
    logits = logits[:, :, jnp.array(LOGIT_REORDER)]
    return logits, h_V


# ---------------------------------------------------------------------------
if __name__ == "__main__":
    key = jax.random.PRNGKey(0)
    B, N, K, H, VOCAB, LAYERS = 2, 16, 8, 32, 22, 3

    k_param, k_tok, k_node, k_edge, k_idx, k_decode = jax.random.split(key, 6)
    params = init_params(k_param, d_model=H, n_vocab=VOCAB, n_layers=LAYERS)

    prev_tokens = jax.random.randint(k_tok, (B, N), 0, VOCAB)
    node_feats = jax.random.normal(k_node, (B, N, H), jnp.float32)
    edge_feats = jax.random.normal(k_edge, (B, N, K, H), jnp.float32)
    edge_idx = jax.random.randint(k_idx, (B, N, K), 0, N)
    memory = {'node_feats': node_feats, 'edge_feats': edge_feats, 'edge_idx': edge_idx}

    memory_padding_mask = jnp.zeros((B, N), jnp.bool_).at[:, N - 2:].set(True)
    memory_mask = (~memory_padding_mask).astype(jnp.float32)    # == (~padding_mask).float()

    fwd = jax.jit(mpnn_sequence_decoder_forward)
    logits, out = fwd(params, prev_tokens, memory, memory_mask, k_decode)
    jax.block_until_ready((logits, out['feats']))

    logits_ref, feats_ref = jax.jit(_forward_reference)(
        params, prev_tokens, memory, memory_mask, k_decode)
    jax.block_until_ready(logits_ref)

    assert logits.shape == (B, N, len(LOGIT_REORDER))
    assert out['feats'].shape == (B, N, H)
    assert bool(jnp.all(jnp.isfinite(logits))) and bool(jnp.all(jnp.isfinite(out['feats'])))
    max_err = float(jnp.max(jnp.abs(logits - logits_ref)))
    assert max_err < 0.5, f"logits mismatch vs reference: {max_err}"
    print("KERNEL_OK")
</pallas_src>

<mosaic_0001>
module attributes {stable_mosaic.version = 11 : i64} {
  func.func @_dec_layer_kernel(%arg0: i32, %arg1: memref<32x32xf32, #tpu.memory_space<vmem>>, %arg2: memref<32x8x96xbf16, #tpu.memory_space<vmem>>, %arg3: memref<32x8x32xbf16, #tpu.memory_space<vmem>>, %arg4: memref<32x1xf32, #tpu.memory_space<vmem>>, %arg5: memref<32x32xbf16, #tpu.memory_space<vmem>>, %arg6: memref<96x32xbf16, #tpu.memory_space<vmem>>, %arg7: memref<32x32xbf16, #tpu.memory_space<vmem>>, %arg8: memref<1x32xf32, #tpu.memory_space<vmem>>, %arg9: memref<32x32xbf16, #tpu.memory_space<vmem>>, %arg10: memref<1x32xf32, #tpu.memory_space<vmem>>, %arg11: memref<32x32xbf16, #tpu.memory_space<vmem>>, %arg12: memref<1x32xf32, #tpu.memory_space<vmem>>, %arg13: memref<1x32xf32, #tpu.memory_space<vmem>>, %arg14: memref<1x32xf32, #tpu.memory_space<vmem>>, %arg15: memref<32x128xbf16, #tpu.memory_space<vmem>>, %arg16: memref<1x128xf32, #tpu.memory_space<vmem>>, %arg17: memref<128x32xbf16, #tpu.memory_space<vmem>>, %arg18: memref<1x32xf32, #tpu.memory_space<vmem>>, %arg19: memref<1x32xf32, #tpu.memory_space<vmem>>, %arg20: memref<1x32xf32, #tpu.memory_space<vmem>>, %arg21: memref<32x32xf32, #tpu.memory_space<vmem>>) attributes {dimension_semantics = [#tpu.dimension_semantics<parallel>], iteration_bounds = array<i64: 1>, scalar_prefetch = 0 : i64, scratch_operands = 0 : i64, tpu.core_type = #tpu.core_type<tc>, window_params = [{transform_indices = @transform_0, window_bounds = array<i64: 32, 32>}, {transform_indices = @transform_1, window_bounds = array<i64: 32, 8, 96>}, {transform_indices = @transform_2, window_bounds = array<i64: 32, 8, 32>}, {transform_indices = @transform_3, window_bounds = array<i64: 32, 1>}, {pipeline_mode = #tpu.pipeline_mode<synchronous>, transform_indices = @transform_4, window_bounds = array<i64: 32, 32>}, {pipeline_mode = #tpu.pipeline_mode<synchronous>, transform_indices = @transform_5, window_bounds = array<i64: 96, 32>}, {pipeline_mode = #tpu.pipeline_mode<synchronous>, transform_indices = @transform_6, window_bounds = array<i64: 32, 32>}, {pipeline_mode = #tpu.pipeline_mode<synchronous>, transform_indices = @transform_7, window_bounds = array<i64: 1, 32>}, {pipeline_mode = #tpu.pipeline_mode<synchronous>, transform_indices = @transform_8, window_bounds = array<i64: 32, 32>}, {pipeline_mode = #tpu.pipeline_mode<synchronous>, transform_indices = @transform_9, window_bounds = array<i64: 1, 32>}, {pipeline_mode = #tpu.pipeline_mode<synchronous>, transform_indices = @transform_10, window_bounds = array<i64: 32, 32>}, {pipeline_mode = #tpu.pipeline_mode<synchronous>, transform_indices = @transform_11, window_bounds = array<i64: 1, 32>}, {pipeline_mode = #tpu.pipeline_mode<synchronous>, transform_indices = @transform_12, window_bounds = array<i64: 1, 32>}, {pipeline_mode = #tpu.pipeline_mode<synchronous>, transform_indices = @transform_13, window_bounds = array<i64: 1, 32>}, {pipeline_mode = #tpu.pipeline_mode<synchronous>, transform_indices = @transform_14, window_bounds = array<i64: 32, 128>}, {pipeline_mode = #tpu.pipeline_mode<synchronous>, transform_indices = @transform_15, window_bounds = array<i64: 1, 128>}, {pipeline_mode = #tpu.pipeline_mode<synchronous>, transform_indices = @transform_16, window_bounds = array<i64: 128, 32>}, {pipeline_mode = #tpu.pipeline_mode<synchronous>, transform_indices = @transform_17, window_bounds = array<i64: 1, 32>}, {pipeline_mode = #tpu.pipeline_mode<synchronous>, transform_indices = @transform_18, window_bounds = array<i64: 1, 32>}, {pipeline_mode = #tpu.pipeline_mode<synchronous>, transform_indices = @transform_19, window_bounds = array<i64: 1, 32>}, {transform_indices = @transform_20, window_bounds = array<i64: 32, 32>}]} {
    %c0 = arith.constant 0 : index
    %c0_0 = arith.constant 0 : index
    %0 = vector.load %arg1[%c0, %c0_0] : memref<32x32xf32, #tpu.memory_space<vmem>>, vector<32x32xf32>
    %c0_1 = arith.constant 0 : index
    %c0_2 = arith.constant 0 : index
    %c0_3 = arith.constant 0 : index
    %1 = vector.load %arg2[%c0_1, %c0_2, %c0_3] : memref<32x8x96xbf16, #tpu.memory_space<vmem>>, vector<32x8x96xbf16>
    %c0_4 = arith.constant 0 : index
    %c0_5 = arith.constant 0 : index
    %c0_6 = arith.constant 0 : index
    %2 = vector.load %arg3[%c0_4, %c0_5, %c0_6] : memref<32x8x32xbf16, #tpu.memory_space<vmem>>, vector<32x8x32xbf16>
    %3 = arith.truncf %0 : vector<32x32xf32> to vector<32x32xbf16>
    %c0_7 = arith.constant 0 : index
    %c0_8 = arith.constant 0 : index
    %4 = vector.load %arg5[%c0_7, %c0_8] : memref<32x32xbf16, #tpu.memory_space<vmem>>, vector<32x32xbf16>
    %cst = arith.constant dense<0.000000e+00> : vector<32x32xf32>
    %5 = tpu.matmul %3, %4, %cst {dimension_numbers = #tpu.dot_dimension_numbers<[1], [0], [0], [1], [0, 0, 1, 1], [], []>} : vector<32x32xbf16>, vector<32x32xbf16>, vector<32x32xf32> -> vector<32x32xf32>
    %c0_9 = arith.constant 0 : index
    %c0_10 = arith.constant 0 : index
    %6 = vector.load %arg8[%c0_9, %c0_10] : memref<1x32xf32, #tpu.memory_space<vmem>>, vector<1x32xf32>
    %7 = vector.broadcast %6 : vector<1x32xf32> to vector<32x32xf32>
    %8 = arith.addf %5, %7 : vector<32x32xf32>
    %9 = vector.shape_cast %1 : vector<32x8x96xbf16> to vector<256x96xbf16>
    %c0_11 = arith.constant 0 : index
    %c0_12 = arith.constant 0 : index
    %10 = vector.load %arg6[%c0_11, %c0_12] : memref<96x32xbf16, #tpu.memory_space<vmem>>, vector<96x32xbf16>
    %cst_13 = arith.constant dense<0.000000e+00> : vector<256x32xf32>
    %11 = tpu.matmul %9, %10, %cst_13 {dimension_numbers = #tpu.dot_dimension_numbers<[1], [0], [0], [1], [0, 0, 1, 1], [], []>} : vector<256x96xbf16>, vector<96x32xbf16>, vector<256x32xf32> -> vector<256x32xf32>
    %12 = vector.shape_cast %2 : vector<32x8x32xbf16> to vector<256x32xbf16>
    %c0_14 = arith.constant 0 : index
    %c0_15 = arith.constant 0 : index
    %13 = vector.load %arg7[%c0_14, %c0_15] : memref<32x32xbf16, #tpu.memory_space<vmem>>, vector<32x32xbf16>
    %cst_16 = arith.constant dense<0.000000e+00> : vector<256x32xf32>
    %14 = tpu.matmul %12, %13, %cst_16 {dimension_numbers = #tpu.dot_dimension_numbers<[1], [0], [0], [1], [0, 0, 1, 1], [], []>} : vector<256x32xbf16>, vector<32x32xbf16>, vector<256x32xf32> -> vector<256x32xf32>
    %15 = arith.addf %11, %14 : vector<256x32xf32>
    %16 = vector.shape_cast %15 : vector<256x32xf32> to vector<32x8x32xf32>
    %17 = vector.shape_cast %8 : vector<32x32xf32> to vector<32x1x32xf32>
    %18 = vector.broadcast %17 : vector<32x1x32xf32> to vector<32x8x32xf32>
    %19 = arith.addf %16, %18 : vector<32x8x32xf32>
    %20 = arith.mulf %19, %19 : vector<32x8x32xf32>
    %cst_17 = arith.constant 5.000000e-01 : f32
    %21 = vector.broadcast %cst_17 : f32 to vector<32x8x32xf32>
    %22 = arith.mulf %21, %19 : vector<32x8x32xf32>
    %cst_18 = arith.constant 0.0356774069 : f32
    %23 = vector.broadcast %cst_18 : f32 to vector<32x8x32xf32>
    %24 = arith.mulf %23, %20 : vector<32x8x32xf32>
    %cst_19 = arith.constant 0.797884583 : f32
    %25 = vector.broadcast %cst_19 : f32 to vector<32x8x32xf32>
    %26 = arith.addf %25, %24 : vector<32x8x32xf32>
    %27 = arith.mulf %19, %26 : vector<32x8x32xf32>
    %28 = math.tanh %27 : vector<32x8x32xf32>
    %cst_20 = arith.constant 1.000000e+00 : f32
    %29 = vector.broadcast %cst_20 : f32 to vector<32x8x32xf32>
    %30 = arith.addf %29, %28 : vector<32x8x32xf32>
    %31 = arith.mulf %22, %30 : vector<32x8x32xf32>
    %32 = vector.shape_cast %31 : vector<32x8x32xf32> to vector<256x32xf32>
    %33 = arith.truncf %32 : vector<256x32xf32> to vector<256x32xbf16>
    %c0_21 = arith.constant 0 : index
    %c0_22 = arith.constant 0 : index
    %34 = vector.load %arg9[%c0_21, %c0_22] : memref<32x32xbf16, #tpu.memory_space<vmem>>, vector<32x32xbf16>
    %cst_23 = arith.constant dense<0.000000e+00> : vector<256x32xf32>
    %35 = tpu.matmul %33, %34, %cst_23 {dimension_numbers = #tpu.dot_dimension_numbers<[1], [0], [0], [1], [0, 0, 1, 1], [], []>} : vector<256x32xbf16>, vector<32x32xbf16>, vector<256x32xf32> -> vector<256x32xf32>
    %c0_24 = arith.constant 0 : index
    %c0_25 = arith.constant 0 : index
    %36 = vector.load %arg10[%c0_24, %c0_25] : memref<1x32xf32, #tpu.memory_space<vmem>>, vector<1x32xf32>
    %37 = vector.broadcast %36 : vector<1x32xf32> to vector<256x32xf32>
    %38 = arith.addf %35, %37 : vector<256x32xf32>
    %39 = arith.mulf %38, %38 : vector<256x32xf32>
    %cst_26 = arith.constant 5.000000e-01 : f32
    %40 = vector.broadcast %cst_26 : f32 to vector<256x32xf32>
    %41 = arith.mulf %40, %38 : vector<256x32xf32>
    %cst_27 = arith.constant 0.0356774069 : f32
    %42 = vector.broadcast %cst_27 : f32 to vector<256x32xf32>
    %43 = arith.mulf %42, %39 : vector<256x32xf32>
    %cst_28 = arith.constant 0.797884583 : f32
    %44 = vector.broadcast %cst_28 : f32 to vector<256x32xf32>
    %45 = arith.addf %44, %43 : vector<256x32xf32>
    %46 = arith.mulf %38, %45 : vector<256x32xf32>
    %47 = math.tanh %46 : vector<256x32xf32>
    %cst_29 = arith.constant 1.000000e+00 : f32
    %48 = vector.broadcast %cst_29 : f32 to vector<256x32xf32>
    %49 = arith.addf %48, %47 : vector<256x32xf32>
    %50 = arith.mulf %41, %49 : vector<256x32xf32>
    %51 = arith.truncf %50 : vector<256x32xf32> to vector<256x32xbf16>
    %c0_30 = arith.constant 0 : index
    %c0_31 = arith.constant 0 : index
    %52 = vector.load %arg11[%c0_30, %c0_31] : memref<32x32xbf16, #tpu.memory_space<vmem>>, vector<32x32xbf16>
    %cst_32 = arith.constant dense<0.000000e+00> : vector<256x32xf32>
    %53 = tpu.matmul %51, %52, %cst_32 {dimension_numbers = #tpu.dot_dimension_numbers<[1], [0], [0], [1], [0, 0, 1, 1], [], []>} : vector<256x32xbf16>, vector<32x32xbf16>, vector<256x32xf32> -> vector<256x32xf32>
    %c0_33 = arith.constant 0 : index
    %c0_34 = arith.constant 0 : index
    %54 = vector.load %arg12[%c0_33, %c0_34] : memref<1x32xf32, #tpu.memory_space<vmem>>, vector<1x32xf32>
    %55 = vector.broadcast %54 : vector<1x32xf32> to vector<256x32xf32>
    %56 = arith.addf %53, %55 : vector<256x32xf32>
    %57 = vector.shape_cast %56 : vector<256x32xf32> to vector<32x8x32xf32>
    %cst_35 = arith.constant dense<0.000000e+00> : vector<32x32xf32>
    %58 = vector.multi_reduction <add>, %57, %cst_35 [1] : vector<32x8x32xf32> to vector<32x32xf32>
    %cst_36 = arith.constant 0.0333333351 : f32
    %59 = vector.broadcast %cst_36 : f32 to vector<32x32xf32>
    %60 = arith.mulf %58, %59 : vector<32x32xf32>
    %61 = arith.addf %0, %60 : vector<32x32xf32>
    %c0_37 = arith.constant 0 : index
    %c0_38 = arith.constant 0 : index
    %62 = vector.load %arg13[%c0_37, %c0_38] : memref<1x32xf32, #tpu.memory_space<vmem>>, vector<1x32xf32>
    %c0_39 = arith.constant 0 : index
    %c0_40 = arith.constant 0 : index
    %63 = vector.load %arg14[%c0_39, %c0_40] : memref<1x32xf32, #tpu.memory_space<vmem>>, vector<1x32xf32>
    %cst_41 = arith.constant dense<0.000000e+00> : vector<32xf32>
    %64 = vector.multi_reduction <add>, %61, %cst_41 [1] : vector<32x32xf32> to vector<32xf32>
    %65 = vector.shape_cast %64 : vector<32xf32> to vector<32x1xf32>
    %cst_42 = arith.constant 3.200000e+01 : f32
    %66 = vector.broadcast %cst_42 : f32 to vector<32x1xf32>
    %67 = arith.divf %65, %66 : vector<32x1xf32>
    %68 = vector.broadcast %67 : vector<32x1xf32> to vector<32x32xf32>
    %69 = arith.subf %61, %68 : vector<32x32xf32>
    %70 = arith.mulf %69, %69 : vector<32x32xf32>
    %cst_43 = arith.constant dense<0.000000e+00> : vector<32xf32>
    %71 = vector.multi_reduction <add>, %70, %cst_43 [1] : vector<32x32xf32> to vector<32xf32>
    %72 = vector.shape_cast %71 : vector<32xf32> to vector<32x1xf32>
    %cst_44 = arith.constant 3.200000e+01 : f32
    %73 = vector.broadcast %cst_44 : f32 to vector<32x1xf32>
    %74 = arith.divf %72, %73 : vector<32x1xf32>
    %cst_45 = arith.constant 9.99999974E-6 : f32
    %75 = vector.broadcast %cst_45 : f32 to vector<32x1xf32>
    %76 = arith.addf %74, %75 : vector<32x1xf32>
    %77 = math.rsqrt %76 : vector<32x1xf32>
    %78 = vector.broadcast %77 : vector<32x1xf32> to vector<32x32xf32>
    %79 = arith.mulf %69, %78 : vector<32x32xf32>
    %80 = vector.broadcast %62 : vector<1x32xf32> to vector<32x32xf32>
    %81 = arith.mulf %79, %80 : vector<32x32xf32>
    %82 = vector.broadcast %63 : vector<1x32xf32> to vector<32x32xf32>
    %83 = arith.addf %81, %82 : vector<32x32xf32>
    %84 = arith.truncf %83 : vector<32x32xf32> to vector<32x32xbf16>
    %c0_46 = arith.constant 0 : index
    %c0_47 = arith.constant 0 : index
    %85 = vector.load %arg15[%c0_46, %c0_47] : memref<32x128xbf16, #tpu.memory_space<vmem>>, vector<32x128xbf16>
    %cst_48 = arith.constant dense<0.000000e+00> : vector<32x128xf32>
    %86 = tpu.matmul %84, %85, %cst_48 {dimension_numbers = #tpu.dot_dimension_numbers<[1], [0], [0], [1], [0, 0, 1, 1], [], []>} : vector<32x32xbf16>, vector<32x128xbf16>, vector<32x128xf32> -> vector<32x128xf32>
    %c0_49 = arith.constant 0 : index
    %c0_50 = arith.constant 0 : index
    %87 = vector.load %arg16[%c0_49, %c0_50] : memref<1x128xf32, #tpu.memory_space<vmem>>, vector<1x128xf32>
    %88 = vector.broadcast %87 : vector<1x128xf32> to vector<32x128xf32>
    %89 = arith.addf %86, %88 : vector<32x128xf32>
    %90 = arith.mulf %89, %89 : vector<32x128xf32>
    %cst_51 = arith.constant 5.000000e-01 : f32
    %91 = vector.broadcast %cst_51 : f32 to vector<32x128xf32>
    %92 = arith.mulf %91, %89 : vector<32x128xf32>
    %cst_52 = arith.constant 0.0356774069 : f32
    %93 = vector.broadcast %cst_52 : f32 to vector<32x128xf32>
    %94 = arith.mulf %93, %90 : vector<32x128xf32>
    %cst_53 = arith.constant 0.797884583 : f32
    %95 = vector.broadcast %cst_53 : f32 to vector<32x128xf32>
    %96 = arith.addf %95, %94 : vector<32x128xf32>
    %97 = arith.mulf %89, %96 : vector<32x128xf32>
    %98 = math.tanh %97 : vector<32x128xf32>
    %cst_54 = arith.constant 1.000000e+00 : f32
    %99 = vector.broadcast %cst_54 : f32 to vector<32x128xf32>
    %100 = arith.addf %99, %98 : vector<32x128xf32>
    %101 = arith.mulf %92, %100 : vector<32x128xf32>
    %102 = arith.truncf %101 : vector<32x128xf32> to vector<32x128xbf16>
    %c0_55 = arith.constant 0 : index
    %c0_56 = arith.constant 0 : index
    %103 = vector.load %arg17[%c0_55, %c0_56] : memref<128x32xbf16, #tpu.memory_space<vmem>>, vector<128x32xbf16>
    %cst_57 = arith.constant dense<0.000000e+00> : vector<32x32xf32>
    %104 = tpu.matmul %102, %103, %cst_57 {dimension_numbers = #tpu.dot_dimension_numbers<[1], [0], [0], [1], [0, 0, 1, 1], [], []>} : vector<32x128xbf16>, vector<128x32xbf16>, vector<32x32xf32> -> vector<32x32xf32>
    %c0_58 = arith.constant 0 : index
    %c0_59 = arith.constant 0 : index
    %105 = vector.load %arg18[%c0_58, %c0_59] : memref<1x32xf32, #tpu.memory_space<vmem>>, vector<1x32xf32>
    %106 = vector.broadcast %105 : vector<1x32xf32> to vector<32x32xf32>
    %107 = arith.addf %104, %106 : vector<32x32xf32>
    %c0_60 = arith.constant 0 : index
    %c0_61 = arith.constant 0 : index
    %108 = vector.load %arg4[%c0_60, %c0_61] : memref<32x1xf32, #tpu.memory_space<vmem>>, vector<32x1xf32>
    %109 = arith.addf %83, %107 : vector<32x32xf32>
    %c0_62 = arith.constant 0 : index
    %c0_63 = arith.constant 0 : index
    %110 = vector.load %arg19[%c0_62, %c0_63] : memref<1x32xf32, #tpu.memory_space<vmem>>, vector<1x32xf32>
    %c0_64 = arith.constant 0 : index
    %c0_65 = arith.constant 0 : index
    %111 = vector.load %arg20[%c0_64, %c0_65] : memref<1x32xf32, #tpu.memory_space<vmem>>, vector<1x32xf32>
    %cst_66 = arith.constant dense<0.000000e+00> : vector<32xf32>
    %112 = vector.multi_reduction <add>, %109, %cst_66 [1] : vector<32x32xf32> to vector<32xf32>
    %113 = vector.shape_cast %112 : vector<32xf32> to vector<32x1xf32>
    %cst_67 = arith.constant 3.200000e+01 : f32
    %114 = vector.broadcast %cst_67 : f32 to vector<32x1xf32>
    %115 = arith.divf %113, %114 : vector<32x1xf32>
    %116 = vector.broadcast %115 : vector<32x1xf32> to vector<32x32xf32>
    %117 = arith.subf %109, %116 : vector<32x32xf32>
    %118 = arith.mulf %117, %117 : vector<32x32xf32>
    %cst_68 = arith.constant dense<0.000000e+00> : vector<32xf32>
    %119 = vector.multi_reduction <add>, %118, %cst_68 [1] : vector<32x32xf32> to vector<32xf32>
    %120 = vector.shape_cast %119 : vector<32xf32> to vector<32x1xf32>
    %cst_69 = arith.constant 3.200000e+01 : f32
    %121 = vector.broadcast %cst_69 : f32 to vector<32x1xf32>
    %122 = arith.divf %120, %121 : vector<32x1xf32>
    %cst_70 = arith.constant 9.99999974E-6 : f32
    %123 = vector.broadcast %cst_70 : f32 to vector<32x1xf32>
    %124 = arith.addf %122, %123 : vector<32x1xf32>
    %125 = math.rsqrt %124 : vector<32x1xf32>
    %126 = vector.broadcast %125 : vector<32x1xf32> to vector<32x32xf32>
    %127 = arith.mulf %117, %126 : vector<32x32xf32>
    %128 = vector.broadcast %110 : vector<1x32xf32> to vector<32x32xf32>
    %129 = arith.mulf %127, %128 : vector<32x32xf32>
    %130 = vector.broadcast %111 : vector<1x32xf32> to vector<32x32xf32>
    %131 = arith.addf %129, %130 : vector<32x32xf32>
    %132 = vector.broadcast %108 : vector<32x1xf32> to vector<32x32xf32>
    %133 = arith.mulf %132, %131 : vector<32x32xf32>
    %c0_71 = arith.constant 0 : index
    %c0_72 = arith.constant 0 : index
    %134 = vector.load %arg21[%c0_71, %c0_72] : memref<32x32xf32, #tpu.memory_space<vmem>>, vector<32x32xf32>
    tpu.vector_store %arg21[%c0_71, %c0_72], %133 {strides = array<i32>} : memref<32x32xf32, #tpu.memory_space<vmem>>, vector<32x32xf32>,
    return
  }
  func.func @transform_0(%arg0: i32) -> (i32, i32) {
    %c0_i32 = arith.constant 0 : i32
    %c0_i32_0 = arith.constant 0 : i32
    return %arg0, %c0_i32 : i32, i32
  }
  func.func @transform_1(%arg0: i32) -> (i32, i32, i32) {
    %c0_i32 = arith.constant 0 : i32
    %c0_i32_0 = arith.constant 0 : i32
    %c0_i32_1 = arith.constant 0 : i32
    return %arg0, %c0_i32, %c0_i32_0 : i32, i32, i32
  }
  func.func @transform_2(%arg0: i32) -> (i32, i32, i32) {
    %c0_i32 = arith.constant 0 : i32
    %c0_i32_0 = arith.constant 0 : i32
    %c0_i32_1 = arith.constant 0 : i32
    return %arg0, %c0_i32, %c0_i32_0 : i32, i32, i32
  }
  func.func @transform_3(%arg0: i32) -> (i32, i32) {
    %c0_i32 = arith.constant 0 : i32
    %c0_i32_0 = arith.constant 0 : i32
    return %arg0, %c0_i32 : i32, i32
  }
  func.func @transform_4(%arg0: i32) -> (i32, i32) {
    %c0_i32 = arith.constant 0 : i32
    %c0_i32_0 = arith.constant 0 : i32
    %c0_i32_1 = arith.constant 0 : i32
    return %c0_i32, %c0_i32_0 : i32, i32
  }
  func.func @transform_5(%arg0: i32) -> (i32, i32) {
    %c0_i32 = arith.constant 0 : i32
    %c0_i32_0 = arith.constant 0 : i32
    %c0_i32_1 = arith.constant 0 : i32
    return %c0_i32, %c0_i32_0 : i32, i32
  }
  func.func @transform_6(%arg0: i32) -> (i32, i32) {
    %c0_i32 = arith.constant 0 : i32
    %c0_i32_0 = arith.constant 0 : i32
    %c0_i32_1 = arith.constant 0 : i32
    return %c0_i32, %c0_i32_0 : i32, i32
  }
  func.func @transform_7(%arg0: i32) -> (i32, i32) {
    %c0_i32 = arith.constant 0 : i32
    %c0_i32_0 = arith.constant 0 : i32
    %c0_i32_1 = arith.constant 0 : i32
    return %c0_i32, %c0_i32_0 : i32, i32
  }
  func.func @transform_8(%arg0: i32) -> (i32, i32) {
    %c0_i32 = arith.constant 0 : i32
    %c0_i32_0 = arith.constant 0 : i32
    %c0_i32_1 = arith.constant 0 : i32
    return %c0_i32, %c0_i32_0 : i32, i32
  }
  func.func @transform_9(%arg0: i32) -> (i32, i32) {
    %c0_i32 = arith.constant 0 : i32
    %c0_i32_0 = arith.constant 0 : i32
    %c0_i32_1 = arith.constant 0 : i32
    return %c0_i32, %c0_i32_0 : i32, i32
  }
  func.func @transform_10(%arg0: i32) -> (i32, i32) {
    %c0_i32 = arith.constant 0 : i32
    %c0_i32_0 = arith.constant 0 : i32
    %c0_i32_1 = arith.constant 0 : i32
    return %c0_i32, %c0_i32_0 : i32, i32
  }
  func.func @transform_11(%arg0: i32) -> (i32, i32) {
    %c0_i32 = arith.constant 0 : i32
    %c0_i32_0 = arith.constant 0 : i32
    %c0_i32_1 = arith.constant 0 : i32
    return %c0_i32, %c0_i32_0 : i32, i32
  }
  func.func @transform_12(%arg0: i32) -> (i32, i32) {
    %c0_i32 = arith.constant 0 : i32
    %c0_i32_0 = arith.constant 0 : i32
    %c0_i32_1 = arith.constant 0 : i32
    return %c0_i32, %c0_i32_0 : i32, i32
  }
  func.func @transform_13(%arg0: i32) -> (i32, i32) {
    %c0_i32 = arith.constant 0 : i32
    %c0_i32_0 = arith.constant 0 : i32
    %c0_i32_1 = arith.constant 0 : i32
    return %c0_i32, %c0_i32_0 : i32, i32
  }
  func.func @transform_14(%arg0: i32) -> (i32, i32) {
    %c0_i32 = arith.constant 0 : i32
    %c0_i32_0 = arith.constant 0 : i32
    %c0_i32_1 = arith.constant 0 : i32
    return %c0_i32, %c0_i32_0 : i32, i32
  }
  func.func @transform_15(%arg0: i32) -> (i32, i32) {
    %c0_i32 = arith.constant 0 : i32
    %c0_i32_0 = arith.constant 0 : i32
    %c0_i32_1 = arith.constant 0 : i32
    return %c0_i32, %c0_i32_0 : i32, i32
  }
  func.func @transform_16(%arg0: i32) -> (i32, i32) {
    %c0_i32 = arith.constant 0 : i32
    %c0_i32_0 = arith.constant 0 : i32
    %c0_i32_1 = arith.constant 0 : i32
    return %c0_i32, %c0_i32_0 : i32, i32
  }
  func.func @transform_17(%arg0: i32) -> (i32, i32) {
    %c0_i32 = arith.constant 0 : i32
    %c0_i32_0 = arith.constant 0 : i32
    %c0_i32_1 = arith.constant 0 : i32
    return %c0_i32, %c0_i32_0 : i32, i32
  }
  func.func @transform_18(%arg0: i32) -> (i32, i32) {
    %c0_i32 = arith.constant 0 : i32
    %c0_i32_0 = arith.constant 0 : i32
    %c0_i32_1 = arith.constant 0 : i32
    return %c0_i32, %c0_i32_0 : i32, i32
  }
  func.func @transform_19(%arg0: i32) -> (i32, i32) {
    %c0_i32 = arith.constant 0 : i32
    %c0_i32_0 = arith.constant 0 : i32
    %c0_i32_1 = arith.constant 0 : i32
    return %c0_i32, %c0_i32_0 : i32, i32
  }
  func.func @transform_20(%arg0: i32) -> (i32, i32) {
    %c0_i32 = arith.constant 0 : i32
    %c0_i32_0 = arith.constant 0 : i32
    return %arg0, %c0_i32 : i32, i32
  }
}

module attributes {stable_mosaic.version = 11 : i64} {
  func.func @_dec_layer_kernel(%arg0: i32, %arg1: memref<32x32xf32, #tpu.memory_space<vmem>>, %arg2: memref<32x8x96xbf16, #tpu.memory_space<vmem>>, %arg3: memref<32x8x32xbf16, #tpu.memory_space<vmem>>, %arg4: memref<32x1xf32, #tpu.memory_space<vmem>>, %arg5: memref<32x32xbf16, #tpu.memory_space<vmem>>, %arg6: memref<96x32xbf16, #tpu.memory_space<vmem>>, %arg7: memref<32x32xbf16, #tpu.memory_space<vmem>>, %arg8: memref<1x32xf32, #tpu.memory_space<vmem>>, %arg9: memref<32x32xbf16, #tpu.memory_space<vmem>>, %arg10: memref<1x32xf32, #tpu.memory_space<vmem>>, %arg11: memref<32x32xbf16, #tpu.memory_space<vmem>>, %arg12: memref<1x32xf32, #tpu.memory_space<vmem>>, %arg13: memref<1x32xf32, #tpu.memory_space<vmem>>, %arg14: memref<1x32xf32, #tpu.memory_space<vmem>>, %arg15: memref<32x128xbf16, #tpu.memory_space<vmem>>, %arg16: memref<1x128xf32, #tpu.memory_space<vmem>>, %arg17: memref<128x32xbf16, #tpu.memory_space<vmem>>, %arg18: memref<1x32xf32, #tpu.memory_space<vmem>>, %arg19: memref<1x32xf32, #tpu.memory_space<vmem>>, %arg20: memref<1x32xf32, #tpu.memory_space<vmem>>, %arg21: memref<32x128xbf16, #tpu.memory_space<vmem>>, %arg22: memref<1x128xf32, #tpu.memory_space<vmem>>, %arg23: memref<32x32xf32, #tpu.memory_space<vmem>>, %arg24: memref<32x128xf32, #tpu.memory_space<vmem>>) attributes {dimension_semantics = [#tpu.dimension_semantics<parallel>], iteration_bounds = array<i64: 1>, scalar_prefetch = 0 : i64, scratch_operands = 0 : i64, tpu.core_type = #tpu.core_type<tc>, window_params = [{transform_indices = @transform_0, window_bounds = array<i64: 32, 32>}, {transform_indices = @transform_1, window_bounds = array<i64: 32, 8, 96>}, {transform_indices = @transform_2, window_bounds = array<i64: 32, 8, 32>}, {transform_indices = @transform_3, window_bounds = array<i64: 32, 1>}, {pipeline_mode = #tpu.pipeline_mode<synchronous>, transform_indices = @transform_4, window_bounds = array<i64: 32, 32>}, {pipeline_mode = #tpu.pipeline_mode<synchronous>, transform_indices = @transform_5, window_bounds = array<i64: 96, 32>}, {pipeline_mode = #tpu.pipeline_mode<synchronous>, transform_indices = @transform_6, window_bounds = array<i64: 32, 32>}, {pipeline_mode = #tpu.pipeline_mode<synchronous>, transform_indices = @transform_7, window_bounds = array<i64: 1, 32>}, {pipeline_mode = #tpu.pipeline_mode<synchronous>, transform_indices = @transform_8, window_bounds = array<i64: 32, 32>}, {pipeline_mode = #tpu.pipeline_mode<synchronous>, transform_indices = @transform_9, window_bounds = array<i64: 1, 32>}, {pipeline_mode = #tpu.pipeline_mode<synchronous>, transform_indices = @transform_10, window_bounds = array<i64: 32, 32>}, {pipeline_mode = #tpu.pipeline_mode<synchronous>, transform_indices = @transform_11, window_bounds = array<i64: 1, 32>}, {pipeline_mode = #tpu.pipeline_mode<synchronous>, transform_indices = @transform_12, window_bounds = array<i64: 1, 32>}, {pipeline_mode = #tpu.pipeline_mode<synchronous>, transform_indices = @transform_13, window_bounds = array<i64: 1, 32>}, {pipeline_mode = #tpu.pipeline_mode<synchronous>, transform_indices = @transform_14, window_bounds = array<i64: 32, 128>}, {pipeline_mode = #tpu.pipeline_mode<synchronous>, transform_indices = @transform_15, window_bounds = array<i64: 1, 128>}, {pipeline_mode = #tpu.pipeline_mode<synchronous>, transform_indices = @transform_16, window_bounds = array<i64: 128, 32>}, {pipeline_mode = #tpu.pipeline_mode<synchronous>, transform_indices = @transform_17, window_bounds = array<i64: 1, 32>}, {pipeline_mode = #tpu.pipeline_mode<synchronous>, transform_indices = @transform_18, window_bounds = array<i64: 1, 32>}, {pipeline_mode = #tpu.pipeline_mode<synchronous>, transform_indices = @transform_19, window_bounds = array<i64: 1, 32>}, {pipeline_mode = #tpu.pipeline_mode<synchronous>, transform_indices = @transform_20, window_bounds = array<i64: 32, 128>}, {pipeline_mode = #tpu.pipeline_mode<synchronous>, transform_indices = @transform_21, window_bounds = array<i64: 1, 128>}, {transform_indices = @transform_22, window_bounds = array<i64: 32, 32>}, {transform_indices = @transform_23, window_bounds = array<i64: 32, 128>}]} {
    %c0 = arith.constant 0 : index
    %c0_0 = arith.constant 0 : index
    %0 = vector.load %arg1[%c0, %c0_0] : memref<32x32xf32, #tpu.memory_space<vmem>>, vector<32x32xf32>
    %c0_1 = arith.constant 0 : index
    %c0_2 = arith.constant 0 : index
    %c0_3 = arith.constant 0 : index
    %1 = vector.load %arg2[%c0_1, %c0_2, %c0_3] : memref<32x8x96xbf16, #tpu.memory_space<vmem>>, vector<32x8x96xbf16>
    %c0_4 = arith.constant 0 : index
    %c0_5 = arith.constant 0 : index
    %c0_6 = arith.constant 0 : index
    %2 = vector.load %arg3[%c0_4, %c0_5, %c0_6] : memref<32x8x32xbf16, #tpu.memory_space<vmem>>, vector<32x8x32xbf16>
    %3 = arith.truncf %0 : vector<32x32xf32> to vector<32x32xbf16>
    %c0_7 = arith.constant 0 : index
    %c0_8 = arith.constant 0 : index
    %4 = vector.load %arg5[%c0_7, %c0_8] : memref<32x32xbf16, #tpu.memory_space<vmem>>, vector<32x32xbf16>
    %cst = arith.constant dense<0.000000e+00> : vector<32x32xf32>
    %5 = tpu.matmul %3, %4, %cst {dimension_numbers = #tpu.dot_dimension_numbers<[1], [0], [0], [1], [0, 0, 1, 1], [], []>} : vector<32x32xbf16>, vector<32x32xbf16>, vector<32x32xf32> -> vector<32x32xf32>
    %c0_9 = arith.constant 0 : index
    %c0_10 = arith.constant 0 : index
    %6 = vector.load %arg8[%c0_9, %c0_10] : memref<1x32xf32, #tpu.memory_space<vmem>>, vector<1x32xf32>
    %7 = vector.broadcast %6 : vector<1x32xf32> to vector<32x32xf32>
    %8 = arith.addf %5, %7 : vector<32x32xf32>
    %9 = vector.shape_cast %1 : vector<32x8x96xbf16> to vector<256x96xbf16>
    %c0_11 = arith.constant 0 : index
    %c0_12 = arith.constant 0 : index
    %10 = vector.load %arg6[%c0_11, %c0_12] : memref<96x32xbf16, #tpu.memory_space<vmem>>, vector<96x32xbf16>
    %cst_13 = arith.constant dense<0.000000e+00> : vector<256x32xf32>
    %11 = tpu.matmul %9, %10, %cst_13 {dimension_numbers = #tpu.dot_dimension_numbers<[1], [0], [0], [1], [0, 0, 1, 1], [], []>} : vector<256x96xbf16>, vector<96x32xbf16>, vector<256x32xf32> -> vector<256x32xf32>
    %12 = vector.shape_cast %2 : vector<32x8x32xbf16> to vector<256x32xbf16>
    %c0_14 = arith.constant 0 : index
    %c0_15 = arith.constant 0 : index
    %13 = vector.load %arg7[%c0_14, %c0_15] : memref<32x32xbf16, #tpu.memory_space<vmem>>, vector<32x32xbf16>
    %cst_16 = arith.constant dense<0.000000e+00> : vector<256x32xf32>
    %14 = tpu.matmul %12, %13, %cst_16 {dimension_numbers = #tpu.dot_dimension_numbers<[1], [0], [0], [1], [0, 0, 1, 1], [], []>} : vector<256x32xbf16>, vector<32x32xbf16>, vector<256x32xf32> -> vector<256x32xf32>
    %15 = arith.addf %11, %14 : vector<256x32xf32>
    %16 = vector.shape_cast %15 : vector<256x32xf32> to vector<32x8x32xf32>
    %17 = vector.shape_cast %8 : vector<32x32xf32> to vector<32x1x32xf32>
    %18 = vector.broadcast %17 : vector<32x1x32xf32> to vector<32x8x32xf32>
    %19 = arith.addf %16, %18 : vector<32x8x32xf32>
    %20 = arith.mulf %19, %19 : vector<32x8x32xf32>
    %cst_17 = arith.constant 5.000000e-01 : f32
    %21 = vector.broadcast %cst_17 : f32 to vector<32x8x32xf32>
    %22 = arith.mulf %21, %19 : vector<32x8x32xf32>
    %cst_18 = arith.constant 0.0356774069 : f32
    %23 = vector.broadcast %cst_18 : f32 to vector<32x8x32xf32>
    %24 = arith.mulf %23, %20 : vector<32x8x32xf32>
    %cst_19 = arith.constant 0.797884583 : f32
    %25 = vector.broadcast %cst_19 : f32 to vector<32x8x32xf32>
    %26 = arith.addf %25, %24 : vector<32x8x32xf32>
    %27 = arith.mulf %19, %26 : vector<32x8x32xf32>
    %28 = math.tanh %27 : vector<32x8x32xf32>
    %cst_20 = arith.constant 1.000000e+00 : f32
    %29 = vector.broadcast %cst_20 : f32 to vector<32x8x32xf32>
    %30 = arith.addf %29, %28 : vector<32x8x32xf32>
    %31 = arith.mulf %22, %30 : vector<32x8x32xf32>
    %32 = vector.shape_cast %31 : vector<32x8x32xf32> to vector<256x32xf32>
    %33 = arith.truncf %32 : vector<256x32xf32> to vector<256x32xbf16>
    %c0_21 = arith.constant 0 : index
    %c0_22 = arith.constant 0 : index
    %34 = vector.load %arg9[%c0_21, %c0_22] : memref<32x32xbf16, #tpu.memory_space<vmem>>, vector<32x32xbf16>
    %cst_23 = arith.constant dense<0.000000e+00> : vector<256x32xf32>
    %35 = tpu.matmul %33, %34, %cst_23 {dimension_numbers = #tpu.dot_dimension_numbers<[1], [0], [0], [1], [0, 0, 1, 1], [], []>} : vector<256x32xbf16>, vector<32x32xbf16>, vector<256x32xf32> -> vector<256x32xf32>
    %c0_24 = arith.constant 0 : index
    %c0_25 = arith.constant 0 : index
    %36 = vector.load %arg10[%c0_24, %c0_25] : memref<1x32xf32, #tpu.memory_space<vmem>>, vector<1x32xf32>
    %37 = vector.broadcast %36 : vector<1x32xf32> to vector<256x32xf32>
    %38 = arith.addf %35, %37 : vector<256x32xf32>
    %39 = arith.mulf %38, %38 : vector<256x32xf32>
    %cst_26 = arith.constant 5.000000e-01 : f32
    %40 = vector.broadcast %cst_26 : f32 to vector<256x32xf32>
    %41 = arith.mulf %40, %38 : vector<256x32xf32>
    %cst_27 = arith.constant 0.0356774069 : f32
    %42 = vector.broadcast %cst_27 : f32 to vector<256x32xf32>
    %43 = arith.mulf %42, %39 : vector<256x32xf32>
    %cst_28 = arith.constant 0.797884583 : f32
    %44 = vector.broadcast %cst_28 : f32 to vector<256x32xf32>
    %45 = arith.addf %44, %43 : vector<256x32xf32>
    %46 = arith.mulf %38, %45 : vector<256x32xf32>
    %47 = math.tanh %46 : vector<256x32xf32>
    %cst_29 = arith.constant 1.000000e+00 : f32
    %48 = vector.broadcast %cst_29 : f32 to vector<256x32xf32>
    %49 = arith.addf %48, %47 : vector<256x32xf32>
    %50 = arith.mulf %41, %49 : vector<256x32xf32>
    %51 = arith.truncf %50 : vector<256x32xf32> to vector<256x32xbf16>
    %c0_30 = arith.constant 0 : index
    %c0_31 = arith.constant 0 : index
    %52 = vector.load %arg11[%c0_30, %c0_31] : memref<32x32xbf16, #tpu.memory_space<vmem>>, vector<32x32xbf16>
    %cst_32 = arith.constant dense<0.000000e+00> : vector<256x32xf32>
    %53 = tpu.matmul %51, %52, %cst_32 {dimension_numbers = #tpu.dot_dimension_numbers<[1], [0], [0], [1], [0, 0, 1, 1], [], []>} : vector<256x32xbf16>, vector<32x32xbf16>, vector<256x32xf32> -> vector<256x32xf32>
    %c0_33 = arith.constant 0 : index
    %c0_34 = arith.constant 0 : index
    %54 = vector.load %arg12[%c0_33, %c0_34] : memref<1x32xf32, #tpu.memory_space<vmem>>, vector<1x32xf32>
    %55 = vector.broadcast %54 : vector<1x32xf32> to vector<256x32xf32>
    %56 = arith.addf %53, %55 : vector<256x32xf32>
    %57 = vector.shape_cast %56 : vector<256x32xf32> to vector<32x8x32xf32>
    %cst_35 = arith.constant dense<0.000000e+00> : vector<32x32xf32>
    %58 = vector.multi_reduction <add>, %57, %cst_35 [1] : vector<32x8x32xf32> to vector<32x32xf32>
    %cst_36 = arith.constant 0.0333333351 : f32
    %59 = vector.broadcast %cst_36 : f32 to vector<32x32xf32>
    %60 = arith.mulf %58, %59 : vector<32x32xf32>
    %61 = arith.addf %0, %60 : vector<32x32xf32>
    %c0_37 = arith.constant 0 : index
    %c0_38 = arith.constant 0 : index
    %62 = vector.load %arg13[%c0_37, %c0_38] : memref<1x32xf32, #tpu.memory_space<vmem>>, vector<1x32xf32>
    %c0_39 = arith.constant 0 : index
    %c0_40 = arith.constant 0 : index
    %63 = vector.load %arg14[%c0_39, %c0_40] : memref<1x32xf32, #tpu.memory_space<vmem>>, vector<1x32xf32>
    %cst_41 = arith.constant dense<0.000000e+00> : vector<32xf32>
    %64 = vector.multi_reduction <add>, %61, %cst_41 [1] : vector<32x32xf32> to vector<32xf32>
    %65 = vector.shape_cast %64 : vector<32xf32> to vector<32x1xf32>
    %cst_42 = arith.constant 3.200000e+01 : f32
    %66 = vector.broadcast %cst_42 : f32 to vector<32x1xf32>
    %67 = arith.divf %65, %66 : vector<32x1xf32>
    %68 = vector.broadcast %67 : vector<32x1xf32> to vector<32x32xf32>
    %69 = arith.subf %61, %68 : vector<32x32xf32>
    %70 = arith.mulf %69, %69 : vector<32x32xf32>
    %cst_43 = arith.constant dense<0.000000e+00> : vector<32xf32>
    %71 = vector.multi_reduction <add>, %70, %cst_43 [1] : vector<32x32xf32> to vector<32xf32>
    %72 = vector.shape_cast %71 : vector<32xf32> to vector<32x1xf32>
    %cst_44 = arith.constant 3.200000e+01 : f32
    %73 = vector.broadcast %cst_44 : f32 to vector<32x1xf32>
    %74 = arith.divf %72, %73 : vector<32x1xf32>
    %cst_45 = arith.constant 9.99999974E-6 : f32
    %75 = vector.broadcast %cst_45 : f32 to vector<32x1xf32>
    %76 = arith.addf %74, %75 : vector<32x1xf32>
    %77 = math.rsqrt %76 : vector<32x1xf32>
    %78 = vector.broadcast %77 : vector<32x1xf32> to vector<32x32xf32>
    %79 = arith.mulf %69, %78 : vector<32x32xf32>
    %80 = vector.broadcast %62 : vector<1x32xf32> to vector<32x32xf32>
    %81 = arith.mulf %79, %80 : vector<32x32xf32>
    %82 = vector.broadcast %63 : vector<1x32xf32> to vector<32x32xf32>
    %83 = arith.addf %81, %82 : vector<32x32xf32>
    %84 = arith.truncf %83 : vector<32x32xf32> to vector<32x32xbf16>
    %c0_46 = arith.constant 0 : index
    %c0_47 = arith.constant 0 : index
    %85 = vector.load %arg15[%c0_46, %c0_47] : memref<32x128xbf16, #tpu.memory_space<vmem>>, vector<32x128xbf16>
    %cst_48 = arith.constant dense<0.000000e+00> : vector<32x128xf32>
    %86 = tpu.matmul %84, %85, %cst_48 {dimension_numbers = #tpu.dot_dimension_numbers<[1], [0], [0], [1], [0, 0, 1, 1], [], []>} : vector<32x32xbf16>, vector<32x128xbf16>, vector<32x128xf32> -> vector<32x128xf32>
    %c0_49 = arith.constant 0 : index
    %c0_50 = arith.constant 0 : index
    %87 = vector.load %arg16[%c0_49, %c0_50] : memref<1x128xf32, #tpu.memory_space<vmem>>, vector<1x128xf32>
    %88 = vector.broadcast %87 : vector<1x128xf32> to vector<32x128xf32>
    %89 = arith.addf %86, %88 : vector<32x128xf32>
    %90 = arith.mulf %89, %89 : vector<32x128xf32>
    %cst_51 = arith.constant 5.000000e-01 : f32
    %91 = vector.broadcast %cst_51 : f32 to vector<32x128xf32>
    %92 = arith.mulf %91, %89 : vector<32x128xf32>
    %cst_52 = arith.constant 0.0356774069 : f32
    %93 = vector.broadcast %cst_52 : f32 to vector<32x128xf32>
    %94 = arith.mulf %93, %90 : vector<32x128xf32>
    %cst_53 = arith.constant 0.797884583 : f32
    %95 = vector.broadcast %cst_53 : f32 to vector<32x128xf32>
    %96 = arith.addf %95, %94 : vector<32x128xf32>
    %97 = arith.mulf %89, %96 : vector<32x128xf32>
    %98 = math.tanh %97 : vector<32x128xf32>
    %cst_54 = arith.constant 1.000000e+00 : f32
    %99 = vector.broadcast %cst_54 : f32 to vector<32x128xf32>
    %100 = arith.addf %99, %98 : vector<32x128xf32>
    %101 = arith.mulf %92, %100 : vector<32x128xf32>
    %102 = arith.truncf %101 : vector<32x128xf32> to vector<32x128xbf16>
    %c0_55 = arith.constant 0 : index
    %c0_56 = arith.constant 0 : index
    %103 = vector.load %arg17[%c0_55, %c0_56] : memref<128x32xbf16, #tpu.memory_space<vmem>>, vector<128x32xbf16>
    %cst_57 = arith.constant dense<0.000000e+00> : vector<32x32xf32>
    %104 = tpu.matmul %102, %103, %cst_57 {dimension_numbers = #tpu.dot_dimension_numbers<[1], [0], [0], [1], [0, 0, 1, 1], [], []>} : vector<32x128xbf16>, vector<128x32xbf16>, vector<32x32xf32> -> vector<32x32xf32>
    %c0_58 = arith.constant 0 : index
    %c0_59 = arith.constant 0 : index
    %105 = vector.load %arg18[%c0_58, %c0_59] : memref<1x32xf32, #tpu.memory_space<vmem>>, vector<1x32xf32>
    %106 = vector.broadcast %105 : vector<1x32xf32> to vector<32x32xf32>
    %107 = arith.addf %104, %106 : vector<32x32xf32>
    %c0_60 = arith.constant 0 : index
    %c0_61 = arith.constant 0 : index
    %108 = vector.load %arg4[%c0_60, %c0_61] : memref<32x1xf32, #tpu.memory_space<vmem>>, vector<32x1xf32>
    %109 = arith.addf %83, %107 : vector<32x32xf32>
    %c0_62 = arith.constant 0 : index
    %c0_63 = arith.constant 0 : index
    %110 = vector.load %arg19[%c0_62, %c0_63] : memref<1x32xf32, #tpu.memory_space<vmem>>, vector<1x32xf32>
    %c0_64 = arith.constant 0 : index
    %c0_65 = arith.constant 0 : index
    %111 = vector.load %arg20[%c0_64, %c0_65] : memref<1x32xf32, #tpu.memory_space<vmem>>, vector<1x32xf32>
    %cst_66 = arith.constant dense<0.000000e+00> : vector<32xf32>
    %112 = vector.multi_reduction <add>, %109, %cst_66 [1] : vector<32x32xf32> to vector<32xf32>
    %113 = vector.shape_cast %112 : vector<32xf32> to vector<32x1xf32>
    %cst_67 = arith.constant 3.200000e+01 : f32
    %114 = vector.broadcast %cst_67 : f32 to vector<32x1xf32>
    %115 = arith.divf %113, %114 : vector<32x1xf32>
    %116 = vector.broadcast %115 : vector<32x1xf32> to vector<32x32xf32>
    %117 = arith.subf %109, %116 : vector<32x32xf32>
    %118 = arith.mulf %117, %117 : vector<32x32xf32>
    %cst_68 = arith.constant dense<0.000000e+00> : vector<32xf32>
    %119 = vector.multi_reduction <add>, %118, %cst_68 [1] : vector<32x32xf32> to vector<32xf32>
    %120 = vector.shape_cast %119 : vector<32xf32> to vector<32x1xf32>
    %cst_69 = arith.constant 3.200000e+01 : f32
    %121 = vector.broadcast %cst_69 : f32 to vector<32x1xf32>
    %122 = arith.divf %120, %121 : vector<32x1xf32>
    %cst_70 = arith.constant 9.99999974E-6 : f32
    %123 = vector.broadcast %cst_70 : f32 to vector<32x1xf32>
    %124 = arith.addf %122, %123 : vector<32x1xf32>
    %125 = math.rsqrt %124 : vector<32x1xf32>
    %126 = vector.broadcast %125 : vector<32x1xf32> to vector<32x32xf32>
    %127 = arith.mulf %117, %126 : vector<32x32xf32>
    %128 = vector.broadcast %110 : vector<1x32xf32> to vector<32x32xf32>
    %129 = arith.mulf %127, %128 : vector<32x32xf32>
    %130 = vector.broadcast %111 : vector<1x32xf32> to vector<32x32xf32>
    %131 = arith.addf %129, %130 : vector<32x32xf32>
    %132 = vector.broadcast %108 : vector<32x1xf32> to vector<32x32xf32>
    %133 = arith.mulf %132, %131 : vector<32x32xf32>
    %c0_71 = arith.constant 0 : index
    %c0_72 = arith.constant 0 : index
    %134 = vector.load %arg23[%c0_71, %c0_72] : memref<32x32xf32, #tpu.memory_space<vmem>>, vector<32x32xf32>
    tpu.vector_store %arg23[%c0_71, %c0_72], %133 {strides = array<i32>} : memref<32x32xf32, #tpu.memory_space<vmem>>, vector<32x32xf32>,
    %135 = arith.truncf %133 : vector<32x32xf32> to vector<32x32xbf16>
    %c0_73 = arith.constant 0 : index
    %c0_74 = arith.constant 0 : index
    %136 = vector.load %arg21[%c0_73, %c0_74] : memref<32x128xbf16, #tpu.memory_space<vmem>>, vector<32x128xbf16>
    %cst_75 = arith.constant dense<0.000000e+00> : vector<32x128xf32>
    %137 = tpu.matmul %135, %136, %cst_75 {dimension_numbers = #tpu.dot_dimension_numbers<[1], [0], [0], [1], [0, 0, 1, 1], [], []>} : vector<32x32xbf16>, vector<32x128xbf16>, vector<32x128xf32> -> vector<32x128xf32>
    %c0_76 = arith.constant 0 : index
    %c0_77 = arith.constant 0 : index
    %138 = vector.load %arg22[%c0_76, %c0_77] : memref<1x128xf32, #tpu.memory_space<vmem>>, vector<1x128xf32>
    %139 = vector.broadcast %138 : vector<1x128xf32> to vector<32x128xf32>
    %140 = arith.addf %137, %139 : vector<32x128xf32>
    %c0_78 = arith.constant 0 : index
    %c0_79 = arith.constant 0 : index
    %141 = vector.load %arg24[%c0_78, %c0_79] : memref<32x128xf32, #tpu.memory_space<vmem>>, vector<32x128xf32>
    tpu.vector_store %arg24[%c0_78, %c0_79], %140 {strides = array<i32>} : memref<32x128xf32, #tpu.memory_space<vmem>>, vector<32x128xf32>,
    return
  }
  func.func @transform_0(%arg0: i32) -> (i32, i32) {
    %c0_i32 = arith.constant 0 : i32
    %c0_i32_0 = arith.constant 0 : i32
    return %arg0, %c0_i32 : i32, i32
  }
  func.func @transform_1(%arg0: i32) -> (i32, i32, i32) {
    %c0_i32 = arith.constant 0 : i32
    %c0_i32_0 = arith.constant 0 : i32
    %c0_i32_1 = arith.constant 0 : i32
    return %arg0, %c0_i32, %c0_i32_0 : i32, i32, i32
  }
  func.func @transform_2(%arg0: i32) -> (i32, i32, i32) {
    %c0_i32 = arith.constant 0 : i32
    %c0_i32_0 = arith.constant 0 : i32
    %c0_i32_1 = arith.constant 0 : i32
    return %arg0, %c0_i32, %c0_i32_0 : i32, i32, i32
  }
  func.func @transform_3(%arg0: i32) -> (i32, i32) {
    %c0_i32 = arith.constant 0 : i32
    %c0_i32_0 = arith.constant 0 : i32
    return %arg0, %c0_i32 : i32, i32
  }
  func.func @transform_4(%arg0: i32) -> (i32, i32) {
    %c0_i32 = arith.constant 0 : i32
    %c0_i32_0 = arith.constant 0 : i32
    %c0_i32_1 = arith.constant 0 : i32
    return %c0_i32, %c0_i32_0 : i32, i32
  }
  func.func @transform_5(%arg0: i32) -> (i32, i32) {
    %c0_i32 = arith.constant 0 : i32
    %c0_i32_0 = arith.constant 0 : i32
    %c0_i32_1 = arith.constant 0 : i32
    return %c0_i32, %c0_i32_0 : i32, i32
  }
  func.func @transform_6(%arg0: i32) -> (i32, i32) {
    %c0_i32 = arith.constant 0 : i32
    %c0_i32_0 = arith.constant 0 : i32
    %c0_i32_1 = arith.constant 0 : i32
    return %c0_i32, %c0_i32_0 : i32, i32
  }
  func.func @transform_7(%arg0: i32) -> (i32, i32) {
    %c0_i32 = arith.constant 0 : i32
    %c0_i32_0 = arith.constant 0 : i32
    %c0_i32_1 = arith.constant 0 : i32
    return %c0_i32, %c0_i32_0 : i32, i32
  }
  func.func @transform_8(%arg0: i32) -> (i32, i32) {
    %c0_i32 = arith.constant 0 : i32
    %c0_i32_0 = arith.constant 0 : i32
    %c0_i32_1 = arith.constant 0 : i32
    return %c0_i32, %c0_i32_0 : i32, i32
  }
  func.func @transform_9(%arg0: i32) -> (i32, i32) {
    %c0_i32 = arith.constant 0 : i32
    %c0_i32_0 = arith.constant 0 : i32
    %c0_i32_1 = arith.constant 0 : i32
    return %c0_i32, %c0_i32_0 : i32, i32
  }
  func.func @transform_10(%arg0: i32) -> (i32, i32) {
    %c0_i32 = arith.constant 0 : i32
    %c0_i32_0 = arith.constant 0 : i32
    %c0_i32_1 = arith.constant 0 : i32
    return %c0_i32, %c0_i32_0 : i32, i32
  }
  func.func @transform_11(%arg0: i32) -> (i32, i32) {
    %c0_i32 = arith.constant 0 : i32
    %c0_i32_0 = arith.constant 0 : i32
    %c0_i32_1 = arith.constant 0 : i32
    return %c0_i32, %c0_i32_0 : i32, i32
  }
  func.func @transform_12(%arg0: i32) -> (i32, i32) {
    %c0_i32 = arith.constant 0 : i32
    %c0_i32_0 = arith.constant 0 : i32
    %c0_i32_1 = arith.constant 0 : i32
    return %c0_i32, %c0_i32_0 : i32, i32
  }
  func.func @transform_13(%arg0: i32) -> (i32, i32) {
    %c0_i32 = arith.constant 0 : i32
    %c0_i32_0 = arith.constant 0 : i32
    %c0_i32_1 = arith.constant 0 : i32
    return %c0_i32, %c0_i32_0 : i32, i32
  }
  func.func @transform_14(%arg0: i32) -> (i32, i32) {
    %c0_i32 = arith.constant 0 : i32
    %c0_i32_0 = arith.constant 0 : i32
    %c0_i32_1 = arith.constant 0 : i32
    return %c0_i32, %c0_i32_0 : i32, i32
  }
  func.func @transform_15(%arg0: i32) -> (i32, i32) {
    %c0_i32 = arith.constant 0 : i32
    %c0_i32_0 = arith.constant 0 : i32
    %c0_i32_1 = arith.constant 0 : i32
    return %c0_i32, %c0_i32_0 : i32, i32
  }
  func.func @transform_16(%arg0: i32) -> (i32, i32) {
    %c0_i32 = arith.constant 0 : i32
    %c0_i32_0 = arith.constant 0 : i32
    %c0_i32_1 = arith.constant 0 : i32
    return %c0_i32, %c0_i32_0 : i32, i32
  }
  func.func @transform_17(%arg0: i32) -> (i32, i32) {
    %c0_i32 = arith.constant 0 : i32
    %c0_i32_0 = arith.constant 0 : i32
    %c0_i32_1 = arith.constant 0 : i32
    return %c0_i32, %c0_i32_0 : i32, i32
  }
  func.func @transform_18(%arg0: i32) -> (i32, i32) {
    %c0_i32 = arith.constant 0 : i32
    %c0_i32_0 = arith.constant 0 : i32
    %c0_i32_1 = arith.constant 0 : i32
    return %c0_i32, %c0_i32_0 : i32, i32
  }
  func.func @transform_19(%arg0: i32) -> (i32, i32) {
    %c0_i32 = arith.constant 0 : i32
    %c0_i32_0 = arith.constant 0 : i32
    %c0_i32_1 = arith.constant 0 : i32
    return %c0_i32, %c0_i32_0 : i32, i32
  }
  func.func @transform_20(%arg0: i32) -> (i32, i32) {
    %c0_i32 = arith.constant 0 : i32
    %c0_i32_0 = arith.constant 0 : i32
    %c0_i32_1 = arith.constant 0 : i32
    return %c0_i32, %c0_i32_0 : i32, i32
  }
  func.func @transform_21(%arg0: i32) -> (i32, i32) {
    %c0_i32 = arith.constant 0 : i32
    %c0_i32_0 = arith.constant 0 : i32
    %c0_i32_1 = arith.constant 0 : i32
    return %c0_i32, %c0_i32_0 : i32, i32
  }
  func.func @transform_22(%arg0: i32) -> (i32, i32) {
    %c0_i32 = arith.constant 0 : i32
    %c0_i32_0 = arith.constant 0 : i32
    return %arg0, %c0_i32 : i32, i32
  }
  func.func @transform_23(%arg0: i32) -> (i32, i32) {
    %c0_i32 = arith.constant 0 : i32
    %c0_i32_0 = arith.constant 0 : i32
    return %arg0, %c0_i32 : i32, i32
  }
}

</mosaic_0001>

<bundles_post_ra>
// kernel: mpnn_sequence_decoder_forward.3
= control target key start
LH: loop header
LB: loop body
LE: loop exit
PB: predicated region body
PF: predicated region fallthrough
CT: control target
= control target key end

     0   :  { %s5679_s0 = inlined_call_operand.hbm [shape: f32[32,32], index: 0, kind: input, shape index: {}]   ;;  %s5680_s1 = inlined_call_operand.hbm [shape: bf16[32,8,96], index: 1, kind: input, shape index: {}]   ;;  %s5681_s2 = inlined_call_operand.hbm [shape: bf16[32,8,32], index: 2, kind: input, shape index: {}]   ;;  %s5682_s3 = inlined_call_operand.hbm [shape: f32[32,1], index: 3, kind: input, shape index: {}]   ;;  %s5683_s4 = inlined_call_operand.hbm [shape: bf16[32,32], index: 4, kind: input, shape index: {}]   ;;  %s5684_s5 = inlined_call_operand.hbm [shape: bf16[96,32], index: 5, kind: input, shape index: {}]   ;;  %s5685_s6 = inlined_call_operand.hbm [shape: bf16[32,32], index: 6, kind: input, shape index: {}]   ;;  %s5686_s7 = inlined_call_operand.hbm [shape: f32[1,32], index: 7, kind: input, shape index: {}]   ;;  %s5687_s8 = inlined_call_operand.hbm [shape: bf16[32,32], index: 8, kind: input, shape index: {}]   ;;  %s5688_s9 = inlined_call_operand.hbm [shape: f32[1,32], index: 9, kind: input, shape index: {}]   ;;  %s5689_s10 = inlined_call_operand.hbm [shape: bf16[32,32], index: 10, kind: input, shape index: {}]   ;;  %s5690_s11 = inlined_call_operand.hbm [shape: f32[1,32], index: 11, kind: input, shape index: {}]   ;;  %s5691_s12 = inlined_call_operand.hbm [shape: f32[1,32], index: 12, kind: input, shape index: {}]   ;;  %s5692_s13 = inlined_call_operand.hbm [shape: f32[1,32], index: 13, kind: input, shape index: {}]   ;;  %s5693_s14 = inlined_call_operand.hbm [shape: bf16[32,128], index: 14, kind: input, shape index: {}]   ;;  %s5694_s15 = inlined_call_operand.hbm [shape: f32[1,128], index: 15, kind: input, shape index: {}]   ;;  %s5695_s16 = inlined_call_operand.hbm [shape: bf16[128,32], index: 16, kind: input, shape index: {}]   ;;  %s5696_s17 = inlined_call_operand.hbm [shape: f32[1,32], index: 17, kind: input, shape index: {}]   ;;  %s5697_s18 = inlined_call_operand.hbm [shape: f32[1,32], index: 18, kind: input, shape index: {}]   ;;  %s5698_s19 = inlined_call_operand.hbm [shape: f32[1,32], index: 19, kind: input, shape index: {}]   ;;  %s5699_s20 = inlined_call_operand.hbm [shape: f32[32,32], index: 20, kind: output, shape index: {}]  }
   0x1   :  { %5708 = sst [smem:[#allocation47_spill]] %s5679_s0 }
   0x2   :  { %5709 = sst [smem:[#allocation48_spill]] %s5680_s1 }
   0x3   :  { %5710 = sst [smem:[#allocation49_spill]] %s5681_s2 }
   0x4   :  { %5711 = sst [smem:[#allocation50_spill]] %s5682_s3 }
   0x5   :  { %5712 = sst [smem:[#allocation51_spill]] %s5683_s4 }
   0x6   :  { %5713 = sst [smem:[#allocation52_spill]] %s5697_s18 }
   0x7   :  { %5714 = sst [smem:[#allocation53_spill]] %s5698_s19 }
   0x8   :  { %5715 = sst [smem:[#allocation54_spill]] %s5699_s20 }
   0x9   :  { %25 = vsyncpa [#allocation3], 0 }
   0xa   :  { %26 = vsyncpa [#allocation6], 0 }
   0xb   :  { %27 = vsyncpa [#allocation9], 0 }
   0xc   :  { %28 = vsyncpa [#allocation12], 0 }
   0xd   :  { %29 = vsyncpa [#allocation15], 0 }
   0xe   :  { %30 = vsyncpa [#allocation18], 0 }
   0xf   :  { %31 = vsyncpa [#allocation21], 0 }
  0x10   :  { %32 = vsyncpa [#allocation24], 0 }
  0x11   :  { %33 = vsyncpa [#allocation27], 0 }
  0x12   :  { %34 = vsyncpa [#allocation30], 0 }
  0x13   :  { %35 = vsyncpa [#allocation33], 0 }
  0x14   :  { %36 = vsyncpa [#allocation4], 0  ;;  %s4463_s1 = smov [#allocation5]   ;;  %s5716_s2 = sld [smem:[#allocation48_spill]] }
  0x15   :  { %s54_s22 = sshll.u32 %s4463_s1, 4  ;;  %s55_s22 = int_to_ptr.vmem [resolvable:$true] %s54_s22 }
  0x1a   :  { %s3977_s25 = scalar_lea.hbm %s5716_s2, 2048 }
  0x1b   :  { %p3978_p0 = scmp.ne.s32.totalorder %s5716_s2, %s3977_s25  ;;  %p3981_p1 = scmp.lt.u32.totalorder %s3977_s25, %s5716_s2 }
  0x1d   :  { %p3983_p2 = pnand %p3981_p1, %p3978_p0 }
  0x1f   :  { %3986 = shalt.err (!%p3983_p2)
}
  0x20   :  { %s3987_s4 = scalar_lea.vmem %s55_s22, 2048  ;;  %p3992_p4 = scmp.lt.s32.totalorder %s55_s22, %s55_s22 }
  0x21   :  { %p3988_p3 = scmp.ne.s32.totalorder %s55_s22, %s3987_s4  ;;  %p3993_p5 = scmp.lt.s32.totalorder %s3987_s4, %s3987_s4 }
  0x23   :  { %p3994_p6 = por %p3993_p5, %p3992_p4 }
  0x25   :  { %p3995_p7 = pnand %p3994_p6, %p3988_p3 }
  0x27   :  { %3998 = shalt.err (!%p3995_p7)
}
  0x28   :  { %s4464_s29 = smov 64   ;;  %s4465_s30 = smov 4  }
  0x29   :  { %60 = dma.hbm_to_vmem [thread:$0]  %s5716_s2, 2048, %s55_s22, [#allocation6], %s4464_s29, %s4464_s29, %s4465_s30  }
  0x2a   :  { %s4466_s1 = smov [#allocation8]   ;;  %s4467_s24 = smov [#allocation11]  }
  0x2b   :  { %s78_s23 = sshll.u32 %s4466_s1, 4  ;;  %s102_s25 = sshll.u32 %s4467_s24, 4  ;;  %s79_s23 = int_to_ptr.vmem [resolvable:$true] %s78_s23  ;;  %s103_s25 = int_to_ptr.vmem [resolvable:$true] %s102_s25 }
  0x2c   :  { %s5717_s27 = sld [smem:[#allocation50_spill]] }
  0x32   :  { %s3999_s28 = scalar_lea.hbm %s5717_s27, 512 }
  0x33   :  { %p4000_p8 = scmp.ne.s32.totalorder %s5717_s27, %s3999_s28  ;;  %p4003_p9 = scmp.lt.u32.totalorder %s3999_s28, %s5717_s27 }
  0x35   :  { %p4005_p10 = pnand %p4003_p9, %p4000_p8 }
  0x37   :  { %4008 = shalt.err (!%p4005_p10)
}
  0x38   :  { %s4009_s22 = scalar_lea.vmem %s79_s23, 512  ;;  %p4014_p12 = scmp.lt.s32.totalorder %s79_s23, %s79_s23 }
  0x39   :  { %p4010_p11 = scmp.ne.s32.totalorder %s79_s23, %s4009_s22  ;;  %p4015_p13 = scmp.lt.s32.totalorder %s4009_s22, %s4009_s22 }
  0x3b   :  { %p4016_p0 = por %p4015_p13, %p4014_p12 }
  0x3d   :  { %p4017_p1 = pnand %p4016_p0, %p4010_p11 }
  0x3f   :  { %4020 = shalt.err (!%p4017_p1)
}
  0x40   :  { %s4468_s2 = smov 128   ;;  %s4469_s0 = smov 8  }
  0x41   :  { %84 = dma.hbm_to_vmem [thread:$0]  %s5717_s27, 512, %s79_s23, [#allocation9], %s4468_s2, %s4468_s2, %s4469_s0  }
  0x42   :  { %s4021_s1 = scalar_lea.hbm %s5684_s5, 768 }
  0x43   :  { %p4022_p2 = scmp.ne.s32.totalorder %s5684_s5, %s4021_s1  ;;  %p4025_p3 = scmp.lt.u32.totalorder %s4021_s1, %s5684_s5 }
  0x45   :  { %p4027_p4 = pnand %p4025_p3, %p4022_p2 }
  0x47   :  { %4030 = shalt.err (!%p4027_p4)
}
  0x48   :  { %s4031_s4 = scalar_lea.vmem %s103_s25, 768  ;;  %p4036_p6 = scmp.lt.s32.totalorder %s103_s25, %s103_s25 }
  0x49   :  { %p4032_p5 = scmp.ne.s32.totalorder %s103_s25, %s4031_s4  ;;  %p4037_p7 = scmp.lt.s32.totalorder %s4031_s4, %s4031_s4 }
  0x4b   :  { %p4038_p8 = por %p4037_p7, %p4036_p6 }
  0x4d   :  { %p4039_p9 = pnand %p4038_p8, %p4032_p5 }
  0x4f   :  { %4042 = shalt.err (!%p4039_p9)
}
  0x50   :  { %108 = dma.hbm_to_vmem [thread:$0]  %s5684_s5, 768, %s103_s25, [#allocation12], %s4464_s29, %s4464_s29, %s4465_s30  }
  0x51   :  { %s4470_s22 = smov [#allocation14]   ;;  %s4471_s21 = smov [#allocation17]  }
  0x52   :  { %s127_s20 = sshll.u32 %s4470_s22, 4  ;;  %s149_s18 = sshll.u32 %s4471_s21, 4  ;;  %s128_s20 = int_to_ptr.vmem [resolvable:$true] %s127_s20  ;;  %s150_s18 = int_to_ptr.vmem [resolvable:$true] %s149_s18 }
  0x53   :  { %s4043_s24 = scalar_lea.hbm %s5686_s7, 16 }
  0x54   :  { %p4044_p10 = scmp.ne.s32.totalorder %s5686_s7, %s4043_s24  ;;  %p4047_p11 = scmp.lt.u32.totalorder %s4043_s24, %s5686_s7 }
  0x56   :  { %p4049_p12 = pnand %p4047_p11, %p4044_p10 }
  0x58   :  { %4052 = shalt.err (!%p4049_p12)
}
  0x59   :  { %s4053_s5 = scalar_lea.vmem %s128_s20, 16  ;;  %s4057_s25 = scalar_lea.vmem %s128_s20, 32 }
  0x5a   :  { %p4054_p13 = scmp.ne.s32.totalorder %s128_s20, %s4053_s5  ;;  %p4058_p0 = scmp.lt.s32.totalorder %s128_s20, %s128_s20 }
  0x5b   :  { %p4059_p1 = scmp.lt.s32.totalorder %s4057_s25, %s4053_s5 }
  0x5d   :  { %p4060_p2 = por %p4059_p1, %p4058_p0 }
  0x5f   :  { %p4061_p3 = pnand %p4060_p2, %p4054_p13 }
  0x61   :  { %4064 = shalt.err (!%p4061_p3)
}
  0x62   :  { %130 = dma.hbm_to_vmem [thread:$0]  %s5686_s7, 16, %s128_s20, [#allocation15]  }
  0x63   :  { %s4065_s19 = scalar_lea.hbm %s5688_s9, 16 }
  0x64   :  { %p4066_p4 = scmp.ne.s32.totalorder %s5688_s9, %s4065_s19  ;;  %p4069_p5 = scmp.lt.u32.totalorder %s4065_s19, %s5688_s9 }
  0x66   :  { %p4071_p6 = pnand %p4069_p5, %p4066_p4 }
  0x68   :  { %4074 = shalt.err (!%p4071_p6)
}
  0x69   :  { %s4075_s28 = scalar_lea.vmem %s150_s18, 16  ;;  %s4079_s4 = scalar_lea.vmem %s150_s18, 32 }
  0x6a   :  { %p4076_p7 = scmp.ne.s32.totalorder %s150_s18, %s4075_s28  ;;  %p4080_p8 = scmp.lt.s32.totalorder %s150_s18, %s150_s18 }
  0x6b   :  { %p4081_p9 = scmp.lt.s32.totalorder %s4079_s4, %s4075_s28 }
  0x6d   :  { %p4082_p10 = por %p4081_p9, %p4080_p8 }
  0x6f   :  { %p4083_p11 = pnand %p4082_p10, %p4076_p7 }
  0x71   :  { %4086 = shalt.err (!%p4083_p11)
}
  0x72   :  { %152 = dma.hbm_to_vmem [thread:$0]  %s5688_s9, 16, %s150_s18, [#allocation18]  }
  0x73   :  { %s4472_s5 = smov [#allocation20]   ;;  %s4473_s23 = smov [#allocation23]  }
  0x74   :  { %s171_s25 = sshll.u32 %s4472_s5, 4  ;;  %s191_s27 = sshll.u32 %s4473_s23, 4  ;;  %s172_s25 = int_to_ptr.vmem [resolvable:$true] %s171_s25  ;;  %s192_s27 = int_to_ptr.vmem [resolvable:$true] %s191_s27 }
  0x75   :  { %s4087_s19 = scalar_lea.hbm %s5690_s11, 16 }
  0x76   :  { %p4088_p12 = scmp.ne.s32.totalorder %s5690_s11, %s4087_s19  ;;  %p4091_p13 = scmp.lt.u32.totalorder %s4087_s19, %s5690_s11 }
  0x78   :  { %p4093_p0 = pnand %p4091_p13, %p4088_p12 }
  0x7a   :  { %4096 = shalt.err (!%p4093_p0)
}
  0x7b   :  { %s4097_s9 = scalar_lea.vmem %s172_s25, 16  ;;  %s4101_s18 = scalar_lea.vmem %s172_s25, 32 }
  0x7c   :  { %p4098_p1 = scmp.ne.s32.totalorder %s172_s25, %s4097_s9  ;;  %p4102_p2 = scmp.lt.s32.totalorder %s172_s25, %s172_s25 }
  0x7d   :  { %p4103_p3 = scmp.lt.s32.totalorder %s4101_s18, %s4097_s9 }
  0x7f   :  { %p4104_p4 = por %p4103_p3, %p4102_p2 }
  0x81   :  { %p4105_p5 = pnand %p4104_p4, %p4098_p1 }
  0x83   :  { %4108 = shalt.err (!%p4105_p5)
}
  0x84   :  { %174 = dma.hbm_to_vmem [thread:$0]  %s5690_s11, 16, %s172_s25, [#allocation21]  }
  0x85   :  { %s4109_s5 = scalar_lea.hbm %s5692_s13, 16 }
  0x86   :  { %p4110_p6 = scmp.ne.s32.totalorder %s5692_s13, %s4109_s5  ;;  %p4113_p7 = scmp.lt.u32.totalorder %s4109_s5, %s5692_s13 }
  0x88   :  { %p4115_p8 = pnand %p4113_p7, %p4110_p6 }
  0x8a   :  { %4118 = shalt.err (!%p4115_p8)
}
  0x8b   :  { %s4119_s1 = scalar_lea.vmem %s192_s27, 16  ;;  %s4123_s24 = scalar_lea.vmem %s192_s27, 32 }
  0x8c   :  { %p4120_p9 = scmp.ne.s32.totalorder %s192_s27, %s4119_s1  ;;  %p4124_p10 = scmp.lt.s32.totalorder %s192_s27, %s192_s27 }
  0x8d   :  { %p4125_p11 = scmp.lt.s32.totalorder %s4123_s24, %s4119_s1 }
  0x8f   :  { %p4126_p12 = por %p4125_p11, %p4124_p10 }
  0x91   :  { %p4127_p13 = pnand %p4126_p12, %p4120_p9 }
  0x93   :  { %4130 = shalt.err (!%p4127_p13)
}
  0x94   :  { %194 = dma.hbm_to_vmem [thread:$0]  %s5692_s13, 16, %s192_s27, [#allocation24]  }
  0x95   :  { %s4474_s3 = smov [#allocation26]   ;;  %s4475_s9 = smov [#allocation29]  }
  0x96   :  { %s213_s26 = sshll.u32 %s4474_s3, 4  ;;  %s235_s18 = sshll.u32 %s4475_s9, 4  ;;  %s214_s26 = int_to_ptr.vmem [resolvable:$true] %s213_s26  ;;  %s236_s18 = int_to_ptr.vmem [resolvable:$true] %s235_s18 }
  0x97   :  { %s4131_s7 = scalar_lea.hbm %s5694_s15, 16 }
  0x98   :  { %p4132_p0 = scmp.ne.s32.totalorder %s5694_s15, %s4131_s7  ;;  %p4135_p1 = scmp.lt.u32.totalorder %s4131_s7, %s5694_s15 }
  0x9a   :  { %p4137_p2 = pnand %p4135_p1, %p4132_p0 }
  0x9c   :  { %4140 = shalt.err (!%p4137_p2)
}
  0x9d   :  { %s4141_s13 = scalar_lea.vmem %s214_s26, 16  ;;  %s4145_s27 = scalar_lea.vmem %s214_s26, 32 }
  0x9e   :  { %p4142_p3 = scmp.ne.s32.totalorder %s214_s26, %s4141_s13  ;;  %p4146_p4 = scmp.lt.s32.totalorder %s214_s26, %s214_s26 }
  0x9f   :  { %p4147_p5 = scmp.lt.s32.totalorder %s4145_s27, %s4141_s13 }
  0xa1   :  { %p4148_p6 = por %p4147_p5, %p4146_p4 }
  0xa3   :  { %p4149_p7 = pnand %p4148_p6, %p4142_p3 }
  0xa5   :  { %4152 = shalt.err (!%p4149_p7)
}
  0xa6   :  { %216 = dma.hbm_to_vmem [thread:$0]  %s5694_s15, 16, %s214_s26, [#allocation27]  }
  0xa7   :  { %s4153_s11 = scalar_lea.hbm %s5696_s17, 16 }
  0xa8   :  { %p4154_p8 = scmp.ne.s32.totalorder %s5696_s17, %s4153_s11  ;;  %p4157_p9 = scmp.lt.u32.totalorder %s4153_s11, %s5696_s17 }
  0xaa   :  { %p4159_p10 = pnand %p4157_p9, %p4154_p8 }
  0xac   :  { %4162 = shalt.err (!%p4159_p10)
}
  0xad   :  { %s4163_s4 = scalar_lea.vmem %s236_s18, 16  ;;  %s4167_s7 = scalar_lea.vmem %s236_s18, 32 }
  0xae   :  { %p4164_p11 = scmp.ne.s32.totalorder %s236_s18, %s4163_s4  ;;  %p4168_p12 = scmp.lt.s32.totalorder %s236_s18, %s236_s18 }
  0xaf   :  { %p4169_p13 = scmp.lt.s32.totalorder %s4167_s7, %s4163_s4 }
  0xb1   :  { %p4170_p0 = por %p4169_p13, %p4168_p12 }
  0xb3   :  { %p4171_p1 = pnand %p4170_p0, %p4164_p11 }
  0xb5   :  { %4174 = shalt.err (!%p4171_p1)
}
  0xb6   :  { %238 = dma.hbm_to_vmem [thread:$0]  %s5696_s17, 16, %s236_s18, [#allocation30]  }
  0xb7   :  { %s4476_s20 = smov [#allocation2]   ;;  %s4477_s23 = smov [#allocation7]  }
  0xb8   :  { %s42_s5 = sshll.u32 %s4476_s20, 4  ;;  %s66_s22 = sshll.u32 %s4477_s23, 4  ;;  %s43_s5 = int_to_ptr.vmem [resolvable:$true] %s42_s5  ;;  %s67_s22 = int_to_ptr.vmem [resolvable:$true] %s66_s22 }
  0xb9   :  { %s5718_s21 = sld [smem:[#allocation47_spill]] }
  0xbf   :  { %s4175_s19 = scalar_lea.hbm %s5718_s21, 512 }
  0xc0   :  { %p4176_p2 = scmp.ne.s32.totalorder %s5718_s21, %s4175_s19  ;;  %p4179_p3 = scmp.lt.u32.totalorder %s4175_s19, %s5718_s21 }
  0xc2   :  { %p4181_p4 = pnand %p4179_p3, %p4176_p2 }
  0xc4   :  { %4184 = shalt.err (!%p4181_p4)
}
  0xc5   :  { %s4185_s17 = scalar_lea.vmem %s43_s5, 512  ;;  %p4190_p6 = scmp.lt.s32.totalorder %s43_s5, %s43_s5 }
  0xc6   :  { %p4186_p5 = scmp.ne.s32.totalorder %s43_s5, %s4185_s17  ;;  %p4191_p7 = scmp.lt.s32.totalorder %s4185_s17, %s4185_s17 }
  0xc8   :  { %p4192_p8 = por %p4191_p7, %p4190_p6 }
  0xca   :  { %p4193_p9 = pnand %p4192_p8, %p4186_p5 }
  0xcc   :  { %4196 = shalt.err (!%p4193_p9)
}
  0xcd   :  { %48 = dma.hbm_to_vmem [thread:$0]  %s5718_s21, 512, %s43_s5, [#allocation3], %s4468_s2, %s4468_s2, %s4469_s0  }
  0xce   :  { %s5719_s4 = sld [smem:[#allocation49_spill]] }
  0xd4   :  { %s4197_s7 = scalar_lea.hbm %s5719_s4, 2048 }
  0xd5   :  { %p4198_p10 = scmp.ne.s32.totalorder %s5719_s4, %s4197_s7  ;;  %p4201_p11 = scmp.lt.u32.totalorder %s4197_s7, %s5719_s4 }
  0xd7   :  { %p4203_p12 = pnand %p4201_p11, %p4198_p10 }
  0xd9   :  { %4206 = shalt.err (!%p4203_p12)
}
  0xda   :  { %s4207_s13 = scalar_lea.vmem %s67_s22, 2048  ;;  %p4212_p0 = scmp.lt.s32.totalorder %s67_s22, %s67_s22 }
  0xdb   :  { %p4208_p13 = scmp.ne.s32.totalorder %s67_s22, %s4207_s13  ;;  %p4213_p1 = scmp.lt.s32.totalorder %s4207_s13, %s4207_s13 }
  0xdd   :  { %p4214_p2 = por %p4213_p1, %p4212_p0 }
  0xdf   :  { %p4215_p3 = pnand %p4214_p2, %p4208_p13 }
  0xe1   :  { %4218 = shalt.err (!%p4215_p3)
}
  0xe2   :  { %72 = dma.hbm_to_vmem [thread:$0]  %s5719_s4, 2048, %s67_s22, [#allocation6], %s4464_s29, %s4464_s29, %s4465_s30  }
  0xe3   :  { %s4478_s21 = smov [#allocation10]   ;;  %s4479_s1 = smov [#allocation13]  }
  0xe4   :  { %s90_s19 = sshll.u32 %s4478_s21, 4  ;;  %s114_s24 = sshll.u32 %s4479_s1, 4  ;;  %s91_s19 = int_to_ptr.vmem [resolvable:$true] %s90_s19  ;;  %s115_s24 = int_to_ptr.vmem [resolvable:$true] %s114_s24 }
  0xe5   :  { %s5720_s17 = sld [smem:[#allocation51_spill]] }
  0xeb   :  { %s4219_s18 = scalar_lea.hbm %s5720_s17, 256 }
  0xec   :  { %p4220_p4 = scmp.ne.s32.totalorder %s5720_s17, %s4219_s18  ;;  %p4223_p5 = scmp.lt.u32.totalorder %s4219_s18, %s5720_s17 }
  0xee   :  { %p4225_p6 = pnand %p4223_p5, %p4220_p4 }
  0xf0   :  { %4228 = shalt.err (!%p4225_p6)
}
  0xf1   :  { %s4229_s22 = scalar_lea.vmem %s91_s19, 256  ;;  %p4234_p8 = scmp.lt.s32.totalorder %s91_s19, %s91_s19 }
  0xf2   :  { %p4230_p7 = scmp.ne.s32.totalorder %s91_s19, %s4229_s22  ;;  %p4235_p9 = scmp.lt.s32.totalorder %s4229_s22, %s4229_s22 }
  0xf4   :  { %p4236_p10 = por %p4235_p9, %p4234_p8 }
  0xf6   :  { %p4237_p11 = pnand %p4236_p10, %p4230_p7 }
  0xf8   :  { %4240 = shalt.err (!%p4237_p11)
}
  0xf9   :  { %96 = dma.hbm_to_vmem [thread:$0]  %s5720_s17, 256, %s91_s19, [#allocation9], %s4464_s29, %s4464_s29, %s4465_s30  }
  0xfa   :  { %s4241_s23 = scalar_lea.hbm %s5685_s6, 256 }
  0xfb   :  { %p4242_p12 = scmp.ne.s32.totalorder %s5685_s6, %s4241_s23  ;;  %p4245_p13 = scmp.lt.u32.totalorder %s4241_s23, %s5685_s6 }
  0xfd   :  { %p4247_p0 = pnand %p4245_p13, %p4242_p12 }
  0xff   :  { %4250 = shalt.err (!%p4247_p0)
}
 0x100   :  { %s4251_s1 = scalar_lea.vmem %s115_s24, 256  ;;  %p4256_p2 = scmp.lt.s32.totalorder %s115_s24, %s115_s24 }
 0x101   :  { %p4252_p1 = scmp.ne.s32.totalorder %s115_s24, %s4251_s1  ;;  %p4257_p3 = scmp.lt.s32.totalorder %s4251_s1, %s4251_s1 }
 0x103   :  { %p4258_p4 = por %p4257_p3, %p4256_p2 }
 0x105   :  { %p4259_p5 = pnand %p4258_p4, %p4252_p1 }
 0x107   :  { %4262 = shalt.err (!%p4259_p5)
}
 0x108   :  { %120 = dma.hbm_to_vmem [thread:$0]  %s5685_s6, 256, %s115_s24, [#allocation12], %s4464_s29, %s4464_s29, %s4465_s30  }
 0x109   :  { %s4480_s25 = smov [#allocation16]   ;;  %s4481_s18 = smov [#allocation19]  }
 0x10a   :  { %s136_s17 = sshll.u32 %s4480_s25, 4  ;;  %s158_s3 = sshll.u32 %s4481_s18, 4  ;;  %s137_s17 = int_to_ptr.vmem [resolvable:$true] %s136_s17  ;;  %s159_s3 = int_to_ptr.vmem [resolvable:$true] %s158_s3 }
 0x10b   :  { %s4263_s7 = scalar_lea.hbm %s5687_s8, 256 }
 0x10c   :  { %p4264_p6 = scmp.ne.s32.totalorder %s5687_s8, %s4263_s7  ;;  %p4267_p7 = scmp.lt.u32.totalorder %s4263_s7, %s5687_s8 }
 0x10e   :  { %p4269_p8 = pnand %p4267_p7, %p4264_p6 }
 0x110   :  { %4272 = shalt.err (!%p4269_p8)
}
 0x111   :  { %s4273_s6 = scalar_lea.vmem %s137_s17, 256  ;;  %p4278_p10 = scmp.lt.s32.totalorder %s137_s17, %s137_s17 }
 0x112   :  { %p4274_p9 = scmp.ne.s32.totalorder %s137_s17, %s4273_s6  ;;  %p4279_p11 = scmp.lt.s32.totalorder %s4273_s6, %s4273_s6 }
 0x114   :  { %p4280_p12 = por %p4279_p11, %p4278_p10 }
 0x116   :  { %p4281_p13 = pnand %p4280_p12, %p4274_p9 }
 0x118   :  { %4284 = shalt.err (!%p4281_p13)
}
 0x119   :  { %142 = dma.hbm_to_vmem [thread:$0]  %s5687_s8, 256, %s137_s17, [#allocation15], %s4464_s29, %s4464_s29, %s4465_s30  }
 0x11a   :  { %s4285_s5 = scalar_lea.hbm %s5689_s10, 256 }
 0x11b   :  { %p4286_p0 = scmp.ne.s32.totalorder %s5689_s10, %s4285_s5  ;;  %p4289_p1 = scmp.lt.u32.totalorder %s4285_s5, %s5689_s10 }
 0x11d   :  { %p4291_p2 = pnand %p4289_p1, %p4286_p0 }
 0x11f   :  { %4294 = shalt.err (!%p4291_p2)
}
 0x120   :  { %s4295_s11 = scalar_lea.vmem %s159_s3, 256  ;;  %p4300_p4 = scmp.lt.s32.totalorder %s159_s3, %s159_s3 }
 0x121   :  { %p4296_p3 = scmp.ne.s32.totalorder %s159_s3, %s4295_s11  ;;  %p4301_p5 = scmp.lt.s32.totalorder %s4295_s11, %s4295_s11 }
 0x123   :  { %p4302_p6 = por %p4301_p5, %p4300_p4 }
 0x125   :  { %p4303_p7 = pnand %p4302_p6, %p4296_p3 }
 0x127   :  { %4306 = shalt.err (!%p4303_p7)
}
 0x128   :  { %164 = dma.hbm_to_vmem [thread:$0]  %s5689_s10, 256, %s159_s3, [#allocation18], %s4464_s29, %s4464_s29, %s4465_s30  }
 0x129   :  { %s4482_s17 = smov [#allocation22]   ;;  %s4483_s9 = smov [#allocation25]  }
 0x12a   :  { %s181_s18 = sshll.u32 %s4482_s17, 4  ;;  %s200_s28 = sshll.u32 %s4483_s9, 4  ;;  %s182_s18 = int_to_ptr.vmem [resolvable:$true] %s181_s18  ;;  %s201_s28 = int_to_ptr.vmem [resolvable:$true] %s200_s28 }
 0x12b   :  { %s4307_s4 = scalar_lea.hbm %s5691_s12, 16 }
 0x12c   :  { %p4308_p8 = scmp.ne.s32.totalorder %s5691_s12, %s4307_s4  ;;  %p4311_p9 = scmp.lt.u32.totalorder %s4307_s4, %s5691_s12 }
 0x12e   :  { %p4313_p10 = pnand %p4311_p9, %p4308_p8 }
 0x130   :  { %4316 = shalt.err (!%p4313_p10)
}
 0x131   :  { %s4317_s10 = scalar_lea.vmem %s182_s18, 16  ;;  %s4321_s3 = scalar_lea.vmem %s182_s18, 32 }
 0x132   :  { %p4318_p11 = scmp.ne.s32.totalorder %s182_s18, %s4317_s10  ;;  %p4322_p12 = scmp.lt.s32.totalorder %s182_s18, %s182_s18 }
 0x133   :  { %p4323_p13 = scmp.lt.s32.totalorder %s4321_s3, %s4317_s10 }
 0x135   :  { %p4324_p0 = por %p4323_p13, %p4322_p12 }
 0x137   :  { %p4325_p1 = pnand %p4324_p0, %p4318_p11 }
 0x139   :  { %4328 = shalt.err (!%p4325_p1)
}
 0x13a   :  { %184 = dma.hbm_to_vmem [thread:$0]  %s5691_s12, 16, %s182_s18, [#allocation21]  }
 0x13b   :  { %s4329_s27 = scalar_lea.hbm %s5693_s14, 256 }
 0x13c   :  { %p4330_p2 = scmp.ne.s32.totalorder %s5693_s14, %s4329_s27  ;;  %p4333_p3 = scmp.lt.u32.totalorder %s4329_s27, %s5693_s14 }
 0x13e   :  { %p4335_p4 = pnand %p4333_p3, %p4330_p2 }
 0x140   :  { %4338 = shalt.err (!%p4335_p4)
}
 0x141   :  { %s4339_s8 = scalar_lea.vmem %s201_s28, 256  ;;  %p4344_p6 = scmp.lt.s32.totalorder %s201_s28, %s201_s28 }
 0x142   :  { %p4340_p5 = scmp.ne.s32.totalorder %s201_s28, %s4339_s8  ;;  %p4345_p7 = scmp.lt.s32.totalorder %s4339_s8, %s4339_s8 }
 0x144   :  { %p4346_p8 = por %p4345_p7, %p4344_p6 }
 0x146   :  { %p4347_p9 = pnand %p4346_p8, %p4340_p5 }
 0x148   :  { %4350 = shalt.err (!%p4347_p9)
}
 0x149   :  { %206 = dma.hbm_to_vmem [thread:$0]  %s5693_s14, 256, %s201_s28, [#allocation24], %s4464_s29, %s4464_s29, %s4465_s30  }
 0x14a   :  { %s4484_s17 = smov [#allocation28]   ;;  %s4485_s9 = smov [#allocation31]  }
 0x14b   :  { %s222_s18 = sshll.u32 %s4484_s17, 4  ;;  %s245_s7 = sshll.u32 %s4485_s9, 4  ;;  %s223_s18 = int_to_ptr.vmem [resolvable:$true] %s222_s18  ;;  %s246_s7 = int_to_ptr.vmem [resolvable:$true] %s245_s7 }
 0x14c   :  { %s4351_s15 = scalar_lea.hbm %s5695_s16, 1024 }
 0x14d   :  { %p4352_p10 = scmp.ne.s32.totalorder %s5695_s16, %s4351_s15  ;;  %p4355_p11 = scmp.lt.u32.totalorder %s4351_s15, %s5695_s16 }
 0x14f   :  { %p4357_p12 = pnand %p4355_p11, %p4352_p10 }
 0x151   :  { %4360 = shalt.err (!%p4357_p12)
}
 0x152   :  { %s4361_s14 = scalar_lea.vmem %s223_s18, 1024  ;;  %p4366_p0 = scmp.lt.s32.totalorder %s223_s18, %s223_s18 }
 0x153   :  { %p4362_p13 = scmp.ne.s32.totalorder %s223_s18, %s4361_s14  ;;  %p4367_p1 = scmp.lt.s32.totalorder %s4361_s14, %s4361_s14 }
 0x155   :  { %p4368_p2 = por %p4367_p1, %p4366_p0 }
 0x157   :  { %p4369_p3 = pnand %p4368_p2, %p4362_p13 }
 0x159   :  { %4372 = shalt.err (!%p4369_p3)
}
 0x15a   :  { %228 = dma.hbm_to_vmem [thread:$0]  %s5695_s16, 1024, %s223_s18, [#allocation27], %s4464_s29, %s4464_s29, %s4465_s30  }
 0x15b   :  { %s5721_s13 = sld [smem:[#allocation52_spill]] }
 0x161   :  { %s4373_s5 = scalar_lea.hbm %s5721_s13, 16 }
 0x162   :  { %p4374_p4 = scmp.ne.s32.totalorder %s5721_s13, %s4373_s5  ;;  %p4377_p5 = scmp.lt.u32.totalorder %s4373_s5, %s5721_s13 }
 0x164   :  { %p4379_p6 = pnand %p4377_p5, %p4374_p4 }
 0x166   :  { %4382 = shalt.err (!%p4379_p6)
}
 0x167   :  { %s4383_s11 = scalar_lea.vmem %s246_s7, 16  ;;  %s4387_s8 = scalar_lea.vmem %s246_s7, 32 }
 0x168   :  { %p4384_p7 = scmp.ne.s32.totalorder %s246_s7, %s4383_s11  ;;  %p4388_p8 = scmp.lt.s32.totalorder %s246_s7, %s246_s7 }
 0x169   :  { %p4389_p9 = scmp.lt.s32.totalorder %s4387_s8, %s4383_s11 }
 0x16b   :  { %p4390_p10 = por %p4389_p9, %p4388_p8 }
 0x16d   :  { %p4391_p11 = pnand %p4390_p10, %p4384_p7 }
 0x16f   :  { %4394 = shalt.err (!%p4391_p11)
}
 0x170   :  { %248 = dma.hbm_to_vmem [thread:$0]  %s5721_s13, 16, %s246_s7, [#allocation30]  }
 0x171   :  { %s4486_s30 = smov [#allocation32]   ;;  %s5722_s18 = sld [smem:[#allocation53_spill]] }
 0x172   :  { %s255_s12 = sshll.u32 %s4486_s30, 4  ;;  %s256_s12 = int_to_ptr.vmem [resolvable:$true] %s255_s12 }
 0x177   :  { %s4395_s9 = scalar_lea.hbm %s5722_s18, 16 }
 0x178   :  { %p4396_p12 = scmp.ne.s32.totalorder %s5722_s18, %s4395_s9  ;;  %p4399_p13 = scmp.lt.u32.totalorder %s4395_s9, %s5722_s18 }
 0x17a   :  { %p4401_p0 = pnand %p4399_p13, %p4396_p12 }
 0x17c   :  { %4404 = shalt.err (!%p4401_p0)
}
 0x17d   :  { %s4405_s6 = scalar_lea.vmem %s256_s12, 16  ;;  %s4409_s7 = scalar_lea.vmem %s256_s12, 32 }
 0x17e   :  { %p4406_p1 = scmp.ne.s32.totalorder %s256_s12, %s4405_s6  ;;  %p4410_p2 = scmp.lt.s32.totalorder %s256_s12, %s256_s12 }
 0x17f   :  { %p4411_p3 = scmp.lt.s32.totalorder %s4409_s7, %s4405_s6 }
 0x181   :  { %p4412_p4 = por %p4411_p3, %p4410_p2 }
 0x183   :  { %p4413_p5 = pnand %p4412_p4, %p4406_p1 }
 0x185   :  { %4416 = shalt.err (!%p4413_p5)
}
 0x186   :  { %258 = dma.hbm_to_vmem [thread:$0]  %s5722_s18, 16, %s256_s12, [#allocation33]  }
 0x187   :  { %4439 = dma.done.wait [#allocation3], 512  }
 0x188   :  { %4440 = vsyncadd [#allocation3], 4294966784 }
 0x189   :  { %4441 = dma.done.wait [#allocation6], 4096  }
 0x18a   :  { %4442 = vsyncadd [#allocation6], 4294963200 }
 0x18b   :  { %4443 = dma.done.wait [#allocation9], 768  }
 0x18c   :  { %4444 = vsyncadd [#allocation9], 4294966528 }
 0x18d   :  { %4445 = dma.done.wait [#allocation12], 1024  }
 0x18e   :  { %4446 = vsyncadd [#allocation12], 4294966272 }
 0x18f   :  { %4447 = dma.done.wait [#allocation15], 272  }
 0x190   :  { %4448 = vsyncadd [#allocation15], 4294967024 }
 0x191   :  { %4449 = dma.done.wait [#allocation18], 272  }
 0x192   :  { %4450 = vsyncadd [#allocation18], 4294967024 }
 0x193   :  { %4451 = dma.done.wait [#allocation21], 32  }
 0x194   :  { %4452 = vsyncadd [#allocation21], 4294967264 }
 0x195   :  { %4453 = dma.done.wait [#allocation24], 272  }
 0x196   :  { %4454 = vsyncadd [#allocation24], 4294967024 }
 0x197   :  { %4455 = dma.done.wait [#allocation27], 1040  }
 0x198   :  { %4456 = vsyncadd [#allocation27], 4294966256 }
 0x199   :  { %4457 = dma.done.wait [#allocation30], 32  }
 0x19a   :  { %4458 = vsyncadd [#allocation30], 4294967264 }
 0x19b   :  { %4459 = dma.done.wait [#allocation33], 16  }
 0x19c   :  { %4460 = vsyncadd [#allocation33], 4294967280  ;;  %v3765_v0 = vld [vmem:[#allocation13] sm:$0xff]   ;;  %v3766_v1 = vld [vmem:[#allocation13 + $0x8] sm:$0xff]   ;;  %vm413_vm0 = vcmask 261120   ;;  %vm902_vm1 = vcmask 785408   ;;  %v1120_v57 = vlaneseq }
 0x19d   :  { %3524 = vmatprep.subr.bf16.mxu1 %v3765_v0  ;;  %v3767_v2 = vld [vmem:[#allocation7] sm:$0xff]   ;;  %v3769_v3 = vld [vmem:[#allocation11] sm:$0xff]   ;;  %v3768_v4 = vld [vmem:[#allocation7 + $0x8] sm:$0xff]   ;;  %v4487_v55 = vmov 1966171168   ;;  %vm2800_vm2 = vcmask 1041409  }
 0x19e   :  { %3525 = vmatpush3.bf16.msra.mxu1 %v3765_v0  ;;  %3528 = vmatprep.mubr.msk.bf16.mxu1 %vm413_vm0, %v3767_v2  ;;  %v3770_v5 = vld [vmem:[#allocation7 + $0x10] sm:$0xff]   ;;  %v3772_v6 = vld [vmem:[#allocation11 + $0x8] sm:$0xff]   ;;  %v3775_v7 = vld [vmem:[#allocation11 + $0x10] sm:$0xff]   ;;  %v1118_v56 = vunpack.c.l.s4 %v4487_v55  ;;  %v1121_v60 = vshrl.u32 %v1120_v57, 7  ;;  %vm2802_vm3 = vcmask 1042434   ;;  %vm2804_vm4 = vcmask 1043459  }
 0x19f   :  { %3526 = vmatprep.subr.bf16.mxu1 %v3766_v1  ;;  %v3771_v8 = vld [vmem:[#allocation7 + $0x18] sm:$0xff]   ;;  %v3773_v9 = vld [vmem:[#allocation7 + $0x20] sm:$0xff]   ;;  %v3780_v10 = vld [vmem:[#allocation11 + $0x18] sm:$0xff]   ;;  %vm2806_vm5 = vcmask 1044484   ;;  %vm2808_vm6 = vcmask 1045509   ;;  %vm2810_vm7 = vcmask 1046534  }
 0x1a0   :  { %v3784_v11 = vld [vmem:[#allocation10] sm:$0xff]   ;;  %v3774_v12 = vld [vmem:[#allocation7 + $0x28] sm:$0xff]   ;;  %v3783_v13 = vld [vmem:[#allocation11 + $0x20] sm:$0xff]   ;;  %v1119_v59 = vunpack.c.0.s8 %v1118_v56  ;;  %vm2812_vm8 = vcmask 1047559   ;;  %s4489_s14 = smov [#allocation34]  }
 0x1a1   :  { %v3776_v14 = vld [vmem:[#allocation7 + $0x30] sm:$0xff]   ;;  %3516 = vmatprep.subr.bf16.mxu0 %v3784_v11  ;;  %v3787_v15 = vld [vmem:[#allocation10 + $0x8] sm:$0xff]   ;;  %v320_v16 = vld [vmem:[#allocation2] sm:$0xff]  ;;  %s3267_s28 = sshll.u32 %s4489_s14, 4  ;;  %s3268_s28 = int_to_ptr.vmem [resolvable:$true] %s3267_s28 }
 0x1a2   :  { %3527 = vmatpush3.bf16.msra.mxu1 %v3766_v1  ;;  %3517 = vmatpush3.bf16.msra.mxu0 %v3784_v11  ;;  %v321_v17 = vld [vmem:[#allocation2 + $0x8] sm:$0xff]  ;;  %v322_v18 = vld [vmem:[#allocation2 + $0x10] sm:$0xff]  ;;  %v323_v20 = vld [vmem:[#allocation2 + $0x18] sm:$0xff]  ;;  %v4902_v62 = vsub.s32 %v1119_v59, %v1121_v60  ;;  %s4417_s3 = scalar_lea.vmem %s3268_s28, 512  ;;  %p4422_p7 = scmp.lt.s32.totalorder %s3268_s28, %s3268_s28 }
 0x1a3   :  { %3560 = vmatprep.subr.bf16.mxu1 %v3769_v3  ;;  %3518 = vmatprep.subr.bf16.mxu0 %v3787_v15  ;;  %v388_v19 = vpack.c.bf16 %v321_v17, %v320_v16  ;;  %v389_v21 = vpack.c.bf16 %v323_v20, %v322_v18  ;;  %v3788_v22 = vld [vmem:[#allocation11 + $0x28] sm:$0xff]   ;;  %v3778_v24 = vld [vmem:[#allocation7 + $0x40] sm:$0xff]   ;;  %v3779_v25 = vld [vmem:[#allocation7 + $0x48] sm:$0xff]   ;;  %p4418_p6 = scmp.ne.s32.totalorder %s3268_s28, %s4417_s3  ;;  %p4423_p8 = scmp.lt.s32.totalorder %s4417_s3, %s4417_s3 }
 0x1a4   :  { %v3777_v23 = vld [vmem:[#allocation7 + $0x38] sm:$0xff]   ;;  %v3781_v26 = vld [vmem:[#allocation7 + $0x50] sm:$0xff]   ;;  %v3785_v28 = vld [vmem:[#allocation7 + $0x60] sm:$0xff]  }
 0x1a5   :  { %3529 = vmatmul.mubr.msk.bf16.vlgmr.msra.gmra.mrb[0].mxu1 %vm413_vm0, %v3768_v4  ;;  %3520 = vmatprep.mubr.msk.bf16.mxu0 %vm413_vm0, %v388_v19  ;;  %v3782_v27 = vld [vmem:[#allocation7 + $0x58] sm:$0xff]   ;;  %v3786_v29 = vld [vmem:[#allocation7 + $0x68] sm:$0xff]   ;;  %v3789_v30 = vld [vmem:[#allocation7 + $0x70] sm:$0xff]   ;;  %p4424_p9 = por %p4423_p8, %p4422_p7 }
 0x1a6   :  { %3561 = vmatpush3.bf16.msra.mxu1 %v3769_v3  ;;  %3532 = vmatprep.mubr.msk.bf16.mxu1 %vm413_vm0, %v3770_v5  ;;  %v3790_v31 = vld [vmem:[#allocation7 + $0x78] sm:$0xff]   ;;  %v3791_v32 = vld [vmem:[#allocation5] sm:$0xff]   ;;  %v3792_v33 = vld [vmem:[#allocation5 + $0x8] sm:$0xff]   ;;  %v4914_v5 = vsub.s32 0, %v1121_v60 }
 0x1a7   :  { %3562 = vmatprep.subr.bf16.mxu1 %v3772_v6  ;;  %3519 = vmatpush3.bf16.msra.mxu0 %v3787_v15  ;;  %v3793_v34 = vld [vmem:[#allocation5 + $0x10] sm:$0xff]   ;;  %v3794_v35 = vld [vmem:[#allocation5 + $0x18] sm:$0xff]   ;;  %v3795_v36 = vld [vmem:[#allocation5 + $0x20] sm:$0xff]   ;;  %p4425_p10 = pnand %p4424_p9, %p4418_p6 }
 0x1a8   :  { %v3796_v37 = vld [vmem:[#allocation5 + $0x28] sm:$0xff]   ;;  %v3797_v38 = vld [vmem:[#allocation5 + $0x30] sm:$0xff]   ;;  %v3798_v39 = vld [vmem:[#allocation5 + $0x38] sm:$0xff]  }
 0x1a9   :  { %v3799_v40 = vld [vmem:[#allocation5 + $0x40] sm:$0xff]   ;;  %v3800_v41 = vld [vmem:[#allocation5 + $0x48] sm:$0xff]   ;;  %v3801_v42 = vld [vmem:[#allocation5 + $0x50] sm:$0xff]  }
 0x1aa   :  { %3563 = vmatpush3.bf16.msra.mxu1 %v3772_v6  ;;  %3521 = vmatmul.mubr.msk.bf16.vlgmr.msra.gmra.mrb[0].mxu0 %vm413_vm0, %v389_v21  ;;  %v3802_v43 = vld [vmem:[#allocation5 + $0x58] sm:$0xff]   ;;  %v3803_v44 = vld [vmem:[#allocation5 + $0x60] sm:$0xff]   ;;  %v3804_v45 = vld [vmem:[#allocation5 + $0x68] sm:$0xff]  }
 0x1ab   :  { %3564 = vmatprep.subr.bf16.mxu1 %v3775_v7  ;;  %v3805_v46 = vld [vmem:[#allocation5 + $0x70] sm:$0xff]   ;;  %v3806_v47 = vld [vmem:[#allocation5 + $0x78] sm:$0xff]   ;;  %v4905_v1 = vld [vmem:[#allocation19] sm:$0xff]  }
 0x1ac   :  { %v3807_v48 = vld [vmem:[#allocation16] sm:$0xff]   ;;  %v3808_v49 = vld [vmem:[#allocation16 + $0x8] sm:$0xff]   ;;  %v3289_v53 = vld [vmem:[#allocation14] ss:$0 sm:$0xff] }
 0x1ad   :  { %3533 = vmatmul.mubr.msk.bf16.gmra.mrb[4].mxu1 %vm413_vm0, %v3771_v8  ;;  %3604 = vmatprep.subr.bf16.mxu0 %v3807_v48 }
 0x1ae   :  { %3536 = vmatprep.mubr.msk.bf16.mxu1 %vm413_vm0, %v3773_v9  ;;  %3565 = vmatpush3.bf16.msra.mxu1 %v3775_v7 }
 0x1af   :  { %3566 = vmatprep.subr.bf16.mxu1 %v3780_v10  ;;  %3605 = vmatpush3.bf16.msra.mxu0 %v3807_v48 }
 0x1b0   :  { %3606 = vmatprep.subr.bf16.mxu0 %v3808_v49 }
 0x1b2   :  { %3567 = vmatpush3.bf16.msra.mxu1 %v3780_v10 }
 0x1b3   :  { %3568 = vmatprep.subr.bf16.mxu1 %v3783_v13  ;;  %3607 = vmatpush3.bf16.msra.mxu0 %v3808_v49 }
 0x1b4   :  { %3640 = vmatprep.subr.bf16.mxu0 %v4905_v1 }
 0x1b5   :  { %3537 = vmatmul.mubr.msk.bf16.gmra.mrb[8].mxu1 %vm413_vm0, %v3774_v12 }
 0x1b6   :  { %3540 = vmatprep.mubr.msk.bf16.mxu1 %vm413_vm0, %v3776_v14  ;;  %3569 = vmatpush3.bf16.msra.mxu1 %v3783_v13 }
 0x1b7   :  { %3570 = vmatprep.subr.bf16.mxu1 %v3788_v22 }
 0x1ba   :  { %3571 = vmatpush3.bf16.msra.mxu1 %v3788_v22 }
 0x1bd   :  { %3541 = vmatmul.mubr.msk.bf16.gmra.mrb[12].mxu1 %vm413_vm0, %v3777_v23 }
 0x1be   :  { %3544 = vmatprep.mubr.msk.bf16.mxu1 %vm413_vm0, %v3778_v24 }
 0x1c5   :  { %3545 = vmatmul.mubr.msk.bf16.gmra.mrb[16].mxu1 %vm413_vm0, %v3779_v25 }
 0x1c6   :  { %3548 = vmatprep.mubr.msk.bf16.mxu1 %vm413_vm0, %v3781_v26 }
 0x1cd   :  { %3549 = vmatmul.mubr.msk.bf16.gmra.mrb[20].mxu1 %vm413_vm0, %v3782_v27 }
 0x1ce   :  { %3552 = vmatprep.mubr.msk.bf16.mxu1 %vm413_vm0, %v3785_v28 }
 0x1d5   :  { %3553 = vmatmul.mubr.msk.bf16.gmra.mrb[24].mxu1 %vm413_vm0, %v3786_v29 }
 0x1d6   :  { %3556 = vmatprep.mubr.msk.bf16.mxu1 %vm413_vm0, %v3789_v30 }
 0x1dd   :  { %3557 = vmatmul.mubr.msk.bf16.gmra.mrb[28].mxu1 %vm413_vm0, %v3790_v31 }
 0x1de   :  { %3572 = vmatprep.mubr.msk.bf16.mxu1 %vm902_vm1, %v3791_v32 }
 0x1e5   :  { %3573 = vmatmul.mubr.msk.bf16.vlgmr.msra.gmra.mrb[0].mxu1 %vm902_vm1, %v3792_v33 }
 0x1e6   :  { %3576 = vmatprep.mubr.msk.bf16.mxu1 %vm902_vm1, %v3793_v34 }
 0x1ed   :  { %3577 = vmatmul.mubr.msk.bf16.gmra.mrb[4].mxu1 %vm902_vm1, %v3794_v35 }
 0x1ee   :  { %3580 = vmatprep.mubr.msk.bf16.mxu1 %vm902_vm1, %v3795_v36 }
 0x1f5   :  { %3581 = vmatmul.mubr.msk.bf16.gmra.mrb[8].mxu1 %vm902_vm1, %v3796_v37 }
 0x1f6   :  { %3584 = vmatprep.mubr.msk.bf16.mxu1 %vm902_vm1, %v3797_v38 }
 0x1fd   :  { %3585 = vmatmul.mubr.msk.bf16.gmra.mrb[12].mxu1 %vm902_vm1, %v3798_v39 }
 0x1fe   :  { %3588 = vmatprep.mubr.msk.bf16.mxu1 %vm902_vm1, %v3799_v40 }
 0x205   :  { %3589 = vmatmul.mubr.msk.bf16.gmra.mrb[16].mxu1 %vm902_vm1, %v3800_v41 }
 0x206   :  { %3592 = vmatprep.mubr.msk.bf16.mxu1 %vm902_vm1, %v3801_v42 }
 0x20d   :  { %3593 = vmatmul.mubr.msk.bf16.gmra.mrb[20].mxu1 %vm902_vm1, %v3802_v43 }
 0x20e   :  { %3596 = vmatprep.mubr.msk.bf16.mxu1 %vm902_vm1, %v3803_v44 }
 0x215   :  { %3597 = vmatmul.mubr.msk.bf16.gmra.mrb[24].mxu1 %vm902_vm1, %v3804_v45 }
 0x216   :  { %3600 = vmatprep.mubr.msk.bf16.mxu1 %vm902_vm1, %v3805_v46 }
 0x21d   :  { %3601 = vmatmul.mubr.msk.bf16.gmra.mrb[28].mxu1 %vm902_vm1, %v3806_v47 }
 0x27d   :  { %v3522_v50 = vpop.f32.mrb[0].mxu0 }
 0x27e   :  { %v454_v51 = vpop.f32.mrb[1].mxu0  ;;  %v463_v13 = vadd.f32 %v3522_v50, %v3289_v53 }
 0x27f   :  { %v3523_v52 = vpop.f32.mrb[2].mxu0  ;;  %v455_v2 = vadd.f32 %v3289_v53, %v454_v51 }
 0x280   :  { %v457_v54 = vpop.f32.mrb[3].mxu0  ;;  %v466_v58 = vadd.f32 %v3523_v52, %v3289_v53  ;;  %v1214_v18 = vcombine.high %v463_v13, %v463_v13  ;;  %v1221_v22 = vrot.slane %v463_v13, %v4902_v62 }
 0x281   :  { %v1116_v8 = vcombine.high %v455_v2, %v455_v2  ;;  %v458_v10 = vadd.f32 %v3289_v53, %v457_v54  ;;  %v1123_v12 = vrot.slane %v455_v2, %v4902_v62 }
 0x282   :  { %v1263_v61 = vcombine.high %v466_v58, %v466_v58  ;;  %v1228_v25 = vrot.slane %v1214_v18, %v4902_v62  ;;  %v4944_v29 = vrot.slane %v466_v58, %v4902_v62  ;;  %v1229_v32 = vcombine.high %v1221_v22, %v1221_v22 }
 0x283   :  { %v1130_v14 = vrot.slane %v1116_v8, %v4902_v62  ;;  %v1165_v15 = vcombine.high %v458_v10, %v458_v10  ;;  %v1131_v16 = vcombine.high %v1123_v12, %v1123_v12  ;;  %v1172_v17 = vrot.slane %v458_v10, %v4902_v62 }
 0x284   :  { %v1277_v63 = vrot.slane %v1263_v61, %v4902_v62  ;;  %v1139_v20 = vrot.slane %v1123_v12, %v4902_v62  ;;  %v4947_v33 = vrot.slane %v1221_v22, %v4902_v62  ;;  %v1230_v36 = vcombine.high %v1228_v25, %v1228_v25 }
 0x285   :  { %v1132_v19 = vcombine.high %v1130_v14, %v1130_v14  ;;  %v1179_v21 = vrot.slane %v1165_v15, %v4902_v62  ;;  %v1180_v23 = vcombine.high %v1172_v17, %v1172_v17  ;;  %v1153_v24 = vrot.slane %v1131_v16, %v4902_v62 }
 0x286   :  { %v1279_v0 = vcombine.high %v1277_v63, %v1277_v63  ;;  %v4909_v3 = vrot.slane %v1277_v63, %v4902_v62  ;;  %v4935_v26 = vrot.slane %v1172_v17, %v4902_v62  ;;  %v4938_v27 = vrot.slane %v1130_v14, %v4902_v62 }
 0x287   :  { %v4941_v28 = vrot.slane %v1132_v19, %v4902_v62  ;;  %v1181_v30 = vcombine.high %v1179_v21, %v1179_v21  ;;  %v1161_v31 = vcombine.high %v1139_v20, %v1139_v20  ;;  %v1163_v34 = vcombine.high %v1153_v24, %v1153_v24 }
 0x288   :  { %v4912_v4 = vrot.slane %v1279_v0, %v4902_v62  ;;  %v1309_v6 = vcombine.high %v4909_v3, %v4909_v3  ;;  %v4950_v35 = vrot.slane %v1180_v23, %v4902_v62  ;;  %v1162_v37 = vcombine.high %v4938_v27, %v4938_v27 }
 0x289   :  { %v1164_v38 = vcombine.high %v4941_v28, %v4941_v28  ;;  %v1210_v39 = vcombine.high %v4935_v26, %v4935_v26  ;;  %v1278_v40 = vcombine.high %v4944_v29, %v4944_v29  ;;  %v1323_v41 = vrot.slane %v1161_v31, %v4914_v5 }
 0x28a   :  { %v1311_v7 = vcombine.high %v4912_v4, %v4912_v4  ;;  %v4921_v9 = vrot.slane %v1309_v6, %v4914_v5  ;;  %v4962_v42 = vrot.slane %v1179_v21, %v4902_v62  ;;  %v4965_v43 = vrot.slane %v1181_v30, %v4902_v62 }
 0x28b   :  { %v4969_v44 = vrot.slane %v4944_v29, %v4902_v62  ;;  %v1315_v45 = vrot.slane %v1139_v20, %v4914_v5  ;;  %v1319_v46 = vrot.slane %v1153_v24, %v4914_v5  ;;  %v1347_v47 = vrot.slane %v4935_v26, %v4914_v5 }
 0x28c   :  { %v4924_v11 = vrot.slane %v1311_v7, %v4914_v5  ;;  %v1327_v48 = vrot.slane %v1163_v34, %v4914_v5  ;;  %v1331_v49 = vrot.slane %v4938_v27, %v4914_v5  ;;  %v1212_v50 = vcombine.high %v4950_v35, %v4950_v35 }
 0x28d   :  { %v1259_v51 = vcombine.high %v4947_v33, %v4947_v33  ;;  %v1339_v53 = vrot.slane %v1162_v37, %v4914_v5  ;;  %v1343_v54 = vrot.slane %v1164_v38, %v4914_v5  ;;  %v1335_v55 = vrot.slane %v4941_v28, %v4914_v5 }
 0x28e   :  { %v4987_v56 = vrot.slane %v1210_v39, %v4914_v5  ;;  %v1351_v59 = vrot.slane %v4950_v35, %v4914_v5  ;;  %v1211_v60 = vcombine.high %v4962_v42, %v4962_v42  ;;  %v1213_v61 = vcombine.high %v4965_v43, %v4965_v43 }
 0x28f   :  { %v1363_v2 = vrot.slane %v4962_v42, %v4914_v5  ;;  %v1367_v6 = vrot.slane %v4965_v43, %v4914_v5  ;;  %v5004_v7 = vrot.slane %v1229_v32, %v4902_v62  ;;  %v5011_v13 = vrot.slane %v1212_v50, %v4914_v5 }
 0x290   :  { %v5014_v14 = vrot.slane %v1259_v51, %v4914_v5  ;;  %v1379_v17 = vrot.slane %v4947_v33, %v4914_v5  ;;  %v5023_v18 = vrot.slane %v1228_v25, %v4902_v62  ;;  %v5028_v21 = vrot.slane %v1211_v60, %v4914_v5 }
 0x291   :  { %v5031_v22 = vrot.slane %v1213_v61, %v4914_v5  ;;  %v1261_v27 = vcombine.high %v5004_v7, %v5004_v7  ;;  %v5038_v25 = vrot.slane %v1230_v36, %v4902_v62  ;;  %v1383_v31 = vrot.slane %v5004_v7, %v4914_v5 }
 0x292   :  { %v1308_v32 = vcombine.high %v4969_v44, %v4969_v44  ;;  %v1260_v39 = vcombine.high %v5023_v18, %v5023_v18  ;;  %v1395_v50 = vrot.slane %v5023_v18, %v4914_v5 }
 0x293   :  { %v1262_v60 = vcombine.high %v5038_v25, %v5038_v25  ;;  %v1399_v61 = vrot.slane %v5038_v25, %v4914_v5 }
 0x2b8   :  { %v3574_v52 = vpop.f32.mrb[0].mxu1 }
 0x2b9   :  { %v4989_v57 = vadd.f32 %v3574_v52, %v1323_v41  ;;  %v985_v58 = vpop.f32.mrb[1].mxu1  ;;  %v1411_v41 = vrot.slane %v4969_v44, %v4914_v5 }
 0x2ba   :  { %v4997_v63 = vadd.f32 %v1315_v45, %v985_v58  ;;  %v3575_v0 = vpop.f32.mrb[2].mxu1 }
 0x2bb   :  { %v1506_v8 = vmul.f32 %v4989_v57, %v4989_v57  ;;  %v5008_v10 = vadd.f32 %v3575_v0, %v1327_v48  ;;  %v988_v12 = vpop.f32.mrb[3].mxu1 }
 0x2bc   :  { %v1504_v15 = vmul.f32 %v4997_v63, %v4997_v63  ;;  %v5018_v16 = vadd.f32 %v1319_v46, %v988_v12 }
 0x2bd   :  { %v1570_v19 = vmul.f32 0.035677407, %v1506_v8  ;;  %v1507_v20 = vmul.f32 %v5008_v10, %v5008_v10 }
 0x2be   :  { %v1568_v23 = vmul.f32 0.035677407, %v1504_v15  ;;  %v1505_v24 = vmul.f32 %v5018_v16, %v5018_v16 }
 0x2bf   :  { %v1602_v28 = vadd.f32 0.7978846, %v1570_v19  ;;  %v1571_v30 = vmul.f32 0.035677407, %v1507_v20  ;;  %v5073_v20 = vrot.slane %v1261_v27, %v4914_v5 }
 0x2c0   :  { %v1600_v34 = vadd.f32 0.7978846, %v1568_v23  ;;  %v1569_v37 = vmul.f32 0.035677407, %v1505_v24  ;;  %v3578_v38 = vpop.f32.mrb[4].mxu1 }
 0x2c1   :  { %v1634_v36 = vmul.f32 %v1602_v28, %v4989_v57  ;;  %v1603_v45 = vadd.f32 0.7978846, %v1571_v30  ;;  %v5049_v46 = vadd.f32 %v3578_v38, %v1339_v53  ;;  %v1001_v48 = vpop.f32.mrb[5].mxu1  ;;  %v5092_v38 = vrot.slane %v1262_v60, %v4914_v5 }
 0x2c2   :  { %v1601_v51 = vadd.f32 0.7978846, %v1569_v37  ;;  %v5053_v52 = vadd.f32 %v1331_v49, %v1001_v48  ;;  %v3579_v58 = vpop.f32.mrb[6].mxu1  ;;  %v5066_v49 = vrot.slane %v1278_v40, %v4902_v62  ;;  %v1632_v12 = vmul.f32 %v1600_v34, %v4997_v63 }
 0x2c3   :  { %3821 = vtanh.f32 %v1634_v36  ;;  %v1635_v0 = vmul.f32 %v1603_v45, %v5008_v10  ;;  %v1510_v53 = vmul.f32 %v5049_v46, %v5049_v46  ;;  %v1004_v8 = vpop.f32.mrb[7].mxu1  ;;  %v5075_v24 = vadd.f32 %v3579_v58, %v1343_v54 }
 0x2c4   :  { %v1633_v15 = vmul.f32 %v1601_v51, %v5018_v16  ;;  %v1508_v19 = vmul.f32 %v5053_v52, %v5053_v52  ;;  %v5077_v28 = vadd.f32 %v1335_v55, %v1004_v8  ;;  %v5080_v62 = vrot.slane %v1260_v39, %v4914_v5 }
 0x2c5   :  { %3823 = vtanh.f32 %v1635_v0  ;;  %v1574_v23 = vmul.f32 0.035677407, %v1510_v53  ;;  %v5083_v40 = vrot.slane %v1308_v32, %v4914_v5  ;;  %v1511_v34 = vmul.f32 %v5075_v24, %v5075_v24 }
 0x2c6   :  { %3825 = vtanh.f32 %v1633_v15  ;;  %v1572_v29 = vmul.f32 0.035677407, %v1508_v19  ;;  %v1509_v27 = vmul.f32 %v5077_v28, %v5077_v28  ;;  %v1310_v54 = vcombine.high %v5066_v49, %v5066_v49 }
 0x2c7   :  { %v1606_v30 = vadd.f32 0.7978846, %v1574_v23  ;;  %3827 = vtanh.f32 %v1632_v12  ;;  %v1575_v36 = vmul.f32 0.035677407, %v1511_v34  ;;  %v5125_v35 = vmul.f32 0.5, %v5053_v52 }
 0x2c8   :  { %v1604_v55 = vadd.f32 0.7978846, %v1572_v29  ;;  %v3582_v37 = vpop.f32.mrb[8].mxu1  ;;  %v1573_v45 = vmul.f32 0.035677407, %v1509_v27  ;;  %v1538_v29 = vmul.f32 0.5, %v4989_v57 }
 0x2c9   :  { %v1638_v39 = vmul.f32 %v1606_v30, %v5049_v46  ;;  %v1482_v48 = vadd.f32 %v3582_v37, %v4987_v56  ;;  %v1017_v51 = vpop.f32.mrb[9].mxu1  ;;  %v1607_v12 = vadd.f32 0.7978846, %v1575_v36  ;;  %v5107_v56 = vrot.slane %v1310_v54, %v4914_v5 }
 0x2ca   :  { %v1636_v58 = vmul.f32 %v1604_v55, %v5053_v52  ;;  %v1480_v0 = vadd.f32 %v1347_v47, %v1017_v51  ;;  %v3583_v53 = vpop.f32.mrb[10].mxu1  ;;  %v1605_v15 = vadd.f32 0.7978846, %v1573_v45  ;;  %v1536_v30 = vmul.f32 0.5, %v4997_v63 }
 0x2cb   :  { %v1514_v19 = vmul.f32 %v1482_v48, %v1482_v48  ;;  %v1020_v23 = vpop.f32.mrb[11].mxu1  ;;  %3829 = vtanh.f32 %v1638_v39  ;;  %v1639_v34 = vmul.f32 %v1607_v12, %v5075_v24  ;;  %v1483_v37 = vadd.f32 %v3583_v53, %v5011_v13 }
 0x2cc   :  { %v1512_v26 = vmul.f32 %v1480_v0, %v1480_v0  ;;  %v1637_v27 = vmul.f32 %v1605_v15, %v5077_v28  ;;  %3831 = vtanh.f32 %v1636_v58  ;;  %v1481_v54 = vadd.f32 %v1351_v59, %v1020_v23 }
 0x2cd   :  { %v3822_v47 = vpop.eup %3821  ;;  %v1578_v55 = vmul.f32 0.035677407, %v1514_v19  ;;  %v1539_v63 = vmul.f32 0.5, %v5008_v10  ;;  %v1537_v39 = vmul.f32 0.5, %v5018_v16  ;;  %v1515_v8 = vmul.f32 %v1483_v37, %v1483_v37 }
 0x2ce   :  { %v1698_v36 = vadd.f32 1.0, %v3822_v47  ;;  %v1576_v45 = vmul.f32 0.035677407, %v1512_v26  ;;  %v5120_v15 = vmul.f32 0.5, %v5049_v46  ;;  %3833 = vtanh.f32 %v1637_v27 }
 0x2cf   :  { %v3824_v57 = vpop.eup %3823  ;;  %v1610_v51 = vadd.f32 0.7978846, %v1578_v55  ;;  %3835 = vtanh.f32 %v1639_v34  ;;  %v1579_v26 = vmul.f32 0.035677407, %v1515_v8  ;;  %v1513_v47 = vmul.f32 %v1481_v54, %v1481_v54 }
 0x2d0   :  { %v3826_v12 = vpop.eup %3825  ;;  %v1699_v60 = vadd.f32 1.0, %v3824_v57  ;;  %v1608_v13 = vadd.f32 0.7978846, %v1576_v45  ;;  %v3586_v58 = vpop.f32.mrb[12].mxu1  ;;  %v5122_v53 = vmul.f32 %v1698_v36, %v1538_v29  ;;  %v5130_v27 = vmul.f32 0.5, %v5075_v24 }
 0x2d1   :  { %v1642_v59 = vmul.f32 %v1610_v51, %v1482_v48  ;;  %v1033_v10 = vpop.f32.mrb[13].mxu1  ;;  %v3828_v19 = vpop.eup %3827  ;;  %v1697_v46 = vadd.f32 1.0, %v3826_v12  ;;  %v1541_v29 = vmul.f32 0.5, %v5077_v28  ;;  %v1486_v36 = vadd.f32 %v3586_v58, %v5028_v21 }
 0x2d2   :  { %v5127_v16 = vmul.f32 %v1699_v60, %v1539_v63  ;;  %v1640_v23 = vmul.f32 %v1608_v13, %v1480_v0  ;;  %v3587_v55 = vpop.f32.mrb[14].mxu1  ;;  %v1611_v45 = vadd.f32 0.7978846, %v1579_v26  ;;  %v1577_v60 = vmul.f32 0.035677407, %v1513_v47 }
 0x2d3   :  { %v1036_v52 = vpop.f32.mrb[15].mxu1  ;;  %3837 = vtanh.f32 %v1642_v59  ;;  %v1696_v57 = vadd.f32 1.0, %v3828_v19  ;;  %v1518_v63 = vmul.f32 %v1486_v36, %v1486_v36  ;;  %v1484_v8 = vadd.f32 %v1363_v2, %v1033_v10 }
 0x2d4   :  { %v1761_v34 = vpack.c.bf16 %v5127_v16, %v5122_v53  ;;  %v1487_v24 = vadd.f32 %v3587_v55, %v5031_v22  ;;  %v5140_v12 = vmul.f32 0.5, %v1482_v48  ;;  %3839 = vtanh.f32 %v1640_v23 }
 0x2d5   :  { %v3830_v51 = vpop.eup %3829  ;;  %v1609_v21 = vadd.f32 0.7978846, %v1577_v60  ;;  %v1485_v28 = vadd.f32 %v1367_v6, %v1036_v52  ;;  %v5145_v13 = vmul.f32 0.5, %v1480_v0  ;;  %v1643_v58 = vmul.f32 %v1611_v45, %v1483_v37 }
 0x2d6   :  { %v1582_v53 = vmul.f32 0.035677407, %v1518_v63  ;;  %v1516_v59 = vmul.f32 %v1484_v8, %v1484_v8  ;;  %v3832_v19 = vpop.eup %3831  ;;  %v1729_v16 = vmul.f32 %v1697_v46, %v1537_v39  ;;  %v5147_v42 = vmul.f32 0.5, %v1483_v37 }
 0x2d7   :  { %v1641_v2 = vmul.f32 %v1609_v21, %v1481_v54  ;;  %v1519_v22 = vmul.f32 %v1487_v24, %v1487_v24  ;;  %v1728_v48 = vmul.f32 %v1696_v57, %v1536_v30  ;;  %v5149_v26 = vmul.f32 0.5, %v1481_v54 }
 0x2d8   :  { %v3590_v10 = vpop.f32.mrb[16].mxu1  ;;  %v1614_v23 = vadd.f32 0.7978846, %v1582_v53  ;;  %v1580_v47 = vmul.f32 0.035677407, %v1516_v59  ;;  %v3834_v43 = vpop.eup %3833  ;;  %v1702_v6 = vadd.f32 1.0, %v3830_v51  ;;  %v1517_v52 = vmul.f32 %v1485_v28, %v1485_v28 }
 0x2d9   :  { %v1049_v55 = vpop.f32.mrb[17].mxu1  ;;  %3841 = vtanh.f32 %v1641_v2  ;;  %v1583_v0 = vmul.f32 0.035677407, %v1519_v22  ;;  %v3836_v60 = vpop.eup %3835  ;;  %v1700_v63 = vadd.f32 1.0, %v3832_v19  ;;  %v1701_v39 = vadd.f32 1.0, %v3834_v43 }
 0x2da   :  { %v3591_v45 = vpop.f32.mrb[18].mxu1  ;;  %3843 = vtanh.f32 %v1643_v58  ;;  %v1646_v37 = vmul.f32 %v1614_v23, %v1486_v36  ;;  %v5151_v21 = vmul.f32 0.5, %v1486_v36  ;;  %v1612_v30 = vadd.f32 0.7978846, %v1580_v47 }
 0x2db   :  { %v1052_v46 = vpop.f32.mrb[19].mxu1  ;;  %v1581_v54 = vmul.f32 0.035677407, %v1517_v52  ;;  %v1760_v57 = vpack.c.bf16 %v1729_v16, %v1728_v48  ;;  %v5153_v53 = vmul.f32 0.5, %v1484_v8  ;;  %v1615_v59 = vadd.f32 0.7978846, %v1583_v0 }
 0x2dc   :  { %3845 = vtanh.f32 %v1646_v37  ;;  %v1490_v51 = vadd.f32 %v3590_v10, %v5014_v14  ;;  %v1734_v22 = vmul.f32 %v1702_v6, %v5120_v15  ;;  %v1733_v32 = vmul.f32 %v1701_v39, %v1541_v29 }
 0x2dd   :  { %v3838_v2 = vpop.eup %3837  ;;  %v1613_v19 = vadd.f32 0.7978846, %v1581_v54  ;;  %3608 = vmatprep.mubr.msk.bf16.mxu0 %vm413_vm0, %v1760_v57  ;;  %v5161_v36 = vadd.f32 %v1379_v17, %v1049_v55  ;;  %v1732_v58 = vmul.f32 %v1700_v63, %v5125_v35  ;;  %v1703_v16 = vadd.f32 1.0, %v3836_v60 }
 0x2de   :  { %v5164_v48 = vmul.f32 0.5, %v1487_v24  ;;  %v1522_v23 = vmul.f32 %v1490_v51, %v1490_v51  ;;  %3609 = vmatmul.mubr.msk.bf16.vlgmr.msra.gmra.mrb[4].mxu0 %vm413_vm0, %v1761_v34  ;;  %v3840_v14 = vpop.eup %3839  ;;  %v1644_v10 = vmul.f32 %v1612_v30, %v1484_v8  ;;  %v5167_v15 = vmul.f32 0.5, %v1485_v28 }
 0x2df   :  { %v1645_v29 = vmul.f32 %v1613_v19, %v1485_v28  ;;  %v1520_v47 = vmul.f32 %v5161_v36, %v5161_v36  ;;  %3641 = vmatpush3.bf16.msra.mxu0 %v4905_v1  ;;  %v1706_v33 = vadd.f32 1.0, %v3838_v2  ;;  %v1647_v17 = vmul.f32 %v1615_v59, %v1487_v24 }
 0x2e0   :  { %v3594_v43 = vpop.f32.mrb[20].mxu1  ;;  %v1586_v35 = vmul.f32 0.035677407, %v1522_v23  ;;  %v1491_v55 = vadd.f32 %v3591_v45, %v5073_v20  ;;  %v1489_v34 = vadd.f32 %v1383_v31, %v1052_v46  ;;  %v1762_v8 = vpack.c.bf16 %v1733_v32, %v1732_v58 }
 0x2e1   :  { %v1065_v6 = vpop.f32.mrb[21].mxu1  ;;  %3847 = vtanh.f32 %v1645_v29  ;;  %v1584_v0 = vmul.f32 0.035677407, %v1520_v47  ;;  %v1735_v52 = vmul.f32 %v1703_v16, %v5130_v27  ;;  %v1704_v60 = vadd.f32 1.0, %v3840_v14 }
 0x2e2   :  { %v3595_v28 = vpop.f32.mrb[22].mxu1  ;;  %v1618_v63 = vadd.f32 0.7978846, %v1586_v35  ;;  %v1523_v39 = vmul.f32 %v1491_v55, %v1491_v55  ;;  %3849 = vtanh.f32 %v1644_v10  ;;  %v1521_v30 = vmul.f32 %v1489_v34, %v1489_v34  ;;  %3612 = vmatprep.mubr.msk.bf16.mxu0 %vm413_vm0, %v1762_v8 }
 0x2e3   :  { %v1068_v1 = vpop.f32.mrb[23].mxu1  ;;  %v3842_v37 = vpop.eup %3841  ;;  %v1616_v24 = vadd.f32 0.7978846, %v1584_v0  ;;  %v1494_v20 = vadd.f32 %v3594_v43, %v5080_v62  ;;  %3851 = vtanh.f32 %v1647_v17  ;;  %v5179_v7 = vmul.f32 0.5, %v1490_v51 }
 0x2e4   :  { %v3844_v45 = vpop.eup %3843  ;;  %v1650_v31 = vmul.f32 %v1618_v63, %v1490_v51  ;;  %v1587_v32 = vmul.f32 0.035677407, %v1523_v39  ;;  %v5182_v27 = vmul.f32 %v1706_v33, %v5140_v12  ;;  %v1585_v54 = vmul.f32 0.035677407, %v1521_v30 }
 0x2e5   :  { %v1648_v46 = vmul.f32 %v1616_v24, %v5161_v36  ;;  %v1526_v57 = vmul.f32 %v1494_v20, %v1494_v20  ;;  %v1705_v2 = vadd.f32 1.0, %v3842_v37  ;;  %v1763_v58 = vpack.c.bf16 %v1735_v52, %v1734_v22 }
 0x2e6   :  { %v3846_v59 = vpop.eup %3845  ;;  %3853 = vtanh.f32 %v1650_v31  ;;  %v1619_v19 = vadd.f32 0.7978846, %v1587_v32  ;;  %v1707_v16 = vadd.f32 1.0, %v3844_v45  ;;  %v1617_v62 = vadd.f32 0.7978846, %v1585_v54 }
 0x2e7   :  { %3855 = vtanh.f32 %v1648_v46  ;;  %v1590_v23 = vmul.f32 0.035677407, %v1526_v57  ;;  %3613 = vmatmul.mubr.msk.bf16.gmra.mrb[8].mxu0 %vm413_vm0, %v1763_v58  ;;  %v1492_v12 = vadd.f32 %v1395_v50, %v1065_v6  ;;  %v5190_v51 = vadd.f32 %v3595_v28, %v5092_v38 }
 0x2e8   :  { %v3598_v14 = vpop.f32.mrb[24].mxu1  ;;  %v1651_v10 = vmul.f32 %v1619_v19, %v1491_v55  ;;  %v5195_v29 = vadd.f32 %v1399_v61, %v1068_v1  ;;  %v1736_v47 = vmul.f32 %v1704_v60, %v5145_v13  ;;  %v1710_v43 = vadd.f32 1.0, %v3846_v59 }
 0x2e9   :  { %v1081_v22 = vpop.f32.mrb[25].mxu1  ;;  %v1649_v33 = vmul.f32 %v1617_v62, %v1489_v34  ;;  %v1622_v17 = vadd.f32 0.7978846, %v1590_v23  ;;  %v1737_v0 = vmul.f32 %v1705_v2, %v5149_v26  ;;  %v5200_v18 = vmul.f32 0.5, %v5161_v36 }
 0x2ea   :  { %v3599_v35 = vpop.f32.mrb[26].mxu1  ;;  %v5202_v50 = vmul.f32 0.5, %v1491_v55  ;;  %v1524_v38 = vmul.f32 %v1492_v12, %v1492_v12  ;;  %v1739_v25 = vmul.f32 %v1707_v16, %v5147_v42  ;;  %3857 = vtanh.f32 %v1651_v10 }
 0x2eb   :  { %v1084_v6 = vpop.f32.mrb[27].mxu1  ;;  %v3848_v8 = vpop.eup %3847  ;;  %v1654_v61 = vmul.f32 %v1622_v17, %v1494_v20  ;;  %v1527_v13 = vmul.f32 %v5190_v51, %v5190_v51  ;;  %v5207_v28 = vmul.f32 0.5, %v1489_v34  ;;  %3859 = vtanh.f32 %v1649_v33 }
 0x2ec   :  { %v5209_v52 = vmul.f32 0.5, %v1494_v20  ;;  %v1588_v26 = vmul.f32 0.035677407, %v1524_v38  ;;  %v3850_v36 = vpop.eup %3849  ;;  %v5212_v55 = vmul.f32 %v1710_v43, %v5151_v21  ;;  %v1525_v42 = vmul.f32 %v5195_v29, %v5195_v29 }
 0x2ed   :  { %3861 = vtanh.f32 %v1654_v61  ;;  %v1591_v60 = vmul.f32 0.035677407, %v1527_v13  ;;  %v3852_v63 = vpop.eup %3851  ;;  %v1709_v39 = vadd.f32 1.0, %v3848_v8  ;;  %v1764_v37 = vpack.c.bf16 %v1737_v0, %v1736_v47 }
 0x2ee   :  { %v1620_v1 = vadd.f32 0.7978846, %v1588_v26  ;;  %v5217_v34 = vadd.f32 %v3598_v14, %v5083_v40  ;;  %v1589_v30 = vmul.f32 0.035677407, %v1525_v42  ;;  %v1765_v20 = vpack.c.bf16 %v1739_v25, %v5182_v27 }
 0x2ef   :  { %v1623_v24 = vadd.f32 0.7978846, %v1591_v60  ;;  %v5223_v21 = vadd.f32 %v1411_v41, %v1081_v22  ;;  %v1708_v32 = vadd.f32 1.0, %v3850_v36  ;;  %3616 = vmatprep.mubr.msk.bf16.mxu0 %vm413_vm0, %v1764_v37  ;;  %v5229_v40 = vadd.f32 %v3599_v35, %v5107_v56 }
 0x2f0   :  { %v3602_v45 = vpop.f32.mrb[28].mxu1  ;;  %v3854_v31 = vpop.eup %3853  ;;  %v1652_v46 = vmul.f32 %v1620_v1, %v1492_v12  ;;  %v1530_v54 = vmul.f32 %v5217_v34, %v5217_v34  ;;  %v1711_v27 = vadd.f32 1.0, %v3852_v63  ;;  %v1621_v44 = vadd.f32 0.7978846, %v1589_v30  ;;  %3617 = vmatmul.mubr.msk.bf16.gmra.mrb[12].mxu0 %vm413_vm0, %v1765_v20 }
 0x2f1   :  { %v1097_v57 = vpop.f32.mrb[29].mxu1  ;;  %v3856_v59 = vpop.eup %3855  ;;  %v1655_v2 = vmul.f32 %v1623_v24, %v5190_v51  ;;  %v1528_v41 = vmul.f32 %v5223_v21, %v5223_v21  ;;  %v1741_v58 = vmul.f32 %v1709_v39, %v5167_v15  ;;  %v1556_v16 = vmul.f32 0.5, %v1492_v12 }
 0x2f2   :  { %v3603_v19 = vpop.f32.mrb[30].mxu1  ;;  %3863 = vtanh.f32 %v1652_v46  ;;  %v1594_v62 = vmul.f32 0.035677407, %v1530_v54  ;;  %v1714_v56 = vadd.f32 1.0, %v3854_v31  ;;  %v1653_v14 = vmul.f32 %v1621_v44, %v5195_v29 }
 0x2f3   :  { %v1100_v23 = vpop.f32.mrb[31].mxu1  ;;  %3865 = vtanh.f32 %v1655_v2  ;;  %v1592_v10 = vmul.f32 0.035677407, %v1528_v41  ;;  %v1740_v22 = vmul.f32 %v1708_v32, %v5153_v53  ;;  %v1712_v47 = vadd.f32 1.0, %v3856_v59 }
 0x2f4   :  { %v1626_v43 = vadd.f32 0.7978846, %v1594_v62  ;;  %v1531_v33 = vmul.f32 %v5229_v40, %v5229_v40  ;;  %v3858_v17 = vpop.eup %3857  ;;  %v1743_v35 = vmul.f32 %v1711_v27, %v5164_v48  ;;  %3867 = vtanh.f32 %v1653_v14 }
 0x2f5   :  { %v1624_v15 = vadd.f32 0.7978846, %v1592_v10  ;;  %v5723_v12 = vrot.slane %v5066_v49, %v4914_v5  ;;  %v3860_v38 = vpop.eup %3859  ;;  %v1559_v8 = vmul.f32 0.5, %v5190_v51  ;;  %v1766_v61 = vpack.c.bf16 %v1741_v58, %v1740_v22 }
 0x2f6   :  { %v1658_v53 = vmul.f32 %v1626_v43, %v5217_v34  ;;  %v1595_v25 = vmul.f32 0.035677407, %v1531_v33  ;;  %v1746_v26 = vmul.f32 %v1714_v56, %v5179_v7  ;;  %v1557_v36 = vmul.f32 0.5, %v5195_v29 }
 0x2f7   :  { %v5244_v0 = vadd.f32 %v5723_v12, %v1084_v6  ;;  %v3862_v13 = vpop.eup %3861  ;;  %v1656_v48 = vmul.f32 %v1624_v15, %v5223_v21  ;;  %v1744_v49 = vmul.f32 %v1712_v47, %v5200_v18  ;;  %v1715_v6 = vadd.f32 1.0, %v3858_v17  ;;  %3620 = vmatprep.mubr.msk.bf16.mxu0 %vm413_vm0, %v1766_v61 }
 0x2f8   :  { %3869 = vtanh.f32 %v1658_v53  ;;  %v1627_v42 = vadd.f32 0.7978846, %v1595_v25  ;;  %v1713_v51 = vadd.f32 1.0, %v3860_v38  ;;  %v5256_v39 = vadd.f32 %v3602_v45, %v4921_v9 }
 0x2f9   :  { %v1529_v60 = vmul.f32 %v5244_v0, %v5244_v0  ;;  %v1767_v7 = vpack.c.bf16 %v1743_v35, %v5212_v55  ;;  %v1718_v29 = vadd.f32 1.0, %v3862_v13  ;;  %v5724_v37 = vrot.slane %v4909_v3, %v4914_v5 }
 0x2fa   :  { %v1659_v1 = vmul.f32 %v1627_v42, %v5229_v40  ;;  %v5266_v18 = vadd.f32 %v3603_v19, %v4924_v11  ;;  %3871 = vtanh.f32 %v1656_v48  ;;  %v1534_v20 = vmul.f32 %v5256_v39, %v5256_v39 }
 0x2fb   :  { %v1593_v63 = vmul.f32 0.035677407, %v1529_v60  ;;  %v5263_v24 = vadd.f32 %v5724_v37, %v1097_v57  ;;  %3621 = vmatmul.mubr.msk.bf16.gmra.mrb[16].mxu0 %vm413_vm0, %v1767_v7  ;;  %v5725_v9 = vrot.slane %v4912_v4, %v4914_v5  ;;  %v1747_v3 = vmul.f32 %v1715_v6, %v5202_v50 }
 0x2fc   :  { %v3864_v45 = vpop.eup %3863  ;;  %3873 = vtanh.f32 %v1659_v1  ;;  %v1535_v31 = vmul.f32 %v5266_v18, %v5266_v18  ;;  %v1745_v46 = vmul.f32 %v1713_v51, %v5207_v28  ;;  %v1598_v59 = vmul.f32 0.035677407, %v1534_v20 }
 0x2fd   :  { %v1625_v30 = vadd.f32 0.7978846, %v1593_v63  ;;  %v5274_v55 = vadd.f32 %v5725_v9, %v1100_v23  ;;  %v1532_v11 = vmul.f32 %v5263_v24, %v5263_v24  ;;  %v3866_v32 = vpop.eup %3865  ;;  %v1716_v54 = vadd.f32 1.0, %v3864_v45 }
 0x2fe   :  { %v1719_v4 = vadd.f32 1.0, %v3866_v32  ;;  %v1599_v27 = vmul.f32 0.035677407, %v1535_v31  ;;  %v3868_v2 = vpop.eup %3867  ;;  %v1750_v44 = vmul.f32 %v1718_v29, %v5209_v52  ;;  %v1630_v19 = vadd.f32 0.7978846, %v1598_v59 }
 0x2ff   :  { %v1657_v57 = vmul.f32 %v1625_v30, %v5244_v0  ;;  %v1596_v5 = vmul.f32 0.035677407, %v1532_v11  ;;  %v1533_v50 = vmul.f32 %v5274_v55, %v5274_v55  ;;  %v1748_v41 = vmul.f32 %v1716_v54, %v1556_v16 }
 0x300   :  { %v1751_v58 = vmul.f32 %v1719_v4, %v1559_v8  ;;  %v1717_v62 = vadd.f32 1.0, %v3868_v2  ;;  %v1631_v28 = vadd.f32 0.7978846, %v1599_v27  ;;  %v1662_v56 = vmul.f32 %v1630_v19, %v5256_v39 }
 0x301   :  { %3875 = vtanh.f32 %v1657_v57  ;;  %v1628_v23 = vadd.f32 0.7978846, %v1596_v5  ;;  %v1597_v14 = vmul.f32 0.035677407, %v1533_v50  ;;  %v1768_v10 = vpack.c.bf16 %v1745_v46, %v1744_v49  ;;  %v5306_v57 = vld [vmem:[#allocation17] ss:$0 sm:$0xff] }
 0x302   :  { %v1769_v22 = vpack.c.bf16 %v1747_v3, %v1746_v26  ;;  %v3870_v47 = vpop.eup %3869  ;;  %v1749_v43 = vmul.f32 %v1717_v62, %v1557_v36  ;;  %v1663_v17 = vmul.f32 %v1631_v28, %v5266_v18  ;;  %v1771_v35 = vpack.c.bf16 %v1751_v58, %v1750_v44 }
 0x303   :  { %v1660_v33 = vmul.f32 %v1628_v23, %v5263_v24  ;;  %3877 = vtanh.f32 %v1662_v56  ;;  %v1629_v52 = vadd.f32 0.7978846, %v1597_v14  ;;  %3624 = vmatprep.mubr.msk.bf16.mxu0 %vm413_vm0, %v1768_v10  ;;  %v1722_v12 = vadd.f32 1.0, %v3870_v47 }
 0x304   :  { %3625 = vmatmul.mubr.msk.bf16.gmra.mrb[20].mxu0 %vm413_vm0, %v1769_v22  ;;  %v1770_v16 = vpack.c.bf16 %v1749_v43, %v1748_v41  ;;  %v3872_v15 = vpop.eup %3871  ;;  %v1562_v53 = vmul.f32 0.5, %v5217_v34  ;;  %v1563_v25 = vmul.f32 0.5, %v5229_v40  ;;  %v1560_v60 = vmul.f32 0.5, %v5223_v21 }
 0x305   :  { %3879 = vtanh.f32 %v1660_v33  ;;  %v1661_v38 = vmul.f32 %v1629_v52, %v5274_v55  ;;  %v1720_v13 = vadd.f32 1.0, %v3872_v15  ;;  %v1561_v49 = vmul.f32 0.5, %v5244_v0 }
 0x306   :  { %3881 = vtanh.f32 %v1663_v17  ;;  %v3874_v8 = vpop.eup %3873  ;;  %3628 = vmatprep.mubr.msk.bf16.mxu0 %vm413_vm0, %v1770_v16  ;;  %v1754_v36 = vmul.f32 %v1722_v12, %v1562_v53  ;;  %v1566_v37 = vmul.f32 0.5, %v5256_v39  ;;  %v1567_v20 = vmul.f32 0.5, %v5266_v18  ;;  %v3810_v18 = vld [vmem:[#allocation19 + $0x8] sm:$0xff]  }
 0x307   :  { %v1723_v61 = vadd.f32 1.0, %v3874_v8  ;;  %3883 = vtanh.f32 %v1661_v38  ;;  %v1752_v51 = vmul.f32 %v1720_v13, %v1560_v60  ;;  %v1564_v0 = vmul.f32 0.5, %v5263_v24  ;;  %3642 = vmatprep.subr.bf16.mxu0 %v3810_v18 }
 0x308   :  { %v1565_v11 = vmul.f32 0.5, %v5274_v55  ;;  %3643 = vmatpush3.bf16.msra.mxu0 %v3810_v18 }
 0x309   :  { %v1755_v48 = vmul.f32 %v1723_v61, %v1563_v25 }
 0x30b   :  { %v3876_v26 = vpop.eup %3875  ;;  %v1773_v42 = vpack.c.bf16 %v1755_v48, %v1754_v36 }
 0x30c   :  { %v1721_v6 = vadd.f32 1.0, %v3876_v26  ;;  %3629 = vmatmul.mubr.msk.bf16.gmra.mrb[24].mxu0 %vm413_vm0, %v1771_v35 }
 0x30d   :  { %v3878_v7 = vpop.eup %3877 }
 0x30e   :  { %v1753_v63 = vmul.f32 %v1721_v6, %v1561_v49  ;;  %v1726_v29 = vadd.f32 1.0, %v3878_v7 }
 0x30f   :  { %v3880_v34 = vpop.eup %3879 }
 0x310   :  { %v1772_v40 = vpack.c.bf16 %v1753_v63, %v1752_v51  ;;  %v3882_v1 = vpop.eup %3881  ;;  %v1724_v30 = vadd.f32 1.0, %v3880_v34  ;;  %v1758_v45 = vmul.f32 %v1726_v29, %v1566_v37 }
 0x311   :  { %v1727_v9 = vadd.f32 1.0, %v3882_v1  ;;  %v3884_v21 = vpop.eup %3883 }
 0x312   :  { %3632 = vmatprep.mubr.msk.bf16.mxu0 %vm413_vm0, %v1772_v40  ;;  %v1725_v31 = vadd.f32 1.0, %v3884_v21  ;;  %v1756_v32 = vmul.f32 %v1724_v30, %v1564_v0 }
 0x313   :  { %v1759_v3 = vmul.f32 %v1727_v9, %v1567_v20 }
 0x314   :  { %v1757_v46 = vmul.f32 %v1725_v31, %v1565_v11  ;;  %3633 = vmatmul.mubr.msk.bf16.gmra.mrb[28].mxu0 %vm413_vm0, %v1773_v42 }
 0x315   :  { %v1775_v54 = vpack.c.bf16 %v1759_v3, %v1758_v45 }
 0x316   :  { %v1774_v39 = vpack.c.bf16 %v1757_v46, %v1756_v32 }
 0x318   :  { %3636 = vmatprep.mubr.msk.bf16.mxu0 %vm413_vm0, %v1774_v39 }
 0x31c   :  { %3637 = vmatmul.mubr.msk.bf16.gmra.mrb[32].mxu0 %vm413_vm0, %v1775_v54 }
 0x3b1   :  { %v3610_v24 = vpop.f32.mrb[4].mxu0 }
 0x3b2   :  { %v1890_v59 = vadd.f32 %v3610_v24, %v5306_v57  ;;  %v1881_v55 = vpop.f32.mrb[5].mxu0 }
 0x3b3   :  { %v1882_v4 = vadd.f32 %v5306_v57, %v1881_v55  ;;  %v3611_v5 = vpop.f32.mrb[6].mxu0 }
 0x3b4   :  { %v2010_v27 = vmul.f32 %v1890_v59, %v1890_v59  ;;  %v5311_v50 = vadd.f32 %v3611_v5, %v5306_v57  ;;  %v1884_v2 = vpop.f32.mrb[7].mxu0  ;;  %v2042_v20 = vmul.f32 0.5, %v1890_v59 }
 0x3b5   :  { %v2008_v44 = vmul.f32 %v1882_v4, %v1882_v4  ;;  %v5314_v41 = vadd.f32 %v5306_v57, %v1884_v2  ;;  %v2040_v54 = vmul.f32 0.5, %v1882_v4 }
 0x3b6   :  { %v2074_v19 = vmul.f32 0.035677407, %v2010_v27  ;;  %v2011_v58 = vmul.f32 %v5311_v50, %v5311_v50 }
 0x3b7   :  { %v2072_v62 = vmul.f32 0.035677407, %v2008_v44  ;;  %v2009_v23 = vmul.f32 %v5314_v41, %v5314_v41  ;;  %v2041_v2 = vmul.f32 0.5, %v5314_v41 }
 0x3b8   :  { %v2106_v28 = vadd.f32 0.7978846, %v2074_v19  ;;  %v2075_v56 = vmul.f32 0.035677407, %v2011_v58 }
 0x3b9   :  { %v2104_v14 = vadd.f32 0.7978846, %v2072_v62  ;;  %v2073_v10 = vmul.f32 0.035677407, %v2009_v23 }
 0x3ba   :  { %v2138_v22 = vmul.f32 %v2106_v28, %v1890_v59  ;;  %v2107_v47 = vadd.f32 0.7978846, %v2075_v56  ;;  %v3614_v17 = vpop.f32.mrb[8].mxu0  ;;  %v2043_v59 = vmul.f32 0.5, %v5311_v50 }
 0x3bb   :  { %v2136_v43 = vmul.f32 %v2104_v14, %v1882_v4  ;;  %v2105_v33 = vadd.f32 0.7978846, %v2073_v10  ;;  %v5322_v52 = vadd.f32 %v3614_v17, %v5306_v57  ;;  %v1897_v16 = vpop.f32.mrb[9].mxu0 }
 0x3bc   :  { %3885 = vtanh.f32 %v2138_v22  ;;  %v2139_v35 = vmul.f32 %v2107_v47, %v5311_v50  ;;  %v5326_v12 = vadd.f32 %v5306_v57, %v1897_v16  ;;  %v3615_v38 = vpop.f32.mrb[10].mxu0 }
 0x3bd   :  { %3887 = vtanh.f32 %v2136_v43  ;;  %v2137_v15 = vmul.f32 %v2105_v33, %v5314_v41  ;;  %v2014_v8 = vmul.f32 %v5322_v52, %v5322_v52  ;;  %v5331_v53 = vadd.f32 %v3615_v38, %v5306_v57  ;;  %v1900_v25 = vpop.f32.mrb[11].mxu0 }
 0x3be   :  { %3889 = vtanh.f32 %v2139_v35  ;;  %v2012_v61 = vmul.f32 %v5326_v12, %v5326_v12  ;;  %v5336_v13 = vadd.f32 %v5306_v57, %v1900_v25  ;;  %v2046_v17 = vmul.f32 0.5, %v5322_v52 }
 0x3bf   :  { %3891 = vtanh.f32 %v2137_v15  ;;  %v2078_v26 = vmul.f32 0.035677407, %v2014_v8  ;;  %v2015_v36 = vmul.f32 %v5331_v53, %v5331_v53  ;;  %v2044_v8 = vmul.f32 0.5, %v5326_v12 }
 0x3c0   :  { %v2076_v48 = vmul.f32 0.035677407, %v2012_v61  ;;  %v2013_v60 = vmul.f32 %v5336_v13, %v5336_v13  ;;  %v2047_v25 = vmul.f32 0.5, %v5331_v53 }
 0x3c1   :  { %v2110_v49 = vadd.f32 0.7978846, %v2078_v26  ;;  %v2079_v6 = vmul.f32 0.035677407, %v2015_v36 }
 0x3c2   :  { %v2108_v42 = vadd.f32 0.7978846, %v2076_v48  ;;  %v2077_v51 = vmul.f32 0.035677407, %v2013_v60 }
 0x3c3   :  { %v2142_v63 = vmul.f32 %v2110_v49, %v5322_v52  ;;  %v2111_v7 = vadd.f32 0.7978846, %v2079_v6  ;;  %v3618_v34 = vpop.f32.mrb[12].mxu0 }
 0x3c4   :  { %v2140_v29 = vmul.f32 %v2108_v42, %v5326_v12  ;;  %v2109_v40 = vadd.f32 0.7978846, %v2077_v51  ;;  %v5345_v1 = vadd.f32 %v3618_v34, %v5306_v57  ;;  %v1913_v37 = vpop.f32.mrb[13].mxu0  ;;  %v2045_v51 = vmul.f32 0.5, %v5336_v13 }
 0x3c5   :  { %3893 = vtanh.f32 %v2142_v63  ;;  %v2143_v9 = vmul.f32 %v2111_v7, %v5331_v53  ;;  %v5349_v21 = vadd.f32 %v5306_v57, %v1913_v37  ;;  %v3619_v0 = vpop.f32.mrb[14].mxu0 }
 0x3c6   :  { %v3886_v30 = vpop.eup %3885  ;;  %3895 = vtanh.f32 %v2140_v29  ;;  %v2141_v11 = vmul.f32 %v2109_v40, %v5336_v13  ;;  %v2018_v31 = vmul.f32 %v5345_v1, %v5345_v1  ;;  %v1916_v32 = vpop.f32.mrb[15].mxu0  ;;  %v5359_v4 = vadd.f32 %v3619_v0, %v5306_v57 }
 0x3c7   :  { %v3888_v45 = vpop.eup %3887  ;;  %v2202_v3 = vadd.f32 1.0, %v3886_v30  ;;  %3897 = vtanh.f32 %v2143_v9  ;;  %v2016_v18 = vmul.f32 %v5349_v21, %v5349_v21  ;;  %v5362_v23 = vadd.f32 %v5306_v57, %v1916_v32 }
 0x3c8   :  { %v3890_v46 = vpop.eup %3889  ;;  %v2200_v39 = vadd.f32 1.0, %v3888_v45  ;;  %3899 = vtanh.f32 %v2141_v11  ;;  %v2082_v5 = vmul.f32 0.035677407, %v2018_v31  ;;  %v2019_v22 = vmul.f32 %v5359_v4, %v5359_v4 }
 0x3c9   :  { %v3892_v24 = vpop.eup %3891  ;;  %v2203_v55 = vadd.f32 1.0, %v3890_v46  ;;  %v2234_v27 = vmul.f32 %v2202_v3, %v2042_v20  ;;  %v2080_v19 = vmul.f32 0.035677407, %v2016_v18  ;;  %v2017_v47 = vmul.f32 %v5362_v23, %v5362_v23 }
 0x3ca   :  { %v2201_v44 = vadd.f32 1.0, %v3892_v24  ;;  %v2114_v62 = vadd.f32 0.7978846, %v2082_v5  ;;  %v2232_v28 = vmul.f32 %v2200_v39, %v2040_v54  ;;  %v2083_v35 = vmul.f32 0.035677407, %v2019_v22 }
 0x3cb   :  { %v2235_v58 = vmul.f32 %v2203_v55, %v2043_v59  ;;  %v2112_v14 = vadd.f32 0.7978846, %v2080_v19  ;;  %v2081_v61 = vmul.f32 0.035677407, %v2017_v47  ;;  %v2050_v18 = vmul.f32 0.5, %v5345_v1 }
 0x3cc   :  { %v2233_v56 = vmul.f32 %v2201_v44, %v2041_v2  ;;  %v2146_v10 = vmul.f32 %v2114_v62, %v5345_v1  ;;  %v2115_v49 = vadd.f32 0.7978846, %v2083_v35  ;;  %v2048_v62 = vmul.f32 0.5, %v5349_v21 }
 0x3cd   :  { %v2265_v50 = vpack.c.bf16 %v2235_v58, %v2234_v27  ;;  %v2144_v41 = vmul.f32 %v2112_v14, %v5349_v21  ;;  %v2113_v12 = vadd.f32 0.7978846, %v2081_v61 }
 0x3ce   :  { %v3622_v43 = vpop.f32.mrb[16].mxu0  ;;  %v2264_v33 = vpack.c.bf16 %v2233_v56, %v2232_v28  ;;  %3901 = vtanh.f32 %v2146_v10  ;;  %v2147_v29 = vmul.f32 %v2115_v49, %v5359_v4  ;;  %v5387_v28 = vmul.f32 0.5, %v5359_v4 }
 0x3cf   :  { %v1938_v16 = vadd.f32 %v3622_v43, %v5306_v57  ;;  %v1929_v15 = vpop.f32.mrb[17].mxu0  ;;  %v3894_v38 = vpop.eup %3893  ;;  %3903 = vtanh.f32 %v2144_v41  ;;  %v2145_v20 = vmul.f32 %v2113_v12, %v5362_v23  ;;  %v2049_v10 = vmul.f32 0.5, %v5362_v23 }
 0x3d0   :  { %v1930_v26 = vadd.f32 %v5306_v57, %v1929_v15  ;;  %v3623_v36 = vpop.f32.mrb[18].mxu0  ;;  %3644 = vmatprep.mubr.msk.bf16.mxu0 %vm413_vm0, %v2264_v33  ;;  %v3896_v48 = vpop.eup %3895  ;;  %v2206_v60 = vadd.f32 1.0, %v3894_v38  ;;  %3905 = vtanh.f32 %v2147_v29 }
 0x3d1   :  { %v2022_v52 = vmul.f32 %v1938_v16, %v1938_v16  ;;  %v1932_v6 = vpop.f32.mrb[19].mxu0  ;;  %3645 = vmatmul.mubr.msk.bf16.vlgmr.msra.gmra.mrb[36].mxu0 %vm413_vm0, %v2265_v50  ;;  %v3898_v42 = vpop.eup %3897  ;;  %v2204_v7 = vadd.f32 1.0, %v3896_v48  ;;  %v1941_v3 = vadd.f32 %v3623_v36, %v5306_v57  ;;  %3907 = vtanh.f32 %v2145_v20 }
 0x3d2   :  { %v2020_v53 = vmul.f32 %v1930_v26, %v1930_v26  ;;  %v3900_v63 = vpop.eup %3899  ;;  %v2207_v34 = vadd.f32 1.0, %v3898_v42  ;;  %v2238_v37 = vmul.f32 %v2206_v60, %v2046_v17  ;;  %v1933_v31 = vadd.f32 %v5306_v57, %v1932_v6 }
 0x3d3   :  { %v2086_v40 = vmul.f32 0.035677407, %v2022_v52  ;;  %v2205_v30 = vadd.f32 1.0, %v3900_v63  ;;  %v2236_v32 = vmul.f32 %v2204_v7, %v2044_v8  ;;  %v2023_v46 = vmul.f32 %v1941_v3, %v1941_v3 }
 0x3d4   :  { %v2084_v9 = vmul.f32 0.035677407, %v2020_v53  ;;  %v2239_v0 = vmul.f32 %v2207_v34, %v2047_v25  ;;  %v2021_v59 = vmul.f32 %v1933_v31, %v1933_v31  ;;  %v5390_v22 = vmul.f32 0.5, %v1938_v16 }
 0x3d5   :  { %v2118_v45 = vadd.f32 0.7978846, %v2086_v40  ;;  %v2237_v13 = vmul.f32 %v2205_v30, %v2045_v51  ;;  %v2087_v2 = vmul.f32 0.035677407, %v2023_v46  ;;  %v5393_v33 = vmul.f32 0.5, %v1930_v26 }
 0x3d6   :  { %v2116_v11 = vadd.f32 0.7978846, %v2084_v9  ;;  %v2267_v39 = vpack.c.bf16 %v2239_v0, %v2238_v37  ;;  %v2085_v56 = vmul.f32 0.035677407, %v2021_v59  ;;  %v5397_v23 = vmul.f32 0.5, %v1941_v3 }
 0x3d7   :  { %v3626_v54 = vpop.f32.mrb[20].mxu0  ;;  %v2150_v24 = vmul.f32 %v2118_v45, %v1938_v16  ;;  %v2266_v58 = vpack.c.bf16 %v2237_v13, %v2236_v32  ;;  %v2119_v41 = vadd.f32 0.7978846, %v2087_v2  ;;  %v5400_v36 = vmul.f32 0.5, %v1933_v31 }
 0x3d8   :  { %v1954_v55 = vadd.f32 %v3626_v54, %v5306_v57  ;;  %v1945_v5 = vpop.f32.mrb[21].mxu0  ;;  %v2148_v27 = vmul.f32 %v2116_v11, %v1930_v26  ;;  %v3902_v1 = vpop.eup %3901  ;;  %v2117_v21 = vadd.f32 0.7978846, %v2085_v56 }
 0x3d9   :  { %v1946_v44 = vadd.f32 %v5306_v57, %v1945_v5  ;;  %v3627_v19 = vpop.f32.mrb[22].mxu0  ;;  %3648 = vmatprep.mubr.msk.bf16.mxu0 %vm413_vm0, %v2266_v58  ;;  %v3904_v43 = vpop.eup %3903  ;;  %3909 = vtanh.f32 %v2150_v24  ;;  %v2151_v4 = vmul.f32 %v2119_v41, %v1941_v3  ;;  %v2210_v61 = vadd.f32 1.0, %v3902_v1 }
 0x3da   :  { %v2026_v14 = vmul.f32 %v1954_v55, %v1954_v55  ;;  %v1948_v50 = vpop.f32.mrb[23].mxu0  ;;  %3649 = vmatmul.mubr.msk.bf16.gmra.mrb[40].mxu0 %vm413_vm0, %v2267_v39  ;;  %3911 = vtanh.f32 %v2148_v27  ;;  %v1957_v15 = vadd.f32 %v3627_v19, %v5306_v57  ;;  %v2149_v16 = vmul.f32 %v2117_v21, %v1933_v31  ;;  %v3906_v25 = vpop.eup %3905 }
 0x3db   :  { %v2024_v47 = vmul.f32 %v1946_v44, %v1946_v44  ;;  %v1949_v8 = vadd.f32 %v5306_v57, %v1948_v50  ;;  %v3908_v49 = vpop.eup %3907  ;;  %v2208_v52 = vadd.f32 1.0, %v3904_v43  ;;  %v5402_v53 = vmul.f32 0.5, %v1954_v55 }
 0x3dc   :  { %v2090_v17 = vmul.f32 0.035677407, %v2026_v14  ;;  %v2027_v48 = vmul.f32 %v1957_v15, %v1957_v15  ;;  %3913 = vtanh.f32 %v2149_v16  ;;  %v2209_v12 = vadd.f32 1.0, %v3908_v49 }
 0x3dd   :  { %v2088_v35 = vmul.f32 0.035677407, %v2024_v47  ;;  %v2025_v42 = vmul.f32 %v1949_v8, %v1949_v8  ;;  %3915 = vtanh.f32 %v2151_v4  ;;  %v2242_v30 = vmul.f32 %v2210_v61, %v2050_v18 }
 0x3de   :  { %v2122_v38 = vadd.f32 0.7978846, %v2090_v17  ;;  %v2091_v63 = vmul.f32 0.035677407, %v2027_v48  ;;  %v2211_v20 = vadd.f32 1.0, %v3906_v25  ;;  %v2240_v45 = vmul.f32 %v2208_v52, %v2048_v62 }
 0x3df   :  { %v2120_v26 = vadd.f32 0.7978846, %v2088_v35  ;;  %v3630_v60 = vpop.f32.mrb[24].mxu0  ;;  %v2089_v29 = vmul.f32 0.035677407, %v2025_v42  ;;  %v5406_v3 = vmul.f32 0.5, %v1946_v44  ;;  %v2241_v31 = vmul.f32 %v2209_v12, %v2049_v10 }
 0x3e0   :  { %v2154_v6 = vmul.f32 %v2122_v38, %v1954_v55  ;;  %v1961_v51 = vpop.f32.mrb[25].mxu0  ;;  %v1970_v40 = vadd.f32 %v3630_v60, %v5306_v57  ;;  %v2123_v9 = vadd.f32 0.7978846, %v2091_v63  ;;  %v5408_v32 = vmul.f32 0.5, %v1957_v15 }
 0x3e1   :  { %v3631_v7 = vpop.f32.mrb[26].mxu0  ;;  %v2152_v34 = vmul.f32 %v2120_v26, %v1946_v44  ;;  %v1962_v0 = vadd.f32 %v5306_v57, %v1961_v51  ;;  %v2121_v13 = vadd.f32 0.7978846, %v2089_v29  ;;  %v2243_v5 = vmul.f32 %v2211_v20, %v5387_v28 }
 0x3e2   :  { %3917 = vtanh.f32 %v2154_v6  ;;  %v1964_v37 = vpop.f32.mrb[27].mxu0  ;;  %v2030_v11 = vmul.f32 %v1970_v40, %v1970_v40  ;;  %v2155_v46 = vmul.f32 %v2123_v9, %v1957_v15  ;;  %v1973_v18 = vadd.f32 %v3631_v7, %v5306_v57 }
 0x3e3   :  { %v2028_v54 = vmul.f32 %v1962_v0, %v1962_v0  ;;  %v3910_v39 = vpop.eup %3909  ;;  %3919 = vtanh.f32 %v2152_v34  ;;  %v2153_v24 = vmul.f32 %v2121_v13, %v1949_v8  ;;  %v1965_v2 = vadd.f32 %v5306_v57, %v1964_v37 }
 0x3e4   :  { %v2094_v59 = vmul.f32 0.035677407, %v2030_v11  ;;  %v3912_v55 = vpop.eup %3911  ;;  %3921 = vtanh.f32 %v2155_v46  ;;  %v5413_v19 = vmul.f32 0.5, %v1949_v8  ;;  %v2031_v62 = vmul.f32 %v1973_v18, %v1973_v18 }
 0x3e5   :  { %v2092_v27 = vmul.f32 0.035677407, %v2028_v54  ;;  %3923 = vtanh.f32 %v2153_v24  ;;  %v2214_v14 = vadd.f32 1.0, %v3910_v39  ;;  %v2029_v1 = vmul.f32 %v1965_v2, %v1965_v2 }
 0x3e6   :  { %v2126_v58 = vadd.f32 0.7978846, %v2094_v59  ;;  %v2268_v10 = vpack.c.bf16 %v2241_v31, %v2240_v45  ;;  %v3914_v47 = vpop.eup %3913  ;;  %v2212_v43 = vadd.f32 1.0, %v3912_v55  ;;  %v2095_v28 = vmul.f32 0.035677407, %v2031_v62 }
 0x3e7   :  { %v3634_v44 = vpop.f32.mrb[28].mxu0  ;;  %v2124_v50 = vadd.f32 0.7978846, %v2092_v27  ;;  %v3916_v35 = vpop.eup %3915  ;;  %v5418_v15 = vmul.f32 0.5, %v1970_v40  ;;  %v2093_v38 = vmul.f32 0.035677407, %v2029_v1  ;;  %v2269_v8 = vpack.c.bf16 %v2243_v5, %v2242_v30 }
 0x3e8   :  { %v1977_v56 = vpop.f32.mrb[29].mxu0  ;;  %v2158_v21 = vmul.f32 %v2126_v58, %v1970_v40  ;;  %v5416_v17 = vadd.f32 %v3634_v44, %v5306_v57  ;;  %3652 = vmatprep.mubr.msk.bf16.mxu0 %vm413_vm0, %v2268_v10  ;;  %v2213_v61 = vadd.f32 1.0, %v3914_v47  ;;  %v2127_v26 = vadd.f32 0.7978846, %v2095_v28 }
 0x3e9   :  { %v3635_v41 = vpop.f32.mrb[30].mxu0  ;;  %v2156_v16 = vmul.f32 %v2124_v50, %v1962_v0  ;;  %v2246_v60 = vmul.f32 %v2214_v14, %v5390_v22  ;;  %v5424_v49 = vmul.f32 0.5, %v1962_v0  ;;  %v2125_v52 = vadd.f32 0.7978846, %v2093_v38  ;;  %3653 = vmatmul.mubr.msk.bf16.gmra.mrb[44].mxu0 %vm413_vm0, %v2269_v8 }
 0x3ea   :  { %v1980_v4 = vpop.f32.mrb[31].mxu0  ;;  %3925 = vtanh.f32 %v2158_v21  ;;  %v2034_v48 = vmul.f32 %v5416_v17, %v5416_v17  ;;  %v2244_v6 = vmul.f32 %v2212_v43, %v5393_v33  ;;  %v2215_v42 = vadd.f32 1.0, %v3916_v35 }
 0x3eb   :  { %3927 = vtanh.f32 %v2156_v16  ;;  %v2159_v51 = vmul.f32 %v2127_v26, %v1973_v18  ;;  %v2157_v7 = vmul.f32 %v2125_v52, %v1965_v2  ;;  %v5429_v34 = vadd.f32 %v5306_v57, %v1977_v56 }
 0x3ec   :  { %v3918_v25 = vpop.eup %3917  ;;  %v2098_v12 = vmul.f32 0.035677407, %v2034_v48  ;;  %v5432_v29 = vadd.f32 %v3635_v41, %v5306_v57  ;;  %v2245_v37 = vmul.f32 %v2213_v61, %v5400_v36  ;;  %v5436_v20 = vadd.f32 %v5306_v57, %v1980_v4 }
 0x3ed   :  { %v2218_v63 = vadd.f32 1.0, %v3918_v25  ;;  %v3920_v40 = vpop.eup %3919  ;;  %3929 = vtanh.f32 %v2159_v51  ;;  %v2063_v0 = vmul.f32 0.5, %v1973_v18  ;;  %v2032_v45 = vmul.f32 %v5429_v34, %v5429_v34 }
 0x3ee   :  { %v2130_v30 = vadd.f32 0.7978846, %v2098_v12  ;;  %v3922_v9 = vpop.eup %3921  ;;  %3931 = vtanh.f32 %v2157_v7  ;;  %v2035_v13 = vmul.f32 %v5432_v29, %v5432_v29  ;;  %v2247_v46 = vmul.f32 %v2215_v42, %v5397_v23 }
 0x3ef   :  { %v3638_v22 = vpop.f32.mrb[32].mxu0  ;;  %v3924_v31 = vpop.eup %3923  ;;  %v2061_v36 = vmul.f32 0.5, %v1965_v2  ;;  %v2033_v39 = vmul.f32 %v5436_v20, %v5436_v20  ;;  %v2250_v59 = vmul.f32 %v2218_v63, %v5402_v53  ;;  %v2216_v18 = vadd.f32 1.0, %v3920_v40 }
 0x3f0   :  { %v1993_v33 = vpop.f32.mrb[33].mxu0  ;;  %v2162_v54 = vmul.f32 %v2130_v30, %v5416_v17  ;;  %v2096_v55 = vmul.f32 0.035677407, %v2032_v45  ;;  %v2099_v5 = vmul.f32 0.035677407, %v2035_v13  ;;  %v2219_v27 = vadd.f32 1.0, %v3922_v9 }
 0x3f1   :  { %v3639_v11 = vpop.f32.mrb[34].mxu0  ;;  %v2217_v44 = vadd.f32 1.0, %v3924_v31  ;;  %v2097_v58 = vmul.f32 0.035677407, %v2033_v39  ;;  %v2270_v62 = vpack.c.bf16 %v2245_v37, %v2244_v6  ;;  %v5448_v23 = vadd.f32 %v3638_v22, %v5306_v57 }
 0x3f2   :  { %v1996_v24 = vpop.f32.mrb[35].mxu0  ;;  %3933 = vtanh.f32 %v2162_v54  ;;  %v2128_v56 = vadd.f32 0.7978846, %v2096_v55  ;;  %v2131_v14 = vadd.f32 0.7978846, %v2099_v5  ;;  %v2271_v1 = vpack.c.bf16 %v2247_v46, %v2246_v60 }
 0x3f3   :  { %v2129_v50 = vadd.f32 0.7978846, %v2097_v58  ;;  %3656 = vmatprep.mubr.msk.bf16.mxu0 %vm413_vm0, %v2270_v62  ;;  %v5452_v53 = vadd.f32 %v5306_v57, %v1993_v33  ;;  %v5455_v10 = vadd.f32 %v3639_v11, %v5306_v57  ;;  %v2038_v28 = vmul.f32 %v5448_v23, %v5448_v23 }
 0x3f4   :  { %v3926_v2 = vpop.eup %3925  ;;  %v2160_v43 = vmul.f32 %v2128_v56, %v5429_v34  ;;  %v2163_v21 = vmul.f32 %v2131_v14, %v5432_v29  ;;  %v2248_v4 = vmul.f32 %v2216_v18, %v5406_v3  ;;  %3657 = vmatmul.mubr.msk.bf16.gmra.mrb[48].mxu0 %vm413_vm0, %v2271_v1  ;;  %v2251_v8 = vmul.f32 %v2219_v27, %v5408_v32 }
 0x3f5   :  { %v3928_v41 = vpop.eup %3927  ;;  %v2222_v47 = vadd.f32 1.0, %v3926_v2  ;;  %v2161_v16 = vmul.f32 %v2129_v50, %v5436_v20  ;;  %v2036_v38 = vmul.f32 %v5452_v53, %v5452_v53  ;;  %v2249_v25 = vmul.f32 %v2217_v44, %v5413_v19 }
 0x3f6   :  { %v2220_v35 = vadd.f32 1.0, %v3928_v41  ;;  %3935 = vtanh.f32 %v2160_v43  ;;  %v2102_v61 = vmul.f32 0.035677407, %v2038_v28  ;;  %v2039_v3 = vmul.f32 %v5455_v10, %v5455_v10 }
 0x3f7   :  { %v3930_v26 = vpop.eup %3929  ;;  %v2254_v48 = vmul.f32 %v2222_v47, %v5418_v15  ;;  %3937 = vtanh.f32 %v2163_v21  ;;  %v2100_v60 = vmul.f32 0.035677407, %v2036_v38  ;;  %v1997_v19 = vadd.f32 %v5306_v57, %v1996_v24 }
 0x3f8   :  { %v3932_v52 = vpop.eup %3931  ;;  %v2252_v6 = vmul.f32 %v2220_v35, %v5424_v49  ;;  %v2223_v42 = vadd.f32 1.0, %v3930_v26  ;;  %3939 = vtanh.f32 %v2161_v16  ;;  %v2134_v51 = vadd.f32 0.7978846, %v2102_v61 }
 0x3f9   :  { %v2221_v12 = vadd.f32 1.0, %v3932_v52  ;;  %v2132_v32 = vadd.f32 0.7978846, %v2100_v60  ;;  %v2103_v63 = vmul.f32 0.035677407, %v2039_v3  ;;  %v2272_v15 = vpack.c.bf16 %v2249_v25, %v2248_v4 }
 0x3fa   :  { %v2255_v7 = vmul.f32 %v2223_v42, %v2063_v0  ;;  %v2166_v22 = vmul.f32 %v2134_v51, %v5448_v23  ;;  %v2273_v40 = vpack.c.bf16 %v2251_v8, %v2250_v59  ;;  %v2037_v9 = vmul.f32 %v1997_v19, %v1997_v19 }
 0x3fb   :  { %v2253_v37 = vmul.f32 %v2221_v12, %v2061_v36  ;;  %v2164_v30 = vmul.f32 %v2132_v32, %v5452_v53  ;;  %v2135_v33 = vadd.f32 0.7978846, %v2103_v63  ;;  %3660 = vmatprep.mubr.msk.bf16.mxu0 %vm413_vm0, %v2272_v15  ;;  %v2066_v59 = vmul.f32 0.5, %v5416_v17 }
 0x3fc   :  { %v3934_v45 = vpop.eup %3933  ;;  %3941 = vtanh.f32 %v2166_v22  ;;  %v2275_v49 = vpack.c.bf16 %v2255_v7, %v2254_v48  ;;  %v2101_v11 = vmul.f32 0.035677407, %v2037_v9  ;;  %3661 = vmatmul.mubr.msk.bf16.gmra.mrb[52].mxu0 %vm413_vm0, %v2273_v40  ;;  %v2067_v18 = vmul.f32 0.5, %v5432_v29 }
 0x3fd   :  { %v2167_v13 = vmul.f32 %v2135_v33, %v5455_v10  ;;  %v2274_v57 = vpack.c.bf16 %v2253_v37, %v2252_v6  ;;  %3943 = vtanh.f32 %v2164_v30  ;;  %v2226_v46 = vadd.f32 1.0, %v3934_v45 }
 0x3fe   :  { %v2133_v0 = vadd.f32 0.7978846, %v2101_v11  ;;  %v2064_v5 = vmul.f32 0.5, %v5429_v34  ;;  %v2065_v27 = vmul.f32 0.5, %v5436_v20  ;;  %v2070_v34 = vmul.f32 0.5, %v5448_v23 }
 0x3ff   :  { %3945 = vtanh.f32 %v2167_v13  ;;  %3664 = vmatprep.mubr.msk.bf16.mxu0 %vm413_vm0, %v2274_v57  ;;  %v2258_v58 = vmul.f32 %v2226_v46, %v2066_v59  ;;  %v2071_v29 = vmul.f32 0.5, %v5455_v10  ;;  %v2068_v35 = vmul.f32 0.5, %v5452_v53  ;;  %v5491_v23 = vld [vmem:[#allocation20] ss:$0 sm:$0xff] }
 0x400   :  { %v3936_v31 = vpop.eup %3935  ;;  %v2165_v39 = vmul.f32 %v2133_v0, %v1997_v19  ;;  %v2069_v16 = vmul.f32 0.5, %v1997_v19 }
 0x401   :  { %v3938_v36 = vpop.eup %3937  ;;  %v2224_v54 = vadd.f32 1.0, %v3936_v31 }
 0x402   :  { %v3940_v24 = vpop.eup %3939  ;;  %v2227_v55 = vadd.f32 1.0, %v3938_v36  ;;  %3947 = vtanh.f32 %v2165_v39 }
 0x403   :  { %v2225_v44 = vadd.f32 1.0, %v3940_v24  ;;  %v2256_v56 = vmul.f32 %v2224_v54, %v2064_v5 }
 0x404   :  { %v2259_v62 = vmul.f32 %v2227_v55, %v2067_v18  ;;  %3665 = vmatmul.mubr.msk.bf16.gmra.mrb[56].mxu0 %vm413_vm0, %v2275_v49 }
 0x405   :  { %v2257_v14 = vmul.f32 %v2225_v44, %v2065_v27 }
 0x406   :  { %v3942_v2 = vpop.eup %3941  ;;  %v2277_v50 = vpack.c.bf16 %v2259_v62, %v2258_v58 }
 0x407   :  { %v2276_v1 = vpack.c.bf16 %v2257_v14, %v2256_v56  ;;  %v3944_v41 = vpop.eup %3943  ;;  %v2230_v17 = vadd.f32 1.0, %v3942_v2 }
 0x408   :  { %v2228_v21 = vadd.f32 1.0, %v3944_v41 }
 0x409   :  { %v3946_v47 = vpop.eup %3945  ;;  %3668 = vmatprep.mubr.msk.bf16.mxu0 %vm413_vm0, %v2276_v1  ;;  %v2262_v43 = vmul.f32 %v2230_v17, %v2070_v34 }
 0x40a   :  { %v2231_v20 = vadd.f32 1.0, %v3946_v47  ;;  %v2260_v25 = vmul.f32 %v2228_v21, %v2068_v35 }
 0x40c   :  { %v2263_v28 = vmul.f32 %v2231_v20, %v2071_v29  ;;  %v3948_v4 = vpop.eup %3947  ;;  %3669 = vmatmul.mubr.msk.bf16.gmra.mrb[60].mxu0 %vm413_vm0, %v2277_v50 }
 0x40d   :  { %v2229_v38 = vadd.f32 1.0, %v3948_v4 }
 0x40e   :  { %v2279_v8 = vpack.c.bf16 %v2263_v28, %v2262_v43 }
 0x40f   :  { %v2261_v61 = vmul.f32 %v2229_v38, %v2069_v16 }
 0x411   :  { %v2278_v26 = vpack.c.bf16 %v2261_v61, %v2260_v25 }
 0x413   :  { %3672 = vmatprep.mubr.msk.bf16.mxu0 %vm413_vm0, %v2278_v26 }
 0x414   :  { %3673 = vmatmul.mubr.msk.bf16.gmra.mrb[64].mxu0 %vm413_vm0, %v2279_v8 }
 0x4a4   :  { %v3646_v10 = vpop.f32.mrb[36].mxu0 }
 0x4a5   :  { %v2394_v48 = vadd.f32 %v3646_v10, %v5491_v23  ;;  %v2385_v60 = vpop.f32.mrb[37].mxu0 }
 0x4a6   :  { %v2386_v3 = vadd.f32 %v5491_v23, %v2385_v60  ;;  %v3647_v52 = vpop.f32.mrb[38].mxu0 }
 0x4a7   :  { %v2526_v53 = vsel %vm413_vm0, %v2394_v48, 0.0  ;;  %v2397_v6 = vadd.f32 %v3647_v52, %v5491_v23  ;;  %v2388_v42 = vpop.f32.mrb[39].mxu0 }
 0x4a8   :  { %v2527_v51 = vrot.slane %v2526_v53, 4  ;;  %v2512_v12 = vsel %vm413_vm0, %v2386_v3, 0.0  ;;  %v2389_v32 = vadd.f32 %v5491_v23, %v2388_v42 }
 0x4a9   :  { %v2513_v63 = vrot.slane %v2512_v12, 4  ;;  %v2533_v19 = vsel %vm413_vm0, %v2397_v6, 0.0 }
 0x4aa   :  { %v2528_v7 = vadd.f32 %v2527_v51, %v2526_v53  ;;  %v2534_v22 = vrot.slane %v2533_v19, 4  ;;  %v2519_v15 = vsel %vm413_vm0, %v2389_v32, 0.0 }
 0x4ab   :  { %v2514_v40 = vadd.f32 %v2513_v63, %v2512_v12  ;;  %v2520_v37 = vrot.slane %v2519_v15, 4 }
 0x4ac   :  { %v2529_v30 = vrot.slane %v2528_v7, 2  ;;  %v2535_v33 = vadd.f32 %v2534_v22, %v2533_v19 }
 0x4ad   :  { %v2515_v9 = vrot.slane %v2514_v40, 2  ;;  %v2521_v45 = vadd.f32 %v2520_v37, %v2519_v15  ;;  %v3650_v0 = vpop.f32.mrb[40].mxu0 }
 0x4ae   :  { %v2530_v49 = vadd.f32 %v2529_v30, %v2528_v7  ;;  %v2536_v13 = vrot.slane %v2535_v33, 2  ;;  %v2410_v36 = vadd.f32 %v3650_v0, %v5491_v23  ;;  %v2401_v54 = vpop.f32.mrb[41].mxu0 }
 0x4af   :  { %v2516_v11 = vadd.f32 %v2515_v9, %v2514_v40  ;;  %v2522_v57 = vrot.slane %v2521_v45, 2  ;;  %v2402_v59 = vadd.f32 %v5491_v23, %v2401_v54  ;;  %v3651_v18 = vpop.f32.mrb[42].mxu0 }
 0x4b0   :  { %v2531_v31 = vrot.slane %v2530_v49, 1  ;;  %v2537_v46 = vadd.f32 %v2536_v13, %v2535_v33  ;;  %v2554_v5 = vsel %vm413_vm0, %v2410_v36, 0.0  ;;  %v2413_v27 = vadd.f32 %v3651_v18, %v5491_v23  ;;  %v2404_v44 = vpop.f32.mrb[43].mxu0 }
 0x4b1   :  { %v2517_v39 = vrot.slane %v2516_v11, 1  ;;  %v2523_v24 = vadd.f32 %v2522_v57, %v2521_v45  ;;  %v2555_v56 = vrot.slane %v2554_v5, 4  ;;  %v2540_v14 = vsel %vm413_vm0, %v2402_v59, 0.0 }
 0x4b2   :  { %v2538_v55 = vrot.slane %v2537_v46, 1  ;;  %v2532_v2 = vadd.f32 %v2531_v31, %v2530_v49  ;;  %v2541_v50 = vrot.slane %v2540_v14, 4  ;;  %v2561_v1 = vsel %vm413_vm0, %v2413_v27, 0.0 }
 0x4b3   :  { %v2518_v58 = vadd.f32 %v2517_v39, %v2516_v11  ;;  %v2524_v62 = vrot.slane %v2523_v24, 1  ;;  %v2556_v47 = vadd.f32 %v2555_v56, %v2554_v5  ;;  %v2562_v34 = vrot.slane %v2561_v1, 4 }
 0x4b4   :  { %v2539_v41 = vadd.f32 %v2538_v55, %v2537_v46  ;;  %v2542_v29 = vadd.f32 %v2541_v50, %v2540_v14  ;;  %v2405_v20 = vadd.f32 %v5491_v23, %v2404_v44  ;;  %v2738_v35 = vmul.f32 0.033333335, %v2532_v2 }
 0x4b5   :  { %v2525_v17 = vadd.f32 %v2524_v62, %v2523_v24  ;;  %v2736_v43 = vmul.f32 0.033333335, %v2518_v58  ;;  %v2557_v28 = vrot.slane %v2556_v47, 2  ;;  %v2563_v4 = vadd.f32 %v2562_v34, %v2561_v1 }
 0x4b6   :  { %v2543_v16 = vrot.slane %v2542_v29, 2  ;;  %v2547_v38 = vsel %vm413_vm0, %v2405_v20, 0.0  ;;  %v2739_v8 = vmul.f32 0.033333335, %v2539_v41 }
 0x4b7   :  { %v2737_v21 = vmul.f32 0.033333335, %v2525_v17  ;;  %v2564_v61 = vrot.slane %v2563_v4, 2  ;;  %v2548_v26 = vrot.slane %v2547_v38, 4  ;;  %v2558_v10 = vadd.f32 %v2557_v28, %v2556_v47  ;;  %v3973_v17 = vld [vmem:[#allocation2] sm:$0xff] }
 0x4b8   :  { %v2544_v48 = vadd.f32 %v2543_v16, %v2542_v29 }
 0x4b9   :  { %v2801_v25 = vsel %vm2800_vm2, %v2737_v21, %v2736_v43  ;;  %v2565_v3 = vadd.f32 %v2564_v61, %v2563_v4  ;;  %v2549_v52 = vadd.f32 %v2548_v26, %v2547_v38  ;;  %v2559_v51 = vrot.slane %v2558_v10, 1 }
 0x4ba   :  { %v2803_v60 = vsel %vm2802_vm3, %v2738_v35, %v2801_v25  ;;  %v2545_v6 = vrot.slane %v2544_v48, 1 }
 0x4bb   :  { %v2805_v53 = vsel %vm2804_vm4, %v2739_v8, %v2803_v60  ;;  %v2550_v42 = vrot.slane %v2549_v52, 2  ;;  %v2566_v32 = vrot.slane %v2565_v3, 1  ;;  %v2560_v37 = vadd.f32 %v2559_v51, %v2558_v10 }
 0x4bc   :  { %v2546_v12 = vadd.f32 %v2545_v6, %v2544_v48  ;;  %v3654_v7 = vpop.f32.mrb[44].mxu0 }
 0x4bd   :  { %v2551_v63 = vadd.f32 %v2550_v42, %v2549_v52  ;;  %v2426_v15 = vadd.f32 %v3654_v7, %v5491_v23  ;;  %v2417_v40 = vpop.f32.mrb[45].mxu0  ;;  %v2567_v45 = vadd.f32 %v2566_v32, %v2565_v3  ;;  %v2742_v24 = vmul.f32 0.033333335, %v2560_v37 }
 0x4be   :  { %v2740_v19 = vmul.f32 0.033333335, %v2546_v12  ;;  %v2418_v30 = vadd.f32 %v5491_v23, %v2417_v40  ;;  %v3655_v33 = vpop.f32.mrb[46].mxu0 }
 0x4bf   :  { %v2552_v22 = vrot.slane %v2551_v63, 1  ;;  %v2582_v13 = vsel %vm413_vm0, %v2426_v15, 0.0  ;;  %v2429_v11 = vadd.f32 %v3655_v33, %v5491_v23  ;;  %v2420_v57 = vpop.f32.mrb[47].mxu0  ;;  %v2743_v44 = vmul.f32 0.033333335, %v2567_v45 }
 0x4c0   :  { %v2807_v9 = vsel %vm2806_vm5, %v2740_v19, %v2805_v53  ;;  %v2583_v0 = vrot.slane %v2582_v13, 4  ;;  %v2568_v31 = vsel %vm413_vm0, %v2418_v30, 0.0  ;;  %v2421_v46 = vadd.f32 %v5491_v23, %v2420_v57 }
 0x4c1   :  { %v2553_v49 = vadd.f32 %v2552_v22, %v2551_v63  ;;  %v2569_v54 = vrot.slane %v2568_v31, 4  ;;  %v2589_v39 = vsel %vm413_vm0, %v2429_v11, 0.0 }
 0x4c2   :  { %v2584_v59 = vadd.f32 %v2583_v0, %v2582_v13  ;;  %v2590_v18 = vrot.slane %v2589_v39, 4  ;;  %v2575_v55 = vsel %vm413_vm0, %v2421_v46, 0.0 }
 0x4c3   :  { %v2741_v36 = vmul.f32 0.033333335, %v2553_v49  ;;  %v2570_v5 = vadd.f32 %v2569_v54, %v2568_v31  ;;  %v2576_v27 = vrot.slane %v2575_v55, 4 }
 0x4c4   :  { %v2585_v62 = vrot.slane %v2584_v59, 2  ;;  %v2591_v56 = vadd.f32 %v2590_v18, %v2589_v39 }
 0x4c5   :  { %v2809_v58 = vsel %vm2808_vm6, %v2741_v36, %v2807_v9  ;;  %v2571_v2 = vrot.slane %v2570_v5, 2  ;;  %v2577_v50 = vadd.f32 %v2576_v27, %v2575_v55 }
 0x4c6   :  { %v2811_v14 = vsel %vm2810_vm7, %v2742_v24, %v2809_v58  ;;  %v2592_v41 = vrot.slane %v2591_v56, 2  ;;  %v2586_v43 = vadd.f32 %v2585_v62, %v2584_v59 }
 0x4c7   :  { %v2813_v1 = vsel %vm2812_vm8, %v2743_v44, %v2811_v14  ;;  %v2572_v34 = vadd.f32 %v2571_v2, %v2570_v5  ;;  %v2578_v29 = vrot.slane %v2577_v50, 2  ;;  %v3658_v20 = vpop.f32.mrb[48].mxu0 }
 0x4c8   :  { %v5524_v47 = vadd.f32 %v3973_v17, %v2813_v1  ;;  %v2442_v21 = vadd.f32 %v3658_v20, %v5491_v23  ;;  %v2433_v28 = vpop.f32.mrb[49].mxu0  ;;  %v2593_v25 = vadd.f32 %v2592_v41, %v2591_v56  ;;  %v2587_v53 = vrot.slane %v2586_v43, 1 }
 0x4c9   :  { %v2573_v35 = vrot.slane %v2572_v34, 1  ;;  %v2579_v16 = vadd.f32 %v2578_v29, %v2577_v50  ;;  %v2434_v38 = vadd.f32 %v5491_v23, %v2433_v28  ;;  %v3659_v8 = vpop.f32.mrb[50].mxu0 }
 0x4ca   :  { %v2845_v4 = vsel %vm413_vm0, %v5524_v47, 0.0  ;;  %v2610_v61 = vsel %vm413_vm0, %v2442_v21, 0.0  ;;  %v2445_v26 = vadd.f32 %v3659_v8, %v5491_v23  ;;  %v2436_v10 = vpop.f32.mrb[51].mxu0  ;;  %v2594_v63 = vrot.slane %v2593_v25, 1 }
 0x4cb   :  { %2846 = vadd.xlane.f32.xlu0 %v2845_v4  ;;  %v2574_v48 = vadd.f32 %v2573_v35, %v2572_v34  ;;  %v2580_v60 = vrot.slane %v2579_v16, 1  ;;  %v2611_v3 = vrot.slane %v2610_v61, 4  ;;  %v2596_v52 = vsel %vm413_vm0, %v2434_v38, 0.0 }
 0x4cc   :  { %v2597_v6 = vrot.slane %v2596_v52, 4  ;;  %v2617_v42 = vsel %vm413_vm0, %v2445_v26, 0.0  ;;  %v2437_v7 = vadd.f32 %v5491_v23, %v2436_v10  ;;  %v2588_v33 = vadd.f32 %v2587_v53, %v2586_v43 }
 0x4cd   :  { %v2581_v51 = vadd.f32 %v2580_v60, %v2579_v16  ;;  %v2612_v12 = vadd.f32 %v2611_v3, %v2610_v61  ;;  %v2618_v32 = vrot.slane %v2617_v42, 4  ;;  %v2744_v22 = vmul.f32 0.033333335, %v2574_v48 }
 0x4ce   :  { %v2598_v19 = vadd.f32 %v2597_v6, %v2596_v52  ;;  %v2603_v45 = vsel %vm413_vm0, %v2437_v7, 0.0  ;;  %v2595_v18 = vadd.f32 %v2594_v63, %v2593_v25  ;;  %v5548_v1 = vmul.f32 0.033333335, %v2588_v33 }
 0x4cf   :  { %v2745_v15 = vmul.f32 0.033333335, %v2581_v51  ;;  %v2613_v40 = vrot.slane %v2612_v12, 2  ;;  %v2619_v37 = vadd.f32 %v2618_v32, %v2617_v42  ;;  %v3662_v30 = vpop.f32.mrb[52].mxu0  ;;  %v2604_v31 = vrot.slane %v2603_v45, 4 }
 0x4d0   :  { %v2599_v9 = vrot.slane %v2598_v19, 2  ;;  %v2458_v49 = vadd.f32 %v3662_v30, %v5491_v23  ;;  %v2449_v13 = vpop.f32.mrb[53].mxu0  ;;  %v5551_v29 = vmul.f32 0.033333335, %v2595_v18 }
 0x4d1   :  { %v5538_v11 = vsel %vm2800_vm2, %v2745_v15, %v2744_v22  ;;  %v2614_v57 = vadd.f32 %v2613_v40, %v2612_v12  ;;  %v2620_v0 = vrot.slane %v2619_v37, 2  ;;  %v3663_v46 = vpop.f32.mrb[54].mxu0  ;;  %v2450_v39 = vadd.f32 %v5491_v23, %v2449_v13 }
 0x4d2   :  { %v2600_v36 = vadd.f32 %v2599_v9, %v2598_v19  ;;  %v2638_v54 = vsel %vm413_vm0, %v2458_v49, 0.0  ;;  %v2461_v24 = vadd.f32 %v3663_v46, %v5491_v23  ;;  %v2452_v59 = vpop.f32.mrb[55].mxu0  ;;  %v2605_v5 = vadd.f32 %v2604_v31, %v2603_v45 }
 0x4d3   :  { %v2615_v55 = vrot.slane %v2614_v57, 1  ;;  %v2639_v27 = vrot.slane %v2638_v54, 4  ;;  %v5543_v44 = vadd.f32 %v2620_v0, %v2619_v37  ;;  %v2624_v58 = vsel %vm413_vm0, %v2450_v39, 0.0 }
 0x4d4   :  { %v2645_v62 = vsel %vm413_vm0, %v2461_v24, 0.0  ;;  %v2453_v56 = vadd.f32 %v5491_v23, %v2452_v59  ;;  %v2601_v14 = vrot.slane %v2600_v36, 1  ;;  %v2606_v2 = vrot.slane %v2605_v5, 2 }
 0x4d5   :  { %v2640_v50 = vadd.f32 %v2639_v27, %v2638_v54  ;;  %v2625_v41 = vrot.slane %v2624_v58, 4  ;;  %v2646_v17 = vrot.slane %v2645_v62, 4  ;;  %v2616_v20 = vadd.f32 %v2615_v55, %v2614_v57 }
 0x4d6   :  { %v2631_v34 = vsel %vm413_vm0, %v2453_v56, 0.0  ;;  %v2607_v43 = vadd.f32 %v2606_v2, %v2605_v5  ;;  %v2622_v4 = vrot.slane %v5543_v44, 1  ;;  %v2602_v25 = vadd.f32 %v2601_v14, %v2600_v36 }
 0x4d7   :  { %v2641_v21 = vrot.slane %v2640_v50, 2  ;;  %v3666_v28 = vpop.f32.mrb[56].mxu0  ;;  %v2626_v35 = vadd.f32 %v2625_v41, %v2624_v58  ;;  %v2647_v16 = vadd.f32 %v2646_v17, %v2645_v62  ;;  %v2632_v38 = vrot.slane %v2631_v34, 4 }
 0x4d8   :  { %v2465_v8 = vpop.f32.mrb[57].mxu0  ;;  %v2474_v26 = vadd.f32 %v3666_v28, %v5491_v23  ;;  %v2608_v42 = vrot.slane %v2607_v43, 1  ;;  %v5559_v15 = vmul.f32 0.033333335, %v2616_v20  ;;  %v5561_v40 = vmul.f32 0.033333335, %v2602_v25 }
 0x4d9   :  { %v2642_v61 = vadd.f32 %v2641_v21, %v2640_v50  ;;  %v2466_v10 = vadd.f32 %v5491_v23, %v2465_v8  ;;  %v3667_v48 = vpop.f32.mrb[58].mxu0  ;;  %v2627_v60 = vrot.slane %v2626_v35, 2  ;;  %v2648_v3 = vrot.slane %v2647_v16, 2 }
 0x4da   :  { %v2633_v52 = vadd.f32 %v2632_v38, %v2631_v34  ;;  %v2477_v53 = vadd.f32 %v3667_v48, %v5491_v23  ;;  %v2468_v6 = vpop.f32.mrb[59].mxu0  ;;  %v2666_v12 = vsel %vm413_vm0, %v2474_v26, 0.0  ;;  %v2609_v13 = vadd.f32 %v2608_v42, %v2607_v43 }
 0x4db   :  { %v2643_v51 = vrot.slane %v2642_v61, 1  ;;  %v2652_v32 = vsel %vm413_vm0, %v2466_v10, 0.0  ;;  %v2628_v63 = vadd.f32 %v2627_v60, %v2626_v35  ;;  %v2649_v19 = vadd.f32 %v2648_v3, %v2647_v16 }
 0x4dc   :  { %v2634_v7 = vrot.slane %v2633_v52, 2  ;;  %v2667_v22 = vrot.slane %v2666_v12, 4  ;;  %v2653_v37 = vrot.slane %v2652_v32, 4  ;;  %v2673_v30 = vsel %vm413_vm0, %v2477_v53, 0.0 }
 0x4dd   :  { %v2629_v33 = vrot.slane %v2628_v63, 1  ;;  %v2650_v9 = vrot.slane %v2649_v19, 1  ;;  %v2674_v0 = vrot.slane %v2673_v30, 4  ;;  %v2469_v31 = vadd.f32 %v5491_v23, %v2468_v6 }
 0x4de   :  { %v2635_v45 = vadd.f32 %v2634_v7, %v2633_v52  ;;  %v2668_v49 = vadd.f32 %v2667_v22, %v2666_v12  ;;  %v2654_v57 = vadd.f32 %v2653_v37, %v2652_v32  ;;  %v2644_v36 = vadd.f32 %v2643_v51, %v2642_v61 }
 0x4df   :  { %v3670_v46 = vpop.f32.mrb[60].mxu0  ;;  %v2630_v54 = vadd.f32 %v2629_v33, %v2628_v63  ;;  %v2675_v55 = vadd.f32 %v2674_v0, %v2673_v30  ;;  %v2659_v5 = vsel %vm413_vm0, %v2469_v31, 0.0  ;;  %v2651_v56 = vadd.f32 %v2650_v9, %v2649_v19 }
 0x4e0   :  { %v2636_v39 = vrot.slane %v2635_v45, 1  ;;  %v2669_v24 = vrot.slane %v2668_v49, 2  ;;  %v2481_v59 = vpop.f32.mrb[61].mxu0  ;;  %v2655_v18 = vrot.slane %v2654_v57, 2  ;;  %v2490_v27 = vadd.f32 %v3670_v46, %v5491_v23 }
 0x4e1   :  { %v3671_v58 = vpop.f32.mrb[62].mxu0  ;;  %v2752_v62 = vmul.f32 0.033333335, %v2630_v54  ;;  %v2676_v17 = vrot.slane %v2675_v55, 2  ;;  %v2660_v34 = vrot.slane %v2659_v5, 4  ;;  %v2482_v35 = vadd.f32 %v5491_v23, %v2481_v59 }
 0x4e2   :  { %v2637_v14 = vadd.f32 %v2636_v39, %v2635_v45  ;;  %v2670_v2 = vadd.f32 %v2669_v24, %v2668_v49  ;;  %v2484_v50 = vpop.f32.mrb[63].mxu0  ;;  %v2656_v41 = vadd.f32 %v2655_v18, %v2654_v57  ;;  %v2694_v20 = vsel %vm413_vm0, %v2490_v27, 0.0 }
 0x4e3   :  { %v2695_v28 = vrot.slane %v2694_v20, 4  ;;  %v2677_v38 = vadd.f32 %v2676_v17, %v2675_v55  ;;  %v2661_v8 = vadd.f32 %v2660_v34, %v2659_v5  ;;  %v2493_v25 = vadd.f32 %v3671_v58, %v5491_v23 }
 0x4e4   :  { %v2753_v43 = vmul.f32 0.033333335, %v2637_v14  ;;  %v2671_v21 = vrot.slane %v2670_v2, 1  ;;  %v2657_v16 = vrot.slane %v2656_v41, 1  ;;  %v2680_v48 = vsel %vm413_vm0, %v2482_v35, 0.0 }
 0x4e5   :  { %v2696_v10 = vadd.f32 %v2695_v28, %v2694_v20  ;;  %v2623_v60 = vadd.f32 %v2622_v4, %v5543_v44  ;;  %v2749_v3 = vmul.f32 0.033333335, %v2609_v13  ;;  %v2662_v52 = vrot.slane %v2661_v8, 2 }
 0x4e6   :  { %v5571_v61 = vsel %vm2800_vm2, %v2753_v43, %v2752_v62  ;;  %v2672_v26 = vadd.f32 %v2671_v21, %v2670_v2  ;;  %v2681_v53 = vrot.slane %v2680_v48, 4  ;;  %v5577_v42 = vmul.f32 0.033333335, %v2644_v36 }
 0x4e7   :  { %v3674_v6 = vpop.f32.mrb[64].mxu0  ;;  %v2697_v51 = vrot.slane %v2696_v10, 2  ;;  %v2701_v12 = vsel %vm413_vm0, %v2493_v25, 0.0  ;;  %v2485_v32 = vadd.f32 %v5491_v23, %v2484_v50  ;;  %v5581_v19 = vmul.f32 0.033333335, %v2651_v56 }
 0x4e8   :  { %v2497_v63 = vpop.f32.mrb[65].mxu0  ;;  %v2658_v7 = vadd.f32 %v2657_v16, %v2656_v41  ;;  %v2663_v22 = vadd.f32 %v2662_v52, %v2661_v8  ;;  %v2682_v37 = vadd.f32 %v2681_v53, %v2680_v48  ;;  %v5583_v33 = vmul.f32 0.033333335, %v2672_v26 }
 0x4e9   :  { %v3675_v30 = vpop.f32.mrb[66].mxu0  ;;  %v2678_v44 = vrot.slane %v2677_v38, 1  ;;  %v2702_v4 = vrot.slane %v2701_v12, 4  ;;  %v2687_v9 = vsel %vm413_vm0, %v2485_v32, 0.0  ;;  %v2698_v49 = vadd.f32 %v2697_v51, %v2696_v10 }
 0x4ea   :  { %v2500_v45 = vpop.f32.mrb[67].mxu0  ;;  %v2683_v13 = vrot.slane %v2682_v37, 2  ;;  %v2688_v57 = vrot.slane %v2687_v9, 4  ;;  %v2815_v0 = vsel %vm2802_vm3, %v5548_v1, %v5538_v11  ;;  %v2664_v31 = vrot.slane %v2663_v22, 1 }
 0x4eb   :  { %v2703_v46 = vadd.f32 %v2702_v4, %v2701_v12  ;;  %v2816_v36 = vsel %vm2804_vm4, %v5551_v29, %v2815_v0  ;;  %v2506_v54 = vadd.f32 %v3674_v6, %v5491_v23  ;;  %v2756_v39 = vmul.f32 0.033333335, %v2658_v7 }
 0x4ec   :  { %v2684_v24 = vadd.f32 %v2683_v13, %v2682_v37  ;;  %v2689_v59 = vadd.f32 %v2688_v57, %v2687_v9  ;;  %v2817_v18 = vsel %vm2806_vm5, %v5561_v40, %v2816_v36  ;;  %v2751_v5 = vmul.f32 0.033333335, %v2623_v60  ;;  %v3974_v40 = vld [vmem:[#allocation2 + $0x8] sm:$0xff] }
 0x4ed   :  { %v2704_v55 = vrot.slane %v2703_v46, 2  ;;  %v2818_v27 = vsel %vm2808_vm6, %v2749_v3, %v2817_v18  ;;  %v2722_v58 = vsel %vm413_vm0, %v2506_v54, 0.0  ;;  %v2699_v11 = vrot.slane %v2698_v49, 1 }
 0x4ee   :  { %v2685_v1 = vrot.slane %v2684_v24, 1  ;;  %v2690_v62 = vrot.slane %v2689_v59, 2  ;;  %v2819_v29 = vsel %vm2810_vm7, %v5559_v15, %v2818_v27  ;;  %v2665_v56 = vadd.f32 %v2664_v31, %v2663_v22 }
 0x4ef   :  { %v2705_v14 = vadd.f32 %v2704_v55, %v2703_v46  ;;  %v2820_v2 = vsel %vm2812_vm8, %v2751_v5, %v2819_v29  ;;  %v2723_v50 = vrot.slane %v2722_v58, 4  ;;  %v2498_v20 = vadd.f32 %v5491_v23, %v2497_v63  ;;  %v3975_v55 = vld [vmem:[#allocation2 + $0x10] sm:$0xff] }
 0x4f0   :  { %v2686_v41 = vadd.f32 %v2685_v1, %v2684_v24  ;;  %v2691_v17 = vadd.f32 %v2690_v62, %v2689_v59  ;;  %v5599_v34 = vadd.f32 %v3974_v40, %v2820_v2  ;;  %v2509_v28 = vadd.f32 %v3675_v30, %v5491_v23 }
 0x4f1   :  { %v2706_v43 = vrot.slane %v2705_v14, 1  ;;  %v2724_v21 = vadd.f32 %v2723_v50, %v2722_v58  ;;  %v2501_v35 = vadd.f32 %v5491_v23, %v2500_v45  ;;  %v2679_v16 = vadd.f32 %v2678_v44, %v2677_v38 }
 0x4f2   :  { %v2692_v15 = vrot.slane %v2691_v17, 1  ;;  %v2848_v8 = vsel %vm413_vm0, %v5599_v34, 0.0  ;;  %v2708_v25 = vsel %vm413_vm0, %v2498_v20, 0.0  ;;  %v2700_v26 = vadd.f32 %v2699_v11, %v2698_v49  ;;  %v3976_v20 = vld [vmem:[#allocation2 + $0x18] sm:$0xff] }
 0x4f3   :  { %2849 = vadd.xlane.f32.xlu0 %v2848_v8  ;;  %v2725_v10 = vrot.slane %v2724_v21, 2  ;;  %v2709_v48 = vrot.slane %v2708_v25, 4  ;;  %v2729_v60 = vsel %vm413_vm0, %v2509_v28, 0.0  ;;  %v2757_v3 = vmul.f32 0.033333335, %v2665_v56 }
 0x4f4   :  { %v2693_v52 = vadd.f32 %v2692_v15, %v2691_v17  ;;  %v2730_v53 = vrot.slane %v2729_v60, 4  ;;  %v2715_v6 = vsel %vm413_vm0, %v2501_v35, 0.0  ;;  %v2760_v51 = vmul.f32 0.033333335, %v2686_v41 }
 0x4f5   :  { %v2707_v23 = vadd.f32 %v2706_v43, %v2705_v14  ;;  %v2710_v38 = vadd.f32 %v2709_v48, %v2708_v25  ;;  %v2716_v12 = vrot.slane %v2715_v6, 4  ;;  %v2726_v63 = vadd.f32 %v2725_v10, %v2724_v21  ;;  %v3811_v25 = vld [vmem:[#allocation25] sm:$0xff]  }
 0x4f6   :  { %v2761_v32 = vmul.f32 0.033333335, %v2693_v52  ;;  %v2731_v7 = vadd.f32 %v2730_v53, %v2729_v60  ;;  %v2822_v22 = vsel %vm2802_vm3, %v5577_v42, %v5571_v61  ;;  %v2762_v37 = vmul.f32 0.033333335, %v2700_v26  ;;  %3676 = vmatprep.subr.bf16.mxu1 %v3811_v25 }
 0x4f7   :  { %v2711_v30 = vrot.slane %v2710_v38, 2  ;;  %v2717_v44 = vadd.f32 %v2716_v12, %v2715_v6  ;;  %v2823_v4 = vsel %vm2804_vm4, %v5581_v19, %v2822_v22  ;;  %v2759_v49 = vmul.f32 0.033333335, %v2679_v16  ;;  %3677 = vmatpush3.bf16.msra.mxu1 %v3811_v25  ;;  %v3814_v22 = vld [vmem:[#allocation28 + $0x8] sm:$0xff]  }
 0x4f8   :  { %v2828_v9 = vsel %vm2800_vm2, %v2761_v32, %v2760_v51  ;;  %v2732_v45 = vrot.slane %v2731_v7, 2  ;;  %v2824_v13 = vsel %vm2806_vm5, %v2756_v39, %v2823_v4  ;;  %v2763_v57 = vmul.f32 0.033333335, %v2707_v23 }
 0x4f9   :  { %v2712_v0 = vadd.f32 %v2711_v30, %v2710_v38  ;;  %v2718_v31 = vrot.slane %v2717_v44, 2  ;;  %v2825_v46 = vsel %vm2808_vm6, %v2757_v3, %v2824_v13  ;;  %v2727_v36 = vrot.slane %v2726_v63, 1  ;;  %v3816_v30 = vld [vmem:[#allocation28 + $0x18] sm:$0xff]  }
 0x4fa   :  { %v2733_v54 = vadd.f32 %v2732_v45, %v2731_v7  ;;  %v2826_v61 = vsel %vm2810_vm7, %v5583_v33, %v2825_v46  ;;  %v2829_v42 = vsel %vm2802_vm3, %v2762_v37, %v2828_v9  ;;  %v3812_v7 = vld [vmem:[#allocation25 + $0x8] sm:$0xff]   ;;  %v3404_v46 = vld [vmem:[#allocation22] ss:$0 sm:$0xff] }
 0x4fb   :  { %v2713_v24 = vrot.slane %v2712_v0, 1  ;;  %v2719_v19 = vadd.f32 %v2718_v31, %v2717_v44  ;;  %v2827_v59 = vsel %vm2812_vm8, %v2759_v49, %v2826_v61  ;;  %v2830_v39 = vsel %vm2804_vm4, %v2763_v57, %v2829_v42  ;;  %3678 = vmatprep.subr.bf16.mxu1 %v3812_v7  ;;  %v3815_v37 = vld [vmem:[#allocation28 + $0x10] sm:$0xff]  }
 0x4fc   :  { %v2734_v18 = vrot.slane %v2733_v54, 1  ;;  %v2841_v5 = vadd.f32 %v3975_v55, %v2827_v59  ;;  %v2728_v11 = vadd.f32 %v2727_v36, %v2726_v63  ;;  %3679 = vmatpush3.bf16.msra.mxu1 %v3812_v7 }
 0x4fd   :  { %v2714_v27 = vadd.f32 %v2713_v24, %v2712_v0  ;;  %v2720_v58 = vrot.slane %v2719_v19, 1 }
 0x4fe   :  { %v2851_v1 = vsel %vm413_vm0, %v2841_v5, 0.0  ;;  %v2735_v29 = vadd.f32 %v2734_v18, %v2733_v54  ;;  %v2766_v2 = vmul.f32 0.033333335, %v2728_v11 }
 0x4ff   :  { %v2764_v62 = vmul.f32 0.033333335, %v2714_v27  ;;  %v2721_v56 = vadd.f32 %v2720_v58, %v2719_v19  ;;  %2852 = vadd.xlane.f32.xlu1 %v2851_v1  ;;  %v3405_v19 = vld [vmem:[#allocation23] ss:$0 sm:$0xff] }
 0x500   :  { %v2767_v50 = vmul.f32 0.033333335, %v2735_v29 }
 0x501   :  { %v2765_v33 = vmul.f32 0.033333335, %v2721_v56  ;;  %v2831_v14 = vsel %vm2806_vm5, %v2764_v62, %v2830_v39 }
 0x503   :  { %v2832_v41 = vsel %vm2808_vm6, %v2765_v33, %v2831_v14 }
 0x504   :  { %v2833_v17 = vsel %vm2810_vm7, %v2766_v2, %v2832_v41  ;;  %v3817_v41 = vld [vmem:[#allocation28 + $0x20] sm:$0xff]  }
 0x505   :  { %v2834_v40 = vsel %vm2812_vm8, %v2767_v50, %v2833_v17  ;;  %v3818_v17 = vld [vmem:[#allocation28 + $0x28] sm:$0xff]  }
 0x506   :  { %v2842_v43 = vadd.f32 %v3976_v20, %v2834_v40  ;;  %v3819_v40 = vld [vmem:[#allocation28 + $0x30] sm:$0xff]   ;;  %v3820_v20 = vld [vmem:[#allocation28 + $0x38] sm:$0xff]  }
 0x508   :  { %v2854_v21 = vsel %vm413_vm0, %v2842_v43, 0.0 }
 0x509   :  { %2855 = vadd.xlane.f32.xlu1 %v2854_v21 }
 0x558   :  { %v2847_v28 = vpop.xlane.xlu0 %2846 }
 0x559   :  { %v2858_v35 = vmul.f32 0.03125, %v2847_v28 }
 0x55b   :  { %v2862_v16 = vsub.f32 %v5524_v47, %v2858_v35 }
 0x55d   :  { %v2866_v15 = vmul.f32 %v2862_v16, %v2862_v16 }
 0x55f   :  { %v2870_v8 = vsel %vm413_vm0, %v2866_v15, 0.0 }
 0x560   :  { %2871 = vadd.xlane.f32.xlu0 %v2870_v8 }
 0x580   :  { %v2850_v26 = vpop.xlane.xlu0 %2849 }
 0x581   :  { %v2859_v10 = vmul.f32 0.03125, %v2850_v26 }
 0x583   :  { %v2863_v48 = vsub.f32 %v5599_v34, %v2859_v10  ;;  %v3813_v34 = vld [vmem:[#allocation28] sm:$0xff]  }
 0x584   :  { %3684 = vmatprep.subr.bf16.mxu0 %v3813_v34 }
 0x585   :  { %v2867_v60 = vmul.f32 %v2863_v48, %v2863_v48  ;;  %3685 = vmatpush3.bf16.msra.mxu0 %v3813_v34 }
 0x586   :  { %3686 = vmatprep.subr.bf16.mxu0 %v3814_v22 }
 0x587   :  { %v2873_v3 = vsel %vm413_vm0, %v2867_v60, 0.0 }
 0x588   :  { %2874 = vadd.xlane.f32.xlu1 %v2873_v3 }
 0x589   :  { %3687 = vmatpush3.bf16.msra.mxu0 %v3814_v22 }
 0x58a   :  { %3688 = vmatprep.subr.bf16.mxu0 %v3815_v37 }
 0x58c   :  { %v2853_v52 = vpop.xlane.xlu1 %2852 }
 0x58d   :  { %v2860_v53 = vmul.f32 0.03125, %v2853_v52  ;;  %3689 = vmatpush3.bf16.msra.mxu0 %v3815_v37 }
 0x58e   :  { %3690 = vmatprep.subr.bf16.mxu0 %v3816_v30 }
 0x58f   :  { %v2864_v6 = vsub.f32 %v2841_v5, %v2860_v53 }
 0x591   :  { %v2868_v51 = vmul.f32 %v2864_v6, %v2864_v6  ;;  %3691 = vmatpush3.bf16.msra.mxu0 %v3816_v30 }
 0x592   :  { %3692 = vmatprep.subr.bf16.mxu0 %v3817_v41 }
 0x593   :  { %v2876_v47 = vsel %vm413_vm0, %v2868_v51, 0.0 }
 0x594   :  { %2877 = vadd.xlane.f32.xlu0 %v2876_v47 }
 0x595   :  { %3693 = vmatpush3.bf16.msra.mxu0 %v3817_v41 }
 0x596   :  { %v2856_v23 = vpop.xlane.xlu1 %2855  ;;  %3694 = vmatprep.subr.bf16.mxu0 %v3818_v17 }
 0x597   :  { %v2861_v38 = vmul.f32 0.03125, %v2856_v23 }
 0x599   :  { %v2865_v12 = vsub.f32 %v2842_v43, %v2861_v38  ;;  %3695 = vmatpush3.bf16.msra.mxu0 %v3818_v17  ;;  %v3406_v43 = vld [vmem:[#allocation26] ss:$0 sm:$0xff] }
 0x59a   :  { %3696 = vmatprep.subr.bf16.mxu0 %v3819_v40 }
 0x59b   :  { %v2869_v32 = vmul.f32 %v2865_v12, %v2865_v12 }
 0x59d   :  { %v2879_v63 = vsel %vm413_vm0, %v2869_v32, 0.0  ;;  %3697 = vmatpush3.bf16.msra.mxu0 %v3819_v40 }
 0x59e   :  { %2880 = vadd.xlane.f32.xlu1 %v2879_v63  ;;  %3698 = vmatprep.subr.bf16.mxu0 %v3820_v20 }
 0x5a1   :  { %3699 = vmatpush3.bf16.msra.mxu0 %v3820_v20 }
 0x5ed   :  { %v2872_v44 = vpop.xlane.xlu0 %2871 }
 0x5ee   :  { %v2882_v4 = vmul.f32 0.03125, %v2872_v44 }
 0x5f0   :  { %v2886_v9 = vadd.f32 1e-05, %v2882_v4 }
 0x5f2   :  { %3949 = vrsqrt.f32 %v2886_v9 }
 0x5fc   :  { %v3950_v57 = vpop.eup %3949 }
 0x5fd   :  { %v2894_v0 = vmul.f32 %v3950_v57, %v2862_v16 }
 0x5ff   :  { %v2904_v42 = vmul.f32 %v3404_v46, %v2894_v0 }
 0x601   :  { %v5634_v18 = vadd.f32 %v3405_v19, %v2904_v42 }
 0x615   :  { %v2875_v45 = vpop.xlane.xlu1 %2874 }
 0x616   :  { %v2883_v49 = vmul.f32 0.03125, %v2875_v45 }
 0x618   :  { %v2887_v13 = vadd.f32 1e-05, %v2883_v49 }
 0x61a   :  { %3951 = vrsqrt.f32 %v2887_v13 }
 0x621   :  { %v2878_v31 = vpop.xlane.xlu0 %2877 }
 0x622   :  { %v2884_v36 = vmul.f32 0.03125, %v2878_v31 }
 0x624   :  { %v3952_v54 = vpop.eup %3951  ;;  %v2888_v24 = vadd.f32 1e-05, %v2884_v36 }
 0x625   :  { %v2895_v61 = vmul.f32 %v3952_v54, %v2863_v48 }
 0x626   :  { %3953 = vrsqrt.f32 %v2888_v24 }
 0x627   :  { %v2905_v59 = vmul.f32 %v3404_v46, %v2895_v61 }
 0x629   :  { %v5636_v55 = vadd.f32 %v3405_v19, %v2905_v59  ;;  %v3411_v59 = vld [vmem:[#allocation29] ss:$0 sm:$0xff] }
 0x62b   :  { %v2918_v5 = vpack.c.bf16 %v5636_v55, %v5634_v18  ;;  %v2881_v39 = vpop.xlane.xlu1 %2880 }
 0x62c   :  { %v2885_v27 = vmul.f32 0.03125, %v2881_v39 }
 0x62d   :  { %3680 = vmatprep.mubr.msk.bf16.mxu1 %vm413_vm0, %v2918_v5 }
 0x62e   :  { %v2889_v58 = vadd.f32 1e-05, %v2885_v27 }
 0x630   :  { %3955 = vrsqrt.f32 %v2889_v58  ;;  %v3954_v11 = vpop.eup %3953 }
 0x631   :  { %v2896_v1 = vmul.f32 %v3954_v11, %v2864_v6 }
 0x633   :  { %v2906_v29 = vmul.f32 %v3404_v46, %v2896_v1 }
 0x635   :  { %v5641_v14 = vadd.f32 %v3405_v19, %v2906_v29 }
 0x63a   :  { %v3956_v62 = vpop.eup %3955 }
 0x63b   :  { %v2897_v56 = vmul.f32 %v3956_v62, %v2865_v12 }
 0x63d   :  { %v2907_v33 = vmul.f32 %v3404_v46, %v2897_v56 }
 0x63f   :  { %v5643_v2 = vadd.f32 %v3405_v19, %v2907_v33  ;;  %v4488_v19 = vmov 0  }
 0x640   :  { %3764 = vset.pattern.permute.xlu1 %v4488_v19  ;;  %3763 = vset.pattern.permute.xlu0 %v4488_v19 }
 0x641   :  { %v2919_v50 = vpack.c.bf16 %v5643_v2, %v5641_v14 }
 0x643   :  { %3681 = vmatmul.mubr.msk.bf16.vlgmr.msra.gmra.mrb[32].mxu1 %vm413_vm0, %v2919_v50 }
 0x716   :  { %v3682_v21 = vpop.f32.mrb[32].mxu1 }
 0x717   :  { %v2992_v28 = vadd.f32 %v3682_v21, %v3406_v43  ;;  %v2983_v35 = vpop.f32.mrb[33].mxu1  ;;  %v3153_v21 = vld [vmem:[#allocation8 + $0x8] sm:$0xff] }
 0x718   :  { %v2984_v16 = vadd.f32 %v3406_v43, %v2983_v35  ;;  %v3683_v15 = vpop.f32.mrb[34].mxu1 }
 0x719   :  { %v3000_v8 = vmul.f32 %v2992_v28, %v2992_v28  ;;  %v2995_v25 = vadd.f32 %v3683_v15, %v3406_v43  ;;  %v2986_v26 = vpop.f32.mrb[35].mxu1  ;;  %v3004_v45 = vmul.f32 0.5, %v2992_v28 }
 0x71a   :  { %v2998_v10 = vmul.f32 %v2984_v16, %v2984_v16  ;;  %v2987_v48 = vadd.f32 %v3406_v43, %v2986_v26  ;;  %v3002_v57 = vmul.f32 0.5, %v2984_v16 }
 0x71b   :  { %v3008_v60 = vmul.f32 0.035677407, %v3000_v8  ;;  %v3001_v3 = vmul.f32 %v2995_v25, %v2995_v25  ;;  %v3005_v49 = vmul.f32 0.5, %v2995_v25 }
 0x71c   :  { %v3006_v52 = vmul.f32 0.035677407, %v2998_v10  ;;  %v2999_v53 = vmul.f32 %v2987_v48, %v2987_v48  ;;  %v3003_v0 = vmul.f32 0.5, %v2987_v48 }
 0x71d   :  { %v3012_v6 = vadd.f32 0.7978846, %v3008_v60  ;;  %v3009_v51 = vmul.f32 0.035677407, %v3001_v3 }
 0x71e   :  { %v3010_v47 = vadd.f32 0.7978846, %v3006_v52  ;;  %v3007_v23 = vmul.f32 0.035677407, %v2999_v53 }
 0x71f   :  { %v3016_v38 = vmul.f32 %v3012_v6, %v2992_v28  ;;  %v3013_v12 = vadd.f32 0.7978846, %v3009_v51 }
 0x720   :  { %v3014_v32 = vmul.f32 %v3010_v47, %v2984_v16  ;;  %v3011_v63 = vadd.f32 0.7978846, %v3007_v23 }
 0x721   :  { %3957 = vtanh.f32 %v3016_v38  ;;  %v3017_v7 = vmul.f32 %v3013_v12, %v2995_v25  ;;  %v3155_v38 = vld [vmem:[#allocation8 + $0x18] sm:$0xff]  ;;  %v3152_v12 = vld [vmem:[#allocation8] sm:$0xff] }
 0x722   :  { %3959 = vtanh.f32 %v3014_v32  ;;  %v3015_v34 = vmul.f32 %v3011_v63, %v2987_v48 }
 0x723   :  { %3961 = vtanh.f32 %v3017_v7 }
 0x724   :  { %3963 = vtanh.f32 %v3015_v34 }
 0x72b   :  { %v3958_v22 = vpop.eup %3957 }
 0x72c   :  { %v3960_v37 = vpop.eup %3959  ;;  %v3024_v30 = vadd.f32 1.0, %v3958_v22 }
 0x72d   :  { %v3962_v44 = vpop.eup %3961  ;;  %v3022_v4 = vadd.f32 1.0, %v3960_v37 }
 0x72e   :  { %v3964_v9 = vpop.eup %3963  ;;  %v3025_v13 = vadd.f32 1.0, %v3962_v44  ;;  %v3028_v46 = vmul.f32 %v3024_v30, %v3004_v45 }
 0x72f   :  { %v3023_v31 = vadd.f32 1.0, %v3964_v9  ;;  %v3026_v54 = vmul.f32 %v3022_v4, %v3002_v57 }
 0x730   :  { %v3029_v36 = vmul.f32 %v3025_v13, %v3005_v49 }
 0x731   :  { %v3027_v61 = vmul.f32 %v3023_v31, %v3003_v0  ;;  %v3420_v31 = vld [vmem:[#allocation31] ss:$0 sm:$0xff] }
 0x732   :  { %v3031_v42 = vpack.c.bf16 %v3029_v36, %v3028_v46 }
 0x733   :  { %v3030_v24 = vpack.c.bf16 %v3027_v61, %v3026_v54  ;;  %v3421_v54 = vld [vmem:[#allocation32] ss:$0 sm:$0xff] }
 0x735   :  { %3700 = vmatprep.mubr.bf16.mxu0 %v3030_v24 }
 0x736   :  { %3701 = vmatmul.mubr.bf16.vlgmr.msra.gmra.mrb[68].mxu0 %v3031_v42 }
 0x809   :  { %v3702_v5 = vpop.f32.mrb[68].mxu0 }
 0x80a   :  { %v3137_v39 = vpop.f32.mrb[69].mxu0  ;;  %v3146_v27 = vadd.f32 %v3702_v5, %v3411_v59 }
 0x80b   :  { %v3138_v58 = vadd.f32 %v3411_v59, %v3137_v39  ;;  %v3703_v11 = vpop.f32.mrb[70].mxu0 }
 0x80c   :  { %v3140_v1 = vpop.f32.mrb[71].mxu0  ;;  %v3149_v62 = vadd.f32 %v3703_v11, %v3411_v59  ;;  %v3158_v41 = vadd.f32 %v3146_v27, %v5641_v14 }
 0x80d   :  { %v3141_v29 = vadd.f32 %v3411_v59, %v3140_v1  ;;  %v3156_v56 = vadd.f32 %v3138_v58, %v5634_v18  ;;  %v3154_v18 = vld [vmem:[#allocation8 + $0x10] sm:$0xff] }
 0x80e   :  { %v3159_v40 = vadd.f32 %v3149_v62, %v5643_v2  ;;  %v3168_v20 = vsel %vm413_vm0, %v3158_v41, 0.0 }
 0x80f   :  { %v3162_v33 = vsel %vm413_vm0, %v3156_v56, 0.0  ;;  %v3157_v50 = vadd.f32 %v3141_v29, %v5636_v55 }
 0x810   :  { %3163 = vadd.xlane.f32.xlu0 %v3162_v33  ;;  %v3171_v43 = vsel %vm413_vm0, %v3159_v40, 0.0 }
 0x811   :  { %v3165_v17 = vsel %vm413_vm0, %v3157_v50, 0.0 }
 0x812   :  { %3166 = vadd.xlane.f32.xlu1 %v3165_v17 }
 0x814   :  { %3169 = vadd.xlane.f32.xlu0 %v3168_v20 }
 0x816   :  { %3172 = vadd.xlane.f32.xlu1 %v3171_v43 }
 0x827   :  { %3241 = vperm.xlu1 %3764, %v3153_v21  }
 0x82b   :  { %3246 = vperm.xlu1 %3764, %v3154_v18  }
 0x89d   :  { %v3164_v28 = vpop.xlane.xlu0 %3163 }
 0x89e   :  { %v3174_v35 = vmul.f32 0.03125, %v3164_v28 }
 0x89f   :  { %v3167_v55 = vpop.xlane.xlu1 %3166 }
 0x8a0   :  { %v3175_v16 = vmul.f32 0.03125, %v3167_v55  ;;  %v3178_v25 = vsub.f32 %v3156_v56, %v3174_v35 }
 0x8a1   :  { %v3170_v14 = vpop.xlane.xlu0 %3169 }
 0x8a2   :  { %v3176_v15 = vmul.f32 0.03125, %v3170_v14  ;;  %v3179_v10 = vsub.f32 %v3157_v50, %v3175_v16  ;;  %v3182_v53 = vmul.f32 %v3178_v25, %v3178_v25 }
 0x8a3   :  { %v3173_v8 = vpop.xlane.xlu1 %3172 }
 0x8a4   :  { %v3180_v2 = vsub.f32 %v3158_v41, %v3176_v15  ;;  %v3177_v26 = vmul.f32 0.03125, %v3173_v8  ;;  %v3183_v51 = vmul.f32 %v3179_v10, %v3179_v10  ;;  %v3186_v47 = vsel %vm413_vm0, %v3182_v53, 0.0 }
 0x8a6   :  { %v3181_v48 = vsub.f32 %v3159_v40, %v3177_v26  ;;  %v3184_v60 = vmul.f32 %v3180_v2, %v3180_v2  ;;  %v3189_v23 = vsel %vm413_vm0, %v3183_v51, 0.0 }
 0x8a7   :  { %v3242_v32 = vpop.permute.xlu1 %3241 }
 0x8a8   :  { %v3192_v3 = vsel %vm413_vm0, %v3184_v60, 0.0  ;;  %v3185_v52 = vmul.f32 %v3181_v48, %v3181_v48 }
 0x8a9   :  { %3193 = vadd.xlane.f32.xlu0 %v3192_v3 }
 0x8aa   :  { %v3195_v6 = vsel %vm413_vm0, %v3185_v52, 0.0 }
 0x8ab   :  { %3196 = vadd.xlane.f32.xlu1 %v3195_v6  ;;  %v3247_v63 = vpop.permute.xlu1 %3246 }
 0x8ad   :  { %3187 = vadd.xlane.f32.xlu0 %v3186_v47 }
 0x8af   :  { %3190 = vadd.xlane.f32.xlu1 %v3189_v23 }
 0x8c0   :  { %3251 = vperm.xlu1 %3764, %v3155_v38  }
 0x8c3   :  { %3236 = vperm.xlu0 %3763, %v3152_v12  }
 0x936   :  { %v3194_v7 = vpop.xlane.xlu0 %3193 }
 0x937   :  { %v3200_v34 = vmul.f32 0.03125, %v3194_v7 }
 0x938   :  { %v3197_v22 = vpop.xlane.xlu1 %3196 }
 0x939   :  { %v3204_v37 = vadd.f32 1e-05, %v3200_v34  ;;  %v3201_v30 = vmul.f32 0.03125, %v3197_v22 }
 0x93a   :  { %v3188_v44 = vpop.xlane.xlu0 %3187 }
 0x93b   :  { %3965 = vrsqrt.f32 %v3204_v37  ;;  %v3205_v4 = vadd.f32 1e-05, %v3201_v30  ;;  %v3198_v9 = vmul.f32 0.03125, %v3188_v44 }
 0x93c   :  { %v3191_v45 = vpop.xlane.xlu1 %3190 }
 0x93d   :  { %3967 = vrsqrt.f32 %v3205_v4  ;;  %v3202_v49 = vadd.f32 1e-05, %v3198_v9  ;;  %v3199_v13 = vmul.f32 0.03125, %v3191_v45 }
 0x93f   :  { %3969 = vrsqrt.f32 %v3202_v49  ;;  %v3203_v57 = vadd.f32 1e-05, %v3199_v13 }
 0x940   :  { %v3252_v62 = vpop.permute.xlu1 %3251 }
 0x941   :  { %3971 = vrsqrt.f32 %v3203_v57 }
 0x942   :  { %v3237_v29 = vpop.permute.xlu0 %3236 }
 0x945   :  { %v3966_v0 = vpop.eup %3965 }
 0x946   :  { %v3212_v46 = vmul.f32 %v3966_v0, %v3180_v2 }
 0x947   :  { %v3968_v36 = vpop.eup %3967 }
 0x948   :  { %v3213_v61 = vmul.f32 %v3968_v36, %v3181_v48  ;;  %v3222_v42 = vmul.f32 %v3420_v31, %v3212_v46 }
 0x949   :  { %v3970_v24 = vpop.eup %3969 }
 0x94a   :  { %v3223_v19 = vmul.f32 %v3420_v31, %v3213_v61  ;;  %v3232_v59 = vadd.f32 %v3421_v54, %v3222_v42  ;;  %v3210_v5 = vmul.f32 %v3970_v24, %v3178_v25 }
 0x94b   :  { %v3972_v39 = vpop.eup %3971 }
 0x94c   :  { %v3211_v27 = vmul.f32 %v3972_v39, %v3179_v10  ;;  %v3233_v58 = vadd.f32 %v3421_v54, %v3223_v19  ;;  %v3256_v11 = vmul.f32 %v3247_v63, %v3232_v59  ;;  %v3220_v1 = vmul.f32 %v3420_v31, %v3210_v5 }
 0x94e   :  { %v3221_v56 = vmul.f32 %v3420_v31, %v3211_v27  ;;  %v3257_v33 = vmul.f32 %v3252_v62, %v3233_v58  ;;  %3260 = vst.msk [vmem:[#allocation34 + $0x10] sm:$0xff] %vm413_vm0, %v3256_v11  ;;  %v3230_v50 = vadd.f32 %v3421_v54, %v3220_v1 }
 0x950   :  { %v3231_v41 = vadd.f32 %v3421_v54, %v3221_v56  ;;  %3261 = vst.msk [vmem:[#allocation34 + $0x18] sm:$0xff] %vm413_vm0, %v3257_v33  ;;  %v3254_v17 = vmul.f32 %v3237_v29, %v3230_v50 }
 0x952   :  { %v3255_v40 = vmul.f32 %v3242_v32, %v3231_v41  ;;  %3258 = vst.msk [vmem:[#allocation34] sm:$0xff] %vm413_vm0, %v3254_v17 }
 0x954   :  { %3259 = vst.msk [vmem:[#allocation34 + $0x8] sm:$0xff] %vm413_vm0, %v3255_v40 }
 0x955   :  { %4428 = shalt.err (!%p4425_p10)
}
 0x956   :  { %s5726_s13 = sld [smem:[#allocation54_spill]] }
 0x95c   :  { %s4429_s5 = scalar_lea.hbm %s5726_s13, 512 }
 0x95d   :  { %p4430_p11 = scmp.ne.s32.totalorder %s5726_s13, %s4429_s5  ;;  %p4433_p12 = scmp.lt.u32.totalorder %s4429_s5, %s5726_s13 }
 0x95f   :  { %p4435_p13 = pnand %p4433_p12, %p4430_p11 }
 0x961   :  { %4438 = shalt.err (!%p4435_p13)
}
 0x962   :  { %3273 = dma.vmem_to_hbm [thread:$0]  %s3268_s28, 512, %s5726_s13, [#allocation4], %s4468_s2, %s4468_s2, %s4469_s0  }
 0x963   :  { %4461 = dma.done.wait [#allocation4], 512  }
 0x964   :  { %4462 = vsyncadd [#allocation4], 4294966784 }
 0x965   :  { %3277 = vsyncpa [#allocation3], 1 }
 0x966   :  { %3278 = vsyncpa [#allocation6], 1 }
 0x967   :  { %3279 = vsyncpa [#allocation9], 1 }
 0x968   :  { %3280 = vsyncpa [#allocation12], 1 }
 0x969   :  { %3281 = vsyncpa [#allocation15], 1 }
 0x96a   :  { %3282 = vsyncpa [#allocation18], 1 }
 0x96b   :  { %3283 = vsyncpa [#allocation21], 1 }
 0x96c   :  { %3284 = vsyncpa [#allocation24], 1 }
 0x96d   :  { %3285 = vsyncpa [#allocation27], 1 }
 0x96e   :  { %3286 = vsyncpa [#allocation30], 1 }
 0x96f   :  { %3287 = vsyncpa [#allocation33], 1 }
 0x970   :  { %3288 = vsyncpa [#allocation4], 1 }

// kernel: mpnn_sequence_decoder_forward.5
= control target key start
LH: loop header
LB: loop body
LE: loop exit
PB: predicated region body
PF: predicated region fallthrough
CT: control target
= control target key end

     0   :  { %s5968_s0 = inlined_call_operand.hbm [shape: f32[32,32], index: 0, kind: input, shape index: {}]   ;;  %s5969_s1 = inlined_call_operand.hbm [shape: bf16[32,8,96], index: 1, kind: input, shape index: {}]   ;;  %s5970_s2 = inlined_call_operand.hbm [shape: bf16[32,8,32], index: 2, kind: input, shape index: {}]   ;;  %s5971_s3 = inlined_call_operand.hbm [shape: f32[32,1], index: 3, kind: input, shape index: {}]   ;;  %s5972_s4 = inlined_call_operand.hbm [shape: bf16[32,32], index: 4, kind: input, shape index: {}]   ;;  %s5973_s5 = inlined_call_operand.hbm [shape: bf16[96,32], index: 5, kind: input, shape index: {}]   ;;  %s5974_s6 = inlined_call_operand.hbm [shape: bf16[32,32], index: 6, kind: input, shape index: {}]   ;;  %s5975_s7 = inlined_call_operand.hbm [shape: f32[1,32], index: 7, kind: input, shape index: {}]   ;;  %s5976_s8 = inlined_call_operand.hbm [shape: bf16[32,32], index: 8, kind: input, shape index: {}]   ;;  %s5977_s9 = inlined_call_operand.hbm [shape: f32[1,32], index: 9, kind: input, shape index: {}]   ;;  %s5978_s10 = inlined_call_operand.hbm [shape: bf16[32,32], index: 10, kind: input, shape index: {}]   ;;  %s5979_s11 = inlined_call_operand.hbm [shape: f32[1,32], index: 11, kind: input, shape index: {}]   ;;  %s5980_s12 = inlined_call_operand.hbm [shape: f32[1,32], index: 12, kind: input, shape index: {}]   ;;  %s5981_s13 = inlined_call_operand.hbm [shape: f32[1,32], index: 13, kind: input, shape index: {}]   ;;  %s5982_s14 = inlined_call_operand.hbm [shape: bf16[32,128], index: 14, kind: input, shape index: {}]   ;;  %s5983_s15 = inlined_call_operand.hbm [shape: f32[1,128], index: 15, kind: input, shape index: {}]   ;;  %s5984_s16 = inlined_call_operand.hbm [shape: bf16[128,32], index: 16, kind: input, shape index: {}]   ;;  %s5985_s17 = inlined_call_operand.hbm [shape: f32[1,32], index: 17, kind: input, shape index: {}]   ;;  %s5986_s18 = inlined_call_operand.hbm [shape: f32[1,32], index: 18, kind: input, shape index: {}]   ;;  %s5987_s19 = inlined_call_operand.hbm [shape: f32[1,32], index: 19, kind: input, shape index: {}]   ;;  %s5988_s20 = inlined_call_operand.hbm [shape: bf16[32,128], index: 20, kind: input, shape index: {}]   ;;  %s5989_s21 = inlined_call_operand.hbm [shape: f32[1,128], index: 21, kind: input, shape index: {}]   ;;  %s5990_s22 = inlined_call_operand.hbm [shape: f32[32,32], index: 22, kind: output, shape index: {0}]   ;;  %s5991_s23 = inlined_call_operand.hbm [shape: f32[32,128], index: 23, kind: output, shape index: {1}]  }
   0x1   :  { %6007 = sst [smem:[#allocation54_spill]] %s5968_s0 }
   0x2   :  { %6008 = sst [smem:[#allocation55_spill]] %s5969_s1 }
   0x3   :  { %6009 = sst [smem:[#allocation56_spill]] %s5970_s2 }
   0x4   :  { %6010 = sst [smem:[#allocation57_spill]] %s5971_s3 }
   0x5   :  { %6011 = sst [smem:[#allocation58_spill]] %s5972_s4 }
   0x6   :  { %6012 = sst [smem:[#allocation59_spill]] %s5973_s5 }
   0x7   :  { %6013 = sst [smem:[#allocation60_spill]] %s5974_s6 }
   0x8   :  { %6014 = sst [smem:[#allocation61_spill]] %s5975_s7 }
   0x9   :  { %6015 = sst [smem:[#allocation62_spill]] %s5989_s21 }
   0xa   :  { %6016 = sst [smem:[#allocation63_spill]] %s5990_s22 }
   0xb   :  { %6017 = sst [smem:[#allocation64_spill]] %s5991_s23 }
   0xc   :  { %29 = vsyncpa [#allocation3], 0 }
   0xd   :  { %30 = vsyncpa [#allocation6], 0 }
   0xe   :  { %31 = vsyncpa [#allocation9], 0 }
   0xf   :  { %32 = vsyncpa [#allocation12], 0 }
  0x10   :  { %33 = vsyncpa [#allocation15], 0 }
  0x11   :  { %34 = vsyncpa [#allocation18], 0 }
  0x12   :  { %35 = vsyncpa [#allocation21], 0 }
  0x13   :  { %36 = vsyncpa [#allocation24], 0 }
  0x14   :  { %37 = vsyncpa [#allocation27], 0 }
  0x15   :  { %38 = vsyncpa [#allocation30], 0 }
  0x16   :  { %39 = vsyncpa [#allocation33], 0 }
  0x17   :  { %40 = vsyncpa [#allocation36], 0 }
  0x18   :  { %41 = vsyncpa [#allocation4], 0 }
  0x19   :  { %42 = vsyncpa [#allocation39], 0  ;;  %s4690_s4 = smov [#allocation5]   ;;  %s6018_s5 = sld [smem:[#allocation55_spill]] }
  0x1a   :  { %s60_s30 = sshll.u32 %s4690_s4, 4  ;;  %s61_s30 = int_to_ptr.vmem [resolvable:$true] %s60_s30 }
  0x1f   :  { %s4134_s1 = scalar_lea.hbm %s6018_s5, 2048 }
  0x20   :  { %p4135_p0 = scmp.ne.s32.totalorder %s6018_s5, %s4134_s1  ;;  %p4138_p1 = scmp.lt.u32.totalorder %s4134_s1, %s6018_s5 }
  0x22   :  { %p4140_p2 = pnand %p4138_p1, %p4135_p0 }
  0x24   :  { %4143 = shalt.err (!%p4140_p2)
}
  0x25   :  { %s4144_s7 = scalar_lea.vmem %s61_s30, 2048  ;;  %p4149_p4 = scmp.lt.s32.totalorder %s61_s30, %s61_s30 }
  0x26   :  { %p4145_p3 = scmp.ne.s32.totalorder %s61_s30, %s4144_s7  ;;  %p4150_p5 = scmp.lt.s32.totalorder %s4144_s7, %s4144_s7 }
  0x28   :  { %p4151_p6 = por %p4150_p5, %p4149_p4 }
  0x2a   :  { %p4152_p7 = pnand %p4151_p6, %p4145_p3 }
  0x2c   :  { %4155 = shalt.err (!%p4152_p7)
}
  0x2d   :  { %s4691_s28 = smov 64   ;;  %s4692_s29 = smov 4  }
  0x2e   :  { %66 = dma.hbm_to_vmem [thread:$0]  %s6018_s5, 2048, %s61_s30, [#allocation6], %s4691_s28, %s4691_s28, %s4692_s29  }
  0x2f   :  { %s4693_s4 = smov [#allocation8]   ;;  %s4694_s25 = smov [#allocation11]  }
  0x30   :  { %s84_s24 = sshll.u32 %s4693_s4, 4  ;;  %s108_s1 = sshll.u32 %s4694_s25, 4  ;;  %s85_s24 = int_to_ptr.vmem [resolvable:$true] %s84_s24  ;;  %s109_s1 = int_to_ptr.vmem [resolvable:$true] %s108_s1 }
  0x31   :  { %s6019_s6 = sld [smem:[#allocation57_spill]] }
  0x37   :  { %s4156_s27 = scalar_lea.hbm %s6019_s6, 512 }
  0x38   :  { %p4157_p8 = scmp.ne.s32.totalorder %s6019_s6, %s4156_s27  ;;  %p4160_p9 = scmp.lt.u32.totalorder %s4156_s27, %s6019_s6 }
  0x3a   :  { %p4162_p10 = pnand %p4160_p9, %p4157_p8 }
  0x3c   :  { %4165 = shalt.err (!%p4162_p10)
}
  0x3d   :  { %s4166_s30 = scalar_lea.vmem %s85_s24, 512  ;;  %p4171_p12 = scmp.lt.s32.totalorder %s85_s24, %s85_s24 }
  0x3e   :  { %p4167_p11 = scmp.ne.s32.totalorder %s85_s24, %s4166_s30  ;;  %p4172_p13 = scmp.lt.s32.totalorder %s4166_s30, %s4166_s30 }
  0x40   :  { %p4173_p0 = por %p4172_p13, %p4171_p12 }
  0x42   :  { %p4174_p1 = pnand %p4173_p0, %p4167_p11 }
  0x44   :  { %4177 = shalt.err (!%p4174_p1)
}
  0x45   :  { %s6003_s5 = smov 128   ;;  %s6005_s3 = smov 8  }
  0x46   :  { %90 = dma.hbm_to_vmem [thread:$0]  %s6019_s6, 512, %s85_s24, [#allocation9], %s6003_s5, %s6003_s5, %s6005_s3  }
  0x47   :  { %s6020_s4 = sld [smem:[#allocation59_spill]] }
  0x4d   :  { %s4178_s25 = scalar_lea.hbm %s6020_s4, 768 }
  0x4e   :  { %p4179_p2 = scmp.ne.s32.totalorder %s6020_s4, %s4178_s25  ;;  %p4182_p3 = scmp.lt.u32.totalorder %s4178_s25, %s6020_s4 }
  0x50   :  { %p4184_p4 = pnand %p4182_p3, %p4179_p2 }
  0x52   :  { %4187 = shalt.err (!%p4184_p4)
}
  0x53   :  { %s4188_s30 = scalar_lea.vmem %s109_s1, 768  ;;  %p4193_p6 = scmp.lt.s32.totalorder %s109_s1, %s109_s1 }
  0x54   :  { %p4189_p5 = scmp.ne.s32.totalorder %s109_s1, %s4188_s30  ;;  %p4194_p7 = scmp.lt.s32.totalorder %s4188_s30, %s4188_s30 }
  0x56   :  { %p4195_p8 = por %p4194_p7, %p4193_p6 }
  0x58   :  { %p4196_p9 = pnand %p4195_p8, %p4189_p5 }
  0x5a   :  { %4199 = shalt.err (!%p4196_p9)
}
  0x5b   :  { %114 = dma.hbm_to_vmem [thread:$0]  %s6020_s4, 768, %s109_s1, [#allocation12], %s4691_s28, %s4691_s28, %s4692_s29  }
  0x5c   :  { %s4697_s23 = smov [#allocation14]   ;;  %s4698_s21 = smov [#allocation17]  }
  0x5d   :  { %s133_s0 = sshll.u32 %s4697_s23, 4  ;;  %s155_s22 = sshll.u32 %s4698_s21, 4  ;;  %s134_s0 = int_to_ptr.vmem [resolvable:$true] %s133_s0  ;;  %s156_s22 = int_to_ptr.vmem [resolvable:$true] %s155_s22 }
  0x5e   :  { %s6021_s2 = sld [smem:[#allocation61_spill]] }
  0x64   :  { %s4200_s27 = scalar_lea.hbm %s6021_s2, 16 }
  0x65   :  { %p4201_p10 = scmp.ne.s32.totalorder %s6021_s2, %s4200_s27  ;;  %p4204_p11 = scmp.lt.u32.totalorder %s4200_s27, %s6021_s2 }
  0x67   :  { %p4206_p12 = pnand %p4204_p11, %p4201_p10 }
  0x69   :  { %4209 = shalt.err (!%p4206_p12)
}
  0x6a   :  { %s4210_s1 = scalar_lea.vmem %s134_s0, 16  ;;  %s4214_s4 = scalar_lea.vmem %s134_s0, 32 }
  0x6b   :  { %p4211_p13 = scmp.ne.s32.totalorder %s134_s0, %s4210_s1  ;;  %p4215_p0 = scmp.lt.s32.totalorder %s134_s0, %s134_s0 }
  0x6c   :  { %p4216_p1 = scmp.lt.s32.totalorder %s4214_s4, %s4210_s1 }
  0x6e   :  { %p4217_p2 = por %p4216_p1, %p4215_p0 }
  0x70   :  { %p4218_p3 = pnand %p4217_p2, %p4211_p13 }
  0x72   :  { %4221 = shalt.err (!%p4218_p3)
}
  0x73   :  { %136 = dma.hbm_to_vmem [thread:$0]  %s6021_s2, 16, %s134_s0, [#allocation15]  }
  0x74   :  { %s4222_s5 = scalar_lea.hbm %s5977_s9, 16 }
  0x75   :  { %p4223_p4 = scmp.ne.s32.totalorder %s5977_s9, %s4222_s5  ;;  %p4226_p5 = scmp.lt.u32.totalorder %s4222_s5, %s5977_s9 }
  0x77   :  { %p4228_p6 = pnand %p4226_p5, %p4223_p4 }
  0x79   :  { %4231 = shalt.err (!%p4228_p6)
}
  0x7a   :  { %s4232_s7 = scalar_lea.vmem %s156_s22, 16  ;;  %s4236_s30 = scalar_lea.vmem %s156_s22, 32 }
  0x7b   :  { %p4233_p7 = scmp.ne.s32.totalorder %s156_s22, %s4232_s7  ;;  %p4237_p8 = scmp.lt.s32.totalorder %s156_s22, %s156_s22 }
  0x7c   :  { %p4238_p9 = scmp.lt.s32.totalorder %s4236_s30, %s4232_s7 }
  0x7e   :  { %p4239_p10 = por %p4238_p9, %p4237_p8 }
  0x80   :  { %p4240_p11 = pnand %p4239_p10, %p4233_p7 }
  0x82   :  { %4243 = shalt.err (!%p4240_p11)
}
  0x83   :  { %158 = dma.hbm_to_vmem [thread:$0]  %s5977_s9, 16, %s156_s22, [#allocation18]  }
  0x84   :  { %s4699_s1 = smov [#allocation20]   ;;  %s4700_s24 = smov [#allocation23]  }
  0x85   :  { %s177_s4 = sshll.u32 %s4699_s1, 4  ;;  %s197_s6 = sshll.u32 %s4700_s24, 4  ;;  %s178_s4 = int_to_ptr.vmem [resolvable:$true] %s177_s4  ;;  %s198_s6 = int_to_ptr.vmem [resolvable:$true] %s197_s6 }
  0x86   :  { %s4244_s5 = scalar_lea.hbm %s5979_s11, 16 }
  0x87   :  { %p4245_p12 = scmp.ne.s32.totalorder %s5979_s11, %s4244_s5  ;;  %p4248_p13 = scmp.lt.u32.totalorder %s4244_s5, %s5979_s11 }
  0x89   :  { %p4250_p0 = pnand %p4248_p13, %p4245_p12 }
  0x8b   :  { %4253 = shalt.err (!%p4250_p0)
}
  0x8c   :  { %s4254_s9 = scalar_lea.vmem %s178_s4, 16  ;;  %s4258_s22 = scalar_lea.vmem %s178_s4, 32 }
  0x8d   :  { %p4255_p1 = scmp.ne.s32.totalorder %s178_s4, %s4254_s9  ;;  %p4259_p2 = scmp.lt.s32.totalorder %s178_s4, %s178_s4 }
  0x8e   :  { %p4260_p3 = scmp.lt.s32.totalorder %s4258_s22, %s4254_s9 }
  0x90   :  { %p4261_p4 = por %p4260_p3, %p4259_p2 }
  0x92   :  { %p4262_p5 = pnand %p4261_p4, %p4255_p1 }
  0x94   :  { %4265 = shalt.err (!%p4262_p5)
}
  0x95   :  { %180 = dma.hbm_to_vmem [thread:$0]  %s5979_s11, 16, %s178_s4, [#allocation21]  }
  0x96   :  { %s4266_s1 = scalar_lea.hbm %s5981_s13, 16 }
  0x97   :  { %p4267_p6 = scmp.ne.s32.totalorder %s5981_s13, %s4266_s1  ;;  %p4270_p7 = scmp.lt.u32.totalorder %s4266_s1, %s5981_s13 }
  0x99   :  { %p4272_p8 = pnand %p4270_p7, %p4267_p6 }
  0x9b   :  { %4275 = shalt.err (!%p4272_p8)
}
  0x9c   :  { %s4276_s3 = scalar_lea.vmem %s198_s6, 16  ;;  %s4280_s25 = scalar_lea.vmem %s198_s6, 32 }
  0x9d   :  { %p4277_p9 = scmp.ne.s32.totalorder %s198_s6, %s4276_s3  ;;  %p4281_p10 = scmp.lt.s32.totalorder %s198_s6, %s198_s6 }
  0x9e   :  { %p4282_p11 = scmp.lt.s32.totalorder %s4280_s25, %s4276_s3 }
  0xa0   :  { %p4283_p12 = por %p4282_p11, %p4281_p10 }
  0xa2   :  { %p4284_p13 = pnand %p4283_p12, %p4277_p9 }
  0xa4   :  { %4287 = shalt.err (!%p4284_p13)
}
  0xa5   :  { %200 = dma.hbm_to_vmem [thread:$0]  %s5981_s13, 16, %s198_s6, [#allocation24]  }
  0xa6   :  { %s4701_s26 = smov [#allocation26]   ;;  %s4702_s9 = smov [#allocation29]  }
  0xa7   :  { %s219_s27 = sshll.u32 %s4701_s26, 4  ;;  %s241_s22 = sshll.u32 %s4702_s9, 4  ;;  %s220_s27 = int_to_ptr.vmem [resolvable:$true] %s219_s27  ;;  %s242_s22 = int_to_ptr.vmem [resolvable:$true] %s241_s22 }
  0xa8   :  { %s4288_s0 = scalar_lea.hbm %s5983_s15, 16 }
  0xa9   :  { %p4289_p0 = scmp.ne.s32.totalorder %s5983_s15, %s4288_s0  ;;  %p4292_p1 = scmp.lt.u32.totalorder %s4288_s0, %s5983_s15 }
  0xab   :  { %p4294_p2 = pnand %p4292_p1, %p4289_p0 }
  0xad   :  { %4297 = shalt.err (!%p4294_p2)
}
  0xae   :  { %s4298_s13 = scalar_lea.vmem %s220_s27, 16  ;;  %s4302_s6 = scalar_lea.vmem %s220_s27, 32 }
  0xaf   :  { %p4299_p3 = scmp.ne.s32.totalorder %s220_s27, %s4298_s13  ;;  %p4303_p4 = scmp.lt.s32.totalorder %s220_s27, %s220_s27 }
  0xb0   :  { %p4304_p5 = scmp.lt.s32.totalorder %s4302_s6, %s4298_s13 }
  0xb2   :  { %p4305_p6 = por %p4304_p5, %p4303_p4 }
  0xb4   :  { %p4306_p7 = pnand %p4305_p6, %p4299_p3 }
  0xb6   :  { %4309 = shalt.err (!%p4306_p7)
}
  0xb7   :  { %222 = dma.hbm_to_vmem [thread:$0]  %s5983_s15, 16, %s220_s27, [#allocation27]  }
  0xb8   :  { %s4310_s11 = scalar_lea.hbm %s5985_s17, 16 }
  0xb9   :  { %p4311_p8 = scmp.ne.s32.totalorder %s5985_s17, %s4310_s11  ;;  %p4314_p9 = scmp.lt.u32.totalorder %s4310_s11, %s5985_s17 }
  0xbb   :  { %p4316_p10 = pnand %p4314_p9, %p4311_p8 }
  0xbd   :  { %4319 = shalt.err (!%p4316_p10)
}
  0xbe   :  { %s4320_s30 = scalar_lea.vmem %s242_s22, 16  ;;  %s4324_s0 = scalar_lea.vmem %s242_s22, 32 }
  0xbf   :  { %p4321_p11 = scmp.ne.s32.totalorder %s242_s22, %s4320_s30  ;;  %p4325_p12 = scmp.lt.s32.totalorder %s242_s22, %s242_s22 }
  0xc0   :  { %p4326_p13 = scmp.lt.s32.totalorder %s4324_s0, %s4320_s30 }
  0xc2   :  { %p4327_p0 = por %p4326_p13, %p4325_p12 }
  0xc4   :  { %p4328_p1 = pnand %p4327_p0, %p4321_p11 }
  0xc6   :  { %4331 = shalt.err (!%p4328_p1)
}
  0xc7   :  { %244 = dma.hbm_to_vmem [thread:$0]  %s5985_s17, 16, %s242_s22, [#allocation30]  }
  0xc8   :  { %s4703_s2 = smov [#allocation32]   ;;  %s4704_s24 = smov [#allocation2]  }
  0xc9   :  { %s261_s1 = sshll.u32 %s4703_s2, 4  ;;  %s48_s23 = sshll.u32 %s4704_s24, 4  ;;  %s262_s1 = int_to_ptr.vmem [resolvable:$true] %s261_s1  ;;  %s49_s23 = int_to_ptr.vmem [resolvable:$true] %s48_s23 }
  0xca   :  { %s4332_s21 = scalar_lea.hbm %s5987_s19, 16 }
  0xcb   :  { %p4333_p2 = scmp.ne.s32.totalorder %s5987_s19, %s4332_s21  ;;  %p4336_p3 = scmp.lt.u32.totalorder %s4332_s21, %s5987_s19 }
  0xcd   :  { %p4338_p4 = pnand %p4336_p3, %p4333_p2 }
  0xcf   :  { %4341 = shalt.err (!%p4338_p4)
}
  0xd0   :  { %s4342_s17 = scalar_lea.vmem %s262_s1, 16  ;;  %s4346_s22 = scalar_lea.vmem %s262_s1, 32 }
  0xd1   :  { %p4343_p5 = scmp.ne.s32.totalorder %s262_s1, %s4342_s17  ;;  %p4347_p6 = scmp.lt.s32.totalorder %s262_s1, %s262_s1 }
  0xd2   :  { %p4348_p7 = scmp.lt.s32.totalorder %s4346_s22, %s4342_s17 }
  0xd4   :  { %p4349_p8 = por %p4348_p7, %p4347_p6 }
  0xd6   :  { %p4350_p9 = pnand %p4349_p8, %p4343_p5 }
  0xd8   :  { %4353 = shalt.err (!%p4350_p9)
}
  0xd9   :  { %264 = dma.hbm_to_vmem [thread:$0]  %s5987_s19, 16, %s262_s1, [#allocation33]  }
  0xda   :  { %s6022_s30 = sld [smem:[#allocation54_spill]] }
  0xe0   :  { %s4354_s0 = scalar_lea.hbm %s6022_s30, 512 }
  0xe1   :  { %p4355_p10 = scmp.ne.s32.totalorder %s6022_s30, %s4354_s0  ;;  %p4358_p11 = scmp.lt.u32.totalorder %s4354_s0, %s6022_s30 }
  0xe3   :  { %p4360_p12 = pnand %p4358_p11, %p4355_p10 }
  0xe5   :  { %4363 = shalt.err (!%p4360_p12)
}
  0xe6   :  { %s4364_s13 = scalar_lea.vmem %s49_s23, 512  ;;  %p4369_p0 = scmp.lt.s32.totalorder %s49_s23, %s49_s23 }
  0xe7   :  { %p4365_p13 = scmp.ne.s32.totalorder %s49_s23, %s4364_s13  ;;  %p4370_p1 = scmp.lt.s32.totalorder %s4364_s13, %s4364_s13 }
  0xe9   :  { %p4371_p2 = por %p4370_p1, %p4369_p0 }
  0xeb   :  { %p4372_p3 = pnand %p4371_p2, %p4365_p13 }
  0xed   :  { %4375 = shalt.err (!%p4372_p3)
}
  0xee   :  { %s6023_s19 = smov 8   ;;  %s6024_s1 = smov 128  }
  0xef   :  { %54 = dma.hbm_to_vmem [thread:$0]  %s6022_s30, 512, %s49_s23, [#allocation3], %s6024_s1, %s6024_s1, %s6023_s19  }
  0xf0   :  { %s4705_s5 = smov [#allocation7]   ;;  %s4706_s25 = smov [#allocation10]  }
  0xf1   :  { %s72_s3 = sshll.u32 %s4705_s5, 4  ;;  %s96_s11 = sshll.u32 %s4706_s25, 4  ;;  %s73_s3 = int_to_ptr.vmem [resolvable:$true] %s72_s3  ;;  %s97_s11 = int_to_ptr.vmem [resolvable:$true] %s96_s11 }
  0xf2   :  { %s6025_s4 = sld [smem:[#allocation56_spill]] }
  0xf8   :  { %s4376_s26 = scalar_lea.hbm %s6025_s4, 2048 }
  0xf9   :  { %p4377_p4 = scmp.ne.s32.totalorder %s6025_s4, %s4376_s26  ;;  %p4380_p5 = scmp.lt.u32.totalorder %s4376_s26, %s6025_s4 }
  0xfb   :  { %p4382_p6 = pnand %p4380_p5, %p4377_p4 }
  0xfd   :  { %4385 = shalt.err (!%p4382_p6)
}
  0xfe   :  { %s4386_s23 = scalar_lea.vmem %s73_s3, 2048  ;;  %p4391_p8 = scmp.lt.s32.totalorder %s73_s3, %s73_s3 }
  0xff   :  { %p4387_p7 = scmp.ne.s32.totalorder %s73_s3, %s4386_s23  ;;  %p4392_p9 = scmp.lt.s32.totalorder %s4386_s23, %s4386_s23 }
 0x101   :  { %p4393_p10 = por %p4392_p9, %p4391_p8 }
 0x103   :  { %p4394_p11 = pnand %p4393_p10, %p4387_p7 }
 0x105   :  { %4397 = shalt.err (!%p4394_p11)
}
 0x106   :  { %78 = dma.hbm_to_vmem [thread:$0]  %s6025_s4, 2048, %s73_s3, [#allocation6], %s4691_s28, %s4691_s28, %s4692_s29  }
 0x107   :  { %s6026_s13 = sld [smem:[#allocation58_spill]] }
 0x10d   :  { %s4398_s6 = scalar_lea.hbm %s6026_s13, 256 }
 0x10e   :  { %p4399_p12 = scmp.ne.s32.totalorder %s6026_s13, %s4398_s6  ;;  %p4402_p13 = scmp.lt.u32.totalorder %s4398_s6, %s6026_s13 }
 0x110   :  { %p4404_p0 = pnand %p4402_p13, %p4399_p12 }
 0x112   :  { %4407 = shalt.err (!%p4404_p0)
}
 0x113   :  { %s4408_s22 = scalar_lea.vmem %s97_s11, 256  ;;  %p4413_p2 = scmp.lt.s32.totalorder %s97_s11, %s97_s11 }
 0x114   :  { %p4409_p1 = scmp.ne.s32.totalorder %s97_s11, %s4408_s22  ;;  %p4414_p3 = scmp.lt.s32.totalorder %s4408_s22, %s4408_s22 }
 0x116   :  { %p4415_p4 = por %p4414_p3, %p4413_p2 }
 0x118   :  { %p4416_p5 = pnand %p4415_p4, %p4409_p1 }
 0x11a   :  { %4419 = shalt.err (!%p4416_p5)
}
 0x11b   :  { %102 = dma.hbm_to_vmem [thread:$0]  %s6026_s13, 256, %s97_s11, [#allocation9], %s4691_s28, %s4691_s28, %s4692_s29  }
 0x11c   :  { %s4707_s26 = smov [#allocation13]   ;;  %s4708_s7 = smov [#allocation16]  }
 0x11d   :  { %s120_s9 = sshll.u32 %s4707_s26, 4  ;;  %s142_s0 = sshll.u32 %s4708_s7, 4  ;;  %s121_s9 = int_to_ptr.vmem [resolvable:$true] %s120_s9  ;;  %s143_s0 = int_to_ptr.vmem [resolvable:$true] %s142_s0 }
 0x11e   :  { %s6027_s30 = sld [smem:[#allocation60_spill]] }
 0x124   :  { %s4420_s27 = scalar_lea.hbm %s6027_s30, 256 }
 0x125   :  { %p4421_p6 = scmp.ne.s32.totalorder %s6027_s30, %s4420_s27  ;;  %p4424_p7 = scmp.lt.u32.totalorder %s4420_s27, %s6027_s30 }
 0x127   :  { %p4426_p8 = pnand %p4424_p7, %p4421_p6 }
 0x129   :  { %4429 = shalt.err (!%p4426_p8)
}
 0x12a   :  { %s4430_s11 = scalar_lea.vmem %s121_s9, 256  ;;  %p4435_p10 = scmp.lt.s32.totalorder %s121_s9, %s121_s9 }
 0x12b   :  { %p4431_p9 = scmp.ne.s32.totalorder %s121_s9, %s4430_s11  ;;  %p4436_p11 = scmp.lt.s32.totalorder %s4430_s11, %s4430_s11 }
 0x12d   :  { %p4437_p12 = por %p4436_p11, %p4435_p10 }
 0x12f   :  { %p4438_p13 = pnand %p4437_p12, %p4431_p9 }
 0x131   :  { %4441 = shalt.err (!%p4438_p13)
}
 0x132   :  { %126 = dma.hbm_to_vmem [thread:$0]  %s6027_s30, 256, %s121_s9, [#allocation12], %s4691_s28, %s4691_s28, %s4692_s29  }
 0x133   :  { %s4442_s22 = scalar_lea.hbm %s5976_s8, 256 }
 0x134   :  { %p4443_p0 = scmp.ne.s32.totalorder %s5976_s8, %s4442_s22  ;;  %p4446_p1 = scmp.lt.u32.totalorder %s4442_s22, %s5976_s8 }
 0x136   :  { %p4448_p2 = pnand %p4446_p1, %p4443_p0 }
 0x138   :  { %4451 = shalt.err (!%p4448_p2)
}
 0x139   :  { %s4452_s15 = scalar_lea.vmem %s143_s0, 256  ;;  %p4457_p4 = scmp.lt.s32.totalorder %s143_s0, %s143_s0 }
 0x13a   :  { %p4453_p3 = scmp.ne.s32.totalorder %s143_s0, %s4452_s15  ;;  %p4458_p5 = scmp.lt.s32.totalorder %s4452_s15, %s4452_s15 }
 0x13c   :  { %p4459_p6 = por %p4458_p5, %p4457_p4 }
 0x13e   :  { %p4460_p7 = pnand %p4459_p6, %p4453_p3 }
 0x140   :  { %4463 = shalt.err (!%p4460_p7)
}
 0x141   :  { %148 = dma.hbm_to_vmem [thread:$0]  %s5976_s8, 256, %s143_s0, [#allocation15], %s4691_s28, %s4691_s28, %s4692_s29  }
 0x142   :  { %s4709_s30 = smov [#allocation19]   ;;  %s4710_s2 = smov [#allocation22]  }
 0x143   :  { %s164_s27 = sshll.u32 %s4709_s30, 4  ;;  %s187_s24 = sshll.u32 %s4710_s2, 4  ;;  %s165_s27 = int_to_ptr.vmem [resolvable:$true] %s164_s27  ;;  %s188_s24 = int_to_ptr.vmem [resolvable:$true] %s187_s24 }
 0x144   :  { %s4464_s11 = scalar_lea.hbm %s5978_s10, 256 }
 0x145   :  { %p4465_p8 = scmp.ne.s32.totalorder %s5978_s10, %s4464_s11  ;;  %p4468_p9 = scmp.lt.u32.totalorder %s4464_s11, %s5978_s10 }
 0x147   :  { %p4470_p10 = pnand %p4468_p9, %p4465_p8 }
 0x149   :  { %4473 = shalt.err (!%p4470_p10)
}
 0x14a   :  { %s4474_s8 = scalar_lea.vmem %s165_s27, 256  ;;  %p4479_p12 = scmp.lt.s32.totalorder %s165_s27, %s165_s27 }
 0x14b   :  { %p4475_p11 = scmp.ne.s32.totalorder %s165_s27, %s4474_s8  ;;  %p4480_p13 = scmp.lt.s32.totalorder %s4474_s8, %s4474_s8 }
 0x14d   :  { %p4481_p0 = por %p4480_p13, %p4479_p12 }
 0x14f   :  { %p4482_p1 = pnand %p4481_p0, %p4475_p11 }
 0x151   :  { %4485 = shalt.err (!%p4482_p1)
}
 0x152   :  { %170 = dma.hbm_to_vmem [thread:$0]  %s5978_s10, 256, %s165_s27, [#allocation18], %s4691_s28, %s4691_s28, %s4692_s29  }
 0x153   :  { %s4486_s26 = scalar_lea.hbm %s5980_s12, 16 }
 0x154   :  { %p4487_p2 = scmp.ne.s32.totalorder %s5980_s12, %s4486_s26  ;;  %p4490_p3 = scmp.lt.u32.totalorder %s4486_s26, %s5980_s12 }
 0x156   :  { %p4492_p4 = pnand %p4490_p3, %p4487_p2 }
 0x158   :  { %4495 = shalt.err (!%p4492_p4)
}
 0x159   :  { %s4496_s30 = scalar_lea.vmem %s188_s24, 16  ;;  %s4500_s2 = scalar_lea.vmem %s188_s24, 32 }
 0x15a   :  { %p4497_p5 = scmp.ne.s32.totalorder %s188_s24, %s4496_s30  ;;  %p4501_p6 = scmp.lt.s32.totalorder %s188_s24, %s188_s24 }
 0x15b   :  { %p4502_p7 = scmp.lt.s32.totalorder %s4500_s2, %s4496_s30 }
 0x15d   :  { %p4503_p8 = por %p4502_p7, %p4501_p6 }
 0x15f   :  { %p4504_p9 = pnand %p4503_p8, %p4497_p5 }
 0x161   :  { %4507 = shalt.err (!%p4504_p9)
}
 0x162   :  { %190 = dma.hbm_to_vmem [thread:$0]  %s5980_s12, 16, %s188_s24, [#allocation21]  }
 0x163   :  { %s4711_s6 = smov [#allocation25]   ;;  %s4712_s11 = smov [#allocation28]  }
 0x164   :  { %s206_s21 = sshll.u32 %s4711_s6, 4  ;;  %s228_s13 = sshll.u32 %s4712_s11, 4  ;;  %s207_s21 = int_to_ptr.vmem [resolvable:$true] %s206_s21  ;;  %s229_s13 = int_to_ptr.vmem [resolvable:$true] %s228_s13 }
 0x165   :  { %s4508_s17 = scalar_lea.hbm %s5982_s14, 256 }
 0x166   :  { %p4509_p10 = scmp.ne.s32.totalorder %s5982_s14, %s4508_s17  ;;  %p4512_p11 = scmp.lt.u32.totalorder %s4508_s17, %s5982_s14 }
 0x168   :  { %p4514_p12 = pnand %p4512_p11, %p4509_p10 }
 0x16a   :  { %4517 = shalt.err (!%p4514_p12)
}
 0x16b   :  { %s4518_s12 = scalar_lea.vmem %s207_s21, 256  ;;  %p4523_p0 = scmp.lt.s32.totalorder %s207_s21, %s207_s21 }
 0x16c   :  { %p4519_p13 = scmp.ne.s32.totalorder %s207_s21, %s4518_s12  ;;  %p4524_p1 = scmp.lt.s32.totalorder %s4518_s12, %s4518_s12 }
 0x16e   :  { %p4525_p2 = por %p4524_p1, %p4523_p0 }
 0x170   :  { %p4526_p3 = pnand %p4525_p2, %p4519_p13 }
 0x172   :  { %4529 = shalt.err (!%p4526_p3)
}
 0x173   :  { %212 = dma.hbm_to_vmem [thread:$0]  %s5982_s14, 256, %s207_s21, [#allocation24], %s4691_s28, %s4691_s28, %s4692_s29  }
 0x174   :  { %s4530_s15 = scalar_lea.hbm %s5984_s16, 1024 }
 0x175   :  { %p4531_p4 = scmp.ne.s32.totalorder %s5984_s16, %s4530_s15  ;;  %p4534_p5 = scmp.lt.u32.totalorder %s4530_s15, %s5984_s16 }
 0x177   :  { %p4536_p6 = pnand %p4534_p5, %p4531_p4 }
 0x179   :  { %4539 = shalt.err (!%p4536_p6)
}
 0x17a   :  { %s4540_s10 = scalar_lea.vmem %s229_s13, 1024  ;;  %p4545_p8 = scmp.lt.s32.totalorder %s229_s13, %s229_s13 }
 0x17b   :  { %p4541_p7 = scmp.ne.s32.totalorder %s229_s13, %s4540_s10  ;;  %p4546_p9 = scmp.lt.s32.totalorder %s4540_s10, %s4540_s10 }
 0x17d   :  { %p4547_p10 = por %p4546_p9, %p4545_p8 }
 0x17f   :  { %p4548_p11 = pnand %p4547_p10, %p4541_p7 }
 0x181   :  { %4551 = shalt.err (!%p4548_p11)
}
 0x182   :  { %234 = dma.hbm_to_vmem [thread:$0]  %s5984_s16, 1024, %s229_s13, [#allocation27], %s4691_s28, %s4691_s28, %s4692_s29  }
 0x183   :  { %s4713_s6 = smov [#allocation31]   ;;  %s4714_s11 = smov [#allocation34]  }
 0x184   :  { %s251_s21 = sshll.u32 %s4713_s6, 4  ;;  %s270_s5 = sshll.u32 %s4714_s11, 4  ;;  %s252_s21 = int_to_ptr.vmem [resolvable:$true] %s251_s21  ;;  %s271_s5 = int_to_ptr.vmem [resolvable:$true] %s270_s5 }
 0x185   :  { %s4552_s8 = scalar_lea.hbm %s5986_s18, 16 }
 0x186   :  { %p4553_p12 = scmp.ne.s32.totalorder %s5986_s18, %s4552_s8  ;;  %p4556_p13 = scmp.lt.u32.totalorder %s4552_s8, %s5986_s18 }
 0x188   :  { %p4558_p0 = pnand %p4556_p13, %p4553_p12 }
 0x18a   :  { %4561 = shalt.err (!%p4558_p0)
}
 0x18b   :  { %s4562_s16 = scalar_lea.vmem %s252_s21, 16  ;;  %s4566_s13 = scalar_lea.vmem %s252_s21, 32 }
 0x18c   :  { %p4563_p1 = scmp.ne.s32.totalorder %s252_s21, %s4562_s16  ;;  %p4567_p2 = scmp.lt.s32.totalorder %s252_s21, %s252_s21 }
 0x18d   :  { %p4568_p3 = scmp.lt.s32.totalorder %s4566_s13, %s4562_s16 }
 0x18f   :  { %p4569_p4 = por %p4568_p3, %p4567_p2 }
 0x191   :  { %p4570_p5 = pnand %p4569_p4, %p4563_p1 }
 0x193   :  { %4573 = shalt.err (!%p4570_p5)
}
 0x194   :  { %254 = dma.hbm_to_vmem [thread:$0]  %s5986_s18, 16, %s252_s21, [#allocation30]  }
 0x195   :  { %s4574_s15 = scalar_lea.hbm %s5988_s20, 256 }
 0x196   :  { %p4575_p6 = scmp.ne.s32.totalorder %s5988_s20, %s4574_s15  ;;  %p4578_p7 = scmp.lt.u32.totalorder %s4574_s15, %s5988_s20 }
 0x198   :  { %p4580_p8 = pnand %p4578_p7, %p4575_p6 }
 0x19a   :  { %4583 = shalt.err (!%p4580_p8)
}
 0x19b   :  { %s4584_s10 = scalar_lea.vmem %s271_s5, 256  ;;  %p4589_p10 = scmp.lt.s32.totalorder %s271_s5, %s271_s5 }
 0x19c   :  { %p4585_p9 = scmp.ne.s32.totalorder %s271_s5, %s4584_s10  ;;  %p4590_p11 = scmp.lt.s32.totalorder %s4584_s10, %s4584_s10 }
 0x19e   :  { %p4591_p12 = por %p4590_p11, %p4589_p10 }
 0x1a0   :  { %p4592_p13 = pnand %p4591_p12, %p4585_p9 }
 0x1a2   :  { %4595 = shalt.err (!%p4592_p13)
}
 0x1a3   :  { %276 = dma.hbm_to_vmem [thread:$0]  %s5988_s20, 256, %s271_s5, [#allocation33], %s4691_s28, %s4691_s28, %s4692_s29  }
 0x1a4   :  { %s4715_s27 = smov [#allocation35]   ;;  %s6028_s25 = sld [smem:[#allocation62_spill]] }
 0x1a5   :  { %s283_s6 = sshll.u32 %s4715_s27, 4  ;;  %s284_s6 = int_to_ptr.vmem [resolvable:$true] %s283_s6 }
 0x1aa   :  { %s4596_s17 = scalar_lea.hbm %s6028_s25, 16 }
 0x1ab   :  { %p4597_p0 = scmp.ne.s32.totalorder %s6028_s25, %s4596_s17  ;;  %p4600_p1 = scmp.lt.u32.totalorder %s4596_s17, %s6028_s25 }
 0x1ad   :  { %p4602_p2 = pnand %p4600_p1, %p4597_p0 }
 0x1af   :  { %4605 = shalt.err (!%p4602_p2)
}
 0x1b0   :  { %s4606_s12 = scalar_lea.vmem %s284_s6, 16  ;;  %s4610_s20 = scalar_lea.vmem %s284_s6, 32 }
 0x1b1   :  { %p4607_p3 = scmp.ne.s32.totalorder %s284_s6, %s4606_s12  ;;  %p4611_p4 = scmp.lt.s32.totalorder %s284_s6, %s284_s6 }
 0x1b2   :  { %p4612_p5 = scmp.lt.s32.totalorder %s4610_s20, %s4606_s12 }
 0x1b4   :  { %p4613_p6 = por %p4612_p5, %p4611_p4 }
 0x1b6   :  { %p4614_p7 = pnand %p4613_p6, %p4607_p3 }
 0x1b8   :  { %4617 = shalt.err (!%p4614_p7)
}
 0x1b9   :  { %286 = dma.hbm_to_vmem [thread:$0]  %s6028_s25, 16, %s284_s6, [#allocation36]  }
 0x1ba   :  { %4662 = dma.done.wait [#allocation3], 512  }
 0x1bb   :  { %4663 = vsyncadd [#allocation3], 4294966784 }
 0x1bc   :  { %4664 = dma.done.wait [#allocation6], 4096  }
 0x1bd   :  { %4665 = vsyncadd [#allocation6], 4294963200 }
 0x1be   :  { %4666 = dma.done.wait [#allocation9], 768  }
 0x1bf   :  { %4667 = vsyncadd [#allocation9], 4294966528 }
 0x1c0   :  { %4668 = dma.done.wait [#allocation12], 1024  }
 0x1c1   :  { %4669 = vsyncadd [#allocation12], 4294966272 }
 0x1c2   :  { %4670 = dma.done.wait [#allocation15], 272  }
 0x1c3   :  { %4671 = vsyncadd [#allocation15], 4294967024 }
 0x1c4   :  { %4672 = dma.done.wait [#allocation18], 272  }
 0x1c5   :  { %4673 = vsyncadd [#allocation18], 4294967024 }
 0x1c6   :  { %4674 = dma.done.wait [#allocation21], 32  }
 0x1c7   :  { %4675 = vsyncadd [#allocation21], 4294967264 }
 0x1c8   :  { %4676 = dma.done.wait [#allocation24], 272  }
 0x1c9   :  { %4677 = vsyncadd [#allocation24], 4294967024 }
 0x1ca   :  { %4678 = dma.done.wait [#allocation27], 1040  }
 0x1cb   :  { %4679 = vsyncadd [#allocation27], 4294966256 }
 0x1cc   :  { %4680 = dma.done.wait [#allocation30], 32  }
 0x1cd   :  { %4681 = vsyncadd [#allocation30], 4294967264 }
 0x1ce   :  { %4682 = dma.done.wait [#allocation33], 272  }
 0x1cf   :  { %4683 = vsyncadd [#allocation33], 4294967024 }
 0x1d0   :  { %4684 = dma.done.wait [#allocation36], 16  }
 0x1d1   :  { %4685 = vsyncadd [#allocation36], 4294967280  ;;  %v3920_v0 = vld [vmem:[#allocation13] sm:$0xff]   ;;  %v3921_v1 = vld [vmem:[#allocation13 + $0x8] sm:$0xff]   ;;  %vm447_vm0 = vcmask 261120   ;;  %vm936_vm1 = vcmask 785408   ;;  %v1154_v57 = vlaneseq }
 0x1d2   :  { %3668 = vmatprep.subr.bf16.mxu1 %v3920_v0  ;;  %v3922_v2 = vld [vmem:[#allocation7] sm:$0xff]   ;;  %v3924_v3 = vld [vmem:[#allocation11] sm:$0xff]   ;;  %v3923_v4 = vld [vmem:[#allocation7 + $0x8] sm:$0xff]   ;;  %v4716_v55 = vmov 1966171168   ;;  %vm2834_vm2 = vcmask 1041409  }
 0x1d3   :  { %3669 = vmatpush3.bf16.msra.mxu1 %v3920_v0  ;;  %3672 = vmatprep.mubr.msk.bf16.mxu1 %vm447_vm0, %v3922_v2  ;;  %v3925_v5 = vld [vmem:[#allocation7 + $0x10] sm:$0xff]   ;;  %v3927_v6 = vld [vmem:[#allocation11 + $0x8] sm:$0xff]   ;;  %v3930_v7 = vld [vmem:[#allocation11 + $0x10] sm:$0xff]   ;;  %v1152_v56 = vunpack.c.l.s4 %v4716_v55  ;;  %v1155_v60 = vshrl.u32 %v1154_v57, 7  ;;  %vm2836_vm3 = vcmask 1042434   ;;  %vm2838_vm4 = vcmask 1043459  }
 0x1d4   :  { %3670 = vmatprep.subr.bf16.mxu1 %v3921_v1  ;;  %v3926_v8 = vld [vmem:[#allocation7 + $0x18] sm:$0xff]   ;;  %v3928_v9 = vld [vmem:[#allocation7 + $0x20] sm:$0xff]   ;;  %v3935_v10 = vld [vmem:[#allocation11 + $0x18] sm:$0xff]   ;;  %vm2840_vm5 = vcmask 1044484   ;;  %vm2842_vm6 = vcmask 1045509   ;;  %vm2844_vm7 = vcmask 1046534  }
 0x1d5   :  { %v3939_v11 = vld [vmem:[#allocation10] sm:$0xff]   ;;  %v3929_v12 = vld [vmem:[#allocation7 + $0x28] sm:$0xff]   ;;  %v3938_v13 = vld [vmem:[#allocation11 + $0x20] sm:$0xff]   ;;  %v1153_v59 = vunpack.c.0.s8 %v1152_v56  ;;  %vm2846_vm8 = vcmask 1047559   ;;  %s4718_s5 = smov [#allocation37]  }
 0x1d6   :  { %v3931_v14 = vld [vmem:[#allocation7 + $0x30] sm:$0xff]   ;;  %3660 = vmatprep.subr.bf16.mxu0 %v3939_v11  ;;  %v3942_v15 = vld [vmem:[#allocation10 + $0x8] sm:$0xff]   ;;  %v354_v16 = vld [vmem:[#allocation2] sm:$0xff]  ;;  %s3385_s16 = sshll.u32 %s4718_s5, 4  ;;  %s3386_s16 = int_to_ptr.vmem [resolvable:$true] %s3385_s16 }
 0x1d7   :  { %3671 = vmatpush3.bf16.msra.mxu1 %v3921_v1  ;;  %3661 = vmatpush3.bf16.msra.mxu0 %v3939_v11  ;;  %v355_v17 = vld [vmem:[#allocation2 + $0x8] sm:$0xff]  ;;  %v356_v18 = vld [vmem:[#allocation2 + $0x10] sm:$0xff]  ;;  %v357_v20 = vld [vmem:[#allocation2 + $0x18] sm:$0xff]  ;;  %v5174_v62 = vsub.s32 %v1153_v59, %v1155_v60  ;;  %s4618_s13 = scalar_lea.vmem %s3386_s16, 512  ;;  %p4623_p9 = scmp.lt.s32.totalorder %s3386_s16, %s3386_s16 }
 0x1d8   :  { %3704 = vmatprep.subr.bf16.mxu1 %v3924_v3  ;;  %3662 = vmatprep.subr.bf16.mxu0 %v3942_v15  ;;  %v422_v19 = vpack.c.bf16 %v355_v17, %v354_v16  ;;  %v423_v21 = vpack.c.bf16 %v357_v20, %v356_v18  ;;  %v3943_v22 = vld [vmem:[#allocation11 + $0x28] sm:$0xff]   ;;  %v3933_v24 = vld [vmem:[#allocation7 + $0x40] sm:$0xff]   ;;  %v3934_v25 = vld [vmem:[#allocation7 + $0x48] sm:$0xff]   ;;  %p4619_p8 = scmp.ne.s32.totalorder %s3386_s16, %s4618_s13  ;;  %p4624_p10 = scmp.lt.s32.totalorder %s4618_s13, %s4618_s13 }
 0x1d9   :  { %v3932_v23 = vld [vmem:[#allocation7 + $0x38] sm:$0xff]   ;;  %v3936_v26 = vld [vmem:[#allocation7 + $0x50] sm:$0xff]   ;;  %v3940_v28 = vld [vmem:[#allocation7 + $0x60] sm:$0xff]  }
 0x1da   :  { %3673 = vmatmul.mubr.msk.bf16.vlgmr.msra.gmra.mrb[0].mxu1 %vm447_vm0, %v3923_v4  ;;  %3664 = vmatprep.mubr.msk.bf16.mxu0 %vm447_vm0, %v422_v19  ;;  %v3937_v27 = vld [vmem:[#allocation7 + $0x58] sm:$0xff]   ;;  %v3941_v29 = vld [vmem:[#allocation7 + $0x68] sm:$0xff]   ;;  %v3944_v30 = vld [vmem:[#allocation7 + $0x70] sm:$0xff]   ;;  %p4625_p11 = por %p4624_p10, %p4623_p9 }
 0x1db   :  { %3705 = vmatpush3.bf16.msra.mxu1 %v3924_v3  ;;  %3676 = vmatprep.mubr.msk.bf16.mxu1 %vm447_vm0, %v3925_v5  ;;  %v3945_v31 = vld [vmem:[#allocation7 + $0x78] sm:$0xff]   ;;  %v3946_v32 = vld [vmem:[#allocation5] sm:$0xff]   ;;  %v3947_v33 = vld [vmem:[#allocation5 + $0x8] sm:$0xff]   ;;  %v5186_v5 = vsub.s32 0, %v1155_v60 }
 0x1dc   :  { %3706 = vmatprep.subr.bf16.mxu1 %v3927_v6  ;;  %3663 = vmatpush3.bf16.msra.mxu0 %v3942_v15  ;;  %v3948_v34 = vld [vmem:[#allocation5 + $0x10] sm:$0xff]   ;;  %v3949_v35 = vld [vmem:[#allocation5 + $0x18] sm:$0xff]   ;;  %v3950_v36 = vld [vmem:[#allocation5 + $0x20] sm:$0xff]   ;;  %p4626_p12 = pnand %p4625_p11, %p4619_p8 }
 0x1dd   :  { %v3951_v37 = vld [vmem:[#allocation5 + $0x28] sm:$0xff]   ;;  %v3952_v38 = vld [vmem:[#allocation5 + $0x30] sm:$0xff]   ;;  %v3953_v39 = vld [vmem:[#allocation5 + $0x38] sm:$0xff]  }
 0x1de   :  { %v3954_v40 = vld [vmem:[#allocation5 + $0x40] sm:$0xff]   ;;  %v3955_v41 = vld [vmem:[#allocation5 + $0x48] sm:$0xff]   ;;  %v3956_v42 = vld [vmem:[#allocation5 + $0x50] sm:$0xff]  }
 0x1df   :  { %3707 = vmatpush3.bf16.msra.mxu1 %v3927_v6  ;;  %3665 = vmatmul.mubr.msk.bf16.vlgmr.msra.gmra.mrb[0].mxu0 %vm447_vm0, %v423_v21  ;;  %v3957_v43 = vld [vmem:[#allocation5 + $0x58] sm:$0xff]   ;;  %v3958_v44 = vld [vmem:[#allocation5 + $0x60] sm:$0xff]   ;;  %v3959_v45 = vld [vmem:[#allocation5 + $0x68] sm:$0xff]  }
 0x1e0   :  { %3708 = vmatprep.subr.bf16.mxu1 %v3930_v7  ;;  %v3960_v46 = vld [vmem:[#allocation5 + $0x70] sm:$0xff]   ;;  %v3961_v47 = vld [vmem:[#allocation5 + $0x78] sm:$0xff]   ;;  %v5177_v1 = vld [vmem:[#allocation19] sm:$0xff]  }
 0x1e1   :  { %v3962_v48 = vld [vmem:[#allocation16] sm:$0xff]   ;;  %v3963_v49 = vld [vmem:[#allocation16 + $0x8] sm:$0xff]   ;;  %v3424_v53 = vld [vmem:[#allocation14] ss:$0 sm:$0xff] }
 0x1e2   :  { %3677 = vmatmul.mubr.msk.bf16.gmra.mrb[4].mxu1 %vm447_vm0, %v3926_v8  ;;  %3748 = vmatprep.subr.bf16.mxu0 %v3962_v48 }
 0x1e3   :  { %3680 = vmatprep.mubr.msk.bf16.mxu1 %vm447_vm0, %v3928_v9  ;;  %3709 = vmatpush3.bf16.msra.mxu1 %v3930_v7 }
 0x1e4   :  { %3710 = vmatprep.subr.bf16.mxu1 %v3935_v10  ;;  %3749 = vmatpush3.bf16.msra.mxu0 %v3962_v48 }
 0x1e5   :  { %3750 = vmatprep.subr.bf16.mxu0 %v3963_v49 }
 0x1e7   :  { %3711 = vmatpush3.bf16.msra.mxu1 %v3935_v10 }
 0x1e8   :  { %3712 = vmatprep.subr.bf16.mxu1 %v3938_v13  ;;  %3751 = vmatpush3.bf16.msra.mxu0 %v3963_v49 }
 0x1e9   :  { %3784 = vmatprep.subr.bf16.mxu0 %v5177_v1 }
 0x1ea   :  { %3681 = vmatmul.mubr.msk.bf16.gmra.mrb[8].mxu1 %vm447_vm0, %v3929_v12 }
 0x1eb   :  { %3684 = vmatprep.mubr.msk.bf16.mxu1 %vm447_vm0, %v3931_v14  ;;  %3713 = vmatpush3.bf16.msra.mxu1 %v3938_v13 }
 0x1ec   :  { %3714 = vmatprep.subr.bf16.mxu1 %v3943_v22 }
 0x1ef   :  { %3715 = vmatpush3.bf16.msra.mxu1 %v3943_v22 }
 0x1f2   :  { %3685 = vmatmul.mubr.msk.bf16.gmra.mrb[12].mxu1 %vm447_vm0, %v3932_v23 }
 0x1f3   :  { %3688 = vmatprep.mubr.msk.bf16.mxu1 %vm447_vm0, %v3933_v24 }
 0x1fa   :  { %3689 = vmatmul.mubr.msk.bf16.gmra.mrb[16].mxu1 %vm447_vm0, %v3934_v25 }
 0x1fb   :  { %3692 = vmatprep.mubr.msk.bf16.mxu1 %vm447_vm0, %v3936_v26 }
 0x202   :  { %3693 = vmatmul.mubr.msk.bf16.gmra.mrb[20].mxu1 %vm447_vm0, %v3937_v27 }
 0x203   :  { %3696 = vmatprep.mubr.msk.bf16.mxu1 %vm447_vm0, %v3940_v28 }
 0x20a   :  { %3697 = vmatmul.mubr.msk.bf16.gmra.mrb[24].mxu1 %vm447_vm0, %v3941_v29 }
 0x20b   :  { %3700 = vmatprep.mubr.msk.bf16.mxu1 %vm447_vm0, %v3944_v30 }
 0x212   :  { %3701 = vmatmul.mubr.msk.bf16.gmra.mrb[28].mxu1 %vm447_vm0, %v3945_v31 }
 0x213   :  { %3716 = vmatprep.mubr.msk.bf16.mxu1 %vm936_vm1, %v3946_v32 }
 0x21a   :  { %3717 = vmatmul.mubr.msk.bf16.vlgmr.msra.gmra.mrb[0].mxu1 %vm936_vm1, %v3947_v33 }
 0x21b   :  { %3720 = vmatprep.mubr.msk.bf16.mxu1 %vm936_vm1, %v3948_v34 }
 0x222   :  { %3721 = vmatmul.mubr.msk.bf16.gmra.mrb[4].mxu1 %vm936_vm1, %v3949_v35 }
 0x223   :  { %3724 = vmatprep.mubr.msk.bf16.mxu1 %vm936_vm1, %v3950_v36 }
 0x22a   :  { %3725 = vmatmul.mubr.msk.bf16.gmra.mrb[8].mxu1 %vm936_vm1, %v3951_v37 }
 0x22b   :  { %3728 = vmatprep.mubr.msk.bf16.mxu1 %vm936_vm1, %v3952_v38 }
 0x232   :  { %3729 = vmatmul.mubr.msk.bf16.gmra.mrb[12].mxu1 %vm936_vm1, %v3953_v39 }
 0x233   :  { %3732 = vmatprep.mubr.msk.bf16.mxu1 %vm936_vm1, %v3954_v40 }
 0x23a   :  { %3733 = vmatmul.mubr.msk.bf16.gmra.mrb[16].mxu1 %vm936_vm1, %v3955_v41 }
 0x23b   :  { %3736 = vmatprep.mubr.msk.bf16.mxu1 %vm936_vm1, %v3956_v42 }
 0x242   :  { %3737 = vmatmul.mubr.msk.bf16.gmra.mrb[20].mxu1 %vm936_vm1, %v3957_v43 }
 0x243   :  { %3740 = vmatprep.mubr.msk.bf16.mxu1 %vm936_vm1, %v3958_v44 }
 0x24a   :  { %3741 = vmatmul.mubr.msk.bf16.gmra.mrb[24].mxu1 %vm936_vm1, %v3959_v45 }
 0x24b   :  { %3744 = vmatprep.mubr.msk.bf16.mxu1 %vm936_vm1, %v3960_v46 }
 0x252   :  { %3745 = vmatmul.mubr.msk.bf16.gmra.mrb[28].mxu1 %vm936_vm1, %v3961_v47 }
 0x2b2   :  { %v3666_v50 = vpop.f32.mrb[0].mxu0 }
 0x2b3   :  { %v488_v51 = vpop.f32.mrb[1].mxu0  ;;  %v497_v13 = vadd.f32 %v3666_v50, %v3424_v53 }
 0x2b4   :  { %v3667_v52 = vpop.f32.mrb[2].mxu0  ;;  %v489_v2 = vadd.f32 %v3424_v53, %v488_v51 }
 0x2b5   :  { %v491_v54 = vpop.f32.mrb[3].mxu0  ;;  %v500_v58 = vadd.f32 %v3667_v52, %v3424_v53  ;;  %v1248_v18 = vcombine.high %v497_v13, %v497_v13  ;;  %v1255_v22 = vrot.slane %v497_v13, %v5174_v62 }
 0x2b6   :  { %v1150_v8 = vcombine.high %v489_v2, %v489_v2  ;;  %v492_v10 = vadd.f32 %v3424_v53, %v491_v54  ;;  %v1157_v12 = vrot.slane %v489_v2, %v5174_v62 }
 0x2b7   :  { %v1297_v61 = vcombine.high %v500_v58, %v500_v58  ;;  %v1262_v25 = vrot.slane %v1248_v18, %v5174_v62  ;;  %v5216_v29 = vrot.slane %v500_v58, %v5174_v62  ;;  %v1263_v32 = vcombine.high %v1255_v22, %v1255_v22 }
 0x2b8   :  { %v1164_v14 = vrot.slane %v1150_v8, %v5174_v62  ;;  %v1199_v15 = vcombine.high %v492_v10, %v492_v10  ;;  %v1165_v16 = vcombine.high %v1157_v12, %v1157_v12  ;;  %v1206_v17 = vrot.slane %v492_v10, %v5174_v62 }
 0x2b9   :  { %v1311_v63 = vrot.slane %v1297_v61, %v5174_v62  ;;  %v1173_v20 = vrot.slane %v1157_v12, %v5174_v62  ;;  %v5219_v33 = vrot.slane %v1255_v22, %v5174_v62  ;;  %v1264_v36 = vcombine.high %v1262_v25, %v1262_v25 }
 0x2ba   :  { %v1166_v19 = vcombine.high %v1164_v14, %v1164_v14  ;;  %v1213_v21 = vrot.slane %v1199_v15, %v5174_v62  ;;  %v1214_v23 = vcombine.high %v1206_v17, %v1206_v17  ;;  %v1187_v24 = vrot.slane %v1165_v16, %v5174_v62 }
 0x2bb   :  { %v1313_v0 = vcombine.high %v1311_v63, %v1311_v63  ;;  %v5181_v3 = vrot.slane %v1311_v63, %v5174_v62  ;;  %v5207_v26 = vrot.slane %v1206_v17, %v5174_v62  ;;  %v5210_v27 = vrot.slane %v1164_v14, %v5174_v62 }
 0x2bc   :  { %v5213_v28 = vrot.slane %v1166_v19, %v5174_v62  ;;  %v1215_v30 = vcombine.high %v1213_v21, %v1213_v21  ;;  %v1195_v31 = vcombine.high %v1173_v20, %v1173_v20  ;;  %v1197_v34 = vcombine.high %v1187_v24, %v1187_v24 }
 0x2bd   :  { %v5184_v4 = vrot.slane %v1313_v0, %v5174_v62  ;;  %v1343_v6 = vcombine.high %v5181_v3, %v5181_v3  ;;  %v5222_v35 = vrot.slane %v1214_v23, %v5174_v62  ;;  %v1196_v37 = vcombine.high %v5210_v27, %v5210_v27 }
 0x2be   :  { %v1198_v38 = vcombine.high %v5213_v28, %v5213_v28  ;;  %v1244_v39 = vcombine.high %v5207_v26, %v5207_v26  ;;  %v1312_v40 = vcombine.high %v5216_v29, %v5216_v29  ;;  %v1357_v41 = vrot.slane %v1195_v31, %v5186_v5 }
 0x2bf   :  { %v1345_v7 = vcombine.high %v5184_v4, %v5184_v4  ;;  %v5193_v9 = vrot.slane %v1343_v6, %v5186_v5  ;;  %v5234_v42 = vrot.slane %v1213_v21, %v5174_v62  ;;  %v5237_v43 = vrot.slane %v1215_v30, %v5174_v62 }
 0x2c0   :  { %v5241_v44 = vrot.slane %v5216_v29, %v5174_v62  ;;  %v1349_v45 = vrot.slane %v1173_v20, %v5186_v5  ;;  %v1353_v46 = vrot.slane %v1187_v24, %v5186_v5  ;;  %v1381_v47 = vrot.slane %v5207_v26, %v5186_v5 }
 0x2c1   :  { %v5196_v11 = vrot.slane %v1345_v7, %v5186_v5  ;;  %v1361_v48 = vrot.slane %v1197_v34, %v5186_v5  ;;  %v1365_v49 = vrot.slane %v5210_v27, %v5186_v5  ;;  %v1246_v50 = vcombine.high %v5222_v35, %v5222_v35 }
 0x2c2   :  { %v1293_v51 = vcombine.high %v5219_v33, %v5219_v33  ;;  %v1373_v53 = vrot.slane %v1196_v37, %v5186_v5  ;;  %v1377_v54 = vrot.slane %v1198_v38, %v5186_v5  ;;  %v1369_v55 = vrot.slane %v5213_v28, %v5186_v5 }
 0x2c3   :  { %v5259_v56 = vrot.slane %v1244_v39, %v5186_v5  ;;  %v1385_v59 = vrot.slane %v5222_v35, %v5186_v5  ;;  %v1245_v60 = vcombine.high %v5234_v42, %v5234_v42  ;;  %v1247_v61 = vcombine.high %v5237_v43, %v5237_v43 }
 0x2c4   :  { %v1397_v2 = vrot.slane %v5234_v42, %v5186_v5  ;;  %v1401_v6 = vrot.slane %v5237_v43, %v5186_v5  ;;  %v5276_v7 = vrot.slane %v1263_v32, %v5174_v62  ;;  %v5283_v13 = vrot.slane %v1246_v50, %v5186_v5 }
 0x2c5   :  { %v5286_v14 = vrot.slane %v1293_v51, %v5186_v5  ;;  %v1413_v17 = vrot.slane %v5219_v33, %v5186_v5  ;;  %v5295_v18 = vrot.slane %v1262_v25, %v5174_v62  ;;  %v5300_v21 = vrot.slane %v1245_v60, %v5186_v5 }
 0x2c6   :  { %v5303_v22 = vrot.slane %v1247_v61, %v5186_v5  ;;  %v1295_v27 = vcombine.high %v5276_v7, %v5276_v7  ;;  %v5310_v25 = vrot.slane %v1264_v36, %v5174_v62  ;;  %v1417_v31 = vrot.slane %v5276_v7, %v5186_v5 }
 0x2c7   :  { %v1342_v32 = vcombine.high %v5241_v44, %v5241_v44  ;;  %v1294_v39 = vcombine.high %v5295_v18, %v5295_v18  ;;  %v1429_v50 = vrot.slane %v5295_v18, %v5186_v5 }
 0x2c8   :  { %v1296_v60 = vcombine.high %v5310_v25, %v5310_v25  ;;  %v1433_v61 = vrot.slane %v5310_v25, %v5186_v5 }
 0x2ed   :  { %v3718_v52 = vpop.f32.mrb[0].mxu1 }
 0x2ee   :  { %v5261_v57 = vadd.f32 %v3718_v52, %v1357_v41  ;;  %v1019_v58 = vpop.f32.mrb[1].mxu1  ;;  %v1445_v41 = vrot.slane %v5241_v44, %v5186_v5 }
 0x2ef   :  { %v5269_v63 = vadd.f32 %v1349_v45, %v1019_v58  ;;  %v3719_v0 = vpop.f32.mrb[2].mxu1 }
 0x2f0   :  { %v1540_v8 = vmul.f32 %v5261_v57, %v5261_v57  ;;  %v5280_v10 = vadd.f32 %v3719_v0, %v1361_v48  ;;  %v1022_v12 = vpop.f32.mrb[3].mxu1 }
 0x2f1   :  { %v1538_v15 = vmul.f32 %v5269_v63, %v5269_v63  ;;  %v5290_v16 = vadd.f32 %v1353_v46, %v1022_v12 }
 0x2f2   :  { %v1604_v19 = vmul.f32 0.035677407, %v1540_v8  ;;  %v1541_v20 = vmul.f32 %v5280_v10, %v5280_v10 }
 0x2f3   :  { %v1602_v23 = vmul.f32 0.035677407, %v1538_v15  ;;  %v1539_v24 = vmul.f32 %v5290_v16, %v5290_v16 }
 0x2f4   :  { %v1636_v28 = vadd.f32 0.7978846, %v1604_v19  ;;  %v1605_v30 = vmul.f32 0.035677407, %v1541_v20  ;;  %v5345_v20 = vrot.slane %v1295_v27, %v5186_v5 }
 0x2f5   :  { %v1634_v34 = vadd.f32 0.7978846, %v1602_v23  ;;  %v1603_v37 = vmul.f32 0.035677407, %v1539_v24  ;;  %v3722_v38 = vpop.f32.mrb[4].mxu1 }
 0x2f6   :  { %v1668_v36 = vmul.f32 %v1636_v28, %v5261_v57  ;;  %v1637_v45 = vadd.f32 0.7978846, %v1605_v30  ;;  %v5321_v46 = vadd.f32 %v3722_v38, %v1373_v53  ;;  %v1035_v48 = vpop.f32.mrb[5].mxu1  ;;  %v5364_v38 = vrot.slane %v1296_v60, %v5186_v5 }
 0x2f7   :  { %v1635_v51 = vadd.f32 0.7978846, %v1603_v37  ;;  %v5325_v52 = vadd.f32 %v1365_v49, %v1035_v48  ;;  %v3723_v58 = vpop.f32.mrb[6].mxu1  ;;  %v5338_v49 = vrot.slane %v1312_v40, %v5174_v62  ;;  %v1666_v12 = vmul.f32 %v1634_v34, %v5269_v63 }
 0x2f8   :  { %3978 = vtanh.f32 %v1668_v36  ;;  %v1669_v0 = vmul.f32 %v1637_v45, %v5280_v10  ;;  %v1544_v53 = vmul.f32 %v5321_v46, %v5321_v46  ;;  %v1038_v8 = vpop.f32.mrb[7].mxu1  ;;  %v5347_v24 = vadd.f32 %v3723_v58, %v1377_v54 }
 0x2f9   :  { %v1667_v15 = vmul.f32 %v1635_v51, %v5290_v16  ;;  %v1542_v19 = vmul.f32 %v5325_v52, %v5325_v52  ;;  %v5349_v28 = vadd.f32 %v1369_v55, %v1038_v8  ;;  %v5352_v62 = vrot.slane %v1294_v39, %v5186_v5 }
 0x2fa   :  { %3980 = vtanh.f32 %v1669_v0  ;;  %v1608_v23 = vmul.f32 0.035677407, %v1544_v53  ;;  %v5355_v40 = vrot.slane %v1342_v32, %v5186_v5  ;;  %v1545_v34 = vmul.f32 %v5347_v24, %v5347_v24 }
 0x2fb   :  { %3982 = vtanh.f32 %v1667_v15  ;;  %v1606_v29 = vmul.f32 0.035677407, %v1542_v19  ;;  %v1543_v27 = vmul.f32 %v5349_v28, %v5349_v28  ;;  %v1344_v54 = vcombine.high %v5338_v49, %v5338_v49 }
 0x2fc   :  { %v1640_v30 = vadd.f32 0.7978846, %v1608_v23  ;;  %3984 = vtanh.f32 %v1666_v12  ;;  %v1609_v36 = vmul.f32 0.035677407, %v1545_v34  ;;  %v5397_v35 = vmul.f32 0.5, %v5325_v52 }
 0x2fd   :  { %v1638_v55 = vadd.f32 0.7978846, %v1606_v29  ;;  %v3726_v37 = vpop.f32.mrb[8].mxu1  ;;  %v1607_v45 = vmul.f32 0.035677407, %v1543_v27  ;;  %v1572_v29 = vmul.f32 0.5, %v5261_v57 }
 0x2fe   :  { %v1672_v39 = vmul.f32 %v1640_v30, %v5321_v46  ;;  %v1516_v48 = vadd.f32 %v3726_v37, %v5259_v56  ;;  %v1051_v51 = vpop.f32.mrb[9].mxu1  ;;  %v1641_v12 = vadd.f32 0.7978846, %v1609_v36  ;;  %v5379_v56 = vrot.slane %v1344_v54, %v5186_v5 }
 0x2ff   :  { %v1670_v58 = vmul.f32 %v1638_v55, %v5325_v52  ;;  %v1514_v0 = vadd.f32 %v1381_v47, %v1051_v51  ;;  %v3727_v53 = vpop.f32.mrb[10].mxu1  ;;  %v1639_v15 = vadd.f32 0.7978846, %v1607_v45  ;;  %v1570_v30 = vmul.f32 0.5, %v5269_v63 }
 0x300   :  { %v1548_v19 = vmul.f32 %v1516_v48, %v1516_v48  ;;  %v1054_v23 = vpop.f32.mrb[11].mxu1  ;;  %3986 = vtanh.f32 %v1672_v39  ;;  %v1673_v34 = vmul.f32 %v1641_v12, %v5347_v24  ;;  %v1517_v37 = vadd.f32 %v3727_v53, %v5283_v13 }
 0x301   :  { %v1546_v26 = vmul.f32 %v1514_v0, %v1514_v0  ;;  %v1671_v27 = vmul.f32 %v1639_v15, %v5349_v28  ;;  %3988 = vtanh.f32 %v1670_v58  ;;  %v1515_v54 = vadd.f32 %v1385_v59, %v1054_v23 }
 0x302   :  { %v3979_v47 = vpop.eup %3978  ;;  %v1612_v55 = vmul.f32 0.035677407, %v1548_v19  ;;  %v1573_v63 = vmul.f32 0.5, %v5280_v10  ;;  %v1571_v39 = vmul.f32 0.5, %v5290_v16  ;;  %v1549_v8 = vmul.f32 %v1517_v37, %v1517_v37 }
 0x303   :  { %v1732_v36 = vadd.f32 1.0, %v3979_v47  ;;  %v1610_v45 = vmul.f32 0.035677407, %v1546_v26  ;;  %v5392_v15 = vmul.f32 0.5, %v5321_v46  ;;  %3990 = vtanh.f32 %v1671_v27 }
 0x304   :  { %v3981_v57 = vpop.eup %3980  ;;  %v1644_v51 = vadd.f32 0.7978846, %v1612_v55  ;;  %3992 = vtanh.f32 %v1673_v34  ;;  %v1613_v26 = vmul.f32 0.035677407, %v1549_v8  ;;  %v1547_v47 = vmul.f32 %v1515_v54, %v1515_v54 }
 0x305   :  { %v3983_v12 = vpop.eup %3982  ;;  %v1733_v60 = vadd.f32 1.0, %v3981_v57  ;;  %v1642_v13 = vadd.f32 0.7978846, %v1610_v45  ;;  %v3730_v58 = vpop.f32.mrb[12].mxu1  ;;  %v5394_v53 = vmul.f32 %v1732_v36, %v1572_v29  ;;  %v5402_v27 = vmul.f32 0.5, %v5347_v24 }
 0x306   :  { %v1676_v59 = vmul.f32 %v1644_v51, %v1516_v48  ;;  %v1067_v10 = vpop.f32.mrb[13].mxu1  ;;  %v3985_v19 = vpop.eup %3984  ;;  %v1731_v46 = vadd.f32 1.0, %v3983_v12  ;;  %v1575_v29 = vmul.f32 0.5, %v5349_v28  ;;  %v1520_v36 = vadd.f32 %v3730_v58, %v5300_v21 }
 0x307   :  { %v5399_v16 = vmul.f32 %v1733_v60, %v1573_v63  ;;  %v1674_v23 = vmul.f32 %v1642_v13, %v1514_v0  ;;  %v3731_v55 = vpop.f32.mrb[14].mxu1  ;;  %v1645_v45 = vadd.f32 0.7978846, %v1613_v26  ;;  %v1611_v60 = vmul.f32 0.035677407, %v1547_v47 }
 0x308   :  { %v1070_v52 = vpop.f32.mrb[15].mxu1  ;;  %3994 = vtanh.f32 %v1676_v59  ;;  %v1730_v57 = vadd.f32 1.0, %v3985_v19  ;;  %v1552_v63 = vmul.f32 %v1520_v36, %v1520_v36  ;;  %v1518_v8 = vadd.f32 %v1397_v2, %v1067_v10 }
 0x309   :  { %v1795_v34 = vpack.c.bf16 %v5399_v16, %v5394_v53  ;;  %v1521_v24 = vadd.f32 %v3731_v55, %v5303_v22  ;;  %v5412_v12 = vmul.f32 0.5, %v1516_v48  ;;  %3996 = vtanh.f32 %v1674_v23 }
 0x30a   :  { %v3987_v51 = vpop.eup %3986  ;;  %v1643_v21 = vadd.f32 0.7978846, %v1611_v60  ;;  %v1519_v28 = vadd.f32 %v1401_v6, %v1070_v52  ;;  %v5417_v13 = vmul.f32 0.5, %v1514_v0  ;;  %v1677_v58 = vmul.f32 %v1645_v45, %v1517_v37 }
 0x30b   :  { %v1616_v53 = vmul.f32 0.035677407, %v1552_v63  ;;  %v1550_v59 = vmul.f32 %v1518_v8, %v1518_v8  ;;  %v3989_v19 = vpop.eup %3988  ;;  %v1763_v16 = vmul.f32 %v1731_v46, %v1571_v39  ;;  %v5419_v42 = vmul.f32 0.5, %v1517_v37 }
 0x30c   :  { %v1675_v2 = vmul.f32 %v1643_v21, %v1515_v54  ;;  %v1553_v22 = vmul.f32 %v1521_v24, %v1521_v24  ;;  %v1762_v48 = vmul.f32 %v1730_v57, %v1570_v30  ;;  %v5421_v26 = vmul.f32 0.5, %v1515_v54 }
 0x30d   :  { %v3734_v10 = vpop.f32.mrb[16].mxu1  ;;  %v1648_v23 = vadd.f32 0.7978846, %v1616_v53  ;;  %v1614_v47 = vmul.f32 0.035677407, %v1550_v59  ;;  %v3991_v43 = vpop.eup %3990  ;;  %v1736_v6 = vadd.f32 1.0, %v3987_v51  ;;  %v1551_v52 = vmul.f32 %v1519_v28, %v1519_v28 }
 0x30e   :  { %v1083_v55 = vpop.f32.mrb[17].mxu1  ;;  %3998 = vtanh.f32 %v1675_v2  ;;  %v1617_v0 = vmul.f32 0.035677407, %v1553_v22  ;;  %v3993_v60 = vpop.eup %3992  ;;  %v1734_v63 = vadd.f32 1.0, %v3989_v19  ;;  %v1735_v39 = vadd.f32 1.0, %v3991_v43 }
 0x30f   :  { %v3735_v45 = vpop.f32.mrb[18].mxu1  ;;  %4000 = vtanh.f32 %v1677_v58  ;;  %v1680_v37 = vmul.f32 %v1648_v23, %v1520_v36  ;;  %v5423_v21 = vmul.f32 0.5, %v1520_v36  ;;  %v1646_v30 = vadd.f32 0.7978846, %v1614_v47 }
 0x310   :  { %v1086_v46 = vpop.f32.mrb[19].mxu1  ;;  %v1615_v54 = vmul.f32 0.035677407, %v1551_v52  ;;  %v1794_v57 = vpack.c.bf16 %v1763_v16, %v1762_v48  ;;  %v5425_v53 = vmul.f32 0.5, %v1518_v8  ;;  %v1649_v59 = vadd.f32 0.7978846, %v1617_v0 }
 0x311   :  { %4002 = vtanh.f32 %v1680_v37  ;;  %v1524_v51 = vadd.f32 %v3734_v10, %v5286_v14  ;;  %v1768_v22 = vmul.f32 %v1736_v6, %v5392_v15  ;;  %v1767_v32 = vmul.f32 %v1735_v39, %v1575_v29 }
 0x312   :  { %v3995_v2 = vpop.eup %3994  ;;  %v1647_v19 = vadd.f32 0.7978846, %v1615_v54  ;;  %3752 = vmatprep.mubr.msk.bf16.mxu0 %vm447_vm0, %v1794_v57  ;;  %v5433_v36 = vadd.f32 %v1413_v17, %v1083_v55  ;;  %v1766_v58 = vmul.f32 %v1734_v63, %v5397_v35  ;;  %v1737_v16 = vadd.f32 1.0, %v3993_v60 }
 0x313   :  { %v5436_v48 = vmul.f32 0.5, %v1521_v24  ;;  %v1556_v23 = vmul.f32 %v1524_v51, %v1524_v51  ;;  %3753 = vmatmul.mubr.msk.bf16.vlgmr.msra.gmra.mrb[4].mxu0 %vm447_vm0, %v1795_v34  ;;  %v3997_v14 = vpop.eup %3996  ;;  %v1678_v10 = vmul.f32 %v1646_v30, %v1518_v8  ;;  %v5439_v15 = vmul.f32 0.5, %v1519_v28 }
 0x314   :  { %v1679_v29 = vmul.f32 %v1647_v19, %v1519_v28  ;;  %v1554_v47 = vmul.f32 %v5433_v36, %v5433_v36  ;;  %3785 = vmatpush3.bf16.msra.mxu0 %v5177_v1  ;;  %v1740_v33 = vadd.f32 1.0, %v3995_v2  ;;  %v1681_v17 = vmul.f32 %v1649_v59, %v1521_v24 }
 0x315   :  { %v3738_v43 = vpop.f32.mrb[20].mxu1  ;;  %v1620_v35 = vmul.f32 0.035677407, %v1556_v23  ;;  %v1525_v55 = vadd.f32 %v3735_v45, %v5345_v20  ;;  %v1523_v34 = vadd.f32 %v1417_v31, %v1086_v46  ;;  %v1796_v8 = vpack.c.bf16 %v1767_v32, %v1766_v58 }
 0x316   :  { %v1099_v6 = vpop.f32.mrb[21].mxu1  ;;  %4004 = vtanh.f32 %v1679_v29  ;;  %v1618_v0 = vmul.f32 0.035677407, %v1554_v47  ;;  %v1769_v52 = vmul.f32 %v1737_v16, %v5402_v27  ;;  %v1738_v60 = vadd.f32 1.0, %v3997_v14 }
 0x317   :  { %v3739_v28 = vpop.f32.mrb[22].mxu1  ;;  %v1652_v63 = vadd.f32 0.7978846, %v1620_v35  ;;  %v1557_v39 = vmul.f32 %v1525_v55, %v1525_v55  ;;  %4006 = vtanh.f32 %v1678_v10  ;;  %v1555_v30 = vmul.f32 %v1523_v34, %v1523_v34  ;;  %3756 = vmatprep.mubr.msk.bf16.mxu0 %vm447_vm0, %v1796_v8 }
 0x318   :  { %v1102_v1 = vpop.f32.mrb[23].mxu1  ;;  %v3999_v37 = vpop.eup %3998  ;;  %v1650_v24 = vadd.f32 0.7978846, %v1618_v0  ;;  %v1528_v20 = vadd.f32 %v3738_v43, %v5352_v62  ;;  %4008 = vtanh.f32 %v1681_v17  ;;  %v5451_v7 = vmul.f32 0.5, %v1524_v51 }
 0x319   :  { %v4001_v45 = vpop.eup %4000  ;;  %v1684_v31 = vmul.f32 %v1652_v63, %v1524_v51  ;;  %v1621_v32 = vmul.f32 0.035677407, %v1557_v39  ;;  %v5454_v27 = vmul.f32 %v1740_v33, %v5412_v12  ;;  %v1619_v54 = vmul.f32 0.035677407, %v1555_v30 }
 0x31a   :  { %v1682_v46 = vmul.f32 %v1650_v24, %v5433_v36  ;;  %v1560_v57 = vmul.f32 %v1528_v20, %v1528_v20  ;;  %v1739_v2 = vadd.f32 1.0, %v3999_v37  ;;  %v1797_v58 = vpack.c.bf16 %v1769_v52, %v1768_v22 }
 0x31b   :  { %v4003_v59 = vpop.eup %4002  ;;  %4010 = vtanh.f32 %v1684_v31  ;;  %v1653_v19 = vadd.f32 0.7978846, %v1621_v32  ;;  %v1741_v16 = vadd.f32 1.0, %v4001_v45  ;;  %v1651_v62 = vadd.f32 0.7978846, %v1619_v54 }
 0x31c   :  { %4012 = vtanh.f32 %v1682_v46  ;;  %v1624_v23 = vmul.f32 0.035677407, %v1560_v57  ;;  %3757 = vmatmul.mubr.msk.bf16.gmra.mrb[8].mxu0 %vm447_vm0, %v1797_v58  ;;  %v1526_v12 = vadd.f32 %v1429_v50, %v1099_v6  ;;  %v5462_v51 = vadd.f32 %v3739_v28, %v5364_v38 }
 0x31d   :  { %v3742_v14 = vpop.f32.mrb[24].mxu1  ;;  %v1685_v10 = vmul.f32 %v1653_v19, %v1525_v55  ;;  %v5467_v29 = vadd.f32 %v1433_v61, %v1102_v1  ;;  %v1770_v47 = vmul.f32 %v1738_v60, %v5417_v13  ;;  %v1744_v43 = vadd.f32 1.0, %v4003_v59 }
 0x31e   :  { %v1115_v22 = vpop.f32.mrb[25].mxu1  ;;  %v1683_v33 = vmul.f32 %v1651_v62, %v1523_v34  ;;  %v1656_v17 = vadd.f32 0.7978846, %v1624_v23  ;;  %v1771_v0 = vmul.f32 %v1739_v2, %v5421_v26  ;;  %v5472_v18 = vmul.f32 0.5, %v5433_v36 }
 0x31f   :  { %v3743_v35 = vpop.f32.mrb[26].mxu1  ;;  %v5474_v50 = vmul.f32 0.5, %v1525_v55  ;;  %v1558_v38 = vmul.f32 %v1526_v12, %v1526_v12  ;;  %v1773_v25 = vmul.f32 %v1741_v16, %v5419_v42  ;;  %4014 = vtanh.f32 %v1685_v10 }
 0x320   :  { %v1118_v6 = vpop.f32.mrb[27].mxu1  ;;  %v4005_v8 = vpop.eup %4004  ;;  %v1688_v61 = vmul.f32 %v1656_v17, %v1528_v20  ;;  %v1561_v13 = vmul.f32 %v5462_v51, %v5462_v51  ;;  %v5479_v28 = vmul.f32 0.5, %v1523_v34  ;;  %4016 = vtanh.f32 %v1683_v33 }
 0x321   :  { %v5481_v52 = vmul.f32 0.5, %v1528_v20  ;;  %v1622_v26 = vmul.f32 0.035677407, %v1558_v38  ;;  %v4007_v36 = vpop.eup %4006  ;;  %v5484_v55 = vmul.f32 %v1744_v43, %v5423_v21  ;;  %v1559_v42 = vmul.f32 %v5467_v29, %v5467_v29 }
 0x322   :  { %4018 = vtanh.f32 %v1688_v61  ;;  %v1625_v60 = vmul.f32 0.035677407, %v1561_v13  ;;  %v4009_v63 = vpop.eup %4008  ;;  %v1743_v39 = vadd.f32 1.0, %v4005_v8  ;;  %v1798_v37 = vpack.c.bf16 %v1771_v0, %v1770_v47 }
 0x323   :  { %v1654_v1 = vadd.f32 0.7978846, %v1622_v26  ;;  %v5489_v34 = vadd.f32 %v3742_v14, %v5355_v40  ;;  %v1623_v30 = vmul.f32 0.035677407, %v1559_v42  ;;  %v1799_v20 = vpack.c.bf16 %v1773_v25, %v5454_v27 }
 0x324   :  { %v1657_v24 = vadd.f32 0.7978846, %v1625_v60  ;;  %v5495_v21 = vadd.f32 %v1445_v41, %v1115_v22  ;;  %v1742_v32 = vadd.f32 1.0, %v4007_v36  ;;  %3760 = vmatprep.mubr.msk.bf16.mxu0 %vm447_vm0, %v1798_v37  ;;  %v5501_v40 = vadd.f32 %v3743_v35, %v5379_v56 }
 0x325   :  { %v3746_v45 = vpop.f32.mrb[28].mxu1  ;;  %v4011_v31 = vpop.eup %4010  ;;  %v1686_v46 = vmul.f32 %v1654_v1, %v1526_v12  ;;  %v1564_v54 = vmul.f32 %v5489_v34, %v5489_v34  ;;  %v1745_v27 = vadd.f32 1.0, %v4009_v63  ;;  %v1655_v44 = vadd.f32 0.7978846, %v1623_v30  ;;  %3761 = vmatmul.mubr.msk.bf16.gmra.mrb[12].mxu0 %vm447_vm0, %v1799_v20 }
 0x326   :  { %v1131_v57 = vpop.f32.mrb[29].mxu1  ;;  %v4013_v59 = vpop.eup %4012  ;;  %v1689_v2 = vmul.f32 %v1657_v24, %v5462_v51  ;;  %v1562_v41 = vmul.f32 %v5495_v21, %v5495_v21  ;;  %v1775_v58 = vmul.f32 %v1743_v39, %v5439_v15  ;;  %v1590_v16 = vmul.f32 0.5, %v1526_v12 }
 0x327   :  { %v3747_v19 = vpop.f32.mrb[30].mxu1  ;;  %4020 = vtanh.f32 %v1686_v46  ;;  %v1628_v62 = vmul.f32 0.035677407, %v1564_v54  ;;  %v1748_v56 = vadd.f32 1.0, %v4011_v31  ;;  %v1687_v14 = vmul.f32 %v1655_v44, %v5467_v29 }
 0x328   :  { %v1134_v23 = vpop.f32.mrb[31].mxu1  ;;  %4022 = vtanh.f32 %v1689_v2  ;;  %v1626_v10 = vmul.f32 0.035677407, %v1562_v41  ;;  %v1774_v22 = vmul.f32 %v1742_v32, %v5425_v53  ;;  %v1746_v47 = vadd.f32 1.0, %v4013_v59 }
 0x329   :  { %v1660_v43 = vadd.f32 0.7978846, %v1628_v62  ;;  %v1565_v33 = vmul.f32 %v5501_v40, %v5501_v40  ;;  %v4015_v17 = vpop.eup %4014  ;;  %v1777_v35 = vmul.f32 %v1745_v27, %v5436_v48  ;;  %4024 = vtanh.f32 %v1687_v14 }
 0x32a   :  { %v1658_v15 = vadd.f32 0.7978846, %v1626_v10  ;;  %v6029_v12 = vrot.slane %v5338_v49, %v5186_v5  ;;  %v4017_v38 = vpop.eup %4016  ;;  %v1593_v8 = vmul.f32 0.5, %v5462_v51  ;;  %v1800_v61 = vpack.c.bf16 %v1775_v58, %v1774_v22 }
 0x32b   :  { %v1692_v53 = vmul.f32 %v1660_v43, %v5489_v34  ;;  %v1629_v25 = vmul.f32 0.035677407, %v1565_v33  ;;  %v1780_v26 = vmul.f32 %v1748_v56, %v5451_v7  ;;  %v1591_v36 = vmul.f32 0.5, %v5467_v29 }
 0x32c   :  { %v5516_v0 = vadd.f32 %v6029_v12, %v1118_v6  ;;  %v4019_v13 = vpop.eup %4018  ;;  %v1690_v48 = vmul.f32 %v1658_v15, %v5495_v21  ;;  %v1778_v49 = vmul.f32 %v1746_v47, %v5472_v18  ;;  %v1749_v6 = vadd.f32 1.0, %v4015_v17  ;;  %3764 = vmatprep.mubr.msk.bf16.mxu0 %vm447_vm0, %v1800_v61 }
 0x32d   :  { %4026 = vtanh.f32 %v1692_v53  ;;  %v1661_v42 = vadd.f32 0.7978846, %v1629_v25  ;;  %v1747_v51 = vadd.f32 1.0, %v4017_v38  ;;  %v5528_v39 = vadd.f32 %v3746_v45, %v5193_v9 }
 0x32e   :  { %v1563_v60 = vmul.f32 %v5516_v0, %v5516_v0  ;;  %v1801_v7 = vpack.c.bf16 %v1777_v35, %v5484_v55  ;;  %v1752_v29 = vadd.f32 1.0, %v4019_v13  ;;  %v6030_v37 = vrot.slane %v5181_v3, %v5186_v5 }
 0x32f   :  { %v1693_v1 = vmul.f32 %v1661_v42, %v5501_v40  ;;  %v5538_v18 = vadd.f32 %v3747_v19, %v5196_v11  ;;  %4028 = vtanh.f32 %v1690_v48  ;;  %v1568_v20 = vmul.f32 %v5528_v39, %v5528_v39 }
 0x330   :  { %v1627_v63 = vmul.f32 0.035677407, %v1563_v60  ;;  %v5535_v24 = vadd.f32 %v6030_v37, %v1131_v57  ;;  %3765 = vmatmul.mubr.msk.bf16.gmra.mrb[16].mxu0 %vm447_vm0, %v1801_v7  ;;  %v6031_v9 = vrot.slane %v5184_v4, %v5186_v5  ;;  %v1781_v3 = vmul.f32 %v1749_v6, %v5474_v50 }
 0x331   :  { %v4021_v45 = vpop.eup %4020  ;;  %4030 = vtanh.f32 %v1693_v1  ;;  %v1569_v31 = vmul.f32 %v5538_v18, %v5538_v18  ;;  %v1779_v46 = vmul.f32 %v1747_v51, %v5479_v28  ;;  %v1632_v59 = vmul.f32 0.035677407, %v1568_v20 }
 0x332   :  { %v1659_v30 = vadd.f32 0.7978846, %v1627_v63  ;;  %v5546_v55 = vadd.f32 %v6031_v9, %v1134_v23  ;;  %v1566_v11 = vmul.f32 %v5535_v24, %v5535_v24  ;;  %v4023_v32 = vpop.eup %4022  ;;  %v1750_v54 = vadd.f32 1.0, %v4021_v45 }
 0x333   :  { %v1753_v4 = vadd.f32 1.0, %v4023_v32  ;;  %v1633_v27 = vmul.f32 0.035677407, %v1569_v31  ;;  %v4025_v2 = vpop.eup %4024  ;;  %v1784_v44 = vmul.f32 %v1752_v29, %v5481_v52  ;;  %v1664_v19 = vadd.f32 0.7978846, %v1632_v59 }
 0x334   :  { %v1691_v57 = vmul.f32 %v1659_v30, %v5516_v0  ;;  %v1630_v5 = vmul.f32 0.035677407, %v1566_v11  ;;  %v1567_v50 = vmul.f32 %v5546_v55, %v5546_v55  ;;  %v1782_v41 = vmul.f32 %v1750_v54, %v1590_v16 }
 0x335   :  { %v1785_v58 = vmul.f32 %v1753_v4, %v1593_v8  ;;  %v1751_v62 = vadd.f32 1.0, %v4025_v2  ;;  %v1665_v28 = vadd.f32 0.7978846, %v1633_v27  ;;  %v1696_v56 = vmul.f32 %v1664_v19, %v5528_v39 }
 0x336   :  { %4032 = vtanh.f32 %v1691_v57  ;;  %v1662_v23 = vadd.f32 0.7978846, %v1630_v5  ;;  %v1631_v14 = vmul.f32 0.035677407, %v1567_v50  ;;  %v1802_v10 = vpack.c.bf16 %v1779_v46, %v1778_v49  ;;  %v5578_v57 = vld [vmem:[#allocation17] ss:$0 sm:$0xff] }
 0x337   :  { %v1803_v22 = vpack.c.bf16 %v1781_v3, %v1780_v26  ;;  %v4027_v47 = vpop.eup %4026  ;;  %v1783_v43 = vmul.f32 %v1751_v62, %v1591_v36  ;;  %v1697_v17 = vmul.f32 %v1665_v28, %v5538_v18  ;;  %v1805_v35 = vpack.c.bf16 %v1785_v58, %v1784_v44 }
 0x338   :  { %v1694_v33 = vmul.f32 %v1662_v23, %v5535_v24  ;;  %4034 = vtanh.f32 %v1696_v56  ;;  %v1663_v52 = vadd.f32 0.7978846, %v1631_v14  ;;  %3768 = vmatprep.mubr.msk.bf16.mxu0 %vm447_vm0, %v1802_v10  ;;  %v1756_v12 = vadd.f32 1.0, %v4027_v47 }
 0x339   :  { %3769 = vmatmul.mubr.msk.bf16.gmra.mrb[20].mxu0 %vm447_vm0, %v1803_v22  ;;  %v1804_v16 = vpack.c.bf16 %v1783_v43, %v1782_v41  ;;  %v4029_v15 = vpop.eup %4028  ;;  %v1596_v53 = vmul.f32 0.5, %v5489_v34  ;;  %v1597_v25 = vmul.f32 0.5, %v5501_v40  ;;  %v1594_v60 = vmul.f32 0.5, %v5495_v21 }
 0x33a   :  { %4036 = vtanh.f32 %v1694_v33  ;;  %v1695_v38 = vmul.f32 %v1663_v52, %v5546_v55  ;;  %v1754_v13 = vadd.f32 1.0, %v4029_v15  ;;  %v1595_v49 = vmul.f32 0.5, %v5516_v0 }
 0x33b   :  { %4038 = vtanh.f32 %v1697_v17  ;;  %v4031_v8 = vpop.eup %4030  ;;  %3772 = vmatprep.mubr.msk.bf16.mxu0 %vm447_vm0, %v1804_v16  ;;  %v1788_v36 = vmul.f32 %v1756_v12, %v1596_v53  ;;  %v1600_v37 = vmul.f32 0.5, %v5528_v39  ;;  %v1601_v20 = vmul.f32 0.5, %v5538_v18  ;;  %v3965_v18 = vld [vmem:[#allocation19 + $0x8] sm:$0xff]  }
 0x33c   :  { %v1757_v61 = vadd.f32 1.0, %v4031_v8  ;;  %4040 = vtanh.f32 %v1695_v38  ;;  %v1786_v51 = vmul.f32 %v1754_v13, %v1594_v60  ;;  %v1598_v0 = vmul.f32 0.5, %v5535_v24  ;;  %3786 = vmatprep.subr.bf16.mxu0 %v3965_v18 }
 0x33d   :  { %v1599_v11 = vmul.f32 0.5, %v5546_v55  ;;  %3787 = vmatpush3.bf16.msra.mxu0 %v3965_v18 }
 0x33e   :  { %v1789_v48 = vmul.f32 %v1757_v61, %v1597_v25 }
 0x340   :  { %v4033_v26 = vpop.eup %4032  ;;  %v1807_v42 = vpack.c.bf16 %v1789_v48, %v1788_v36 }
 0x341   :  { %v1755_v6 = vadd.f32 1.0, %v4033_v26  ;;  %3773 = vmatmul.mubr.msk.bf16.gmra.mrb[24].mxu0 %vm447_vm0, %v1805_v35 }
 0x342   :  { %v4035_v7 = vpop.eup %4034 }
 0x343   :  { %v1787_v63 = vmul.f32 %v1755_v6, %v1595_v49  ;;  %v1760_v29 = vadd.f32 1.0, %v4035_v7 }
 0x344   :  { %v4037_v34 = vpop.eup %4036 }
 0x345   :  { %v1806_v40 = vpack.c.bf16 %v1787_v63, %v1786_v51  ;;  %v4039_v1 = vpop.eup %4038  ;;  %v1758_v30 = vadd.f32 1.0, %v4037_v34  ;;  %v1792_v45 = vmul.f32 %v1760_v29, %v1600_v37 }
 0x346   :  { %v1761_v9 = vadd.f32 1.0, %v4039_v1  ;;  %v4041_v21 = vpop.eup %4040 }
 0x347   :  { %3776 = vmatprep.mubr.msk.bf16.mxu0 %vm447_vm0, %v1806_v40  ;;  %v1759_v31 = vadd.f32 1.0, %v4041_v21  ;;  %v1790_v32 = vmul.f32 %v1758_v30, %v1598_v0 }
 0x348   :  { %v1793_v3 = vmul.f32 %v1761_v9, %v1601_v20 }
 0x349   :  { %v1791_v46 = vmul.f32 %v1759_v31, %v1599_v11  ;;  %3777 = vmatmul.mubr.msk.bf16.gmra.mrb[28].mxu0 %vm447_vm0, %v1807_v42 }
 0x34a   :  { %v1809_v54 = vpack.c.bf16 %v1793_v3, %v1792_v45 }
 0x34b   :  { %v1808_v39 = vpack.c.bf16 %v1791_v46, %v1790_v32 }
 0x34d   :  { %3780 = vmatprep.mubr.msk.bf16.mxu0 %vm447_vm0, %v1808_v39 }
 0x351   :  { %3781 = vmatmul.mubr.msk.bf16.gmra.mrb[32].mxu0 %vm447_vm0, %v1809_v54 }
 0x3e6   :  { %v3754_v24 = vpop.f32.mrb[4].mxu0 }
 0x3e7   :  { %v1924_v59 = vadd.f32 %v3754_v24, %v5578_v57  ;;  %v1915_v55 = vpop.f32.mrb[5].mxu0 }
 0x3e8   :  { %v1916_v4 = vadd.f32 %v5578_v57, %v1915_v55  ;;  %v3755_v5 = vpop.f32.mrb[6].mxu0 }
 0x3e9   :  { %v2044_v27 = vmul.f32 %v1924_v59, %v1924_v59  ;;  %v5583_v50 = vadd.f32 %v3755_v5, %v5578_v57  ;;  %v1918_v2 = vpop.f32.mrb[7].mxu0  ;;  %v2076_v20 = vmul.f32 0.5, %v1924_v59 }
 0x3ea   :  { %v2042_v44 = vmul.f32 %v1916_v4, %v1916_v4  ;;  %v5586_v41 = vadd.f32 %v5578_v57, %v1918_v2  ;;  %v2074_v54 = vmul.f32 0.5, %v1916_v4 }
 0x3eb   :  { %v2108_v19 = vmul.f32 0.035677407, %v2044_v27  ;;  %v2045_v58 = vmul.f32 %v5583_v50, %v5583_v50 }
 0x3ec   :  { %v2106_v62 = vmul.f32 0.035677407, %v2042_v44  ;;  %v2043_v23 = vmul.f32 %v5586_v41, %v5586_v41  ;;  %v2075_v2 = vmul.f32 0.5, %v5586_v41 }
 0x3ed   :  { %v2140_v28 = vadd.f32 0.7978846, %v2108_v19  ;;  %v2109_v56 = vmul.f32 0.035677407, %v2045_v58 }
 0x3ee   :  { %v2138_v14 = vadd.f32 0.7978846, %v2106_v62  ;;  %v2107_v10 = vmul.f32 0.035677407, %v2043_v23 }
 0x3ef   :  { %v2172_v22 = vmul.f32 %v2140_v28, %v1924_v59  ;;  %v2141_v47 = vadd.f32 0.7978846, %v2109_v56  ;;  %v3758_v17 = vpop.f32.mrb[8].mxu0  ;;  %v2077_v59 = vmul.f32 0.5, %v5583_v50 }
 0x3f0   :  { %v2170_v43 = vmul.f32 %v2138_v14, %v1916_v4  ;;  %v2139_v33 = vadd.f32 0.7978846, %v2107_v10  ;;  %v5594_v52 = vadd.f32 %v3758_v17, %v5578_v57  ;;  %v1931_v16 = vpop.f32.mrb[9].mxu0 }
 0x3f1   :  { %4042 = vtanh.f32 %v2172_v22  ;;  %v2173_v35 = vmul.f32 %v2141_v47, %v5583_v50  ;;  %v5598_v12 = vadd.f32 %v5578_v57, %v1931_v16  ;;  %v3759_v38 = vpop.f32.mrb[10].mxu0 }
 0x3f2   :  { %4044 = vtanh.f32 %v2170_v43  ;;  %v2171_v15 = vmul.f32 %v2139_v33, %v5586_v41  ;;  %v2048_v8 = vmul.f32 %v5594_v52, %v5594_v52  ;;  %v5603_v53 = vadd.f32 %v3759_v38, %v5578_v57  ;;  %v1934_v25 = vpop.f32.mrb[11].mxu0 }
 0x3f3   :  { %4046 = vtanh.f32 %v2173_v35  ;;  %v2046_v61 = vmul.f32 %v5598_v12, %v5598_v12  ;;  %v5608_v13 = vadd.f32 %v5578_v57, %v1934_v25  ;;  %v2080_v17 = vmul.f32 0.5, %v5594_v52 }
 0x3f4   :  { %4048 = vtanh.f32 %v2171_v15  ;;  %v2112_v26 = vmul.f32 0.035677407, %v2048_v8  ;;  %v2049_v36 = vmul.f32 %v5603_v53, %v5603_v53  ;;  %v2078_v8 = vmul.f32 0.5, %v5598_v12 }
 0x3f5   :  { %v2110_v48 = vmul.f32 0.035677407, %v2046_v61  ;;  %v2047_v60 = vmul.f32 %v5608_v13, %v5608_v13  ;;  %v2081_v25 = vmul.f32 0.5, %v5603_v53 }
 0x3f6   :  { %v2144_v49 = vadd.f32 0.7978846, %v2112_v26  ;;  %v2113_v6 = vmul.f32 0.035677407, %v2049_v36 }
 0x3f7   :  { %v2142_v42 = vadd.f32 0.7978846, %v2110_v48  ;;  %v2111_v51 = vmul.f32 0.035677407, %v2047_v60 }
 0x3f8   :  { %v2176_v63 = vmul.f32 %v2144_v49, %v5594_v52  ;;  %v2145_v7 = vadd.f32 0.7978846, %v2113_v6  ;;  %v3762_v34 = vpop.f32.mrb[12].mxu0 }
 0x3f9   :  { %v2174_v29 = vmul.f32 %v2142_v42, %v5598_v12  ;;  %v2143_v40 = vadd.f32 0.7978846, %v2111_v51  ;;  %v5617_v1 = vadd.f32 %v3762_v34, %v5578_v57  ;;  %v1947_v37 = vpop.f32.mrb[13].mxu0  ;;  %v2079_v51 = vmul.f32 0.5, %v5608_v13 }
 0x3fa   :  { %4050 = vtanh.f32 %v2176_v63  ;;  %v2177_v9 = vmul.f32 %v2145_v7, %v5603_v53  ;;  %v5621_v21 = vadd.f32 %v5578_v57, %v1947_v37  ;;  %v3763_v0 = vpop.f32.mrb[14].mxu0 }
 0x3fb   :  { %v4043_v30 = vpop.eup %4042  ;;  %4052 = vtanh.f32 %v2174_v29  ;;  %v2175_v11 = vmul.f32 %v2143_v40, %v5608_v13  ;;  %v2052_v31 = vmul.f32 %v5617_v1, %v5617_v1  ;;  %v1950_v32 = vpop.f32.mrb[15].mxu0  ;;  %v5631_v4 = vadd.f32 %v3763_v0, %v5578_v57 }
 0x3fc   :  { %v4045_v45 = vpop.eup %4044  ;;  %v2236_v3 = vadd.f32 1.0, %v4043_v30  ;;  %4054 = vtanh.f32 %v2177_v9  ;;  %v2050_v18 = vmul.f32 %v5621_v21, %v5621_v21  ;;  %v5634_v23 = vadd.f32 %v5578_v57, %v1950_v32 }
 0x3fd   :  { %v4047_v46 = vpop.eup %4046  ;;  %v2234_v39 = vadd.f32 1.0, %v4045_v45  ;;  %4056 = vtanh.f32 %v2175_v11  ;;  %v2116_v5 = vmul.f32 0.035677407, %v2052_v31  ;;  %v2053_v22 = vmul.f32 %v5631_v4, %v5631_v4 }
 0x3fe   :  { %v4049_v24 = vpop.eup %4048  ;;  %v2237_v55 = vadd.f32 1.0, %v4047_v46  ;;  %v2268_v27 = vmul.f32 %v2236_v3, %v2076_v20  ;;  %v2114_v19 = vmul.f32 0.035677407, %v2050_v18  ;;  %v2051_v47 = vmul.f32 %v5634_v23, %v5634_v23 }
 0x3ff   :  { %v2235_v44 = vadd.f32 1.0, %v4049_v24  ;;  %v2148_v62 = vadd.f32 0.7978846, %v2116_v5  ;;  %v2266_v28 = vmul.f32 %v2234_v39, %v2074_v54  ;;  %v2117_v35 = vmul.f32 0.035677407, %v2053_v22 }
 0x400   :  { %v2269_v58 = vmul.f32 %v2237_v55, %v2077_v59  ;;  %v2146_v14 = vadd.f32 0.7978846, %v2114_v19  ;;  %v2115_v61 = vmul.f32 0.035677407, %v2051_v47  ;;  %v2084_v18 = vmul.f32 0.5, %v5617_v1 }
 0x401   :  { %v2267_v56 = vmul.f32 %v2235_v44, %v2075_v2  ;;  %v2180_v10 = vmul.f32 %v2148_v62, %v5617_v1  ;;  %v2149_v49 = vadd.f32 0.7978846, %v2117_v35  ;;  %v2082_v62 = vmul.f32 0.5, %v5621_v21 }
 0x402   :  { %v2299_v50 = vpack.c.bf16 %v2269_v58, %v2268_v27  ;;  %v2178_v41 = vmul.f32 %v2146_v14, %v5621_v21  ;;  %v2147_v12 = vadd.f32 0.7978846, %v2115_v61 }
 0x403   :  { %v3766_v43 = vpop.f32.mrb[16].mxu0  ;;  %v2298_v33 = vpack.c.bf16 %v2267_v56, %v2266_v28  ;;  %4058 = vtanh.f32 %v2180_v10  ;;  %v2181_v29 = vmul.f32 %v2149_v49, %v5631_v4  ;;  %v5659_v28 = vmul.f32 0.5, %v5631_v4 }
 0x404   :  { %v1972_v16 = vadd.f32 %v3766_v43, %v5578_v57  ;;  %v1963_v15 = vpop.f32.mrb[17].mxu0  ;;  %v4051_v38 = vpop.eup %4050  ;;  %4060 = vtanh.f32 %v2178_v41  ;;  %v2179_v20 = vmul.f32 %v2147_v12, %v5634_v23  ;;  %v2083_v10 = vmul.f32 0.5, %v5634_v23 }
 0x405   :  { %v1964_v26 = vadd.f32 %v5578_v57, %v1963_v15  ;;  %v3767_v36 = vpop.f32.mrb[18].mxu0  ;;  %3788 = vmatprep.mubr.msk.bf16.mxu0 %vm447_vm0, %v2298_v33  ;;  %v4053_v48 = vpop.eup %4052  ;;  %v2240_v60 = vadd.f32 1.0, %v4051_v38  ;;  %4062 = vtanh.f32 %v2181_v29 }
 0x406   :  { %v2056_v52 = vmul.f32 %v1972_v16, %v1972_v16  ;;  %v1966_v6 = vpop.f32.mrb[19].mxu0  ;;  %3789 = vmatmul.mubr.msk.bf16.vlgmr.msra.gmra.mrb[36].mxu0 %vm447_vm0, %v2299_v50  ;;  %v4055_v42 = vpop.eup %4054  ;;  %v2238_v7 = vadd.f32 1.0, %v4053_v48  ;;  %v1975_v3 = vadd.f32 %v3767_v36, %v5578_v57  ;;  %4064 = vtanh.f32 %v2179_v20 }
 0x407   :  { %v2054_v53 = vmul.f32 %v1964_v26, %v1964_v26  ;;  %v4057_v63 = vpop.eup %4056  ;;  %v2241_v34 = vadd.f32 1.0, %v4055_v42  ;;  %v2272_v37 = vmul.f32 %v2240_v60, %v2080_v17  ;;  %v1967_v31 = vadd.f32 %v5578_v57, %v1966_v6 }
 0x408   :  { %v2120_v40 = vmul.f32 0.035677407, %v2056_v52  ;;  %v2239_v30 = vadd.f32 1.0, %v4057_v63  ;;  %v2270_v32 = vmul.f32 %v2238_v7, %v2078_v8  ;;  %v2057_v46 = vmul.f32 %v1975_v3, %v1975_v3 }
 0x409   :  { %v2118_v9 = vmul.f32 0.035677407, %v2054_v53  ;;  %v2273_v0 = vmul.f32 %v2241_v34, %v2081_v25  ;;  %v2055_v59 = vmul.f32 %v1967_v31, %v1967_v31  ;;  %v5662_v22 = vmul.f32 0.5, %v1972_v16 }
 0x40a   :  { %v2152_v45 = vadd.f32 0.7978846, %v2120_v40  ;;  %v2271_v13 = vmul.f32 %v2239_v30, %v2079_v51  ;;  %v2121_v2 = vmul.f32 0.035677407, %v2057_v46  ;;  %v5665_v33 = vmul.f32 0.5, %v1964_v26 }
 0x40b   :  { %v2150_v11 = vadd.f32 0.7978846, %v2118_v9  ;;  %v2301_v39 = vpack.c.bf16 %v2273_v0, %v2272_v37  ;;  %v2119_v56 = vmul.f32 0.035677407, %v2055_v59  ;;  %v5669_v23 = vmul.f32 0.5, %v1975_v3 }
 0x40c   :  { %v3770_v54 = vpop.f32.mrb[20].mxu0  ;;  %v2184_v24 = vmul.f32 %v2152_v45, %v1972_v16  ;;  %v2300_v58 = vpack.c.bf16 %v2271_v13, %v2270_v32  ;;  %v2153_v41 = vadd.f32 0.7978846, %v2121_v2  ;;  %v5672_v36 = vmul.f32 0.5, %v1967_v31 }
 0x40d   :  { %v1988_v55 = vadd.f32 %v3770_v54, %v5578_v57  ;;  %v1979_v5 = vpop.f32.mrb[21].mxu0  ;;  %v2182_v27 = vmul.f32 %v2150_v11, %v1964_v26  ;;  %v4059_v1 = vpop.eup %4058  ;;  %v2151_v21 = vadd.f32 0.7978846, %v2119_v56 }
 0x40e   :  { %v1980_v44 = vadd.f32 %v5578_v57, %v1979_v5  ;;  %v3771_v19 = vpop.f32.mrb[22].mxu0  ;;  %3792 = vmatprep.mubr.msk.bf16.mxu0 %vm447_vm0, %v2300_v58  ;;  %v4061_v43 = vpop.eup %4060  ;;  %4066 = vtanh.f32 %v2184_v24  ;;  %v2185_v4 = vmul.f32 %v2153_v41, %v1975_v3  ;;  %v2244_v61 = vadd.f32 1.0, %v4059_v1 }
 0x40f   :  { %v2060_v14 = vmul.f32 %v1988_v55, %v1988_v55  ;;  %v1982_v50 = vpop.f32.mrb[23].mxu0  ;;  %3793 = vmatmul.mubr.msk.bf16.gmra.mrb[40].mxu0 %vm447_vm0, %v2301_v39  ;;  %4068 = vtanh.f32 %v2182_v27  ;;  %v1991_v15 = vadd.f32 %v3771_v19, %v5578_v57  ;;  %v2183_v16 = vmul.f32 %v2151_v21, %v1967_v31  ;;  %v4063_v25 = vpop.eup %4062 }
 0x410   :  { %v2058_v47 = vmul.f32 %v1980_v44, %v1980_v44  ;;  %v1983_v8 = vadd.f32 %v5578_v57, %v1982_v50  ;;  %v4065_v49 = vpop.eup %4064  ;;  %v2242_v52 = vadd.f32 1.0, %v4061_v43  ;;  %v5674_v53 = vmul.f32 0.5, %v1988_v55 }
 0x411   :  { %v2124_v17 = vmul.f32 0.035677407, %v2060_v14  ;;  %v2061_v48 = vmul.f32 %v1991_v15, %v1991_v15  ;;  %4070 = vtanh.f32 %v2183_v16  ;;  %v2243_v12 = vadd.f32 1.0, %v4065_v49 }
 0x412   :  { %v2122_v35 = vmul.f32 0.035677407, %v2058_v47  ;;  %v2059_v42 = vmul.f32 %v1983_v8, %v1983_v8  ;;  %4072 = vtanh.f32 %v2185_v4  ;;  %v2276_v30 = vmul.f32 %v2244_v61, %v2084_v18 }
 0x413   :  { %v2156_v38 = vadd.f32 0.7978846, %v2124_v17  ;;  %v2125_v63 = vmul.f32 0.035677407, %v2061_v48  ;;  %v2245_v20 = vadd.f32 1.0, %v4063_v25  ;;  %v2274_v45 = vmul.f32 %v2242_v52, %v2082_v62 }
 0x414   :  { %v2154_v26 = vadd.f32 0.7978846, %v2122_v35  ;;  %v3774_v60 = vpop.f32.mrb[24].mxu0  ;;  %v2123_v29 = vmul.f32 0.035677407, %v2059_v42  ;;  %v5678_v3 = vmul.f32 0.5, %v1980_v44  ;;  %v2275_v31 = vmul.f32 %v2243_v12, %v2083_v10 }
 0x415   :  { %v2188_v6 = vmul.f32 %v2156_v38, %v1988_v55  ;;  %v1995_v51 = vpop.f32.mrb[25].mxu0  ;;  %v2004_v40 = vadd.f32 %v3774_v60, %v5578_v57  ;;  %v2157_v9 = vadd.f32 0.7978846, %v2125_v63  ;;  %v5680_v32 = vmul.f32 0.5, %v1991_v15 }
 0x416   :  { %v3775_v7 = vpop.f32.mrb[26].mxu0  ;;  %v2186_v34 = vmul.f32 %v2154_v26, %v1980_v44  ;;  %v1996_v0 = vadd.f32 %v5578_v57, %v1995_v51  ;;  %v2155_v13 = vadd.f32 0.7978846, %v2123_v29  ;;  %v2277_v5 = vmul.f32 %v2245_v20, %v5659_v28 }
 0x417   :  { %4074 = vtanh.f32 %v2188_v6  ;;  %v1998_v37 = vpop.f32.mrb[27].mxu0  ;;  %v2064_v11 = vmul.f32 %v2004_v40, %v2004_v40  ;;  %v2189_v46 = vmul.f32 %v2157_v9, %v1991_v15  ;;  %v2007_v18 = vadd.f32 %v3775_v7, %v5578_v57 }
 0x418   :  { %v2062_v54 = vmul.f32 %v1996_v0, %v1996_v0  ;;  %v4067_v39 = vpop.eup %4066  ;;  %4076 = vtanh.f32 %v2186_v34  ;;  %v2187_v24 = vmul.f32 %v2155_v13, %v1983_v8  ;;  %v1999_v2 = vadd.f32 %v5578_v57, %v1998_v37 }
 0x419   :  { %v2128_v59 = vmul.f32 0.035677407, %v2064_v11  ;;  %v4069_v55 = vpop.eup %4068  ;;  %4078 = vtanh.f32 %v2189_v46  ;;  %v5685_v19 = vmul.f32 0.5, %v1983_v8  ;;  %v2065_v62 = vmul.f32 %v2007_v18, %v2007_v18 }
 0x41a   :  { %v2126_v27 = vmul.f32 0.035677407, %v2062_v54  ;;  %4080 = vtanh.f32 %v2187_v24  ;;  %v2248_v14 = vadd.f32 1.0, %v4067_v39  ;;  %v2063_v1 = vmul.f32 %v1999_v2, %v1999_v2 }
 0x41b   :  { %v2160_v58 = vadd.f32 0.7978846, %v2128_v59  ;;  %v2302_v10 = vpack.c.bf16 %v2275_v31, %v2274_v45  ;;  %v4071_v47 = vpop.eup %4070  ;;  %v2246_v43 = vadd.f32 1.0, %v4069_v55  ;;  %v2129_v28 = vmul.f32 0.035677407, %v2065_v62 }
 0x41c   :  { %v3778_v44 = vpop.f32.mrb[28].mxu0  ;;  %v2158_v50 = vadd.f32 0.7978846, %v2126_v27  ;;  %v4073_v35 = vpop.eup %4072  ;;  %v5690_v15 = vmul.f32 0.5, %v2004_v40  ;;  %v2127_v38 = vmul.f32 0.035677407, %v2063_v1  ;;  %v2303_v8 = vpack.c.bf16 %v2277_v5, %v2276_v30 }
 0x41d   :  { %v2011_v56 = vpop.f32.mrb[29].mxu0  ;;  %v2192_v21 = vmul.f32 %v2160_v58, %v2004_v40  ;;  %v5688_v17 = vadd.f32 %v3778_v44, %v5578_v57  ;;  %3796 = vmatprep.mubr.msk.bf16.mxu0 %vm447_vm0, %v2302_v10  ;;  %v2247_v61 = vadd.f32 1.0, %v4071_v47  ;;  %v2161_v26 = vadd.f32 0.7978846, %v2129_v28 }
 0x41e   :  { %v3779_v41 = vpop.f32.mrb[30].mxu0  ;;  %v2190_v16 = vmul.f32 %v2158_v50, %v1996_v0  ;;  %v2280_v60 = vmul.f32 %v2248_v14, %v5662_v22  ;;  %v5696_v49 = vmul.f32 0.5, %v1996_v0  ;;  %v2159_v52 = vadd.f32 0.7978846, %v2127_v38  ;;  %3797 = vmatmul.mubr.msk.bf16.gmra.mrb[44].mxu0 %vm447_vm0, %v2303_v8 }
 0x41f   :  { %v2014_v4 = vpop.f32.mrb[31].mxu0  ;;  %4082 = vtanh.f32 %v2192_v21  ;;  %v2068_v48 = vmul.f32 %v5688_v17, %v5688_v17  ;;  %v2278_v6 = vmul.f32 %v2246_v43, %v5665_v33  ;;  %v2249_v42 = vadd.f32 1.0, %v4073_v35 }
 0x420   :  { %4084 = vtanh.f32 %v2190_v16  ;;  %v2193_v51 = vmul.f32 %v2161_v26, %v2007_v18  ;;  %v2191_v7 = vmul.f32 %v2159_v52, %v1999_v2  ;;  %v5701_v34 = vadd.f32 %v5578_v57, %v2011_v56 }
 0x421   :  { %v4075_v25 = vpop.eup %4074  ;;  %v2132_v12 = vmul.f32 0.035677407, %v2068_v48  ;;  %v5704_v29 = vadd.f32 %v3779_v41, %v5578_v57  ;;  %v2279_v37 = vmul.f32 %v2247_v61, %v5672_v36  ;;  %v5708_v20 = vadd.f32 %v5578_v57, %v2014_v4 }
 0x422   :  { %v2252_v63 = vadd.f32 1.0, %v4075_v25  ;;  %v4077_v40 = vpop.eup %4076  ;;  %4086 = vtanh.f32 %v2193_v51  ;;  %v2097_v0 = vmul.f32 0.5, %v2007_v18  ;;  %v2066_v45 = vmul.f32 %v5701_v34, %v5701_v34 }
 0x423   :  { %v2164_v30 = vadd.f32 0.7978846, %v2132_v12  ;;  %v4079_v9 = vpop.eup %4078  ;;  %4088 = vtanh.f32 %v2191_v7  ;;  %v2069_v13 = vmul.f32 %v5704_v29, %v5704_v29  ;;  %v2281_v46 = vmul.f32 %v2249_v42, %v5669_v23 }
 0x424   :  { %v3782_v22 = vpop.f32.mrb[32].mxu0  ;;  %v4081_v31 = vpop.eup %4080  ;;  %v2095_v36 = vmul.f32 0.5, %v1999_v2  ;;  %v2067_v39 = vmul.f32 %v5708_v20, %v5708_v20  ;;  %v2284_v59 = vmul.f32 %v2252_v63, %v5674_v53  ;;  %v2250_v18 = vadd.f32 1.0, %v4077_v40 }
 0x425   :  { %v2027_v33 = vpop.f32.mrb[33].mxu0  ;;  %v2196_v54 = vmul.f32 %v2164_v30, %v5688_v17  ;;  %v2130_v55 = vmul.f32 0.035677407, %v2066_v45  ;;  %v2133_v5 = vmul.f32 0.035677407, %v2069_v13  ;;  %v2253_v27 = vadd.f32 1.0, %v4079_v9 }
 0x426   :  { %v3783_v11 = vpop.f32.mrb[34].mxu0  ;;  %v2251_v44 = vadd.f32 1.0, %v4081_v31  ;;  %v2131_v58 = vmul.f32 0.035677407, %v2067_v39  ;;  %v2304_v62 = vpack.c.bf16 %v2279_v37, %v2278_v6  ;;  %v5720_v23 = vadd.f32 %v3782_v22, %v5578_v57 }
 0x427   :  { %v2030_v24 = vpop.f32.mrb[35].mxu0  ;;  %4090 = vtanh.f32 %v2196_v54  ;;  %v2162_v56 = vadd.f32 0.7978846, %v2130_v55  ;;  %v2165_v14 = vadd.f32 0.7978846, %v2133_v5  ;;  %v2305_v1 = vpack.c.bf16 %v2281_v46, %v2280_v60 }
 0x428   :  { %v2163_v50 = vadd.f32 0.7978846, %v2131_v58  ;;  %3800 = vmatprep.mubr.msk.bf16.mxu0 %vm447_vm0, %v2304_v62  ;;  %v5724_v53 = vadd.f32 %v5578_v57, %v2027_v33  ;;  %v5727_v10 = vadd.f32 %v3783_v11, %v5578_v57  ;;  %v2072_v28 = vmul.f32 %v5720_v23, %v5720_v23 }
 0x429   :  { %v4083_v2 = vpop.eup %4082  ;;  %v2194_v43 = vmul.f32 %v2162_v56, %v5701_v34  ;;  %v2197_v21 = vmul.f32 %v2165_v14, %v5704_v29  ;;  %v2282_v4 = vmul.f32 %v2250_v18, %v5678_v3  ;;  %3801 = vmatmul.mubr.msk.bf16.gmra.mrb[48].mxu0 %vm447_vm0, %v2305_v1  ;;  %v2285_v8 = vmul.f32 %v2253_v27, %v5680_v32 }
 0x42a   :  { %v4085_v41 = vpop.eup %4084  ;;  %v2256_v47 = vadd.f32 1.0, %v4083_v2  ;;  %v2195_v16 = vmul.f32 %v2163_v50, %v5708_v20  ;;  %v2070_v38 = vmul.f32 %v5724_v53, %v5724_v53  ;;  %v2283_v25 = vmul.f32 %v2251_v44, %v5685_v19 }
 0x42b   :  { %v2254_v35 = vadd.f32 1.0, %v4085_v41  ;;  %4092 = vtanh.f32 %v2194_v43  ;;  %v2136_v61 = vmul.f32 0.035677407, %v2072_v28  ;;  %v2073_v3 = vmul.f32 %v5727_v10, %v5727_v10 }
 0x42c   :  { %v4087_v26 = vpop.eup %4086  ;;  %v2288_v48 = vmul.f32 %v2256_v47, %v5690_v15  ;;  %4094 = vtanh.f32 %v2197_v21  ;;  %v2134_v60 = vmul.f32 0.035677407, %v2070_v38  ;;  %v2031_v19 = vadd.f32 %v5578_v57, %v2030_v24 }
 0x42d   :  { %v4089_v52 = vpop.eup %4088  ;;  %v2286_v6 = vmul.f32 %v2254_v35, %v5696_v49  ;;  %v2257_v42 = vadd.f32 1.0, %v4087_v26  ;;  %4096 = vtanh.f32 %v2195_v16  ;;  %v2168_v51 = vadd.f32 0.7978846, %v2136_v61 }
 0x42e   :  { %v2255_v12 = vadd.f32 1.0, %v4089_v52  ;;  %v2166_v32 = vadd.f32 0.7978846, %v2134_v60  ;;  %v2137_v63 = vmul.f32 0.035677407, %v2073_v3  ;;  %v2306_v15 = vpack.c.bf16 %v2283_v25, %v2282_v4 }
 0x42f   :  { %v2289_v7 = vmul.f32 %v2257_v42, %v2097_v0  ;;  %v2200_v22 = vmul.f32 %v2168_v51, %v5720_v23  ;;  %v2307_v40 = vpack.c.bf16 %v2285_v8, %v2284_v59  ;;  %v2071_v9 = vmul.f32 %v2031_v19, %v2031_v19 }
 0x430   :  { %v2287_v37 = vmul.f32 %v2255_v12, %v2095_v36  ;;  %v2198_v30 = vmul.f32 %v2166_v32, %v5724_v53  ;;  %v2169_v33 = vadd.f32 0.7978846, %v2137_v63  ;;  %3804 = vmatprep.mubr.msk.bf16.mxu0 %vm447_vm0, %v2306_v15  ;;  %v2100_v59 = vmul.f32 0.5, %v5688_v17 }
 0x431   :  { %v4091_v45 = vpop.eup %4090  ;;  %4098 = vtanh.f32 %v2200_v22  ;;  %v2309_v49 = vpack.c.bf16 %v2289_v7, %v2288_v48  ;;  %v2135_v11 = vmul.f32 0.035677407, %v2071_v9  ;;  %3805 = vmatmul.mubr.msk.bf16.gmra.mrb[52].mxu0 %vm447_vm0, %v2307_v40  ;;  %v2101_v18 = vmul.f32 0.5, %v5704_v29 }
 0x432   :  { %v2201_v13 = vmul.f32 %v2169_v33, %v5727_v10  ;;  %v2308_v57 = vpack.c.bf16 %v2287_v37, %v2286_v6  ;;  %4100 = vtanh.f32 %v2198_v30  ;;  %v2260_v46 = vadd.f32 1.0, %v4091_v45 }
 0x433   :  { %v2167_v0 = vadd.f32 0.7978846, %v2135_v11  ;;  %v2098_v5 = vmul.f32 0.5, %v5701_v34  ;;  %v2099_v27 = vmul.f32 0.5, %v5708_v20  ;;  %v2104_v34 = vmul.f32 0.5, %v5720_v23 }
 0x434   :  { %4102 = vtanh.f32 %v2201_v13  ;;  %3808 = vmatprep.mubr.msk.bf16.mxu0 %vm447_vm0, %v2308_v57  ;;  %v2292_v58 = vmul.f32 %v2260_v46, %v2100_v59  ;;  %v2105_v29 = vmul.f32 0.5, %v5727_v10  ;;  %v2102_v35 = vmul.f32 0.5, %v5724_v53  ;;  %v5763_v23 = vld [vmem:[#allocation20] ss:$0 sm:$0xff] }
 0x435   :  { %v4093_v31 = vpop.eup %4092  ;;  %v2199_v39 = vmul.f32 %v2167_v0, %v2031_v19  ;;  %v2103_v16 = vmul.f32 0.5, %v2031_v19 }
 0x436   :  { %v4095_v36 = vpop.eup %4094  ;;  %v2258_v54 = vadd.f32 1.0, %v4093_v31 }
 0x437   :  { %v4097_v24 = vpop.eup %4096  ;;  %v2261_v55 = vadd.f32 1.0, %v4095_v36  ;;  %4104 = vtanh.f32 %v2199_v39 }
 0x438   :  { %v2259_v44 = vadd.f32 1.0, %v4097_v24  ;;  %v2290_v56 = vmul.f32 %v2258_v54, %v2098_v5 }
 0x439   :  { %v2293_v62 = vmul.f32 %v2261_v55, %v2101_v18  ;;  %3809 = vmatmul.mubr.msk.bf16.gmra.mrb[56].mxu0 %vm447_vm0, %v2309_v49 }
 0x43a   :  { %v2291_v14 = vmul.f32 %v2259_v44, %v2099_v27 }
 0x43b   :  { %v4099_v2 = vpop.eup %4098  ;;  %v2311_v50 = vpack.c.bf16 %v2293_v62, %v2292_v58 }
 0x43c   :  { %v2310_v1 = vpack.c.bf16 %v2291_v14, %v2290_v56  ;;  %v4101_v41 = vpop.eup %4100  ;;  %v2264_v17 = vadd.f32 1.0, %v4099_v2 }
 0x43d   :  { %v2262_v21 = vadd.f32 1.0, %v4101_v41 }
 0x43e   :  { %v4103_v47 = vpop.eup %4102  ;;  %3812 = vmatprep.mubr.msk.bf16.mxu0 %vm447_vm0, %v2310_v1  ;;  %v2296_v43 = vmul.f32 %v2264_v17, %v2104_v34 }
 0x43f   :  { %v2265_v20 = vadd.f32 1.0, %v4103_v47  ;;  %v2294_v25 = vmul.f32 %v2262_v21, %v2102_v35 }
 0x441   :  { %v2297_v28 = vmul.f32 %v2265_v20, %v2105_v29  ;;  %v4105_v4 = vpop.eup %4104  ;;  %3813 = vmatmul.mubr.msk.bf16.gmra.mrb[60].mxu0 %vm447_vm0, %v2311_v50 }
 0x442   :  { %v2263_v38 = vadd.f32 1.0, %v4105_v4 }
 0x443   :  { %v2313_v8 = vpack.c.bf16 %v2297_v28, %v2296_v43 }
 0x444   :  { %v2295_v61 = vmul.f32 %v2263_v38, %v2103_v16 }
 0x446   :  { %v2312_v26 = vpack.c.bf16 %v2295_v61, %v2294_v25 }
 0x448   :  { %3816 = vmatprep.mubr.msk.bf16.mxu0 %vm447_vm0, %v2312_v26 }
 0x449   :  { %3817 = vmatmul.mubr.msk.bf16.gmra.mrb[64].mxu0 %vm447_vm0, %v2313_v8 }
 0x4d9   :  { %v3790_v10 = vpop.f32.mrb[36].mxu0 }
 0x4da   :  { %v2428_v48 = vadd.f32 %v3790_v10, %v5763_v23  ;;  %v2419_v60 = vpop.f32.mrb[37].mxu0 }
 0x4db   :  { %v2420_v3 = vadd.f32 %v5763_v23, %v2419_v60  ;;  %v3791_v52 = vpop.f32.mrb[38].mxu0 }
 0x4dc   :  { %v2560_v53 = vsel %vm447_vm0, %v2428_v48, 0.0  ;;  %v2431_v6 = vadd.f32 %v3791_v52, %v5763_v23  ;;  %v2422_v42 = vpop.f32.mrb[39].mxu0 }
 0x4dd   :  { %v2561_v51 = vrot.slane %v2560_v53, 4  ;;  %v2546_v12 = vsel %vm447_vm0, %v2420_v3, 0.0  ;;  %v2423_v32 = vadd.f32 %v5763_v23, %v2422_v42 }
 0x4de   :  { %v2547_v63 = vrot.slane %v2546_v12, 4  ;;  %v2567_v19 = vsel %vm447_vm0, %v2431_v6, 0.0 }
 0x4df   :  { %v2562_v7 = vadd.f32 %v2561_v51, %v2560_v53  ;;  %v2568_v22 = vrot.slane %v2567_v19, 4  ;;  %v2553_v15 = vsel %vm447_vm0, %v2423_v32, 0.0 }
 0x4e0   :  { %v2548_v40 = vadd.f32 %v2547_v63, %v2546_v12  ;;  %v2554_v37 = vrot.slane %v2553_v15, 4 }
 0x4e1   :  { %v2563_v30 = vrot.slane %v2562_v7, 2  ;;  %v2569_v33 = vadd.f32 %v2568_v22, %v2567_v19 }
 0x4e2   :  { %v2549_v9 = vrot.slane %v2548_v40, 2  ;;  %v2555_v45 = vadd.f32 %v2554_v37, %v2553_v15  ;;  %v3794_v0 = vpop.f32.mrb[40].mxu0 }
 0x4e3   :  { %v2564_v49 = vadd.f32 %v2563_v30, %v2562_v7  ;;  %v2570_v13 = vrot.slane %v2569_v33, 2  ;;  %v2444_v36 = vadd.f32 %v3794_v0, %v5763_v23  ;;  %v2435_v54 = vpop.f32.mrb[41].mxu0 }
 0x4e4   :  { %v2550_v11 = vadd.f32 %v2549_v9, %v2548_v40  ;;  %v2556_v57 = vrot.slane %v2555_v45, 2  ;;  %v2436_v59 = vadd.f32 %v5763_v23, %v2435_v54  ;;  %v3795_v18 = vpop.f32.mrb[42].mxu0 }
 0x4e5   :  { %v2565_v31 = vrot.slane %v2564_v49, 1  ;;  %v2571_v46 = vadd.f32 %v2570_v13, %v2569_v33  ;;  %v2588_v5 = vsel %vm447_vm0, %v2444_v36, 0.0  ;;  %v2447_v27 = vadd.f32 %v3795_v18, %v5763_v23  ;;  %v2438_v44 = vpop.f32.mrb[43].mxu0 }
 0x4e6   :  { %v2551_v39 = vrot.slane %v2550_v11, 1  ;;  %v2557_v24 = vadd.f32 %v2556_v57, %v2555_v45  ;;  %v2589_v56 = vrot.slane %v2588_v5, 4  ;;  %v2574_v14 = vsel %vm447_vm0, %v2436_v59, 0.0 }
 0x4e7   :  { %v2572_v55 = vrot.slane %v2571_v46, 1  ;;  %v2566_v2 = vadd.f32 %v2565_v31, %v2564_v49  ;;  %v2575_v50 = vrot.slane %v2574_v14, 4  ;;  %v2595_v1 = vsel %vm447_vm0, %v2447_v27, 0.0 }
 0x4e8   :  { %v2552_v58 = vadd.f32 %v2551_v39, %v2550_v11  ;;  %v2558_v62 = vrot.slane %v2557_v24, 1  ;;  %v2590_v47 = vadd.f32 %v2589_v56, %v2588_v5  ;;  %v2596_v34 = vrot.slane %v2595_v1, 4 }
 0x4e9   :  { %v2573_v41 = vadd.f32 %v2572_v55, %v2571_v46  ;;  %v2576_v29 = vadd.f32 %v2575_v50, %v2574_v14  ;;  %v2439_v20 = vadd.f32 %v5763_v23, %v2438_v44  ;;  %v2772_v35 = vmul.f32 0.033333335, %v2566_v2 }
 0x4ea   :  { %v2559_v17 = vadd.f32 %v2558_v62, %v2557_v24  ;;  %v2770_v43 = vmul.f32 0.033333335, %v2552_v58  ;;  %v2591_v28 = vrot.slane %v2590_v47, 2  ;;  %v2597_v4 = vadd.f32 %v2596_v34, %v2595_v1 }
 0x4eb   :  { %v2577_v16 = vrot.slane %v2576_v29, 2  ;;  %v2581_v38 = vsel %vm447_vm0, %v2439_v20, 0.0  ;;  %v2773_v8 = vmul.f32 0.033333335, %v2573_v41 }
 0x4ec   :  { %v2771_v21 = vmul.f32 0.033333335, %v2559_v17  ;;  %v2598_v61 = vrot.slane %v2597_v4, 2  ;;  %v2582_v26 = vrot.slane %v2581_v38, 4  ;;  %v2592_v10 = vadd.f32 %v2591_v28, %v2590_v47  ;;  %v4130_v17 = vld [vmem:[#allocation2] sm:$0xff] }
 0x4ed   :  { %v2578_v48 = vadd.f32 %v2577_v16, %v2576_v29 }
 0x4ee   :  { %v2835_v25 = vsel %vm2834_vm2, %v2771_v21, %v2770_v43  ;;  %v2599_v3 = vadd.f32 %v2598_v61, %v2597_v4  ;;  %v2583_v52 = vadd.f32 %v2582_v26, %v2581_v38  ;;  %v2593_v51 = vrot.slane %v2592_v10, 1 }
 0x4ef   :  { %v2837_v60 = vsel %vm2836_vm3, %v2772_v35, %v2835_v25  ;;  %v2579_v6 = vrot.slane %v2578_v48, 1 }
 0x4f0   :  { %v2839_v53 = vsel %vm2838_vm4, %v2773_v8, %v2837_v60  ;;  %v2584_v42 = vrot.slane %v2583_v52, 2  ;;  %v2600_v32 = vrot.slane %v2599_v3, 1  ;;  %v2594_v37 = vadd.f32 %v2593_v51, %v2592_v10 }
 0x4f1   :  { %v2580_v12 = vadd.f32 %v2579_v6, %v2578_v48  ;;  %v3798_v7 = vpop.f32.mrb[44].mxu0 }
 0x4f2   :  { %v2585_v63 = vadd.f32 %v2584_v42, %v2583_v52  ;;  %v2460_v15 = vadd.f32 %v3798_v7, %v5763_v23  ;;  %v2451_v40 = vpop.f32.mrb[45].mxu0  ;;  %v2601_v45 = vadd.f32 %v2600_v32, %v2599_v3  ;;  %v2776_v24 = vmul.f32 0.033333335, %v2594_v37 }
 0x4f3   :  { %v2774_v19 = vmul.f32 0.033333335, %v2580_v12  ;;  %v2452_v30 = vadd.f32 %v5763_v23, %v2451_v40  ;;  %v3799_v33 = vpop.f32.mrb[46].mxu0 }
 0x4f4   :  { %v2586_v22 = vrot.slane %v2585_v63, 1  ;;  %v2616_v13 = vsel %vm447_vm0, %v2460_v15, 0.0  ;;  %v2463_v11 = vadd.f32 %v3799_v33, %v5763_v23  ;;  %v2454_v57 = vpop.f32.mrb[47].mxu0  ;;  %v2777_v44 = vmul.f32 0.033333335, %v2601_v45 }
 0x4f5   :  { %v2841_v9 = vsel %vm2840_vm5, %v2774_v19, %v2839_v53  ;;  %v2617_v0 = vrot.slane %v2616_v13, 4  ;;  %v2602_v31 = vsel %vm447_vm0, %v2452_v30, 0.0  ;;  %v2455_v46 = vadd.f32 %v5763_v23, %v2454_v57 }
 0x4f6   :  { %v2587_v49 = vadd.f32 %v2586_v22, %v2585_v63  ;;  %v2603_v54 = vrot.slane %v2602_v31, 4  ;;  %v2623_v39 = vsel %vm447_vm0, %v2463_v11, 0.0 }
 0x4f7   :  { %v2618_v59 = vadd.f32 %v2617_v0, %v2616_v13  ;;  %v2624_v18 = vrot.slane %v2623_v39, 4  ;;  %v2609_v55 = vsel %vm447_vm0, %v2455_v46, 0.0 }
 0x4f8   :  { %v2775_v36 = vmul.f32 0.033333335, %v2587_v49  ;;  %v2604_v5 = vadd.f32 %v2603_v54, %v2602_v31  ;;  %v2610_v27 = vrot.slane %v2609_v55, 4 }
 0x4f9   :  { %v2619_v62 = vrot.slane %v2618_v59, 2  ;;  %v2625_v56 = vadd.f32 %v2624_v18, %v2623_v39 }
 0x4fa   :  { %v2843_v58 = vsel %vm2842_vm6, %v2775_v36, %v2841_v9  ;;  %v2605_v2 = vrot.slane %v2604_v5, 2  ;;  %v2611_v50 = vadd.f32 %v2610_v27, %v2609_v55 }
 0x4fb   :  { %v2845_v14 = vsel %vm2844_vm7, %v2776_v24, %v2843_v58  ;;  %v2626_v41 = vrot.slane %v2625_v56, 2  ;;  %v2620_v43 = vadd.f32 %v2619_v62, %v2618_v59 }
 0x4fc   :  { %v2847_v1 = vsel %vm2846_vm8, %v2777_v44, %v2845_v14  ;;  %v2606_v34 = vadd.f32 %v2605_v2, %v2604_v5  ;;  %v2612_v29 = vrot.slane %v2611_v50, 2  ;;  %v3802_v20 = vpop.f32.mrb[48].mxu0 }
 0x4fd   :  { %v5796_v47 = vadd.f32 %v4130_v17, %v2847_v1  ;;  %v2476_v21 = vadd.f32 %v3802_v20, %v5763_v23  ;;  %v2467_v28 = vpop.f32.mrb[49].mxu0  ;;  %v2627_v25 = vadd.f32 %v2626_v41, %v2625_v56  ;;  %v2621_v53 = vrot.slane %v2620_v43, 1 }
 0x4fe   :  { %v2607_v35 = vrot.slane %v2606_v34, 1  ;;  %v2613_v16 = vadd.f32 %v2612_v29, %v2611_v50  ;;  %v2468_v38 = vadd.f32 %v5763_v23, %v2467_v28  ;;  %v3803_v8 = vpop.f32.mrb[50].mxu0 }
 0x4ff   :  { %v2879_v4 = vsel %vm447_vm0, %v5796_v47, 0.0  ;;  %v2644_v61 = vsel %vm447_vm0, %v2476_v21, 0.0  ;;  %v2479_v26 = vadd.f32 %v3803_v8, %v5763_v23  ;;  %v2470_v10 = vpop.f32.mrb[51].mxu0  ;;  %v2628_v63 = vrot.slane %v2627_v25, 1 }
 0x500   :  { %2880 = vadd.xlane.f32.xlu0 %v2879_v4  ;;  %v2608_v48 = vadd.f32 %v2607_v35, %v2606_v34  ;;  %v2614_v60 = vrot.slane %v2613_v16, 1  ;;  %v2645_v3 = vrot.slane %v2644_v61, 4  ;;  %v2630_v52 = vsel %vm447_vm0, %v2468_v38, 0.0 }
 0x501   :  { %v2631_v6 = vrot.slane %v2630_v52, 4  ;;  %v2651_v42 = vsel %vm447_vm0, %v2479_v26, 0.0  ;;  %v2471_v7 = vadd.f32 %v5763_v23, %v2470_v10  ;;  %v2622_v33 = vadd.f32 %v2621_v53, %v2620_v43 }
 0x502   :  { %v2615_v51 = vadd.f32 %v2614_v60, %v2613_v16  ;;  %v2646_v12 = vadd.f32 %v2645_v3, %v2644_v61  ;;  %v2652_v32 = vrot.slane %v2651_v42, 4  ;;  %v2778_v22 = vmul.f32 0.033333335, %v2608_v48 }
 0x503   :  { %v2632_v19 = vadd.f32 %v2631_v6, %v2630_v52  ;;  %v2637_v45 = vsel %vm447_vm0, %v2471_v7, 0.0  ;;  %v2629_v18 = vadd.f32 %v2628_v63, %v2627_v25  ;;  %v5820_v1 = vmul.f32 0.033333335, %v2622_v33 }
 0x504   :  { %v2779_v15 = vmul.f32 0.033333335, %v2615_v51  ;;  %v2647_v40 = vrot.slane %v2646_v12, 2  ;;  %v2653_v37 = vadd.f32 %v2652_v32, %v2651_v42  ;;  %v3806_v30 = vpop.f32.mrb[52].mxu0  ;;  %v2638_v31 = vrot.slane %v2637_v45, 4 }
 0x505   :  { %v2633_v9 = vrot.slane %v2632_v19, 2  ;;  %v2492_v49 = vadd.f32 %v3806_v30, %v5763_v23  ;;  %v2483_v13 = vpop.f32.mrb[53].mxu0  ;;  %v5823_v29 = vmul.f32 0.033333335, %v2629_v18 }
 0x506   :  { %v5810_v11 = vsel %vm2834_vm2, %v2779_v15, %v2778_v22  ;;  %v2648_v57 = vadd.f32 %v2647_v40, %v2646_v12  ;;  %v2654_v0 = vrot.slane %v2653_v37, 2  ;;  %v3807_v46 = vpop.f32.mrb[54].mxu0  ;;  %v2484_v39 = vadd.f32 %v5763_v23, %v2483_v13 }
 0x507   :  { %v2634_v36 = vadd.f32 %v2633_v9, %v2632_v19  ;;  %v2672_v54 = vsel %vm447_vm0, %v2492_v49, 0.0  ;;  %v2495_v24 = vadd.f32 %v3807_v46, %v5763_v23  ;;  %v2486_v59 = vpop.f32.mrb[55].mxu0  ;;  %v2639_v5 = vadd.f32 %v2638_v31, %v2637_v45 }
 0x508   :  { %v2649_v55 = vrot.slane %v2648_v57, 1  ;;  %v2673_v27 = vrot.slane %v2672_v54, 4  ;;  %v5815_v44 = vadd.f32 %v2654_v0, %v2653_v37  ;;  %v2658_v58 = vsel %vm447_vm0, %v2484_v39, 0.0 }
 0x509   :  { %v2679_v62 = vsel %vm447_vm0, %v2495_v24, 0.0  ;;  %v2487_v56 = vadd.f32 %v5763_v23, %v2486_v59  ;;  %v2635_v14 = vrot.slane %v2634_v36, 1  ;;  %v2640_v2 = vrot.slane %v2639_v5, 2 }
 0x50a   :  { %v2674_v50 = vadd.f32 %v2673_v27, %v2672_v54  ;;  %v2659_v41 = vrot.slane %v2658_v58, 4  ;;  %v2680_v17 = vrot.slane %v2679_v62, 4  ;;  %v2650_v20 = vadd.f32 %v2649_v55, %v2648_v57 }
 0x50b   :  { %v2665_v34 = vsel %vm447_vm0, %v2487_v56, 0.0  ;;  %v2641_v43 = vadd.f32 %v2640_v2, %v2639_v5  ;;  %v2656_v4 = vrot.slane %v5815_v44, 1  ;;  %v2636_v25 = vadd.f32 %v2635_v14, %v2634_v36 }
 0x50c   :  { %v2675_v21 = vrot.slane %v2674_v50, 2  ;;  %v3810_v28 = vpop.f32.mrb[56].mxu0  ;;  %v2660_v35 = vadd.f32 %v2659_v41, %v2658_v58  ;;  %v2681_v16 = vadd.f32 %v2680_v17, %v2679_v62  ;;  %v2666_v38 = vrot.slane %v2665_v34, 4 }
 0x50d   :  { %v2499_v8 = vpop.f32.mrb[57].mxu0  ;;  %v2508_v26 = vadd.f32 %v3810_v28, %v5763_v23  ;;  %v2642_v42 = vrot.slane %v2641_v43, 1  ;;  %v5831_v15 = vmul.f32 0.033333335, %v2650_v20  ;;  %v5833_v40 = vmul.f32 0.033333335, %v2636_v25 }
 0x50e   :  { %v2676_v61 = vadd.f32 %v2675_v21, %v2674_v50  ;;  %v2500_v10 = vadd.f32 %v5763_v23, %v2499_v8  ;;  %v3811_v48 = vpop.f32.mrb[58].mxu0  ;;  %v2661_v60 = vrot.slane %v2660_v35, 2  ;;  %v2682_v3 = vrot.slane %v2681_v16, 2 }
 0x50f   :  { %v2667_v52 = vadd.f32 %v2666_v38, %v2665_v34  ;;  %v2511_v53 = vadd.f32 %v3811_v48, %v5763_v23  ;;  %v2502_v6 = vpop.f32.mrb[59].mxu0  ;;  %v2700_v12 = vsel %vm447_vm0, %v2508_v26, 0.0  ;;  %v2643_v13 = vadd.f32 %v2642_v42, %v2641_v43 }
 0x510   :  { %v2677_v51 = vrot.slane %v2676_v61, 1  ;;  %v2686_v32 = vsel %vm447_vm0, %v2500_v10, 0.0  ;;  %v2662_v63 = vadd.f32 %v2661_v60, %v2660_v35  ;;  %v2683_v19 = vadd.f32 %v2682_v3, %v2681_v16 }
 0x511   :  { %v2668_v7 = vrot.slane %v2667_v52, 2  ;;  %v2701_v22 = vrot.slane %v2700_v12, 4  ;;  %v2687_v37 = vrot.slane %v2686_v32, 4  ;;  %v2707_v30 = vsel %vm447_vm0, %v2511_v53, 0.0 }
 0x512   :  { %v2663_v33 = vrot.slane %v2662_v63, 1  ;;  %v2684_v9 = vrot.slane %v2683_v19, 1  ;;  %v2708_v0 = vrot.slane %v2707_v30, 4  ;;  %v2503_v31 = vadd.f32 %v5763_v23, %v2502_v6 }
 0x513   :  { %v2669_v45 = vadd.f32 %v2668_v7, %v2667_v52  ;;  %v2702_v49 = vadd.f32 %v2701_v22, %v2700_v12  ;;  %v2688_v57 = vadd.f32 %v2687_v37, %v2686_v32  ;;  %v2678_v36 = vadd.f32 %v2677_v51, %v2676_v61 }
 0x514   :  { %v3814_v46 = vpop.f32.mrb[60].mxu0  ;;  %v2664_v54 = vadd.f32 %v2663_v33, %v2662_v63  ;;  %v2709_v55 = vadd.f32 %v2708_v0, %v2707_v30  ;;  %v2693_v5 = vsel %vm447_vm0, %v2503_v31, 0.0  ;;  %v2685_v56 = vadd.f32 %v2684_v9, %v2683_v19 }
 0x515   :  { %v2670_v39 = vrot.slane %v2669_v45, 1  ;;  %v2703_v24 = vrot.slane %v2702_v49, 2  ;;  %v2515_v59 = vpop.f32.mrb[61].mxu0  ;;  %v2689_v18 = vrot.slane %v2688_v57, 2  ;;  %v2524_v27 = vadd.f32 %v3814_v46, %v5763_v23 }
 0x516   :  { %v3815_v58 = vpop.f32.mrb[62].mxu0  ;;  %v2786_v62 = vmul.f32 0.033333335, %v2664_v54  ;;  %v2710_v17 = vrot.slane %v2709_v55, 2  ;;  %v2694_v34 = vrot.slane %v2693_v5, 4  ;;  %v2516_v35 = vadd.f32 %v5763_v23, %v2515_v59 }
 0x517   :  { %v2671_v14 = vadd.f32 %v2670_v39, %v2669_v45  ;;  %v2704_v2 = vadd.f32 %v2703_v24, %v2702_v49  ;;  %v2518_v50 = vpop.f32.mrb[63].mxu0  ;;  %v2690_v41 = vadd.f32 %v2689_v18, %v2688_v57  ;;  %v2728_v20 = vsel %vm447_vm0, %v2524_v27, 0.0 }
 0x518   :  { %v2729_v28 = vrot.slane %v2728_v20, 4  ;;  %v2711_v38 = vadd.f32 %v2710_v17, %v2709_v55  ;;  %v2695_v8 = vadd.f32 %v2694_v34, %v2693_v5  ;;  %v2527_v25 = vadd.f32 %v3815_v58, %v5763_v23 }
 0x519   :  { %v2787_v43 = vmul.f32 0.033333335, %v2671_v14  ;;  %v2705_v21 = vrot.slane %v2704_v2, 1  ;;  %v2691_v16 = vrot.slane %v2690_v41, 1  ;;  %v2714_v48 = vsel %vm447_vm0, %v2516_v35, 0.0 }
 0x51a   :  { %v2730_v10 = vadd.f32 %v2729_v28, %v2728_v20  ;;  %v2657_v60 = vadd.f32 %v2656_v4, %v5815_v44  ;;  %v2783_v3 = vmul.f32 0.033333335, %v2643_v13  ;;  %v2696_v52 = vrot.slane %v2695_v8, 2 }
 0x51b   :  { %v5843_v61 = vsel %vm2834_vm2, %v2787_v43, %v2786_v62  ;;  %v2706_v26 = vadd.f32 %v2705_v21, %v2704_v2  ;;  %v2715_v53 = vrot.slane %v2714_v48, 4  ;;  %v5849_v42 = vmul.f32 0.033333335, %v2678_v36 }
 0x51c   :  { %v3818_v6 = vpop.f32.mrb[64].mxu0  ;;  %v2731_v51 = vrot.slane %v2730_v10, 2  ;;  %v2735_v12 = vsel %vm447_vm0, %v2527_v25, 0.0  ;;  %v2519_v32 = vadd.f32 %v5763_v23, %v2518_v50  ;;  %v5853_v19 = vmul.f32 0.033333335, %v2685_v56 }
 0x51d   :  { %v2531_v63 = vpop.f32.mrb[65].mxu0  ;;  %v2692_v7 = vadd.f32 %v2691_v16, %v2690_v41  ;;  %v2697_v22 = vadd.f32 %v2696_v52, %v2695_v8  ;;  %v2716_v37 = vadd.f32 %v2715_v53, %v2714_v48  ;;  %v5855_v33 = vmul.f32 0.033333335, %v2706_v26 }
 0x51e   :  { %v3819_v30 = vpop.f32.mrb[66].mxu0  ;;  %v2712_v44 = vrot.slane %v2711_v38, 1  ;;  %v2736_v4 = vrot.slane %v2735_v12, 4  ;;  %v2721_v9 = vsel %vm447_vm0, %v2519_v32, 0.0  ;;  %v2732_v49 = vadd.f32 %v2731_v51, %v2730_v10 }
 0x51f   :  { %v2534_v45 = vpop.f32.mrb[67].mxu0  ;;  %v2717_v13 = vrot.slane %v2716_v37, 2  ;;  %v2722_v57 = vrot.slane %v2721_v9, 4  ;;  %v2849_v0 = vsel %vm2836_vm3, %v5820_v1, %v5810_v11  ;;  %v2698_v31 = vrot.slane %v2697_v22, 1 }
 0x520   :  { %v2737_v46 = vadd.f32 %v2736_v4, %v2735_v12  ;;  %v2850_v36 = vsel %vm2838_vm4, %v5823_v29, %v2849_v0  ;;  %v2540_v54 = vadd.f32 %v3818_v6, %v5763_v23  ;;  %v2790_v39 = vmul.f32 0.033333335, %v2692_v7 }
 0x521   :  { %v2718_v24 = vadd.f32 %v2717_v13, %v2716_v37  ;;  %v2723_v59 = vadd.f32 %v2722_v57, %v2721_v9  ;;  %v2851_v18 = vsel %vm2840_vm5, %v5833_v40, %v2850_v36  ;;  %v2785_v5 = vmul.f32 0.033333335, %v2657_v60  ;;  %v4131_v40 = vld [vmem:[#allocation2 + $0x8] sm:$0xff] }
 0x522   :  { %v2738_v55 = vrot.slane %v2737_v46, 2  ;;  %v2852_v27 = vsel %vm2842_vm6, %v2783_v3, %v2851_v18  ;;  %v2756_v58 = vsel %vm447_vm0, %v2540_v54, 0.0  ;;  %v2733_v11 = vrot.slane %v2732_v49, 1 }
 0x523   :  { %v2719_v1 = vrot.slane %v2718_v24, 1  ;;  %v2724_v62 = vrot.slane %v2723_v59, 2  ;;  %v2853_v29 = vsel %vm2844_vm7, %v5831_v15, %v2852_v27  ;;  %v2699_v56 = vadd.f32 %v2698_v31, %v2697_v22 }
 0x524   :  { %v2739_v14 = vadd.f32 %v2738_v55, %v2737_v46  ;;  %v2854_v2 = vsel %vm2846_vm8, %v2785_v5, %v2853_v29  ;;  %v2757_v50 = vrot.slane %v2756_v58, 4  ;;  %v2532_v20 = vadd.f32 %v5763_v23, %v2531_v63  ;;  %v4132_v55 = vld [vmem:[#allocation2 + $0x10] sm:$0xff] }
 0x525   :  { %v2720_v41 = vadd.f32 %v2719_v1, %v2718_v24  ;;  %v2725_v17 = vadd.f32 %v2724_v62, %v2723_v59  ;;  %v5871_v34 = vadd.f32 %v4131_v40, %v2854_v2  ;;  %v2543_v28 = vadd.f32 %v3819_v30, %v5763_v23 }
 0x526   :  { %v2740_v43 = vrot.slane %v2739_v14, 1  ;;  %v2758_v21 = vadd.f32 %v2757_v50, %v2756_v58  ;;  %v2535_v35 = vadd.f32 %v5763_v23, %v2534_v45  ;;  %v2713_v16 = vadd.f32 %v2712_v44, %v2711_v38 }
 0x527   :  { %v2726_v15 = vrot.slane %v2725_v17, 1  ;;  %v2882_v8 = vsel %vm447_vm0, %v5871_v34, 0.0  ;;  %v2742_v25 = vsel %vm447_vm0, %v2532_v20, 0.0  ;;  %v2734_v26 = vadd.f32 %v2733_v11, %v2732_v49  ;;  %v4133_v20 = vld [vmem:[#allocation2 + $0x18] sm:$0xff] }
 0x528   :  { %2883 = vadd.xlane.f32.xlu0 %v2882_v8  ;;  %v2759_v10 = vrot.slane %v2758_v21, 2  ;;  %v2743_v48 = vrot.slane %v2742_v25, 4  ;;  %v2763_v60 = vsel %vm447_vm0, %v2543_v28, 0.0  ;;  %v2791_v3 = vmul.f32 0.033333335, %v2699_v56 }
 0x529   :  { %v2727_v52 = vadd.f32 %v2726_v15, %v2725_v17  ;;  %v2764_v53 = vrot.slane %v2763_v60, 4  ;;  %v2749_v6 = vsel %vm447_vm0, %v2535_v35, 0.0  ;;  %v2794_v51 = vmul.f32 0.033333335, %v2720_v41 }
 0x52a   :  { %v2741_v23 = vadd.f32 %v2740_v43, %v2739_v14  ;;  %v2744_v38 = vadd.f32 %v2743_v48, %v2742_v25  ;;  %v2750_v12 = vrot.slane %v2749_v6, 4  ;;  %v2760_v63 = vadd.f32 %v2759_v10, %v2758_v21  ;;  %v3966_v25 = vld [vmem:[#allocation25] sm:$0xff]  }
 0x52b   :  { %v2795_v32 = vmul.f32 0.033333335, %v2727_v52  ;;  %v2765_v7 = vadd.f32 %v2764_v53, %v2763_v60  ;;  %v2856_v22 = vsel %vm2836_vm3, %v5849_v42, %v5843_v61  ;;  %v2796_v37 = vmul.f32 0.033333335, %v2734_v26  ;;  %3820 = vmatprep.subr.bf16.mxu1 %v3966_v25 }
 0x52c   :  { %v2745_v30 = vrot.slane %v2744_v38, 2  ;;  %v2751_v44 = vadd.f32 %v2750_v12, %v2749_v6  ;;  %v2857_v4 = vsel %vm2838_vm4, %v5853_v19, %v2856_v22  ;;  %v2793_v49 = vmul.f32 0.033333335, %v2713_v16  ;;  %3821 = vmatpush3.bf16.msra.mxu1 %v3966_v25  ;;  %v3969_v22 = vld [vmem:[#allocation28 + $0x8] sm:$0xff]  }
 0x52d   :  { %v2862_v9 = vsel %vm2834_vm2, %v2795_v32, %v2794_v51  ;;  %v2766_v45 = vrot.slane %v2765_v7, 2  ;;  %v2858_v13 = vsel %vm2840_vm5, %v2790_v39, %v2857_v4  ;;  %v2797_v57 = vmul.f32 0.033333335, %v2741_v23 }
 0x52e   :  { %v2746_v0 = vadd.f32 %v2745_v30, %v2744_v38  ;;  %v2752_v31 = vrot.slane %v2751_v44, 2  ;;  %v2859_v46 = vsel %vm2842_vm6, %v2791_v3, %v2858_v13  ;;  %v2761_v36 = vrot.slane %v2760_v63, 1  ;;  %v3971_v30 = vld [vmem:[#allocation28 + $0x18] sm:$0xff]  }
 0x52f   :  { %v2767_v54 = vadd.f32 %v2766_v45, %v2765_v7  ;;  %v2860_v61 = vsel %vm2844_vm7, %v5855_v33, %v2859_v46  ;;  %v2863_v42 = vsel %vm2836_vm3, %v2796_v37, %v2862_v9  ;;  %v3967_v7 = vld [vmem:[#allocation25 + $0x8] sm:$0xff]   ;;  %v3539_v46 = vld [vmem:[#allocation22] ss:$0 sm:$0xff] }
 0x530   :  { %v2747_v24 = vrot.slane %v2746_v0, 1  ;;  %v2753_v19 = vadd.f32 %v2752_v31, %v2751_v44  ;;  %v2861_v59 = vsel %vm2846_vm8, %v2793_v49, %v2860_v61  ;;  %v2864_v39 = vsel %vm2838_vm4, %v2797_v57, %v2863_v42  ;;  %3822 = vmatprep.subr.bf16.mxu1 %v3967_v7  ;;  %v3970_v37 = vld [vmem:[#allocation28 + $0x10] sm:$0xff]  }
 0x531   :  { %v2768_v18 = vrot.slane %v2767_v54, 1  ;;  %v2875_v5 = vadd.f32 %v4132_v55, %v2861_v59  ;;  %v2762_v11 = vadd.f32 %v2761_v36, %v2760_v63  ;;  %3823 = vmatpush3.bf16.msra.mxu1 %v3967_v7 }
 0x532   :  { %v2748_v27 = vadd.f32 %v2747_v24, %v2746_v0  ;;  %v2754_v58 = vrot.slane %v2753_v19, 1 }
 0x533   :  { %v2885_v1 = vsel %vm447_vm0, %v2875_v5, 0.0  ;;  %v2769_v29 = vadd.f32 %v2768_v18, %v2767_v54  ;;  %v2800_v2 = vmul.f32 0.033333335, %v2762_v11 }
 0x534   :  { %v2798_v62 = vmul.f32 0.033333335, %v2748_v27  ;;  %v2755_v56 = vadd.f32 %v2754_v58, %v2753_v19  ;;  %2886 = vadd.xlane.f32.xlu1 %v2885_v1  ;;  %v3540_v19 = vld [vmem:[#allocation23] ss:$0 sm:$0xff] }
 0x535   :  { %v2801_v50 = vmul.f32 0.033333335, %v2769_v29 }
 0x536   :  { %v2799_v33 = vmul.f32 0.033333335, %v2755_v56  ;;  %v2865_v14 = vsel %vm2840_vm5, %v2798_v62, %v2864_v39 }
 0x538   :  { %v2866_v41 = vsel %vm2842_vm6, %v2799_v33, %v2865_v14 }
 0x539   :  { %v2867_v17 = vsel %vm2844_vm7, %v2800_v2, %v2866_v41  ;;  %v3972_v41 = vld [vmem:[#allocation28 + $0x20] sm:$0xff]  }
 0x53a   :  { %v2868_v40 = vsel %vm2846_vm8, %v2801_v50, %v2867_v17  ;;  %v3973_v17 = vld [vmem:[#allocation28 + $0x28] sm:$0xff]  }
 0x53b   :  { %v2876_v43 = vadd.f32 %v4133_v20, %v2868_v40  ;;  %v3974_v40 = vld [vmem:[#allocation28 + $0x30] sm:$0xff]   ;;  %v3975_v20 = vld [vmem:[#allocation28 + $0x38] sm:$0xff]  }
 0x53d   :  { %v2888_v21 = vsel %vm447_vm0, %v2876_v43, 0.0 }
 0x53e   :  { %2889 = vadd.xlane.f32.xlu1 %v2888_v21 }
 0x58d   :  { %v2881_v28 = vpop.xlane.xlu0 %2880 }
 0x58e   :  { %v2892_v35 = vmul.f32 0.03125, %v2881_v28 }
 0x590   :  { %v2896_v16 = vsub.f32 %v5796_v47, %v2892_v35 }
 0x592   :  { %v2900_v15 = vmul.f32 %v2896_v16, %v2896_v16 }
 0x594   :  { %v2904_v8 = vsel %vm447_vm0, %v2900_v15, 0.0 }
 0x595   :  { %2905 = vadd.xlane.f32.xlu0 %v2904_v8 }
 0x5b5   :  { %v2884_v26 = vpop.xlane.xlu0 %2883 }
 0x5b6   :  { %v2893_v10 = vmul.f32 0.03125, %v2884_v26 }
 0x5b8   :  { %v2897_v48 = vsub.f32 %v5871_v34, %v2893_v10  ;;  %v3968_v34 = vld [vmem:[#allocation28] sm:$0xff]  }
 0x5b9   :  { %3828 = vmatprep.subr.bf16.mxu0 %v3968_v34 }
 0x5ba   :  { %v2901_v60 = vmul.f32 %v2897_v48, %v2897_v48  ;;  %3829 = vmatpush3.bf16.msra.mxu0 %v3968_v34 }
 0x5bb   :  { %3830 = vmatprep.subr.bf16.mxu0 %v3969_v22 }
 0x5bc   :  { %v2907_v3 = vsel %vm447_vm0, %v2901_v60, 0.0 }
 0x5bd   :  { %2908 = vadd.xlane.f32.xlu1 %v2907_v3 }
 0x5be   :  { %3831 = vmatpush3.bf16.msra.mxu0 %v3969_v22 }
 0x5bf   :  { %3832 = vmatprep.subr.bf16.mxu0 %v3970_v37 }
 0x5c1   :  { %v2887_v52 = vpop.xlane.xlu1 %2886 }
 0x5c2   :  { %v2894_v53 = vmul.f32 0.03125, %v2887_v52  ;;  %3833 = vmatpush3.bf16.msra.mxu0 %v3970_v37 }
 0x5c3   :  { %3834 = vmatprep.subr.bf16.mxu0 %v3971_v30 }
 0x5c4   :  { %v2898_v6 = vsub.f32 %v2875_v5, %v2894_v53 }
 0x5c6   :  { %v2902_v51 = vmul.f32 %v2898_v6, %v2898_v6  ;;  %3835 = vmatpush3.bf16.msra.mxu0 %v3971_v30 }
 0x5c7   :  { %3836 = vmatprep.subr.bf16.mxu0 %v3972_v41 }
 0x5c8   :  { %v2910_v47 = vsel %vm447_vm0, %v2902_v51, 0.0 }
 0x5c9   :  { %2911 = vadd.xlane.f32.xlu0 %v2910_v47 }
 0x5ca   :  { %3837 = vmatpush3.bf16.msra.mxu0 %v3972_v41 }
 0x5cb   :  { %v2890_v23 = vpop.xlane.xlu1 %2889  ;;  %3838 = vmatprep.subr.bf16.mxu0 %v3973_v17 }
 0x5cc   :  { %v2895_v38 = vmul.f32 0.03125, %v2890_v23 }
 0x5ce   :  { %v2899_v12 = vsub.f32 %v2876_v43, %v2895_v38  ;;  %3839 = vmatpush3.bf16.msra.mxu0 %v3973_v17  ;;  %v3541_v43 = vld [vmem:[#allocation26] ss:$0 sm:$0xff] }
 0x5cf   :  { %3840 = vmatprep.subr.bf16.mxu0 %v3974_v40 }
 0x5d0   :  { %v2903_v32 = vmul.f32 %v2899_v12, %v2899_v12 }
 0x5d2   :  { %v2913_v63 = vsel %vm447_vm0, %v2903_v32, 0.0  ;;  %3841 = vmatpush3.bf16.msra.mxu0 %v3974_v40 }
 0x5d3   :  { %2914 = vadd.xlane.f32.xlu1 %v2913_v63  ;;  %3842 = vmatprep.subr.bf16.mxu0 %v3975_v20 }
 0x5d6   :  { %3843 = vmatpush3.bf16.msra.mxu0 %v3975_v20 }
 0x622   :  { %v2906_v44 = vpop.xlane.xlu0 %2905 }
 0x623   :  { %v2916_v4 = vmul.f32 0.03125, %v2906_v44 }
 0x625   :  { %v2920_v9 = vadd.f32 1e-05, %v2916_v4 }
 0x627   :  { %4106 = vrsqrt.f32 %v2920_v9 }
 0x631   :  { %v4107_v57 = vpop.eup %4106 }
 0x632   :  { %v2928_v0 = vmul.f32 %v4107_v57, %v2896_v16 }
 0x634   :  { %v2938_v42 = vmul.f32 %v3539_v46, %v2928_v0 }
 0x636   :  { %v5906_v18 = vadd.f32 %v3540_v19, %v2938_v42 }
 0x64a   :  { %v2909_v45 = vpop.xlane.xlu1 %2908 }
 0x64b   :  { %v2917_v49 = vmul.f32 0.03125, %v2909_v45 }
 0x64d   :  { %v2921_v13 = vadd.f32 1e-05, %v2917_v49 }
 0x64f   :  { %4108 = vrsqrt.f32 %v2921_v13 }
 0x656   :  { %v2912_v31 = vpop.xlane.xlu0 %2911 }
 0x657   :  { %v2918_v36 = vmul.f32 0.03125, %v2912_v31 }
 0x659   :  { %v4109_v54 = vpop.eup %4108  ;;  %v2922_v24 = vadd.f32 1e-05, %v2918_v36 }
 0x65a   :  { %v2929_v61 = vmul.f32 %v4109_v54, %v2897_v48 }
 0x65b   :  { %4110 = vrsqrt.f32 %v2922_v24 }
 0x65c   :  { %v2939_v59 = vmul.f32 %v3539_v46, %v2929_v61 }
 0x65e   :  { %v5908_v55 = vadd.f32 %v3540_v19, %v2939_v59  ;;  %v3546_v59 = vld [vmem:[#allocation29] ss:$0 sm:$0xff] }
 0x660   :  { %v2952_v5 = vpack.c.bf16 %v5908_v55, %v5906_v18  ;;  %v2915_v39 = vpop.xlane.xlu1 %2914 }
 0x661   :  { %v2919_v27 = vmul.f32 0.03125, %v2915_v39 }
 0x662   :  { %3824 = vmatprep.mubr.msk.bf16.mxu1 %vm447_vm0, %v2952_v5 }
 0x663   :  { %v2923_v58 = vadd.f32 1e-05, %v2919_v27 }
 0x665   :  { %4112 = vrsqrt.f32 %v2923_v58  ;;  %v4111_v11 = vpop.eup %4110 }
 0x666   :  { %v2930_v1 = vmul.f32 %v4111_v11, %v2898_v6 }
 0x668   :  { %v2940_v29 = vmul.f32 %v3539_v46, %v2930_v1 }
 0x66a   :  { %v5913_v14 = vadd.f32 %v3540_v19, %v2940_v29 }
 0x66f   :  { %v4113_v62 = vpop.eup %4112 }
 0x670   :  { %v2931_v56 = vmul.f32 %v4113_v62, %v2899_v12 }
 0x672   :  { %v2941_v33 = vmul.f32 %v3539_v46, %v2931_v56 }
 0x674   :  { %v5915_v2 = vadd.f32 %v3540_v19, %v2941_v33  ;;  %v4717_v19 = vmov 0  }
 0x675   :  { %3919 = vset.pattern.permute.xlu1 %v4717_v19  ;;  %3918 = vset.pattern.permute.xlu0 %v4717_v19 }
 0x676   :  { %v2953_v50 = vpack.c.bf16 %v5915_v2, %v5913_v14 }
 0x678   :  { %3825 = vmatmul.mubr.msk.bf16.vlgmr.msra.gmra.mrb[32].mxu1 %vm447_vm0, %v2953_v50 }
 0x74b   :  { %v3826_v21 = vpop.f32.mrb[32].mxu1 }
 0x74c   :  { %v3026_v28 = vadd.f32 %v3826_v21, %v3541_v43  ;;  %v3017_v35 = vpop.f32.mrb[33].mxu1  ;;  %v3187_v21 = vld [vmem:[#allocation8 + $0x8] sm:$0xff] }
 0x74d   :  { %v3018_v16 = vadd.f32 %v3541_v43, %v3017_v35  ;;  %v3827_v15 = vpop.f32.mrb[34].mxu1 }
 0x74e   :  { %v3034_v8 = vmul.f32 %v3026_v28, %v3026_v28  ;;  %v3029_v25 = vadd.f32 %v3827_v15, %v3541_v43  ;;  %v3020_v26 = vpop.f32.mrb[35].mxu1  ;;  %v3038_v45 = vmul.f32 0.5, %v3026_v28 }
 0x74f   :  { %v3032_v10 = vmul.f32 %v3018_v16, %v3018_v16  ;;  %v3021_v48 = vadd.f32 %v3541_v43, %v3020_v26  ;;  %v3036_v57 = vmul.f32 0.5, %v3018_v16 }
 0x750   :  { %v3042_v60 = vmul.f32 0.035677407, %v3034_v8  ;;  %v3035_v3 = vmul.f32 %v3029_v25, %v3029_v25  ;;  %v3039_v49 = vmul.f32 0.5, %v3029_v25 }
 0x751   :  { %v3040_v52 = vmul.f32 0.035677407, %v3032_v10  ;;  %v3033_v53 = vmul.f32 %v3021_v48, %v3021_v48  ;;  %v3037_v0 = vmul.f32 0.5, %v3021_v48 }
 0x752   :  { %v3046_v6 = vadd.f32 0.7978846, %v3042_v60  ;;  %v3043_v51 = vmul.f32 0.035677407, %v3035_v3 }
 0x753   :  { %v3044_v47 = vadd.f32 0.7978846, %v3040_v52  ;;  %v3041_v23 = vmul.f32 0.035677407, %v3033_v53 }
 0x754   :  { %v3050_v38 = vmul.f32 %v3046_v6, %v3026_v28  ;;  %v3047_v12 = vadd.f32 0.7978846, %v3043_v51 }
 0x755   :  { %v3048_v32 = vmul.f32 %v3044_v47, %v3018_v16  ;;  %v3045_v63 = vadd.f32 0.7978846, %v3041_v23 }
 0x756   :  { %4114 = vtanh.f32 %v3050_v38  ;;  %v3051_v7 = vmul.f32 %v3047_v12, %v3029_v25  ;;  %v3189_v38 = vld [vmem:[#allocation8 + $0x18] sm:$0xff]  ;;  %v3186_v12 = vld [vmem:[#allocation8] sm:$0xff] }
 0x757   :  { %4116 = vtanh.f32 %v3048_v32  ;;  %v3049_v34 = vmul.f32 %v3045_v63, %v3021_v48  ;;  %v3976_v32 = vld [vmem:[#allocation34] sm:$0xff]   ;;  %v3977_v63 = vld [vmem:[#allocation34 + $0x8] sm:$0xff]  }
 0x758   :  { %4118 = vtanh.f32 %v3051_v7  ;;  %3848 = vmatprep.subr.bf16.mxu1 %v3976_v32 }
 0x759   :  { %4120 = vtanh.f32 %v3049_v34  ;;  %3849 = vmatpush3.bf16.msra.mxu1 %v3976_v32 }
 0x75a   :  { %3850 = vmatprep.subr.bf16.mxu1 %v3977_v63 }
 0x75d   :  { %3851 = vmatpush3.bf16.msra.mxu1 %v3977_v63 }
 0x760   :  { %v4115_v22 = vpop.eup %4114 }
 0x761   :  { %v4117_v37 = vpop.eup %4116  ;;  %v3058_v30 = vadd.f32 1.0, %v4115_v22 }
 0x762   :  { %v4119_v44 = vpop.eup %4118  ;;  %v3056_v4 = vadd.f32 1.0, %v4117_v37 }
 0x763   :  { %v4121_v9 = vpop.eup %4120  ;;  %v3059_v13 = vadd.f32 1.0, %v4119_v44  ;;  %v3062_v46 = vmul.f32 %v3058_v30, %v3038_v45 }
 0x764   :  { %v3057_v31 = vadd.f32 1.0, %v4121_v9  ;;  %v3060_v54 = vmul.f32 %v3056_v4, %v3036_v57 }
 0x765   :  { %v3063_v36 = vmul.f32 %v3059_v13, %v3039_v49 }
 0x766   :  { %v3061_v61 = vmul.f32 %v3057_v31, %v3037_v0 }
 0x767   :  { %v3065_v42 = vpack.c.bf16 %v3063_v36, %v3062_v46  ;;  %v3555_v36 = vld [vmem:[#allocation31] ss:$0 sm:$0xff] }
 0x768   :  { %v3064_v24 = vpack.c.bf16 %v3061_v61, %v3060_v54 }
 0x76a   :  { %3844 = vmatprep.mubr.bf16.mxu0 %v3064_v24 }
 0x76b   :  { %3845 = vmatmul.mubr.bf16.vlgmr.msra.gmra.mrb[68].mxu0 %v3065_v42  ;;  %v3556_v42 = vld [vmem:[#allocation32] ss:$0 sm:$0xff] }
 0x83e   :  { %v3846_v5 = vpop.f32.mrb[68].mxu0 }
 0x83f   :  { %v3171_v39 = vpop.f32.mrb[69].mxu0  ;;  %v3180_v27 = vadd.f32 %v3846_v5, %v3546_v59 }
 0x840   :  { %v3172_v58 = vadd.f32 %v3546_v59, %v3171_v39  ;;  %v3847_v11 = vpop.f32.mrb[70].mxu0 }
 0x841   :  { %v3174_v1 = vpop.f32.mrb[71].mxu0  ;;  %v3183_v62 = vadd.f32 %v3847_v11, %v3546_v59  ;;  %v3192_v41 = vadd.f32 %v3180_v27, %v5913_v14 }
 0x842   :  { %v3175_v29 = vadd.f32 %v3546_v59, %v3174_v1  ;;  %v3190_v56 = vadd.f32 %v3172_v58, %v5906_v18  ;;  %v3188_v18 = vld [vmem:[#allocation8 + $0x10] sm:$0xff] }
 0x843   :  { %v3193_v40 = vadd.f32 %v3183_v62, %v5915_v2  ;;  %v3202_v20 = vsel %vm447_vm0, %v3192_v41, 0.0 }
 0x844   :  { %v3196_v33 = vsel %vm447_vm0, %v3190_v56, 0.0  ;;  %v3191_v50 = vadd.f32 %v3175_v29, %v5908_v55 }
 0x845   :  { %3197 = vadd.xlane.f32.xlu0 %v3196_v33  ;;  %v3205_v43 = vsel %vm447_vm0, %v3193_v40, 0.0 }
 0x846   :  { %v3199_v17 = vsel %vm447_vm0, %v3191_v50, 0.0 }
 0x847   :  { %3200 = vadd.xlane.f32.xlu1 %v3199_v17 }
 0x849   :  { %3203 = vadd.xlane.f32.xlu0 %v3202_v20 }
 0x84b   :  { %3206 = vadd.xlane.f32.xlu1 %v3205_v43 }
 0x85c   :  { %3275 = vperm.xlu1 %3919, %v3187_v21  }
 0x860   :  { %3280 = vperm.xlu1 %3919, %v3188_v18  }
 0x8d2   :  { %v3198_v28 = vpop.xlane.xlu0 %3197 }
 0x8d3   :  { %v3208_v35 = vmul.f32 0.03125, %v3198_v28 }
 0x8d4   :  { %v3201_v55 = vpop.xlane.xlu1 %3200 }
 0x8d5   :  { %v3209_v16 = vmul.f32 0.03125, %v3201_v55  ;;  %v3212_v25 = vsub.f32 %v3190_v56, %v3208_v35 }
 0x8d6   :  { %v3204_v14 = vpop.xlane.xlu0 %3203 }
 0x8d7   :  { %v3210_v15 = vmul.f32 0.03125, %v3204_v14  ;;  %v3213_v10 = vsub.f32 %v3191_v50, %v3209_v16  ;;  %v3216_v53 = vmul.f32 %v3212_v25, %v3212_v25 }
 0x8d8   :  { %v3207_v8 = vpop.xlane.xlu1 %3206 }
 0x8d9   :  { %v3214_v2 = vsub.f32 %v3192_v41, %v3210_v15  ;;  %v3211_v26 = vmul.f32 0.03125, %v3207_v8  ;;  %v3217_v51 = vmul.f32 %v3213_v10, %v3213_v10  ;;  %v3220_v47 = vsel %vm447_vm0, %v3216_v53, 0.0 }
 0x8db   :  { %v3215_v48 = vsub.f32 %v3193_v40, %v3211_v26  ;;  %v3218_v60 = vmul.f32 %v3214_v2, %v3214_v2  ;;  %v3223_v23 = vsel %vm447_vm0, %v3217_v51, 0.0 }
 0x8dc   :  { %v3276_v7 = vpop.permute.xlu1 %3275 }
 0x8dd   :  { %v3226_v3 = vsel %vm447_vm0, %v3218_v60, 0.0  ;;  %v3219_v52 = vmul.f32 %v3215_v48, %v3215_v48 }
 0x8de   :  { %3227 = vadd.xlane.f32.xlu0 %v3226_v3 }
 0x8df   :  { %v3229_v6 = vsel %vm447_vm0, %v3219_v52, 0.0 }
 0x8e0   :  { %3230 = vadd.xlane.f32.xlu1 %v3229_v6  ;;  %v3281_v34 = vpop.permute.xlu1 %3280 }
 0x8e2   :  { %3221 = vadd.xlane.f32.xlu0 %v3220_v47 }
 0x8e4   :  { %3224 = vadd.xlane.f32.xlu1 %v3223_v23 }
 0x8f5   :  { %3285 = vperm.xlu1 %3919, %v3189_v38  }
 0x8f8   :  { %3270 = vperm.xlu0 %3918, %v3186_v12  }
 0x96b   :  { %v3228_v22 = vpop.xlane.xlu0 %3227 }
 0x96c   :  { %v3234_v37 = vmul.f32 0.03125, %v3228_v22 }
 0x96d   :  { %v3231_v30 = vpop.xlane.xlu1 %3230 }
 0x96e   :  { %v3238_v44 = vadd.f32 1e-05, %v3234_v37  ;;  %v3235_v4 = vmul.f32 0.03125, %v3231_v30 }
 0x96f   :  { %v3222_v9 = vpop.xlane.xlu0 %3221 }
 0x970   :  { %4122 = vrsqrt.f32 %v3238_v44  ;;  %v3239_v45 = vadd.f32 1e-05, %v3235_v4  ;;  %v3232_v49 = vmul.f32 0.03125, %v3222_v9 }
 0x971   :  { %v3225_v13 = vpop.xlane.xlu1 %3224 }
 0x972   :  { %4124 = vrsqrt.f32 %v3239_v45  ;;  %v3236_v57 = vadd.f32 1e-05, %v3232_v49  ;;  %v3233_v0 = vmul.f32 0.03125, %v3225_v13 }
 0x974   :  { %4126 = vrsqrt.f32 %v3236_v57  ;;  %v3237_v31 = vadd.f32 1e-05, %v3233_v0 }
 0x975   :  { %v3286_v56 = vpop.permute.xlu1 %3285 }
 0x976   :  { %4128 = vrsqrt.f32 %v3237_v31 }
 0x977   :  { %v3271_v33 = vpop.permute.xlu0 %3270 }
 0x97a   :  { %v4123_v46 = vpop.eup %4122 }
 0x97b   :  { %v3246_v54 = vmul.f32 %v4123_v46, %v3214_v2 }
 0x97c   :  { %v4125_v61 = vpop.eup %4124 }
 0x97d   :  { %v3247_v24 = vmul.f32 %v4125_v61, %v3215_v48  ;;  %v3256_v19 = vmul.f32 %v3555_v36, %v3246_v54 }
 0x97e   :  { %v4127_v59 = vpop.eup %4126 }
 0x97f   :  { %v3257_v5 = vmul.f32 %v3555_v36, %v3247_v24  ;;  %v3266_v39 = vadd.f32 %v3556_v42, %v3256_v19  ;;  %v3244_v27 = vmul.f32 %v4127_v59, %v3212_v25 }
 0x980   :  { %v4129_v58 = vpop.eup %4128 }
 0x981   :  { %v3267_v11 = vadd.f32 %v3556_v42, %v3257_v5  ;;  %v3290_v1 = vmul.f32 %v3281_v34, %v3266_v39  ;;  %v3245_v62 = vmul.f32 %v4129_v58, %v3213_v10  ;;  %v3254_v29 = vmul.f32 %v3555_v36, %v3244_v27 }
 0x983   :  { %v3291_v50 = vmul.f32 %v3286_v56, %v3267_v11  ;;  %3294 = vst.msk [vmem:[#allocation37 + $0x10] sm:$0xff] %vm447_vm0, %v3290_v1  ;;  %v3255_v41 = vmul.f32 %v3555_v36, %v3245_v62  ;;  %v3264_v17 = vadd.f32 %v3556_v42, %v3254_v29 }
 0x985   :  { %3295 = vst.msk [vmem:[#allocation37 + $0x18] sm:$0xff] %vm447_vm0, %v3291_v50  ;;  %v3265_v40 = vadd.f32 %v3556_v42, %v3255_v41  ;;  %v3288_v20 = vmul.f32 %v3271_v33, %v3264_v17  ;;  %v3297_v18 = vpack.c.bf16 %v3291_v50, %v3290_v1 }
 0x987   :  { %v3289_v43 = vmul.f32 %v3276_v7, %v3265_v40  ;;  %3292 = vst.msk [vmem:[#allocation37] sm:$0xff] %vm447_vm0, %v3288_v20 }
 0x989   :  { %v3296_v21 = vpack.c.bf16 %v3289_v43, %v3288_v20  ;;  %3293 = vst.msk [vmem:[#allocation37 + $0x8] sm:$0xff] %vm447_vm0, %v3289_v43 }
 0x98b   :  { %3852 = vmatprep.mubr.msk.bf16.mxu1 %vm447_vm0, %v3296_v21 }
 0x98c   :  { %3853 = vmatmul.mubr.msk.bf16.vlgmr.msra.gmra.mrb[36].mxu1 %vm447_vm0, %v3297_v18 }
 0x98d   :  { %4629 = shalt.err (!%p4626_p12)
}
 0x98e   :  { %s6032_s26 = sld [smem:[#allocation63_spill]] }
 0x994   :  { %s4630_s7 = scalar_lea.hbm %s6032_s26, 512 }
 0x995   :  { %p4631_p13 = scmp.ne.s32.totalorder %s6032_s26, %s4630_s7  ;;  %p4634_p0 = scmp.lt.u32.totalorder %s4630_s7, %s6032_s26 }
 0x997   :  { %p4636_p1 = pnand %p4634_p0, %p4631_p13 }
 0x999   :  { %4639 = shalt.err (!%p4636_p1)
}
 0x99a   :  { %3391 = dma.vmem_to_hbm [thread:$0]  %s3386_s16, 512, %s6032_s26, [#allocation4], %s6024_s1, %s6024_s1, %s6023_s19   ;;  %v3557_v28 = vld [vmem:[#allocation35] ss:$0 sm:$0xff] }
 0x99b   :  { %s4719_s18 = smov [#allocation38]  }
 0x99c   :  { %s3397_s14 = sshll.u32 %s4719_s18, 4  ;;  %s3398_s14 = int_to_ptr.vmem [resolvable:$true] %s3397_s14 }
 0x99d   :  { %s4640_s27 = scalar_lea.vmem %s3398_s14, 512  ;;  %p4645_p3 = scmp.lt.s32.totalorder %s3398_s14, %s3398_s14 }
 0x99e   :  { %p4641_p2 = scmp.ne.s32.totalorder %s3398_s14, %s4640_s27  ;;  %p4646_p4 = scmp.lt.s32.totalorder %s4640_s27, %s4640_s27 }
 0x9a0   :  { %p4647_p5 = por %p4646_p4, %p4645_p3 }
 0x9a2   :  { %p4648_p6 = pnand %p4647_p5, %p4641_p2 }
 0xa5f   :  { %v3854_v55 = vpop.f32.mrb[36].mxu1 }
 0xa60   :  { %v3370_v35 = vadd.f32 %v3854_v55, %v3557_v28  ;;  %v3361_v14 = vpop.f32.mrb[37].mxu1 }
 0xa61   :  { %v3362_v16 = vadd.f32 %v3557_v28, %v3361_v14  ;;  %v3855_v15 = vpop.f32.mrb[38].mxu1 }
 0xa62   :  { %3378 = vst [vmem:[#allocation38 + $0x10] sm:$0xff] %v3370_v35  ;;  %v3373_v8 = vadd.f32 %v3855_v15, %v3557_v28  ;;  %v3364_v25 = vpop.f32.mrb[39].mxu1 }
 0xa63   :  { %3376 = vst [vmem:[#allocation38] sm:$0xff] %v3362_v16  ;;  %v3365_v2 = vadd.f32 %v3557_v28, %v3364_v25 }
 0xa64   :  { %3379 = vst [vmem:[#allocation38 + $0x18] sm:$0xff] %v3373_v8 }
 0xa65   :  { %3377 = vst [vmem:[#allocation38 + $0x8] sm:$0xff] %v3365_v2 }
 0xa66   :  { %4651 = shalt.err (!%p4648_p6)
}
 0xa67   :  { %s6033_s11 = sld [smem:[#allocation64_spill]] }
 0xa6d   :  { %s4652_s25 = scalar_lea.hbm %s6033_s11, 512 }
 0xa6e   :  { %p4653_p7 = scmp.ne.s32.totalorder %s6033_s11, %s4652_s25  ;;  %p4656_p8 = scmp.lt.u32.totalorder %s4652_s25, %s6033_s11 }
 0xa70   :  { %p4658_p9 = pnand %p4656_p8, %p4653_p7 }
 0xa72   :  { %4661 = shalt.err (!%p4658_p9)
}
 0xa73   :  { %3403 = dma.vmem_to_hbm [thread:$0]  %s3398_s14, 512, %s6033_s11, [#allocation39], %s6024_s1, %s6024_s1, %s6023_s19  }
 0xa74   :  { %4686 = dma.done.wait [#allocation4], 512  }
 0xa75   :  { %4687 = vsyncadd [#allocation4], 4294966784 }
 0xa76   :  { %4688 = dma.done.wait [#allocation39], 512  }
 0xa77   :  { %4689 = vsyncadd [#allocation39], 4294966784 }
 0xa78   :  { %3410 = vsyncpa [#allocation3], 1 }
 0xa79   :  { %3411 = vsyncpa [#allocation6], 1 }
 0xa7a   :  { %3412 = vsyncpa [#allocation9], 1 }
 0xa7b   :  { %3413 = vsyncpa [#allocation12], 1 }
 0xa7c   :  { %3414 = vsyncpa [#allocation15], 1 }
 0xa7d   :  { %3415 = vsyncpa [#allocation18], 1 }
 0xa7e   :  { %3416 = vsyncpa [#allocation21], 1 }
 0xa7f   :  { %3417 = vsyncpa [#allocation24], 1 }
 0xa80   :  { %3418 = vsyncpa [#allocation27], 1 }
 0xa81   :  { %3419 = vsyncpa [#allocation30], 1 }
 0xa82   :  { %3420 = vsyncpa [#allocation33], 1 }
 0xa83   :  { %3421 = vsyncpa [#allocation36], 1 }
 0xa84   :  { %3422 = vsyncpa [#allocation4], 1 }
 0xa85   :  { %3423 = vsyncpa [#allocation39], 1 }

</bundles_post_ra>
